<compile_context>
chip_gen: v7x
topology: tpu7x:2x2x1
jax: 0.10.0
libtpu: 0.0.40
codegen_flags: <defaults>
</compile_context>

<pallas_src>
import numpy as np
import jax
import jax.numpy as jnp
from jax import lax
from jax.experimental import pallas as pl
from jax.experimental.pallas import tpu as pltpu

_YOFF = 16  # column offset of y inside the bf16 staging scratch
            # (multiple of 16 -> bf16 sublane-pair aligned, unmasked stores)


def _pick_th(H, W):
    """Largest divisor of H with TH*W <= 128: keeps the f32 accumulator at
    ~16 vregs (Cp=128) so it never spills, even at ResNet-scale W."""
    target = max(1, 128 // max(W, 1))
    th = 1
    for d in range(1, H + 1):
        if H % d == 0 and d <= target:
            th = d
    return th


def _resblock_kernel(x_ref, w1_ref, w2_ref, b1_ref, b2_ref, out_ref, ypad_ref):
    H, W, C = out_ref.shape            # C is already lane-padded (Cp)
    TH = _pick_th(H, W)
    NT = H // TH
    Wpad = ypad_ref.shape[1]
    RSTART = Wpad - 16                 # 16-aligned right-halo slab start

    b1 = b1_ref[...]                   # (1, C) f32
    b2 = b2_ref[...]

    # ---- zero only the halo ring of the bf16 staging scratch ---------------
    # Aligned, unmasked slab stores (16-wide column slabs, full-width rows).
    # The interior is fully overwritten below; per-step zeroing stays correct
    # when the "parallel" grid axis is sharded across TensorCores (each core
    # has its own scratch and its first step need not be n == 0).
    zrow = jnp.zeros((1, Wpad, C), jnp.bfloat16)
    ypad_ref[0:1, :, :] = zrow
    ypad_ref[H + 1:H + 2, :, :] = zrow
    zcol = jnp.zeros((H + 2, 16, C), jnp.bfloat16)
    ypad_ref[:, 0:_YOFF, :] = zcol
    ypad_ref[:, RSTART:Wpad, :] = zcol

    def conv3x3_rows(src_ref, r0, c0, w_ref, bias):
        """K-packed 3x3 conv for TH output rows whose top source row is r0.

        Per dy the three dx taps are lane-concatenated into a (TH*W, 3C) bf16
        LHS and hit the MXU once against a (3C, C) bf16 weight slab with f32
        accumulation (3 matmuls per tile instead of 9).  BN scale lives in the
        weights; the bias is added once at the end (implicit broadcast)."""
        acc = None
        for dy in range(3):
            parts = [src_ref[pl.ds(r0 + dy, TH), c0 + dx:c0 + dx + W, :]
                     for dx in range(3)]
            lhs = jnp.concatenate(parts, axis=-1).reshape(TH * W, 3 * C)
            p = jnp.dot(lhs, w_ref[dy], preferred_element_type=jnp.float32)
            acc = p if acc is None else acc + p
        return acc + bias              # (TH*W, C) f32

    # ---- conv1 (BN1 scale folded) + bias + relu -> bf16 staging scratch ----
    def conv1_step(m):
        r = m * TH
        y = jnp.maximum(conv3x3_rows(x_ref, r, 0, w1_ref, b1), 0.0)
        # aligned interior store: column offset _YOFF is a multiple of 16
        ypad_ref[pl.ds(1 + r, TH), _YOFF:_YOFF + W, :] = (
            y.astype(jnp.bfloat16).reshape(TH, W, C))

    # ---- conv2 (BN2 scale folded) + bias + residual add + relu -------------
    def conv2_step(m):
        r = m * TH
        z = conv3x3_rows(ypad_ref, r, _YOFF - 1, w2_ref, b2)
        ident = x_ref[pl.ds(1 + r, TH), 1:1 + W, :]          # bf16 identity
        z = z + ident.reshape(TH * W, C).astype(jnp.float32)
        out_ref[pl.ds(r, TH), :, :] = (
            jnp.maximum(z, 0.0).astype(out_ref.dtype).reshape(TH, W, C))

    if NT <= 4:
        # Short trip count: full unroll keeps the scheduling window tight.
        for m in range(NT):
            conv1_step(m)
        for m in range(NT):
            conv2_step(m)
    else:
        # Large H: bound code size / vreg live ranges with a real loop.
        def loop1(m, carry):
            conv1_step(m)
            return carry

        def loop2(m, carry):
            conv2_step(m)
            return carry

        lax.fori_loop(0, NT, loop1, None, unroll=2)
        lax.fori_loop(0, NT, loop2, None, unroll=2)


def residual_block(x_nhwc, w1_hwio, w2_hwio, scale1, bias1, scale2, bias2):
    """x_nhwc: (N,H,W,C); w*_hwio: (3,3,C,C); scale/bias: folded BN affine (C,)."""
    N, H, W, C = x_nhwc.shape
    Cp = max(128, ((C + 127) // 128) * 128)     # lane-dense channel padding
    cpad = Cp - C

    def pack_weights(w_hwio, scale):
        # Fold BN scale (per output channel), pad channels, then K-pack the
        # 3 dx taps of each dy along the input axis: (3, 3*Cp, Cp) bf16.
        w = (w_hwio * scale[None, None, None, :]).astype(jnp.float32)
        w = jnp.pad(w, ((0, 0), (0, 0), (0, cpad), (0, cpad)))   # (3,3,Cp,Cp)
        return w.reshape(3, 3 * Cp, Cp).astype(jnp.bfloat16)

    w1p = pack_weights(w1_hwio, scale1)
    w2p = pack_weights(w2_hwio, scale2)
    b1 = jnp.pad(bias1, (0, cpad)).reshape(1, Cp).astype(jnp.float32)
    b2 = jnp.pad(bias2, (0, cpad)).reshape(1, Cp).astype(jnp.float32)

    # Single pad op (+1 spatial halo, zero channel padding); cast to bf16 once
    # so tap loads need no per-tap VPU casts and input DMA bytes are halved.
    x_pad = jnp.pad(x_nhwc, ((0, 0), (1, 1), (1, 1), (0, cpad))).astype(jnp.bfloat16)

    # Staging scratch width: interior at _YOFF plus a 16-wide aligned right
    # halo slab (only column _YOFF+W must be zero; the slab keeps it unmasked).
    Wpad = ((_YOFF + W) // 16) * 16 + 16

    grid_spec = pltpu.PrefetchScalarGridSpec(
        num_scalar_prefetch=0,
        grid=(N,),
        in_specs=[
            pl.BlockSpec((None, H + 2, W + 2, Cp), lambda n: (n, 0, 0, 0)),
            pl.BlockSpec((3, 3 * Cp, Cp), lambda n: (0, 0, 0)),
            pl.BlockSpec((3, 3 * Cp, Cp), lambda n: (0, 0, 0)),
            pl.BlockSpec((1, Cp), lambda n: (0, 0)),
            pl.BlockSpec((1, Cp), lambda n: (0, 0)),
        ],
        out_specs=pl.BlockSpec((None, H, W, Cp), lambda n: (n, 0, 0, 0)),
        scratch_shapes=[pltpu.VMEM((H + 2, Wpad, Cp), jnp.bfloat16)],
    )
    # TODO(synk): at ResNet scale on v7x (64 MiB VMEM, 2 TCs) additionally tile
    # the grid over row strips (grid=(N, H//strip)) with a 1-row halo and
    # single-buffer the constant weight blocks (pipeline_mode=pl.Buffered(1)).

    out = pl.pallas_call(
        _resblock_kernel,
        out_shape=jax.ShapeDtypeStruct((N, H, W, Cp), x_nhwc.dtype),
        grid_spec=grid_spec,
        compiler_params=pltpu.CompilerParams(
            dimension_semantics=("parallel",),
            vmem_limit_bytes=64 * 1024 * 1024),
    )(x_pad, w1p, w2p, b1, b2)
    # Kernel already emits the final dtype; slice only if channels were padded.
    return out if cpad == 0 else out[..., :C]


def _reference(x, w1_hwio, w2_hwio, s1, b1, s2, b2):
    dn = ('NHWC', 'HWIO', 'NHWC')

    def conv(a, w):
        return jax.lax.conv_general_dilated(
            a, w, window_strides=(1, 1), padding='SAME',
            dimension_numbers=dn, precision=jax.lax.Precision.HIGHEST)

    y = jnp.maximum(conv(x, w1_hwio) * s1 + b1, 0.0)
    z = conv(y, w2_hwio) * s2 + b2 + x
    return jnp.maximum(z, 0.0)


if __name__ == "__main__":
    key = jax.random.PRNGKey(0)
    N, C, H, W = 2, 8, 16, 16
    k = jax.random.split(key, 9)

    # Input in PyTorch NCHW convention.
    x_nchw = jax.random.normal(k[0], (N, C, H, W), jnp.float32)

    # Conv weights in PyTorch OIHW layout (Cout, Cin, 3, 3), bias=False.
    w1_oihw = 0.1 * jax.random.normal(k[1], (C, C, 3, 3), jnp.float32)
    w2_oihw = 0.1 * jax.random.normal(k[2], (C, C, 3, 3), jnp.float32)
    w1 = jnp.transpose(w1_oihw, (2, 3, 1, 0))   # -> HWIO
    w2 = jnp.transpose(w2_oihw, (2, 3, 1, 0))   # -> HWIO

    # BatchNorm2d params (eval mode), folded into per-channel scale/bias.
    eps = 1e-5
    gamma1 = 1.0 + 0.1 * jax.random.normal(k[3], (C,), jnp.float32)
    beta1 = 0.1 * jax.random.normal(k[4], (C,), jnp.float32)
    mean1 = 0.1 * jax.random.normal(k[5], (C,), jnp.float32)
    var1 = jnp.abs(1.0 + 0.1 * jax.random.normal(k[6], (C,), jnp.float32))
    gamma2 = 1.0 + 0.1 * jax.random.normal(k[7], (C,), jnp.float32)
    beta2 = 0.1 * jax.random.normal(k[8], (C,), jnp.float32)
    mean2 = jnp.zeros((C,), jnp.float32)
    var2 = jnp.ones((C,), jnp.float32)
    s1 = gamma1 / jnp.sqrt(var1 + eps)
    b1 = beta1 - mean1 * s1
    s2 = gamma2 / jnp.sqrt(var2 + eps)
    b2 = beta2 - mean2 * s2

    # NCHW -> NHWC for the TPU kernel.
    x_nhwc = jnp.transpose(x_nchw, (0, 2, 3, 1))

    out = residual_block(x_nhwc, w1, w2, s1, b1, s2, b2)
    out = jax.block_until_ready(out)

    ref = _reference(x_nhwc, w1, w2, s1, b1, s2, b2)
    np.testing.assert_allclose(np.asarray(out), np.asarray(ref),
                               rtol=2e-2, atol=2e-2)
    print("KERNEL_OK")
</pallas_src>

<mosaic_0001>
module attributes {stable_mosaic.version = 11 : i64} {
  func.func @_resblock_kernel(%arg0: i32, %arg1: memref<1x18x18x128xbf16, #tpu.memory_space<vmem>>, %arg2: memref<3x384x128xbf16, #tpu.memory_space<vmem>>, %arg3: memref<3x384x128xbf16, #tpu.memory_space<vmem>>, %arg4: memref<1x128xf32, #tpu.memory_space<vmem>>, %arg5: memref<1x128xf32, #tpu.memory_space<vmem>>, %arg6: memref<1x16x16x128xf32, #tpu.memory_space<vmem>>, %arg7: memref<18x48x128xbf16, #tpu.memory_space<vmem>>) attributes {dimension_semantics = [#tpu.dimension_semantics<parallel>], iteration_bounds = array<i64: 2>, scalar_prefetch = 0 : i64, scratch_operands = 1 : i64, tpu.core_type = #tpu.core_type<tc>, window_params = [{transform_indices = @transform_0, window_bounds = array<i64: 1, 18, 18, 128>}, {pipeline_mode = #tpu.pipeline_mode<synchronous>, transform_indices = @transform_1, window_bounds = array<i64: 3, 384, 128>}, {pipeline_mode = #tpu.pipeline_mode<synchronous>, transform_indices = @transform_2, window_bounds = array<i64: 3, 384, 128>}, {pipeline_mode = #tpu.pipeline_mode<synchronous>, transform_indices = @transform_3, window_bounds = array<i64: 1, 128>}, {pipeline_mode = #tpu.pipeline_mode<synchronous>, transform_indices = @transform_4, window_bounds = array<i64: 1, 128>}, {transform_indices = @transform_5, window_bounds = array<i64: 1, 16, 16, 128>}]} {
    %c0 = arith.constant 0 : index
    %c0_0 = arith.constant 0 : index
    %0 = vector.load %arg4[%c0, %c0_0] : memref<1x128xf32, #tpu.memory_space<vmem>>, vector<1x128xf32>
    %c0_1 = arith.constant 0 : index
    %c0_2 = arith.constant 0 : index
    %1 = vector.load %arg5[%c0_1, %c0_2] : memref<1x128xf32, #tpu.memory_space<vmem>>, vector<1x128xf32>
    %cst = arith.constant 0.000000e+00 : bf16
    %2 = vector.broadcast %cst : bf16 to vector<1x48x128xbf16>
    %c0_3 = arith.constant 0 : index
    %c0_4 = arith.constant 0 : index
    %c0_5 = arith.constant 0 : index
    %3 = vector.load %arg7[%c0_3, %c0_4, %c0_5] : memref<18x48x128xbf16, #tpu.memory_space<vmem>>, vector<1x48x128xbf16>
    tpu.vector_store %arg7[%c0_3, %c0_4, %c0_5], %2 {strides = array<i32>} : memref<18x48x128xbf16, #tpu.memory_space<vmem>>, vector<1x48x128xbf16>,
    %c17 = arith.constant 17 : index
    %c0_6 = arith.constant 0 : index
    %c0_7 = arith.constant 0 : index
    %4 = vector.load %arg7[%c17, %c0_6, %c0_7] : memref<18x48x128xbf16, #tpu.memory_space<vmem>>, vector<1x48x128xbf16>
    tpu.vector_store %arg7[%c17, %c0_6, %c0_7], %2 {strides = array<i32>} : memref<18x48x128xbf16, #tpu.memory_space<vmem>>, vector<1x48x128xbf16>,
    %cst_8 = arith.constant 0.000000e+00 : bf16
    %5 = vector.broadcast %cst_8 : bf16 to vector<18x16x128xbf16>
    %c0_9 = arith.constant 0 : index
    %c0_10 = arith.constant 0 : index
    %c0_11 = arith.constant 0 : index
    %6 = vector.load %arg7[%c0_9, %c0_10, %c0_11] : memref<18x48x128xbf16, #tpu.memory_space<vmem>>, vector<18x16x128xbf16>
    tpu.vector_store %arg7[%c0_9, %c0_10, %c0_11], %5 {strides = array<i32>} : memref<18x48x128xbf16, #tpu.memory_space<vmem>>, vector<18x16x128xbf16>,
    %c0_12 = arith.constant 0 : index
    %c32 = arith.constant 32 : index
    %c0_13 = arith.constant 0 : index
    %7 = vector.load %arg7[%c0_12, %c32, %c0_13] : memref<18x48x128xbf16, #tpu.memory_space<vmem>>, vector<18x16x128xbf16>
    tpu.vector_store %arg7[%c0_12, %c32, %c0_13], %5 {strides = array<i32>} : memref<18x48x128xbf16, #tpu.memory_space<vmem>>, vector<18x16x128xbf16>,
    %c0_14 = arith.constant 0 : index
    %c0_15 = arith.constant 0 : index
    %c0_16 = arith.constant 0 : index
    %c0_17 = arith.constant 0 : index
    %8 = vector.load %arg1[%c0_14, %c0_15, %c0_16, %c0_17] : memref<1x18x18x128xbf16, #tpu.memory_space<vmem>>, vector<1x8x16x128xbf16>
    %9 = vector.shape_cast %8 : vector<1x8x16x128xbf16> to vector<8x16x128xbf16>
    %c0_18 = arith.constant 0 : index
    %c0_19 = arith.constant 0 : index
    %c1 = arith.constant 1 : index
    %c0_20 = arith.constant 0 : index
    %10 = vector.load %arg1[%c0_18, %c0_19, %c1, %c0_20] : memref<1x18x18x128xbf16, #tpu.memory_space<vmem>>, vector<1x8x16x128xbf16>
    %11 = vector.shape_cast %10 : vector<1x8x16x128xbf16> to vector<8x16x128xbf16>
    %c0_21 = arith.constant 0 : index
    %c0_22 = arith.constant 0 : index
    %c2 = arith.constant 2 : index
    %c0_23 = arith.constant 0 : index
    %12 = vector.load %arg1[%c0_21, %c0_22, %c2, %c0_23] : memref<1x18x18x128xbf16, #tpu.memory_space<vmem>>, vector<1x8x16x128xbf16>
    %13 = vector.shape_cast %12 : vector<1x8x16x128xbf16> to vector<8x16x128xbf16>
    %14 = tpu.concatenate %9, %11, %13 in 2 : vector<8x16x128xbf16>, vector<8x16x128xbf16>, vector<8x16x128xbf16> -> vector<8x16x384xbf16>
    %15 = vector.shape_cast %14 : vector<8x16x384xbf16> to vector<128x384xbf16>
    %c0_24 = arith.constant 0 : index
    %c0_25 = arith.constant 0 : index
    %c0_26 = arith.constant 0 : index
    %16 = vector.load %arg2[%c0_24, %c0_25, %c0_26] : memref<3x384x128xbf16, #tpu.memory_space<vmem>>, vector<1x384x128xbf16>
    %17 = vector.shape_cast %16 : vector<1x384x128xbf16> to vector<384x128xbf16>
    %cst_27 = arith.constant dense<0.000000e+00> : vector<128x128xf32>
    %18 = tpu.matmul %15, %17, %cst_27 {dimension_numbers = #tpu.dot_dimension_numbers<[1], [0], [0], [1], [0, 0, 1, 1], [], []>} : vector<128x384xbf16>, vector<384x128xbf16>, vector<128x128xf32> -> vector<128x128xf32>
    %c0_28 = arith.constant 0 : index
    %c1_29 = arith.constant 1 : index
    %c0_30 = arith.constant 0 : index
    %c0_31 = arith.constant 0 : index
    %19 = vector.load %arg1[%c0_28, %c1_29, %c0_30, %c0_31] : memref<1x18x18x128xbf16, #tpu.memory_space<vmem>>, vector<1x8x16x128xbf16>
    %20 = vector.shape_cast %19 : vector<1x8x16x128xbf16> to vector<8x16x128xbf16>
    %c0_32 = arith.constant 0 : index
    %c1_33 = arith.constant 1 : index
    %c1_34 = arith.constant 1 : index
    %c0_35 = arith.constant 0 : index
    %21 = vector.load %arg1[%c0_32, %c1_33, %c1_34, %c0_35] : memref<1x18x18x128xbf16, #tpu.memory_space<vmem>>, vector<1x8x16x128xbf16>
    %22 = vector.shape_cast %21 : vector<1x8x16x128xbf16> to vector<8x16x128xbf16>
    %c0_36 = arith.constant 0 : index
    %c1_37 = arith.constant 1 : index
    %c2_38 = arith.constant 2 : index
    %c0_39 = arith.constant 0 : index
    %23 = vector.load %arg1[%c0_36, %c1_37, %c2_38, %c0_39] : memref<1x18x18x128xbf16, #tpu.memory_space<vmem>>, vector<1x8x16x128xbf16>
    %24 = vector.shape_cast %23 : vector<1x8x16x128xbf16> to vector<8x16x128xbf16>
    %25 = tpu.concatenate %20, %22, %24 in 2 : vector<8x16x128xbf16>, vector<8x16x128xbf16>, vector<8x16x128xbf16> -> vector<8x16x384xbf16>
    %26 = vector.shape_cast %25 : vector<8x16x384xbf16> to vector<128x384xbf16>
    %c1_40 = arith.constant 1 : index
    %c0_41 = arith.constant 0 : index
    %c0_42 = arith.constant 0 : index
    %27 = vector.load %arg2[%c1_40, %c0_41, %c0_42] : memref<3x384x128xbf16, #tpu.memory_space<vmem>>, vector<1x384x128xbf16>
    %28 = vector.shape_cast %27 : vector<1x384x128xbf16> to vector<384x128xbf16>
    %cst_43 = arith.constant dense<0.000000e+00> : vector<128x128xf32>
    %29 = tpu.matmul %26, %28, %cst_43 {dimension_numbers = #tpu.dot_dimension_numbers<[1], [0], [0], [1], [0, 0, 1, 1], [], []>} : vector<128x384xbf16>, vector<384x128xbf16>, vector<128x128xf32> -> vector<128x128xf32>
    %30 = arith.addf %18, %29 : vector<128x128xf32>
    %c0_44 = arith.constant 0 : index
    %c2_45 = arith.constant 2 : index
    %c0_46 = arith.constant 0 : index
    %c0_47 = arith.constant 0 : index
    %31 = vector.load %arg1[%c0_44, %c2_45, %c0_46, %c0_47] : memref<1x18x18x128xbf16, #tpu.memory_space<vmem>>, vector<1x8x16x128xbf16>
    %32 = vector.shape_cast %31 : vector<1x8x16x128xbf16> to vector<8x16x128xbf16>
    %c0_48 = arith.constant 0 : index
    %c2_49 = arith.constant 2 : index
    %c1_50 = arith.constant 1 : index
    %c0_51 = arith.constant 0 : index
    %33 = vector.load %arg1[%c0_48, %c2_49, %c1_50, %c0_51] : memref<1x18x18x128xbf16, #tpu.memory_space<vmem>>, vector<1x8x16x128xbf16>
    %34 = vector.shape_cast %33 : vector<1x8x16x128xbf16> to vector<8x16x128xbf16>
    %c0_52 = arith.constant 0 : index
    %c2_53 = arith.constant 2 : index
    %c2_54 = arith.constant 2 : index
    %c0_55 = arith.constant 0 : index
    %35 = vector.load %arg1[%c0_52, %c2_53, %c2_54, %c0_55] : memref<1x18x18x128xbf16, #tpu.memory_space<vmem>>, vector<1x8x16x128xbf16>
    %36 = vector.shape_cast %35 : vector<1x8x16x128xbf16> to vector<8x16x128xbf16>
    %37 = tpu.concatenate %32, %34, %36 in 2 : vector<8x16x128xbf16>, vector<8x16x128xbf16>, vector<8x16x128xbf16> -> vector<8x16x384xbf16>
    %38 = vector.shape_cast %37 : vector<8x16x384xbf16> to vector<128x384xbf16>
    %c2_56 = arith.constant 2 : index
    %c0_57 = arith.constant 0 : index
    %c0_58 = arith.constant 0 : index
    %39 = vector.load %arg2[%c2_56, %c0_57, %c0_58] : memref<3x384x128xbf16, #tpu.memory_space<vmem>>, vector<1x384x128xbf16>
    %40 = vector.shape_cast %39 : vector<1x384x128xbf16> to vector<384x128xbf16>
    %cst_59 = arith.constant dense<0.000000e+00> : vector<128x128xf32>
    %41 = tpu.matmul %38, %40, %cst_59 {dimension_numbers = #tpu.dot_dimension_numbers<[1], [0], [0], [1], [0, 0, 1, 1], [], []>} : vector<128x384xbf16>, vector<384x128xbf16>, vector<128x128xf32> -> vector<128x128xf32>
    %42 = arith.addf %30, %41 : vector<128x128xf32>
    %43 = vector.broadcast %0 : vector<1x128xf32> to vector<128x128xf32>
    %44 = arith.addf %42, %43 : vector<128x128xf32>
    %cst_60 = arith.constant 0.000000e+00 : f32
    %45 = vector.broadcast %cst_60 : f32 to vector<128x128xf32>
    %46 = arith.maximumf %44, %45 : vector<128x128xf32>
    %47 = arith.truncf %46 : vector<128x128xf32> to vector<128x128xbf16>
    %48 = vector.shape_cast %47 : vector<128x128xbf16> to vector<8x16x128xbf16>
    %c1_61 = arith.constant 1 : index
    %c16 = arith.constant 16 : index
    %c0_62 = arith.constant 0 : index
    %49 = vector.load %arg7[%c1_61, %c16, %c0_62] : memref<18x48x128xbf16, #tpu.memory_space<vmem>>, vector<8x16x128xbf16>
    tpu.vector_store %arg7[%c1_61, %c16, %c0_62], %48 {strides = array<i32>} : memref<18x48x128xbf16, #tpu.memory_space<vmem>>, vector<8x16x128xbf16>,
    %c0_63 = arith.constant 0 : index
    %c8 = arith.constant 8 : index
    %c0_64 = arith.constant 0 : index
    %c0_65 = arith.constant 0 : index
    %50 = vector.load %arg1[%c0_63, %c8, %c0_64, %c0_65] : memref<1x18x18x128xbf16, #tpu.memory_space<vmem>>, vector<1x8x16x128xbf16>
    %51 = vector.shape_cast %50 : vector<1x8x16x128xbf16> to vector<8x16x128xbf16>
    %c0_66 = arith.constant 0 : index
    %c8_67 = arith.constant 8 : index
    %c1_68 = arith.constant 1 : index
    %c0_69 = arith.constant 0 : index
    %52 = vector.load %arg1[%c0_66, %c8_67, %c1_68, %c0_69] : memref<1x18x18x128xbf16, #tpu.memory_space<vmem>>, vector<1x8x16x128xbf16>
    %53 = vector.shape_cast %52 : vector<1x8x16x128xbf16> to vector<8x16x128xbf16>
    %c0_70 = arith.constant 0 : index
    %c8_71 = arith.constant 8 : index
    %c2_72 = arith.constant 2 : index
    %c0_73 = arith.constant 0 : index
    %54 = vector.load %arg1[%c0_70, %c8_71, %c2_72, %c0_73] : memref<1x18x18x128xbf16, #tpu.memory_space<vmem>>, vector<1x8x16x128xbf16>
    %55 = vector.shape_cast %54 : vector<1x8x16x128xbf16> to vector<8x16x128xbf16>
    %56 = tpu.concatenate %51, %53, %55 in 2 : vector<8x16x128xbf16>, vector<8x16x128xbf16>, vector<8x16x128xbf16> -> vector<8x16x384xbf16>
    %57 = vector.shape_cast %56 : vector<8x16x384xbf16> to vector<128x384xbf16>
    %c0_74 = arith.constant 0 : index
    %c0_75 = arith.constant 0 : index
    %c0_76 = arith.constant 0 : index
    %58 = vector.load %arg2[%c0_74, %c0_75, %c0_76] : memref<3x384x128xbf16, #tpu.memory_space<vmem>>, vector<1x384x128xbf16>
    %59 = vector.shape_cast %58 : vector<1x384x128xbf16> to vector<384x128xbf16>
    %cst_77 = arith.constant dense<0.000000e+00> : vector<128x128xf32>
    %60 = tpu.matmul %57, %59, %cst_77 {dimension_numbers = #tpu.dot_dimension_numbers<[1], [0], [0], [1], [0, 0, 1, 1], [], []>} : vector<128x384xbf16>, vector<384x128xbf16>, vector<128x128xf32> -> vector<128x128xf32>
    %c0_78 = arith.constant 0 : index
    %c9 = arith.constant 9 : index
    %c0_79 = arith.constant 0 : index
    %c0_80 = arith.constant 0 : index
    %61 = vector.load %arg1[%c0_78, %c9, %c0_79, %c0_80] : memref<1x18x18x128xbf16, #tpu.memory_space<vmem>>, vector<1x8x16x128xbf16>
    %62 = vector.shape_cast %61 : vector<1x8x16x128xbf16> to vector<8x16x128xbf16>
    %c0_81 = arith.constant 0 : index
    %c9_82 = arith.constant 9 : index
    %c1_83 = arith.constant 1 : index
    %c0_84 = arith.constant 0 : index
    %63 = vector.load %arg1[%c0_81, %c9_82, %c1_83, %c0_84] : memref<1x18x18x128xbf16, #tpu.memory_space<vmem>>, vector<1x8x16x128xbf16>
    %64 = vector.shape_cast %63 : vector<1x8x16x128xbf16> to vector<8x16x128xbf16>
    %c0_85 = arith.constant 0 : index
    %c9_86 = arith.constant 9 : index
    %c2_87 = arith.constant 2 : index
    %c0_88 = arith.constant 0 : index
    %65 = vector.load %arg1[%c0_85, %c9_86, %c2_87, %c0_88] : memref<1x18x18x128xbf16, #tpu.memory_space<vmem>>, vector<1x8x16x128xbf16>
    %66 = vector.shape_cast %65 : vector<1x8x16x128xbf16> to vector<8x16x128xbf16>
    %67 = tpu.concatenate %62, %64, %66 in 2 : vector<8x16x128xbf16>, vector<8x16x128xbf16>, vector<8x16x128xbf16> -> vector<8x16x384xbf16>
    %68 = vector.shape_cast %67 : vector<8x16x384xbf16> to vector<128x384xbf16>
    %c1_89 = arith.constant 1 : index
    %c0_90 = arith.constant 0 : index
    %c0_91 = arith.constant 0 : index
    %69 = vector.load %arg2[%c1_89, %c0_90, %c0_91] : memref<3x384x128xbf16, #tpu.memory_space<vmem>>, vector<1x384x128xbf16>
    %70 = vector.shape_cast %69 : vector<1x384x128xbf16> to vector<384x128xbf16>
    %cst_92 = arith.constant dense<0.000000e+00> : vector<128x128xf32>
    %71 = tpu.matmul %68, %70, %cst_92 {dimension_numbers = #tpu.dot_dimension_numbers<[1], [0], [0], [1], [0, 0, 1, 1], [], []>} : vector<128x384xbf16>, vector<384x128xbf16>, vector<128x128xf32> -> vector<128x128xf32>
    %72 = arith.addf %60, %71 : vector<128x128xf32>
    %c0_93 = arith.constant 0 : index
    %c10 = arith.constant 10 : index
    %c0_94 = arith.constant 0 : index
    %c0_95 = arith.constant 0 : index
    %73 = vector.load %arg1[%c0_93, %c10, %c0_94, %c0_95] : memref<1x18x18x128xbf16, #tpu.memory_space<vmem>>, vector<1x8x16x128xbf16>
    %74 = vector.shape_cast %73 : vector<1x8x16x128xbf16> to vector<8x16x128xbf16>
    %c0_96 = arith.constant 0 : index
    %c10_97 = arith.constant 10 : index
    %c1_98 = arith.constant 1 : index
    %c0_99 = arith.constant 0 : index
    %75 = vector.load %arg1[%c0_96, %c10_97, %c1_98, %c0_99] : memref<1x18x18x128xbf16, #tpu.memory_space<vmem>>, vector<1x8x16x128xbf16>
    %76 = vector.shape_cast %75 : vector<1x8x16x128xbf16> to vector<8x16x128xbf16>
    %c0_100 = arith.constant 0 : index
    %c10_101 = arith.constant 10 : index
    %c2_102 = arith.constant 2 : index
    %c0_103 = arith.constant 0 : index
    %77 = vector.load %arg1[%c0_100, %c10_101, %c2_102, %c0_103] : memref<1x18x18x128xbf16, #tpu.memory_space<vmem>>, vector<1x8x16x128xbf16>
    %78 = vector.shape_cast %77 : vector<1x8x16x128xbf16> to vector<8x16x128xbf16>
    %79 = tpu.concatenate %74, %76, %78 in 2 : vector<8x16x128xbf16>, vector<8x16x128xbf16>, vector<8x16x128xbf16> -> vector<8x16x384xbf16>
    %80 = vector.shape_cast %79 : vector<8x16x384xbf16> to vector<128x384xbf16>
    %c2_104 = arith.constant 2 : index
    %c0_105 = arith.constant 0 : index
    %c0_106 = arith.constant 0 : index
    %81 = vector.load %arg2[%c2_104, %c0_105, %c0_106] : memref<3x384x128xbf16, #tpu.memory_space<vmem>>, vector<1x384x128xbf16>
    %82 = vector.shape_cast %81 : vector<1x384x128xbf16> to vector<384x128xbf16>
    %cst_107 = arith.constant dense<0.000000e+00> : vector<128x128xf32>
    %83 = tpu.matmul %80, %82, %cst_107 {dimension_numbers = #tpu.dot_dimension_numbers<[1], [0], [0], [1], [0, 0, 1, 1], [], []>} : vector<128x384xbf16>, vector<384x128xbf16>, vector<128x128xf32> -> vector<128x128xf32>
    %84 = arith.addf %72, %83 : vector<128x128xf32>
    %85 = vector.broadcast %0 : vector<1x128xf32> to vector<128x128xf32>
    %86 = arith.addf %84, %85 : vector<128x128xf32>
    %cst_108 = arith.constant 0.000000e+00 : f32
    %87 = vector.broadcast %cst_108 : f32 to vector<128x128xf32>
    %88 = arith.maximumf %86, %87 : vector<128x128xf32>
    %89 = arith.truncf %88 : vector<128x128xf32> to vector<128x128xbf16>
    %90 = vector.shape_cast %89 : vector<128x128xbf16> to vector<8x16x128xbf16>
    %c9_109 = arith.constant 9 : index
    %c16_110 = arith.constant 16 : index
    %c0_111 = arith.constant 0 : index
    %91 = vector.load %arg7[%c9_109, %c16_110, %c0_111] : memref<18x48x128xbf16, #tpu.memory_space<vmem>>, vector<8x16x128xbf16>
    tpu.vector_store %arg7[%c9_109, %c16_110, %c0_111], %90 {strides = array<i32>} : memref<18x48x128xbf16, #tpu.memory_space<vmem>>, vector<8x16x128xbf16>,
    %c0_112 = arith.constant 0 : index
    %c15 = arith.constant 15 : index
    %c0_113 = arith.constant 0 : index
    %92 = vector.load %arg7[%c0_112, %c15, %c0_113] : memref<18x48x128xbf16, #tpu.memory_space<vmem>>, vector<8x16x128xbf16>
    %c0_114 = arith.constant 0 : index
    %c16_115 = arith.constant 16 : index
    %c0_116 = arith.constant 0 : index
    %93 = vector.load %arg7[%c0_114, %c16_115, %c0_116] : memref<18x48x128xbf16, #tpu.memory_space<vmem>>, vector<8x16x128xbf16>
    %c0_117 = arith.constant 0 : index
    %c17_118 = arith.constant 17 : index
    %c0_119 = arith.constant 0 : index
    %94 = vector.load %arg7[%c0_117, %c17_118, %c0_119] : memref<18x48x128xbf16, #tpu.memory_space<vmem>>, vector<8x16x128xbf16>
    %95 = tpu.concatenate %92, %93, %94 in 2 : vector<8x16x128xbf16>, vector<8x16x128xbf16>, vector<8x16x128xbf16> -> vector<8x16x384xbf16>
    %96 = vector.shape_cast %95 : vector<8x16x384xbf16> to vector<128x384xbf16>
    %c0_120 = arith.constant 0 : index
    %c0_121 = arith.constant 0 : index
    %c0_122 = arith.constant 0 : index
    %97 = vector.load %arg3[%c0_120, %c0_121, %c0_122] : memref<3x384x128xbf16, #tpu.memory_space<vmem>>, vector<1x384x128xbf16>
    %98 = vector.shape_cast %97 : vector<1x384x128xbf16> to vector<384x128xbf16>
    %cst_123 = arith.constant dense<0.000000e+00> : vector<128x128xf32>
    %99 = tpu.matmul %96, %98, %cst_123 {dimension_numbers = #tpu.dot_dimension_numbers<[1], [0], [0], [1], [0, 0, 1, 1], [], []>} : vector<128x384xbf16>, vector<384x128xbf16>, vector<128x128xf32> -> vector<128x128xf32>
    %c1_124 = arith.constant 1 : index
    %c15_125 = arith.constant 15 : index
    %c0_126 = arith.constant 0 : index
    %100 = vector.load %arg7[%c1_124, %c15_125, %c0_126] : memref<18x48x128xbf16, #tpu.memory_space<vmem>>, vector<8x16x128xbf16>
    %c1_127 = arith.constant 1 : index
    %c16_128 = arith.constant 16 : index
    %c0_129 = arith.constant 0 : index
    %101 = vector.load %arg7[%c1_127, %c16_128, %c0_129] : memref<18x48x128xbf16, #tpu.memory_space<vmem>>, vector<8x16x128xbf16>
    %c1_130 = arith.constant 1 : index
    %c17_131 = arith.constant 17 : index
    %c0_132 = arith.constant 0 : index
    %102 = vector.load %arg7[%c1_130, %c17_131, %c0_132] : memref<18x48x128xbf16, #tpu.memory_space<vmem>>, vector<8x16x128xbf16>
    %103 = tpu.concatenate %100, %101, %102 in 2 : vector<8x16x128xbf16>, vector<8x16x128xbf16>, vector<8x16x128xbf16> -> vector<8x16x384xbf16>
    %104 = vector.shape_cast %103 : vector<8x16x384xbf16> to vector<128x384xbf16>
    %c1_133 = arith.constant 1 : index
    %c0_134 = arith.constant 0 : index
    %c0_135 = arith.constant 0 : index
    %105 = vector.load %arg3[%c1_133, %c0_134, %c0_135] : memref<3x384x128xbf16, #tpu.memory_space<vmem>>, vector<1x384x128xbf16>
    %106 = vector.shape_cast %105 : vector<1x384x128xbf16> to vector<384x128xbf16>
    %cst_136 = arith.constant dense<0.000000e+00> : vector<128x128xf32>
    %107 = tpu.matmul %104, %106, %cst_136 {dimension_numbers = #tpu.dot_dimension_numbers<[1], [0], [0], [1], [0, 0, 1, 1], [], []>} : vector<128x384xbf16>, vector<384x128xbf16>, vector<128x128xf32> -> vector<128x128xf32>
    %108 = arith.addf %99, %107 : vector<128x128xf32>
    %c2_137 = arith.constant 2 : index
    %c15_138 = arith.constant 15 : index
    %c0_139 = arith.constant 0 : index
    %109 = vector.load %arg7[%c2_137, %c15_138, %c0_139] : memref<18x48x128xbf16, #tpu.memory_space<vmem>>, vector<8x16x128xbf16>
    %c2_140 = arith.constant 2 : index
    %c16_141 = arith.constant 16 : index
    %c0_142 = arith.constant 0 : index
    %110 = vector.load %arg7[%c2_140, %c16_141, %c0_142] : memref<18x48x128xbf16, #tpu.memory_space<vmem>>, vector<8x16x128xbf16>
    %c2_143 = arith.constant 2 : index
    %c17_144 = arith.constant 17 : index
    %c0_145 = arith.constant 0 : index
    %111 = vector.load %arg7[%c2_143, %c17_144, %c0_145] : memref<18x48x128xbf16, #tpu.memory_space<vmem>>, vector<8x16x128xbf16>
    %112 = tpu.concatenate %109, %110, %111 in 2 : vector<8x16x128xbf16>, vector<8x16x128xbf16>, vector<8x16x128xbf16> -> vector<8x16x384xbf16>
    %113 = vector.shape_cast %112 : vector<8x16x384xbf16> to vector<128x384xbf16>
    %c2_146 = arith.constant 2 : index
    %c0_147 = arith.constant 0 : index
    %c0_148 = arith.constant 0 : index
    %114 = vector.load %arg3[%c2_146, %c0_147, %c0_148] : memref<3x384x128xbf16, #tpu.memory_space<vmem>>, vector<1x384x128xbf16>
    %115 = vector.shape_cast %114 : vector<1x384x128xbf16> to vector<384x128xbf16>
    %cst_149 = arith.constant dense<0.000000e+00> : vector<128x128xf32>
    %116 = tpu.matmul %113, %115, %cst_149 {dimension_numbers = #tpu.dot_dimension_numbers<[1], [0], [0], [1], [0, 0, 1, 1], [], []>} : vector<128x384xbf16>, vector<384x128xbf16>, vector<128x128xf32> -> vector<128x128xf32>
    %117 = arith.addf %108, %116 : vector<128x128xf32>
    %118 = vector.broadcast %1 : vector<1x128xf32> to vector<128x128xf32>
    %119 = arith.addf %117, %118 : vector<128x128xf32>
    %c0_150 = arith.constant 0 : index
    %c1_151 = arith.constant 1 : index
    %c1_152 = arith.constant 1 : index
    %c0_153 = arith.constant 0 : index
    %120 = vector.load %arg1[%c0_150, %c1_151, %c1_152, %c0_153] : memref<1x18x18x128xbf16, #tpu.memory_space<vmem>>, vector<1x8x16x128xbf16>
    %121 = vector.shape_cast %120 : vector<1x8x16x128xbf16> to vector<8x16x128xbf16>
    %122 = vector.shape_cast %121 : vector<8x16x128xbf16> to vector<128x128xbf16>
    %123 = arith.extf %122 : vector<128x128xbf16> to vector<128x128xf32>
    %124 = arith.addf %119, %123 : vector<128x128xf32>
    %cst_154 = arith.constant 0.000000e+00 : f32
    %125 = vector.broadcast %cst_154 : f32 to vector<128x128xf32>
    %126 = arith.maximumf %124, %125 : vector<128x128xf32>
    %127 = vector.shape_cast %126 : vector<128x128xf32> to vector<8x16x128xf32>
    %c0_155 = arith.constant 0 : index
    %c0_156 = arith.constant 0 : index
    %c0_157 = arith.constant 0 : index
    %c0_158 = arith.constant 0 : index
    %128 = vector.load %arg6[%c0_155, %c0_156, %c0_157, %c0_158] : memref<1x16x16x128xf32, #tpu.memory_space<vmem>>, vector<1x8x16x128xf32>
    %129 = vector.shape_cast %128 : vector<1x8x16x128xf32> to vector<8x16x128xf32>
    %130 = vector.shape_cast %127 : vector<8x16x128xf32> to vector<1x8x16x128xf32>
    tpu.vector_store %arg6[%c0_155, %c0_156, %c0_157, %c0_158], %130 {strides = array<i32>} : memref<1x16x16x128xf32, #tpu.memory_space<vmem>>, vector<1x8x16x128xf32>,
    %c8_159 = arith.constant 8 : index
    %c15_160 = arith.constant 15 : index
    %c0_161 = arith.constant 0 : index
    %131 = vector.load %arg7[%c8_159, %c15_160, %c0_161] : memref<18x48x128xbf16, #tpu.memory_space<vmem>>, vector<8x16x128xbf16>
    %c8_162 = arith.constant 8 : index
    %c16_163 = arith.constant 16 : index
    %c0_164 = arith.constant 0 : index
    %132 = vector.load %arg7[%c8_162, %c16_163, %c0_164] : memref<18x48x128xbf16, #tpu.memory_space<vmem>>, vector<8x16x128xbf16>
    %c8_165 = arith.constant 8 : index
    %c17_166 = arith.constant 17 : index
    %c0_167 = arith.constant 0 : index
    %133 = vector.load %arg7[%c8_165, %c17_166, %c0_167] : memref<18x48x128xbf16, #tpu.memory_space<vmem>>, vector<8x16x128xbf16>
    %134 = tpu.concatenate %131, %132, %133 in 2 : vector<8x16x128xbf16>, vector<8x16x128xbf16>, vector<8x16x128xbf16> -> vector<8x16x384xbf16>
    %135 = vector.shape_cast %134 : vector<8x16x384xbf16> to vector<128x384xbf16>
    %c0_168 = arith.constant 0 : index
    %c0_169 = arith.constant 0 : index
    %c0_170 = arith.constant 0 : index
    %136 = vector.load %arg3[%c0_168, %c0_169, %c0_170] : memref<3x384x128xbf16, #tpu.memory_space<vmem>>, vector<1x384x128xbf16>
    %137 = vector.shape_cast %136 : vector<1x384x128xbf16> to vector<384x128xbf16>
    %cst_171 = arith.constant dense<0.000000e+00> : vector<128x128xf32>
    %138 = tpu.matmul %135, %137, %cst_171 {dimension_numbers = #tpu.dot_dimension_numbers<[1], [0], [0], [1], [0, 0, 1, 1], [], []>} : vector<128x384xbf16>, vector<384x128xbf16>, vector<128x128xf32> -> vector<128x128xf32>
    %c9_172 = arith.constant 9 : index
    %c15_173 = arith.constant 15 : index
    %c0_174 = arith.constant 0 : index
    %139 = vector.load %arg7[%c9_172, %c15_173, %c0_174] : memref<18x48x128xbf16, #tpu.memory_space<vmem>>, vector<8x16x128xbf16>
    %c9_175 = arith.constant 9 : index
    %c16_176 = arith.constant 16 : index
    %c0_177 = arith.constant 0 : index
    %140 = vector.load %arg7[%c9_175, %c16_176, %c0_177] : memref<18x48x128xbf16, #tpu.memory_space<vmem>>, vector<8x16x128xbf16>
    %c9_178 = arith.constant 9 : index
    %c17_179 = arith.constant 17 : index
    %c0_180 = arith.constant 0 : index
    %141 = vector.load %arg7[%c9_178, %c17_179, %c0_180] : memref<18x48x128xbf16, #tpu.memory_space<vmem>>, vector<8x16x128xbf16>
    %142 = tpu.concatenate %139, %140, %141 in 2 : vector<8x16x128xbf16>, vector<8x16x128xbf16>, vector<8x16x128xbf16> -> vector<8x16x384xbf16>
    %143 = vector.shape_cast %142 : vector<8x16x384xbf16> to vector<128x384xbf16>
    %c1_181 = arith.constant 1 : index
    %c0_182 = arith.constant 0 : index
    %c0_183 = arith.constant 0 : index
    %144 = vector.load %arg3[%c1_181, %c0_182, %c0_183] : memref<3x384x128xbf16, #tpu.memory_space<vmem>>, vector<1x384x128xbf16>
    %145 = vector.shape_cast %144 : vector<1x384x128xbf16> to vector<384x128xbf16>
    %cst_184 = arith.constant dense<0.000000e+00> : vector<128x128xf32>
    %146 = tpu.matmul %143, %145, %cst_184 {dimension_numbers = #tpu.dot_dimension_numbers<[1], [0], [0], [1], [0, 0, 1, 1], [], []>} : vector<128x384xbf16>, vector<384x128xbf16>, vector<128x128xf32> -> vector<128x128xf32>
    %147 = arith.addf %138, %146 : vector<128x128xf32>
    %c10_185 = arith.constant 10 : index
    %c15_186 = arith.constant 15 : index
    %c0_187 = arith.constant 0 : index
    %148 = vector.load %arg7[%c10_185, %c15_186, %c0_187] : memref<18x48x128xbf16, #tpu.memory_space<vmem>>, vector<8x16x128xbf16>
    %c10_188 = arith.constant 10 : index
    %c16_189 = arith.constant 16 : index
    %c0_190 = arith.constant 0 : index
    %149 = vector.load %arg7[%c10_188, %c16_189, %c0_190] : memref<18x48x128xbf16, #tpu.memory_space<vmem>>, vector<8x16x128xbf16>
    %c10_191 = arith.constant 10 : index
    %c17_192 = arith.constant 17 : index
    %c0_193 = arith.constant 0 : index
    %150 = vector.load %arg7[%c10_191, %c17_192, %c0_193] : memref<18x48x128xbf16, #tpu.memory_space<vmem>>, vector<8x16x128xbf16>
    %151 = tpu.concatenate %148, %149, %150 in 2 : vector<8x16x128xbf16>, vector<8x16x128xbf16>, vector<8x16x128xbf16> -> vector<8x16x384xbf16>
    %152 = vector.shape_cast %151 : vector<8x16x384xbf16> to vector<128x384xbf16>
    %c2_194 = arith.constant 2 : index
    %c0_195 = arith.constant 0 : index
    %c0_196 = arith.constant 0 : index
    %153 = vector.load %arg3[%c2_194, %c0_195, %c0_196] : memref<3x384x128xbf16, #tpu.memory_space<vmem>>, vector<1x384x128xbf16>
    %154 = vector.shape_cast %153 : vector<1x384x128xbf16> to vector<384x128xbf16>
    %cst_197 = arith.constant dense<0.000000e+00> : vector<128x128xf32>
    %155 = tpu.matmul %152, %154, %cst_197 {dimension_numbers = #tpu.dot_dimension_numbers<[1], [0], [0], [1], [0, 0, 1, 1], [], []>} : vector<128x384xbf16>, vector<384x128xbf16>, vector<128x128xf32> -> vector<128x128xf32>
    %156 = arith.addf %147, %155 : vector<128x128xf32>
    %157 = vector.broadcast %1 : vector<1x128xf32> to vector<128x128xf32>
    %158 = arith.addf %156, %157 : vector<128x128xf32>
    %c0_198 = arith.constant 0 : index
    %c9_199 = arith.constant 9 : index
    %c1_200 = arith.constant 1 : index
    %c0_201 = arith.constant 0 : index
    %159 = vector.load %arg1[%c0_198, %c9_199, %c1_200, %c0_201] : memref<1x18x18x128xbf16, #tpu.memory_space<vmem>>, vector<1x8x16x128xbf16>
    %160 = vector.shape_cast %159 : vector<1x8x16x128xbf16> to vector<8x16x128xbf16>
    %161 = vector.shape_cast %160 : vector<8x16x128xbf16> to vector<128x128xbf16>
    %162 = arith.extf %161 : vector<128x128xbf16> to vector<128x128xf32>
    %163 = arith.addf %158, %162 : vector<128x128xf32>
    %cst_202 = arith.constant 0.000000e+00 : f32
    %164 = vector.broadcast %cst_202 : f32 to vector<128x128xf32>
    %165 = arith.maximumf %163, %164 : vector<128x128xf32>
    %166 = vector.shape_cast %165 : vector<128x128xf32> to vector<8x16x128xf32>
    %c0_203 = arith.constant 0 : index
    %c8_204 = arith.constant 8 : index
    %c0_205 = arith.constant 0 : index
    %c0_206 = arith.constant 0 : index
    %167 = vector.load %arg6[%c0_203, %c8_204, %c0_205, %c0_206] : memref<1x16x16x128xf32, #tpu.memory_space<vmem>>, vector<1x8x16x128xf32>
    %168 = vector.shape_cast %167 : vector<1x8x16x128xf32> to vector<8x16x128xf32>
    %169 = vector.shape_cast %166 : vector<8x16x128xf32> to vector<1x8x16x128xf32>
    tpu.vector_store %arg6[%c0_203, %c8_204, %c0_205, %c0_206], %169 {strides = array<i32>} : memref<1x16x16x128xf32, #tpu.memory_space<vmem>>, vector<1x8x16x128xf32>,
    return
  }
  func.func @transform_0(%arg0: i32) -> (i32, i32, i32, i32) {
    %c0_i32 = arith.constant 0 : i32
    %c0_i32_0 = arith.constant 0 : i32
    %c0_i32_1 = arith.constant 0 : i32
    %c0_i32_2 = arith.constant 0 : i32
    return %arg0, %c0_i32, %c0_i32_0, %c0_i32_1 : i32, i32, i32, i32
  }
  func.func @transform_1(%arg0: i32) -> (i32, i32, i32) {
    %c0_i32 = arith.constant 0 : i32
    %c0_i32_0 = arith.constant 0 : i32
    %c0_i32_1 = arith.constant 0 : i32
    %c0_i32_2 = arith.constant 0 : i32
    return %c0_i32, %c0_i32_0, %c0_i32_1 : i32, i32, i32
  }
  func.func @transform_2(%arg0: i32) -> (i32, i32, i32) {
    %c0_i32 = arith.constant 0 : i32
    %c0_i32_0 = arith.constant 0 : i32
    %c0_i32_1 = arith.constant 0 : i32
    %c0_i32_2 = arith.constant 0 : i32
    return %c0_i32, %c0_i32_0, %c0_i32_1 : i32, i32, i32
  }
  func.func @transform_3(%arg0: i32) -> (i32, i32) {
    %c0_i32 = arith.constant 0 : i32
    %c0_i32_0 = arith.constant 0 : i32
    %c0_i32_1 = arith.constant 0 : i32
    return %c0_i32, %c0_i32_0 : i32, i32
  }
  func.func @transform_4(%arg0: i32) -> (i32, i32) {
    %c0_i32 = arith.constant 0 : i32
    %c0_i32_0 = arith.constant 0 : i32
    %c0_i32_1 = arith.constant 0 : i32
    return %c0_i32, %c0_i32_0 : i32, i32
  }
  func.func @transform_5(%arg0: i32) -> (i32, i32, i32, i32) {
    %c0_i32 = arith.constant 0 : i32
    %c0_i32_0 = arith.constant 0 : i32
    %c0_i32_1 = arith.constant 0 : i32
    %c0_i32_2 = arith.constant 0 : i32
    return %arg0, %c0_i32, %c0_i32_0, %c0_i32_1 : i32, i32, i32, i32
  }
}

</mosaic_0001>

<bundles_post_ra>
// kernel: tpu_custom_call.1
= control target key start
LH: loop header
LB: loop body
LE: loop exit
PB: predicated region body
PF: predicated region fallthrough
CT: control target
= control target key end

     0   :  { %10 = vsyncpa [#allocation4], 0  ;;  %s16591_s0 = inlined_call_operand.hbm [shape: bf16[2,18,18,128], index: 0, kind: input, shape index: {}]   ;;  %s16592_s1 = inlined_call_operand.hbm [shape: bf16[3,384,128], index: 1, kind: input, shape index: {}]   ;;  %s16593_s2 = inlined_call_operand.hbm [shape: bf16[3,384,128], index: 2, kind: input, shape index: {}]   ;;  %s16594_s3 = inlined_call_operand.hbm [shape: f32[1,128], index: 3, kind: input, shape index: {}]   ;;  %s16595_s4 = inlined_call_operand.hbm [shape: f32[1,128], index: 4, kind: input, shape index: {}]   ;;  %s16596_s5 = inlined_call_operand.hbm [shape: f32[2,16,16,128], index: 5, kind: output, shape index: {}]  }
   0x1   :  { %12 = vsyncpa [#allocation4 + $0x1], 0 }
   0x2   :  { %13 = vsyncpa [#allocation7], 0 }
   0x3   :  { %14 = vsyncpa [#allocation10], 0 }
   0x4   :  { %15 = vsyncpa [#allocation5], 0 }
   0x5   :  { %17 = vsyncpa [#allocation5 + $0x1], 0  ;;  %s12986_s18 = smov 0   ;;  %s12988_s19 = smov 0  }
   0x6   :  { %s12990_s20 = smov 0   ;;  %s12992_s21 = smov 0  }
   0x7 LB: > { %s13007_s22 = sadd.s32 4294967295, %s12943_s21   ;;  %s9853_s23 = sadd.s32 4294967294, %s12943_s21   ;;  %s12943_s21 = sphi %s12992_s21, %s16733_s21   ;;  %s12939_s20 = sphi %s12990_s20, %s16732_s20   ;;  %s12935_s19 = sphi %s12988_s19, %s16731_s19   ;;  %s12931_s18 = sphi %s12986_s18, %s16730_s18  }
   0x8   : > { %p43_p0 = scmp.ne.s32.totalorder %s12935_s19, %s12931_s18  ;;  %p16597_p1 = scmp.eq.s32.totalorder %s13007_s22, 0 }
   0x9   : > { %p157_p3 = scmp.eq.s32.totalorder %s9853_s23, 1  ;;  %p9854_p5 = scmp.ge.s32.totalorder %s12943_s21, 1 }
   0xa   : > { %p13016_p4 = por %p16597_p1, %p43_p0  ;;  %p164_p7 = scmp.lt.s32.totalorder %s12943_s21, 3 }
   0xb   : > { %p13021_p6 = por %p157_p3, %p43_p0  ;;  %s12945_s27 = smov [#allocation6]  }
   0xc   : > { %s16619_s24 = scalar_select %p13016_p4, 1, 0 }
   0xd   : > { %s16620_s25 = scalar_select %p13021_p6, 1, 0 }
   0xe   : > { %p13026_p8 = pnand %p9854_p5, %p164_p7  ;;  %s176_s28 = sshll.u32 %s12945_s27, 4  ;;  %s13030_s28 = int_to_ptr.vmem [resolvable:$true] %s176_s28 }
   0xf   : > { %s12946_s30 = smov [#allocation9]   ;;  %s12947_s7 = smov [#allocation8]  }
  0x10   : > { %s16621_s26 = scalar_select %p13026_p8, 1, 0 }
  0x11   : > { %p12218_p9 = pneg %p13026_p8  ;;  %s203_s6 = sshll.u32 %s12946_s30, 4  ;;  %s13041_s6 = int_to_ptr.vmem [resolvable:$true] %s203_s6 }
  0x12   : > { %s13043_s8 = sshll.u32 %s12947_s7, 4  ;;  %s12727_s11 = scalar_lea.hbm %s16592_s1, 9216  ;;  %s190_s8 = int_to_ptr.vmem [resolvable:$true] %s13043_s8 }
  0x13   : > { %p13037_p11 = pnand %p12218_p9, %p16597_p1  ;;  %p12728_p12 = scmp.ne.s32.totalorder %s16592_s1, %s12727_s11 }
  0x14   : > { %p12734_p5 = scmp.lt.u32.totalorder %s12727_s11, %s16592_s1 }
  0x15   : > { %p13053_p13 = pneg %p13037_p11 }
  0x17   : > { %p12730_p0 = pnand %p13053_p13, %p12728_p12 }
  0x19   : > { %p12731_p3 = pneg %p12730_p0 }
  0x1b   : > { %p12736_p7 = pnand %p12734_p5, %p12731_p3 }
  0x1d   : > { %12739 = shalt.err (!%p12736_p7)
}
  0x1e   : > { %s12740_s17 = scalar_lea.vmem %s13030_s28, 9216  ;;  %p12748_p2 = scmp.lt.s32.totalorder %s13030_s28, %s13030_s28 }
  0x1f   : > { %p12741_p9 = scmp.ne.s32.totalorder %s13030_s28, %s12740_s17  ;;  %p12749_p6 = scmp.lt.s32.totalorder %s12740_s17, %s12740_s17 }
  0x21   : > { %p12743_p10 = pnand %p12741_p9, %p13053_p13  ;;  %p12750_p12 = por %p12749_p6, %p12748_p2 }
  0x23   : > { %p12744_p1 = pneg %p12743_p10 }
  0x25   : > { %p12751_p0 = pnand %p12750_p12, %p12744_p1 }
  0x27   : > { %12754 = shalt.err (!%p12751_p0)
}
  0x28   : > { %s16600_s23 = smov 64   ;;  %s12949_s27 = smov 4  }
  0x29   : > { %12221 = dma.hbm_to_vmem [thread:$0]  (!%p13037_p11), %s16592_s1, 9216, %s13030_s28, [#allocation7], %s16600_s23, %s16600_s23, %s12949_s27  }
  0x2a   : > { %s12755_s11 = scalar_lea.hbm %s16594_s3, 16 }
  0x2b   : > { %p12756_p1 = scmp.ne.s32.totalorder %s16594_s3, %s12755_s11  ;;  %p12762_p10 = scmp.lt.u32.totalorder %s12755_s11, %s16594_s3 }
  0x2d   : > { %p12758_p2 = pnand %p12756_p1, %p13053_p13 }
  0x2f   : > { %p12759_p6 = pneg %p12758_p2 }
  0x31   : > { %p12764_p3 = pnand %p12762_p10, %p12759_p6 }
  0x33   : > { %12767 = shalt.err (!%p12764_p3)
}
  0x34   : > { %s12768_s28 = scalar_lea.vmem %s13041_s6, 16  ;;  %s12775_s17 = scalar_lea.vmem %s13041_s6, 32 }
  0x35   : > { %p12769_p5 = scmp.ne.s32.totalorder %s13041_s6, %s12768_s28  ;;  %p12776_p12 = scmp.lt.s32.totalorder %s13041_s6, %s13041_s6 }
  0x36   : > { %p12777_p0 = scmp.lt.s32.totalorder %s12775_s17, %s12768_s28 }
  0x37   : > { %p12771_p7 = pnand %p12769_p5, %p13053_p13 }
  0x38   : > { %p12778_p1 = por %p12777_p0, %p12776_p12 }
  0x39   : > { %p12772_p9 = pneg %p12771_p7 }
  0x3b   : > { %p12779_p2 = pnand %p12778_p1, %p12772_p9 }
  0x3d   : > { %12782 = shalt.err (!%p12779_p2)
}
  0x3e   : > { %12227 = dma.hbm_to_vmem [thread:$0]  (!%p13037_p11), %s16594_s3, 16, %s13041_s6, [#allocation10]  }
  0x3f   : > { %s12783_s11 = scalar_lea.hbm %s16593_s2, 9216 }
  0x40   : > { %p12784_p6 = scmp.ne.s32.totalorder %s16593_s2, %s12783_s11  ;;  %p12790_p5 = scmp.lt.u32.totalorder %s12783_s11, %s16593_s2 }
  0x42   : > { %p12786_p10 = pnand %p12784_p6, %p13053_p13 }
  0x44   : > { %p12787_p3 = pneg %p12786_p10 }
  0x46   : > { %p12792_p7 = pnand %p12790_p5, %p12787_p3 }
  0x48   : > { %12795 = shalt.err (!%p12792_p7)
}
  0x49   : > { %s12796_s28 = scalar_lea.vmem %s190_s8, 9216  ;;  %p12804_p1 = scmp.lt.s32.totalorder %s190_s8, %s190_s8 }
  0x4a   : > { %p12797_p9 = scmp.ne.s32.totalorder %s190_s8, %s12796_s28  ;;  %p12805_p2 = scmp.lt.s32.totalorder %s12796_s28, %s12796_s28 }
  0x4c   : > { %p12799_p12 = pnand %p12797_p9, %p13053_p13  ;;  %p12806_p4 = por %p12805_p2, %p12804_p1 }
  0x4e   : > { %p12800_p0 = pneg %p12799_p12 }
  0x50   : > { %p12807_p8 = pnand %p12806_p4, %p12800_p0 }
  0x52   : > { %12810 = shalt.err (!%p12807_p8)
}
  0x53   : > { %12224 = dma.hbm_to_vmem [thread:$0]  (!%p13037_p11), %s16593_s2, 9216, %s190_s8, [#allocation7], %s16600_s23, %s16600_s23, %s12949_s27  }
  0x54   : > { %s12950_s30 = smov [#allocation11]   ;;  %s12811_s11 = scalar_lea.hbm %s16595_s4, 16 }
  0x55   : > { %s214_s7 = sshll.u32 %s12950_s30, 4  ;;  %p12812_p4 = scmp.ne.s32.totalorder %s16595_s4, %s12811_s11  ;;  %s215_s7 = int_to_ptr.vmem [resolvable:$true] %s214_s7 }
  0x56   : > { %p12818_p10 = scmp.lt.u32.totalorder %s12811_s11, %s16595_s4 }
  0x57   : > { %p12814_p8 = pnand %p12812_p4, %p13053_p13 }
  0x59   : > { %p12815_p6 = pneg %p12814_p8 }
  0x5b   : > { %p12820_p3 = pnand %p12818_p10, %p12815_p6 }
  0x5d   : > { %12823 = shalt.err (!%p12820_p3)
}
  0x5e   : > { %s12824_s8 = scalar_lea.vmem %s215_s7, 16  ;;  %s12831_s28 = scalar_lea.vmem %s215_s7, 32 }
  0x5f   : > { %p12825_p5 = scmp.ne.s32.totalorder %s215_s7, %s12824_s8  ;;  %p12832_p12 = scmp.lt.s32.totalorder %s215_s7, %s215_s7 }
  0x60   : > { %p12833_p0 = scmp.lt.s32.totalorder %s12831_s28, %s12824_s8 }
  0x61   : > { %p12827_p7 = pnand %p12825_p5, %p13053_p13 }
  0x62   : > { %p12834_p1 = por %p12833_p0, %p12832_p12 }
  0x63   : > { %p12828_p9 = pneg %p12827_p7 }
  0x65   : > { %p12835_p2 = pnand %p12834_p1, %p12828_p9 }
  0x67   : > { %12838 = shalt.err (!%p12835_p2)
}
  0x68   : > { %12230 = dma.hbm_to_vmem [thread:$0]  (!%p13037_p11), %s16595_s4, 16, %s215_s7, [#allocation10]  }
  0x69   : > { %s13142_s14 = sadd.s32 1, %s12943_s21   ;;  %s30_s30 = sadd.s32 1, %s12939_s20 }
  0x6a   : > { %s27_s29 = ssub.s32 %s12943_s21, %s13142_s14  ;;  %p37_p13 = scmp.ne.s32.totalorder %s12939_s20, %s12935_s19 }
  0x6b   : > { %p28_p4 = scmp.eq.s32.totalorder %s27_s29, 0  ;;  %p38_p8 = scmp.eq.s32.totalorder %s12943_s21, 0 }
  0x6c   : > { %p16624_p6 = scmp.eq.s32.totalorder %s13007_s22, 1  ;;  %p12243_p3 = scmp.lt.s32.totalorder %s12943_s21, 2 }
  0x6d   : > { %s13158_s10 = scalar_select %p28_p4, %s12939_s20, %s30_s30  }
  0x6e   : > { %p13152_p10 = por %p16624_p6, %p37_p13  ;;  %p39_p5 = por %p38_p8, %p37_p13 }
  0x6f   : > { %s225_s11 = sand.u32 1, %s12939_s20   ;;  %s12196_s7 = smul.u32 3456, %s12943_s21 }
  0x70   : > { %s12195_s12 = smul.u32 216, %s225_s11  ;;  %p13162_p11 = pnand %p12243_p3, %p39_p5 }
  0x71   : > { %s13169_s8 = scalar_lea.hbm %s16591_s0, %s12196_s7  ;;  %s13173_s17 = scalar_lea.sflag [#allocation4], %s225_s11 }
  0x72   : > { %s229_s28 = scalar_lea.vmem [#allocation3], %s12195_s12  ;;  %s12839_s30 = scalar_lea.hbm %s13169_s8, 3456 }
  0x73   : > { %s236_s6 = sshll.u32 %s229_s28, 4  ;;  %p12840_p7 = scmp.ne.s32.totalorder %s13169_s8, %s12839_s30  ;;  %s13171_s6 = int_to_ptr.vmem [resolvable:$true] %s236_s6 }
  0x74   : > { %p12841_p9 = pneg %p13162_p11  ;;  %s12844_s15 = scalar_lea.hbm %s16591_s0, 6912 }
  0x75   : > { %p12845_p1 = scmp.lt.u32.totalorder %s13169_s8, %s16591_s0  ;;  %p12846_p2 = scmp.lt.u32.totalorder %s12844_s15, %s12839_s30 }
  0x76   : > { %p12842_p12 = pnand %p12841_p9, %p12840_p7  ;;  %p12848_p4 = scmp.lt.u32.totalorder %s12839_s30, %s13169_s8 }
  0x77   : > { %p12847_p13 = por %p12846_p2, %p12845_p1 }
  0x78   : > { %p12843_p0 = pneg %p12842_p12 }
  0x79   : > { %p12849_p8 = por %p12848_p4, %p12847_p13 }
  0x7b   : > { %p12850_p6 = pnand %p12849_p8, %p12843_p0 }
  0x7d   : > { %12853 = shalt.err (!%p12850_p6)
}
  0x7e   : > { %s12854_s11 = scalar_lea.vmem %s13171_s6, 3456  ;;  %s12951_s12 = smov [#allocation3]  }
  0x7f   : > { %p12855_p3 = scmp.ne.s32.totalorder %s13171_s6, %s12854_s11  ;;  %s12859_s28 = sshll.u32 %s12951_s12, 4  ;;  %s12860_s28 = int_to_ptr.vmem [resolvable:$false] %s12859_s28 }
  0x80   : > { %s12861_s23 = scalar_lea.vmem %s12860_s28, 6912  ;;  %p12862_p12 = scmp.lt.s32.totalorder %s13171_s6, %s12860_s28 }
  0x81   : > { %p12857_p5 = pnand %p12855_p3, %p12841_p9  ;;  %p12863_p1 = scmp.lt.s32.totalorder %s12861_s23, %s12854_s11 }
  0x83   : > { %p12858_p7 = pneg %p12857_p5  ;;  %p12864_p2 = por %p12863_p1, %p12862_p12 }
  0x85   : > { %p12865_p13 = pnand %p12864_p2, %p12858_p7 }
  0x87   : > { %12868 = shalt.err (!%p12865_p13)
}
  0x88   : > { %s16627_s30 = smov 64   ;;  %p16628_p9 = scmp.ne.s32.totalorder %s16621_s26, 0 }
  0x89   : > { %12234 = dma.hbm_to_vmem [thread:$0]  (!%p13162_p11), %s13169_s8, 3456, %s13171_s6, %s13173_s17, %s16627_s30, %s16627_s30, %s12949_s27  }
  0x8a   : > { %248 = sbr.rel (%p16628_p9) target bundleno = 1144 (0x478), region = 40 }
  0x91   : > { %s13207_s29 = sand.u32 1, %s12935_s19   ;;  %p16629_p0 = scmp.ne.s32.totalorder %s16619_s24, 0 }
  0x92   : > { %s12197_s7 = smul.u32 216, %s13207_s29  ;;  %s251_s15 = scalar_lea.sflag [#allocation4], %s13207_s29 }
  0x94   : > { %s13211_s16 = scalar_lea.vmem [#allocation3], %s12197_s7 }
  0x95   : > { %12914 = dma.done.wait (%p16629_p0), %s251_s15, 3456  }
  0x96   : > { %12916 = vsyncadd (%p16629_p0), %s251_s15, 4294963840  ;;  %p16630_p11 = scmp.eq.s32.totalorder %s13007_s22, 0 }
  0x98   : > { %12918 = dma.done.wait (%p16630_p11), [#allocation7], 18432   ;;  %p16631_p4 = pmov %p16630_p11 }
  0x9a   : > { %12920 = vsyncadd (%p16631_p4), [#allocation7], 4294948864  ;;  %p16632_p8 = pmov %p16631_p4 }
  0x9b   : > { %p16633_p6 = pmov %p16631_p4 }
  0x9c   : > { %12922 = dma.done.wait (%p16632_p8), [#allocation10], 32  }
  0x9d   : > { %12924 = vsyncadd (%p16633_p6), [#allocation10], 4294967264  ;;  %v12290_v0 = vld [vmem:[#allocation6 + $0x100] sm:$0xff]   ;;  %v12294_v4 = vld [vmem:[#allocation6 + $0x108] sm:$0xff]   ;;  %vm447_vm0 = vsmask.f32 7424 }
  0x9e   : > { %v12291_v1 = vld [vmem:[#allocation6 + $0x40] sm:$0xff]   ;;  %10531 = vmatprep.subr.bf16.mxu0 %v12290_v0  ;;  %v12295_v5 = vld [vmem:[#allocation6 + $0x48] sm:$0xff]   ;;  %v12298_v8 = vld [vmem:[#allocation6 + $0x110] sm:$0xff]   ;;  %vm576_vm1 = vcmask 1046528   ;;  %vm4508_vm2 = vsmask.f32 256 }
  0x9f   : > { %v12292_v2 = vld [vmem:[#allocation6 + $0xc0] sm:$0xff]   ;;  %10611 = vmatprep.subr.bf16.mxu1 %v12291_v1  ;;  %v12296_v6 = vld [vmem:[#allocation6 + $0xc8] sm:$0xff]   ;;  %v12299_v9 = vld [vmem:[#allocation6 + $0x50] sm:$0xff]   ;;  %vm6788_vm3 = vsmask.f32 3328  ;;  %s9866_s24 = sshll.u32 %s13207_s29, 8 }
  0xa0   : > { %v12293_v3 = vld [vmem:[#allocation6] sm:$0xff]   ;;  %10532 = vmatpush3.bf16.msra.mxu0 %v12292_v2  ;;  %v12297_v7 = vld [vmem:[#allocation6 + $0x8] sm:$0xff]   ;;  %v12300_v10 = vld [vmem:[#allocation6 + $0xd0] sm:$0xff]   ;;  %vm6789_vm4 = vsmask.f32 7440  ;;  %s16211_s26 = scalar_lea.vmem [#allocation12], %s9866_s24 }
  0xa1   : > { %10612 = vmatpush3.bf16.msra.mxu1 %v12293_v3  ;;  %10533 = vmatprep.subr.bf16.mxu0 %v12294_v4  ;;  %v12301_v11 = vld [vmem:[#allocation6 + $0x10] sm:$0xff]   ;;  %v12302_v12 = vld [vmem:[#allocation6 + $0x118] sm:$0xff]   ;;  %v12306_v16 = vld [vmem:[#allocation6 + $0x120] sm:$0xff]   ;;  %s10530_s27 = sshll.u32 %s13007_s22, 12  ;;  %s9742_s13 = sshll.u32 %s16211_s26, 4  ;;  %s16544_s13 = int_to_ptr.vmem [resolvable:$true] %s9742_s13 }
  0xa2   : > { %10613 = vmatprep.subr.bf16.mxu1 %v12295_v5  ;;  %v12303_v13 = vld [vmem:[#allocation6 + $0x58] sm:$0xff]   ;;  %v12307_v17 = vld [vmem:[#allocation6 + $0x60] sm:$0xff]   ;;  %v12310_v20 = vld [vmem:[#allocation6 + $0x128] sm:$0xff]   ;;  %s16542_s17 = scalar_lea.hbm %s16596_s5, %s10530_s27  ;;  %s9729_s22 = scalar_lea.sflag [#allocation5], %s13207_s29 }
  0xa3   : > { %v12304_v14 = vld [vmem:[#allocation6 + $0xd8] sm:$0xff]   ;;  %v12308_v18 = vld [vmem:[#allocation6 + $0xe0] sm:$0xff]   ;;  %v12311_v21 = vld [vmem:[#allocation6 + $0x68] sm:$0xff]   ;;  %s12869_s11 = scalar_lea.vmem %s16544_s13, 4096  ;;  %s12953_s12 = smov [#allocation12]  }
  0xa4   : > { %10534 = vmatpush3.bf16.msra.mxu0 %v12296_v6  ;;  %v12305_v15 = vld [vmem:[#allocation6 + $0x18] sm:$0xff]   ;;  %v12309_v19 = vld [vmem:[#allocation6 + $0x20] sm:$0xff]   ;;  %v12312_v22 = vld [vmem:[#allocation6 + $0xe8] sm:$0xff]   ;;  %p12870_p3 = scmp.ne.s32.totalorder %s16544_s13, %s12869_s11  ;;  %s12873_s28 = sshll.u32 %s12953_s12, 4  ;;  %s12874_s28 = int_to_ptr.vmem [resolvable:$false] %s12873_s28 }
  0xa5   : > { %10614 = vmatpush3.bf16.msra.mxu1 %v12297_v7  ;;  %10535 = vmatprep.subr.bf16.mxu0 %v12298_v8  ;;  %v12313_v23 = vld [vmem:[#allocation6 + $0x28] sm:$0xff]   ;;  %v12314_v24 = vld [vmem:[#allocation6 + $0x130] sm:$0xff]   ;;  %v12318_v28 = vld [vmem:[#allocation6 + $0x138] sm:$0xff]   ;;  %s12875_s23 = scalar_lea.vmem %s12874_s28, 8192  ;;  %p12876_p12 = scmp.lt.s32.totalorder %s16544_s13, %s12874_s28 }
  0xa6   : > { %10615 = vmatprep.subr.bf16.mxu1 %v12299_v9  ;;  %v12315_v25 = vld [vmem:[#allocation6 + $0x70] sm:$0xff]   ;;  %v12319_v29 = vld [vmem:[#allocation6 + $0x78] sm:$0xff]   ;;  %v12326_v37 = vld [vmem:[#allocation6 + $0x80] sm:$0xff]   ;;  %p12871_p5 = pnand %p12870_p3, %p13152_p10  ;;  %p12877_p1 = scmp.lt.s32.totalorder %s12875_s23, %s12869_s11 }
  0xa7   : > { %v12316_v26 = vld [vmem:[#allocation6 + $0xf0] sm:$0xff]   ;;  %v12320_v30 = vld [vmem:[#allocation6 + $0xf8] sm:$0xff]   ;;  %v9893_v44 = vld [vmem:[%s13211_s16 + $0x18] sm:$0xf] }
  0xa8   : > { %10536 = vmatpush3.bf16.msra.mxu0 %v12300_v10  ;;  %v12317_v27 = vld [vmem:[#allocation6 + $0x30] sm:$0xff]   ;;  %v12321_v31 = vld [vmem:[#allocation6 + $0x38] sm:$0xff]   ;;  %v13244_v45 = vld [vmem:[%s13211_s16 + $0x1c] sm:$0xf]  ;;  %p12872_p7 = pneg %p12871_p5  ;;  %p12878_p2 = por %p12877_p1, %p12876_p12 }
  0xa9   : > { %10616 = vmatpush3.bf16.msra.mxu1 %v12301_v11  ;;  %10537 = vmatprep.subr.bf16.mxu0 %v12302_v12  ;;  %v9891_v32 = vld [vmem:[%s13211_s16 + $0xc] sm:$0xf]  ;;  %v13227_v33 = vld [vmem:[%s13211_s16 + $0x10] sm:$0xf]  ;;  %v343_v36 = vld [vmem:[%s13211_s16] sm:$0xf]  ;;  %v13248_v51 = vcombine.low %v9893_v44, %v13244_v45 }
  0xaa   : > { %10617 = vmatprep.subr.bf16.mxu1 %v12303_v13  ;;  %v9923_v34 = vcombine.low %v9891_v32, %v13227_v33  ;;  %v13231_v35 = vld [vmem:[%s13211_s16 + $0x14] ss:$0 sps:$4 sm:$0x11]   ;;  %v13235_v38 = vld [vmem:[%s13211_s16 + $0x4] sm:$0xf]  ;;  %vm16075_vm5 = vmor %vm6788_vm3, %vm6789_vm4  ;;  %p12879_p13 = pnand %p12878_p2, %p12872_p7 }
  0xab   : > { %v770_v41 = vshll.u32 %v13231_v35, 16  ;;  %v9867_v42 = vcombine.low %v343_v36, %v13235_v38  ;;  %v13240_v43 = vld [vmem:[%s13211_s16 + $0x8] ss:$0 sps:$4 sm:$0x11]   ;;  %v345_v53 = vld [vmem:[%s13211_s16 + $0xc] sm:$0xf] }
  0xac   : > { %10538 = vmatpush3.bf16.msra.mxu0 %v12304_v14  ;;  %v763_v39 = vshrl.u32 %v9923_v34, 16  ;;  %v765_v40 = vshll.u32 %v9923_v34, 16  ;;  %v456_v50 = vshll.u32 %v13240_v43, 16  ;;  %v13251_v52 = vld [vmem:[%s13211_s16 + $0x20] ss:$0 sps:$4 sm:$0x11]  }
  0xad   : > { %10618 = vmatpush3.bf16.msra.mxu1 %v12305_v15  ;;  %10539 = vmatprep.subr.bf16.mxu0 %v12306_v16  ;;  %v772_v47 = vrot.slane %v770_v41, 1  ;;  %v449_v48 = vshrl.u32 %v9867_v42, 16  ;;  %v451_v49 = vshll.u32 %v9867_v42, 16  ;;  %v13255_v56 = vld [vmem:[%s13211_s16 + $0x10] sm:$0xf]  ;;  %v775_v58 = vshrl.u32 %v13248_v51, 16 }
  0xae   : > { %10619 = vmatprep.subr.bf16.mxu1 %v12307_v17  ;;  %v767_v46 = vrot.slane %v765_v40, 1  ;;  %v458_v57 = vrot.slane %v456_v50, 1  ;;  %v777_v59 = vshll.u32 %v13248_v51, 16  ;;  %v782_v60 = vshll.u32 %v13251_v52, 16  ;;  %v9895_v3 = vld [vmem:[%s13211_s16 + $0x24] sm:$0xf] }
  0xaf   : > { %v453_v55 = vrot.slane %v451_v49, 1  ;;  %v9868_v63 = vcombine.low %v345_v53, %v13255_v56  ;;  %v13263_v0 = vld [vmem:[%s13211_s16 + $0x14] ss:$0 sps:$4 sm:$0x11]   ;;  %v13267_v4 = vld [vmem:[%s13211_s16 + $0x28] sm:$0xf] }
  0xb0   : > { %10540 = vmatpush3.bf16.msra.mxu0 %v12308_v18  ;;  %v768_v54 = vor.u32 %v767_v46, %v763_v39  ;;  %v779_v1 = vrot.slane %v777_v59, 1  ;;  %v784_v2 = vrot.slane %v782_v60, 1  ;;  %v468_v8 = vshll.u32 %v13263_v0, 16  ;;  %v12331_v9 = vld [vmem:[#allocation6 + $0x88] sm:$0xff]   ;;  %v12342_v14 = vld [vmem:[#allocation6 + $0x140] sm:$0xff]   ;;  %v12336_v18 = vld [vmem:[#allocation6 + $0x90] sm:$0xff]  }
  0xb1   : > { %10620 = vmatpush3.bf16.msra.mxu1 %v12309_v19  ;;  %10541 = vmatprep.subr.bf16.mxu0 %v12310_v20  ;;  %v454_v62 = vor.u32 %v453_v55, %v449_v48  ;;  %v461_v6 = vshrl.u32 %v9868_v63, 16  ;;  %v463_v7 = vshll.u32 %v9868_v63, 16  ;;  %v13272_v11 = vcombine.low %v9895_v3, %v13267_v4  ;;  %v13275_v12 = vld [vmem:[%s13211_s16 + $0x2c] ss:$0 sps:$4 sm:$0x11]   ;;  %v12348_v50 = vld [vmem:[#allocation6 + $0x148] sm:$0xff]  }
  0xb2   : > { %10621 = vmatprep.subr.bf16.mxu1 %v12311_v21  ;;  %v773_v61 = vsel %vm447_vm0, %v768_v54, %v772_v47  ;;  %v780_v10 = vor.u32 %v779_v1, %v775_v58  ;;  %v347_v13 = vld [vmem:[%s13211_s16 + $0x18] sm:$0xf]  ;;  %v470_v16 = vrot.slane %v468_v8, 1  ;;  %v13279_v17 = vld [vmem:[%s13211_s16 + $0x1c] sm:$0xf]  ;;  %v12341_v39 = vld [vmem:[#allocation6 + $0x98] sm:$0xff]  }
  0xb3   : > { %1147 = vmatprep.mubr.bf16.mxu0 %v773_v61  ;;  %v459_v5 = vsel %vm447_vm0, %v454_v62, %v458_v57  ;;  %v465_v15 = vrot.slane %v463_v7, 1  ;;  %v787_v20 = vshrl.u32 %v13272_v11, 16  ;;  %v789_v21 = vshll.u32 %v13272_v11, 16  ;;  %v13307_v44 = vld [vmem:[%s13211_s16 + $0x28] sm:$0xf] }
  0xb4   : > { %10542 = vmatpush3.bf16.msra.mxu0 %v12312_v22  ;;  %1485 = vmatprep.mubr.bf16.mxu1 %v459_v5  ;;  %v785_v19 = vsel %vm447_vm0, %v780_v10, %v784_v2  ;;  %v794_v22 = vshll.u32 %v13275_v12, 16  ;;  %v13318_v55 = vld [vmem:[%s13211_s16 + $0x2c] ss:$0 sps:$4 sm:$0x11]   ;;  %v9899_v3 = vld [vmem:[%s13211_s16 + $0x3c] sm:$0xf] }
  0xb5   : > { %10622 = vmatpush3.bf16.msra.mxu1 %v12313_v23  ;;  %10543 = vmatprep.subr.bf16.mxu0 %v12314_v24  ;;  %v13286_v23 = vld [vmem:[%s13211_s16 + $0x20] ss:$0 sps:$4 sm:$0x11]   ;;  %v466_v24 = vor.u32 %v465_v15, %v461_v6  ;;  %v492_v62 = vshll.u32 %v13318_v55, 16  ;;  %v12347_v6 = vld [vmem:[#allocation6 + $0xa0] sm:$0xff]  }
  0xb6   : > { %10623 = vmatprep.subr.bf16.mxu1 %v12315_v25  ;;  %v13289_v25 = vcombine.low %v347_v13, %v13279_v17  ;;  %v12353_v60 = vld [vmem:[#allocation6 + $0x150] sm:$0xff]   ;;  %v13337_v15 = vld [vmem:[%s13211_s16 + $0x34] sm:$0xf] }
  0xb7   : > { %v13326_v5 = vld [vmem:[%s13211_s16 + $0x40] sm:$0xf]  ;;  %v494_v7 = vrot.slane %v492_v62, 1 }
  0xb8   : > { %10544 = vmatpush3.bf16.msra.mxu0 %v12316_v26  ;;  %v9897_v26 = vld [vmem:[%s13211_s16 + $0x30] sm:$0xf]  ;;  %v473_v32 = vshrl.u32 %v13289_v25, 16  ;;  %v13329_v8 = vcombine.low %v9899_v3, %v13326_v5  ;;  %v9903_v3 = vld [vmem:[%s13211_s16 + $0x54] sm:$0xf] }
  0xb9   : > { %10624 = vmatpush3.bf16.msra.mxu1 %v12317_v27  ;;  %10545 = vmatprep.subr.bf16.mxu0 %v12318_v28  ;;  %v791_v27 = vrot.slane %v789_v21, 1  ;;  %v796_v28 = vrot.slane %v794_v22, 1  ;;  %v13346_v22 = vld [vmem:[%s13211_s16 + $0x38] ss:$0 sps:$4 sm:$0x11]  }
  0xba   : > { %10625 = vmatprep.subr.bf16.mxu1 %v12319_v29  ;;  %v480_v29 = vshll.u32 %v13286_v23, 16 }
  0xbb   : > { %v792_v40 = vor.u32 %v791_v27, %v787_v20 }
  0xbc   : > { %10546 = vmatpush3.bf16.msra.mxu0 %v12320_v30  ;;  %v13294_v30 = vld [vmem:[%s13211_s16 + $0x34] sm:$0xf]  ;;  %v482_v41 = vrot.slane %v480_v29, 1 }
  0xbd   : > { %10626 = vmatpush3.bf16.msra.mxu1 %v12321_v31  ;;  %11491 = vmatprep.subr.bf16.mxu0 %v12342_v14  ;;  %v471_v31 = vsel %vm447_vm0, %v466_v24, %v470_v16  ;;  %v13300_v36 = vcombine.low %v9897_v26, %v13294_v30  ;;  %v797_v53 = vsel %vm447_vm0, %v792_v40, %v796_v28  ;;  %v12354_v16 = vld [vmem:[#allocation6 + $0xa8] sm:$0xff]  }
  0xbe   : > { %11523 = vmatprep.subr.bf16.mxu1 %v12326_v37 }
  0xbf   : > { %1148 = vmatmul.mubr.bf16.vlgmr.msra.gmra.mrb[0].mxu0 %v9923_v34  ;;  %v475_v34 = vshll.u32 %v13289_v25, 16  ;;  %v799_v47 = vshrl.u32 %v13300_v36, 16  ;;  %v801_v48 = vshll.u32 %v13300_v36, 16 }
  0xc0   : > { %1486 = vmatmul.mubr.bf16.vlgmr.msra.gmra.mrb[0].mxu1 %v9867_v42  ;;  %1155 = vmatprep.mubr.bf16.mxu0 %v785_v19  ;;  %v13304_v42 = vld [vmem:[%s13211_s16 + $0x38] ss:$0 sps:$4 sm:$0x11]   ;;  %v813_v19 = vshll.u32 %v13329_v8, 16 }
  0xc1   : > { %11524 = vmatpush3.bf16.msra.mxu1 %v12326_v37  ;;  %11492 = vmatpush3.bf16.msra.mxu0 %v12342_v14  ;;  %v349_v37 = vld [vmem:[%s13211_s16 + $0x24] sm:$0xf]  ;;  %v477_v46 = vrot.slane %v475_v34, 1  ;;  %v806_v54 = vshll.u32 %v13304_v42, 16  ;;  %v803_v57 = vrot.slane %v801_v48, 1  ;;  %v12355_v34 = vld [vmem:[#allocation6 + $0x158] sm:$0xff]  }
  0xc2   : > { %11525 = vmatprep.subr.bf16.mxu1 %v12331_v9  ;;  %1493 = vmatprep.mubr.bf16.mxu1 %v471_v31  ;;  %v13313_v49 = vcombine.low %v349_v37, %v13307_v44  ;;  %v351_v14 = vld [vmem:[%s13211_s16 + $0x30] sm:$0xf]  ;;  %v815_v26 = vrot.slane %v813_v19, 1  ;;  %v504_v31 = vshll.u32 %v13346_v22, 16  ;;  %v13366_v48 = vld [vmem:[%s13211_s16 + $0x40] sm:$0xf] }
  0xc3   : > { %v808_v61 = vrot.slane %v806_v54, 1  ;;  %11493 = vmatprep.subr.bf16.mxu0 %v12348_v50  ;;  %v13343_v21 = vcombine.low %v351_v14, %v13337_v15  ;;  %v355_v14 = vld [vmem:[%s13211_s16 + $0x48] sm:$0xf]  ;;  %v12362_v19 = vld [vmem:[#allocation6 + $0x168] sm:$0xff]  }
  0xc4   : > { %v485_v58 = vshrl.u32 %v13313_v49, 16  ;;  %v487_v59 = vshll.u32 %v13313_v49, 16 }
  0xc5   : > { %11526 = vmatpush3.bf16.msra.mxu1 %v12331_v9  ;;  %11494 = vmatpush3.bf16.msra.mxu0 %v12348_v50  ;;  %v13332_v9 = vld [vmem:[%s13211_s16 + $0x44] ss:$0 sps:$4 sm:$0x11]   ;;  %v497_v28 = vshrl.u32 %v13343_v21, 16  ;;  %v499_v29 = vshll.u32 %v13343_v21, 16 }
  0xc6   : > { %11527 = vmatprep.subr.bf16.mxu1 %v12336_v18  ;;  %v489_v2 = vrot.slane %v487_v59, 1  ;;  %11495 = vmatprep.subr.bf16.mxu0 %v12353_v60  ;;  %v818_v20 = vshll.u32 %v13332_v9, 16  ;;  %v13376_v59 = vld [vmem:[%s13211_s16 + $0x44] ss:$0 sps:$4 sm:$0x11]  }
  0xc7   : > { %1156 = vmatmul.mubr.bf16.gmra.mrb[4].mxu0 %v13248_v51  ;;  %v478_v51 = vor.u32 %v477_v46, %v473_v32  ;;  %v9901_v32 = vld [vmem:[%s13211_s16 + $0x48] sm:$0xf]  ;;  %v506_v46 = vrot.slane %v504_v31, 1 }
  0xc8   : > { %1494 = vmatmul.mubr.bf16.gmra.mrb[4].mxu1 %v9868_v63  ;;  %1163 = vmatprep.mubr.bf16.mxu0 %v797_v53  ;;  %v804_v63 = vor.u32 %v803_v57, %v799_v47  ;;  %v490_v13 = vor.u32 %v489_v2, %v485_v58  ;;  %v820_v27 = vrot.slane %v818_v20, 1  ;;  %v353_v47 = vld [vmem:[%s13211_s16 + $0x3c] sm:$0xf]  ;;  %v516_v2 = vshll.u32 %v13376_v59, 16 }
  0xc9   : > { %11528 = vmatpush3.bf16.msra.mxu1 %v12336_v18  ;;  %v483_v1 = vsel %vm447_vm0, %v478_v51, %v482_v41  ;;  %v811_v18 = vshrl.u32 %v13329_v8, 16  ;;  %11496 = vmatpush3.bf16.msra.mxu0 %v12353_v60  ;;  %v13362_v41 = vld [vmem:[%s13211_s16 + $0x50] ss:$0 sps:$4 sm:$0x11]   ;;  %v13373_v58 = vcombine.low %v353_v47, %v13366_v48 }
  0xca   : > { %11529 = vmatprep.subr.bf16.mxu1 %v12341_v39  ;;  %1501 = vmatprep.mubr.bf16.mxu1 %v483_v1  ;;  %v809_v10 = vsel %vm447_vm0, %v804_v63, %v808_v61  ;;  %v495_v24 = vsel %vm447_vm0, %v490_v13, %v494_v7  ;;  %v830_v57 = vshll.u32 %v13362_v41, 16  ;;  %v12361_v61 = vld [vmem:[#allocation6 + $0xb0] sm:$0xff]  }
  0xcb   : > { %v816_v37 = vor.u32 %v815_v26, %v811_v18  ;;  %11497 = vmatprep.subr.bf16.mxu0 %v12355_v34  ;;  %v509_v1 = vshrl.u32 %v13373_v58, 16  ;;  %v511_v63 = vshll.u32 %v13373_v58, 16  ;;  %v13396_v18 = vld [vmem:[%s13211_s16 + $0x4c] sm:$0xf] }
  0xcc   : > { %v13400_v26 = vcombine.low %v355_v14, %v13396_v18 }
  0xcd   : > { %11530 = vmatpush3.bf16.msra.mxu1 %v12341_v39  ;;  %v501_v39 = vrot.slane %v499_v29, 1  ;;  %11498 = vmatpush3.bf16.msra.mxu0 %v12355_v34  ;;  %v821_v51 = vsel %vm447_vm0, %v816_v37, %v820_v27  ;;  %v12367_v37 = vld [vmem:[#allocation6 + $0x170] sm:$0xff]  }
  0xce   : > { %11531 = vmatprep.subr.bf16.mxu1 %v12347_v6  ;;  %v523_v34 = vshll.u32 %v13400_v26, 16 }
  0xcf   : > { %1164 = vmatmul.mubr.bf16.gmra.mrb[8].mxu0 %v13272_v11  ;;  %v13356_v11 = vld [vmem:[%s13211_s16 + $0x4c] sm:$0xf]  ;;  %v502_v50 = vor.u32 %v501_v39, %v497_v28  ;;  %v13404_v28 = vld [vmem:[%s13211_s16 + $0x50] ss:$0 sps:$4 sm:$0x11]   ;;  %v521_v39 = vshrl.u32 %v13400_v26, 16 }
  0xd0   : > { %1171 = vmatprep.mubr.bf16.mxu0 %v809_v10  ;;  %1502 = vmatmul.mubr.bf16.gmra.mrb[8].mxu1 %v13289_v25  ;;  %v13359_v40 = vcombine.low %v9901_v32, %v13356_v11  ;;  %v12360_v25 = vld [vmem:[#allocation6 + $0x160] sm:$0xff]   ;;  %v513_v10 = vrot.slane %v511_v63, 1 }
  0xd1   : > { %1509 = vmatprep.mubr.bf16.mxu1 %v495_v24  ;;  %11532 = vmatpush3.bf16.msra.mxu1 %v12347_v6  ;;  %v507_v62 = vsel %vm447_vm0, %v502_v50, %v506_v46  ;;  %v13385_v6 = vld [vmem:[%s13211_s16 + $0x58] sm:$0xf]  ;;  %v518_v24 = vrot.slane %v516_v2, 1  ;;  %v528_v46 = vshll.u32 %v13404_v28, 16  ;;  %v9905_v50 = vld [vmem:[%s13211_s16 + $0x60] sm:$0xf] }
  0xd2   : > { %11533 = vmatprep.subr.bf16.mxu1 %v12354_v16  ;;  %v823_v53 = vshrl.u32 %v13359_v40, 16  ;;  %v825_v54 = vshll.u32 %v13359_v40, 16  ;;  %11499 = vmatprep.subr.bf16.mxu0 %v12360_v25  ;;  %v13389_v13 = vcombine.low %v9903_v3, %v13385_v6  ;;  %v514_v20 = vor.u32 %v513_v10, %v509_v1  ;;  %v13424_v1 = vld [vmem:[%s13211_s16 + $0x58] sm:$0xf] }
  0xd3   : > { %11500 = vmatpush3.bf16.msra.mxu0 %v12360_v25  ;;  %v525_v25 = vrot.slane %v523_v34, 1  ;;  %v530_v2 = vrot.slane %v528_v46, 1  ;;  %v12374_v34 = vld [vmem:[#allocation6 + $0x1c0] sm:$0xff]  }
  0xd4   : > { %v827_v60 = vrot.slane %v825_v54, 1  ;;  %v835_v27 = vshrl.u32 %v13389_v13, 16  ;;  %11501 = vmatprep.subr.bf16.mxu0 %v12362_v19  ;;  %v519_v47 = vsel %vm447_vm0, %v514_v20, %v518_v24  ;;  %v13415_v54 = vld [vmem:[%s13211_s16 + $0x64] sm:$0xf]  ;;  %v13437_v46 = vld [vmem:[#allocation6 + $0x200] sm:$0xff]  }
  0xd5   : > { %11534 = vmatpush3.bf16.msra.mxu1 %v12354_v16  ;;  %v13393_v16 = vld [vmem:[%s13211_s16 + $0x5c] ss:$0 sps:$4 sm:$0x11]   ;;  %v526_v63 = vor.u32 %v525_v25, %v521_v39  ;;  %v9915_v39 = vld [vmem:[%s13211_s16 + $0xc] sm:$0xe] }
  0xd6   : > { %11535 = vmatprep.subr.bf16.mxu1 %v12361_v61  ;;  %v828_v7 = vor.u32 %v827_v60, %v823_v53  ;;  %v842_v32 = vshll.u32 %v13393_v16, 16  ;;  %v12368_v53 = vld [vmem:[#allocation6 + $0xb8] sm:$0xff]   ;;  %v367_v25 = vld [vmem:[%s13211_s16] sm:$0xe] }
  0xd7   : > { %1172 = vmatmul.mubr.bf16.gmra.mrb[12].mxu0 %v13300_v36  ;;  %v832_v36 = vrot.slane %v830_v57, 1 }
  0xd8   : > { %1179 = vmatprep.mubr.bf16.mxu0 %v821_v51  ;;  %1510 = vmatmul.mubr.bf16.gmra.mrb[12].mxu1 %v13313_v49  ;;  %v837_v49 = vshll.u32 %v13389_v13, 16  ;;  %v12369_v51 = vld [vmem:[#allocation6 + $0x178] sm:$0xff]   ;;  %v844_v60 = vrot.slane %v842_v32, 1 }
  0xd9   : > { %1517 = vmatprep.mubr.bf16.mxu1 %v507_v62  ;;  %11536 = vmatpush3.bf16.msra.mxu1 %v12361_v61  ;;  %v833_v29 = vsel %vm447_vm0, %v828_v7, %v832_v36  ;;  %v9930_v61 = vcombine.low %v9905_v50, %v13415_v54  ;;  %v13420_v62 = vld [vmem:[%s13211_s16 + $0x68] ss:$0 sps:$4 sm:$0x11]   ;;  %v13427_v7 = vld [vmem:[%s13211_s16 + $0x5c] ss:$0 sps:$4 sm:$0x11]   ;;  %v9883_v50 = vcombine.low %v367_v25, %v13235_v38 }
  0xda   : > { %v839_v31 = vrot.slane %v837_v49, 1  ;;  %11502 = vmatpush3.bf16.msra.mxu0 %v12362_v19  ;;  %11537 = vmatprep.subr.bf16.mxu1 %v12368_v53  ;;  %v854_v19 = vshll.u32 %v13420_v62, 16  ;;  %v540_v24 = vshll.u32 %v13427_v7, 16  ;;  %v531_v49 = vsel %vm447_vm0, %v526_v63, %v530_v2  ;;  %v9917_v38 = vld [vmem:[%s13211_s16 + $0x24] sm:$0xe] }
  0xdb   : > { %11503 = vmatprep.subr.bf16.mxu0 %v12367_v37  ;;  %v849_v3 = vshll.u32 %v9930_v61, 16  ;;  %v847_v10 = vshrl.u32 %v9930_v61, 16  ;;  %v577_v63 = vrot.slane %v9883_v50, 1  ;;  %v12385_v50 = vld [vmem:[#allocation6 + $0x210] sm:$0xff]  }
  0xdc   : > { %v840_v57 = vor.u32 %v839_v31, %v835_v27  ;;  %v856_v32 = vrot.slane %v854_v19, 1 }
  0xdd   : > { %11538 = vmatpush3.bf16.msra.mxu1 %v12368_v53  ;;  %v851_v14 = vrot.slane %v849_v3, 1  ;;  %v369_v3 = vld [vmem:[%s13211_s16 + $0x18] sm:$0xe] }
  0xde   : > { %11504 = vmatpush3.bf16.msra.mxu0 %v12367_v37  ;;  %v845_v36 = vsel %vm447_vm0, %v840_v57, %v844_v60  ;;  %v542_v37 = vrot.slane %v540_v24, 1  ;;  %11555 = vmatprep.subr.bf16.mxu1 %v13437_v46  ;;  %v368_v57 = vld [vmem:[%s13211_s16 + $0xc] sm:$0xe] }
  0xdf   : > { %1180 = vmatmul.mubr.bf16.gmra.mrb[16].mxu0 %v13329_v8  ;;  %v357_v8 = vld [vmem:[%s13211_s16 + $0x54] sm:$0xf]  ;;  %11505 = vmatprep.subr.bf16.mxu0 %v12369_v51  ;;  %v852_v31 = vor.u32 %v851_v14, %v847_v10  ;;  %v9884_v2 = vcombine.low %v368_v57, %v13255_v56  ;;  %v9941_v10 = vcombine.low %v9917_v38, %v13267_v4  ;;  %v370_v56 = vld [vmem:[%s13211_s16 + $0x24] sm:$0xe]  ;;  %v897_v4 = vrot.slane %v13275_v12, 1 }
  0xe0   : > { %1187 = vmatprep.mubr.bf16.mxu0 %v833_v29  ;;  %1518 = vmatmul.mubr.bf16.gmra.mrb[16].mxu1 %v13343_v21  ;;  %v9874_v21 = vcombine.low %v357_v8, %v13424_v1  ;;  %v891_v8 = vrot.slane %v13231_v35, 1  ;;  %v9885_v35 = vcombine.low %v369_v3, %v13279_v17  ;;  %v584_v17 = vrot.slane %v13286_v23, 1  ;;  %v372_v57 = vld [vmem:[%s13211_s16 + $0x3c] sm:$0xe]  ;;  %v373_v38 = vld [vmem:[%s13211_s16 + $0x48] sm:$0xe] }
  0xe1   : > { %1525 = vmatprep.mubr.bf16.mxu1 %v519_v47  ;;  %v580_v19 = vrot.slane %v9884_v2, 1  ;;  %v896_v24 = vrot.slane %v9941_v10, 1  ;;  %v587_v23 = vrot.slane %v13318_v55, 1  ;;  %v903_v55 = vrot.slane %v13332_v9, 1  ;;  %v13493_v10 = vld [vmem:[%s13211_s16 + $0x1c] sm:$0xf] }
  0xe2   : > { %v535_v20 = vshll.u32 %v9874_v21, 16  ;;  %11506 = vmatpush3.bf16.msra.mxu0 %v12369_v51  ;;  %v533_v27 = vshrl.u32 %v9874_v21, 16  ;;  %v9916_v51 = vld [vmem:[%s13211_s16 + $0x18] sm:$0xe]  ;;  %v906_v2 = vrot.slane %v13362_v41, 1  ;;  %v9889_v41 = vcombine.low %v373_v38, %v13396_v18 }
  0xe3   : > { %10691 = vmatprep.subr.bf16.mxu0 %v12374_v34  ;;  %v593_v18 = vrot.slane %v13376_v59, 1  ;;  %v12397_v59 = vld [vmem:[#allocation6 + $0x1e8] sm:$0xff]  }
  0xe4   : > { %v537_v29 = vrot.slane %v535_v20, 1  ;;  %v9918_v20 = vld [vmem:[%s13211_s16 + $0x30] sm:$0xe] }
  0xe6   : > { %v538_v47 = vor.u32 %v537_v29, %v533_v27  ;;  %v9942_v27 = vcombine.low %v9918_v20, %v13294_v30  ;;  %v9886_v29 = vcombine.low %v370_v56, %v13307_v44  ;;  %v12379_v30 = vld [vmem:[#allocation6 + $0x188] sm:$0xff]  }
  0xe7   : > { %1188 = vmatmul.mubr.bf16.gmra.mrb[20].mxu0 %v13359_v40  ;;  %v857_v40 = vsel %vm447_vm0, %v852_v31, %v856_v32  ;;  %v12377_v32 = vld [vmem:[#allocation6 + $0x1c8] sm:$0xff]  }
  0xe8   : > { %1195 = vmatprep.mubr.bf16.mxu0 %v845_v36  ;;  %1526 = vmatmul.mubr.bf16.gmra.mrb[20].mxu1 %v13373_v58  ;;  %v9939_v58 = vcombine.low %v9915_v39, %v13227_v33  ;;  %v543_v53 = vsel %vm447_vm0, %v538_v47, %v542_v37  ;;  %v578_v33 = vrot.slane %v13240_v43, 1  ;;  %v12378_v37 = vld [vmem:[#allocation6 + $0x208] sm:$0xff]   ;;  %v900_v39 = vrot.slane %v13304_v42, 1 }
  0xe9   : > { %1533 = vmatprep.mubr.bf16.mxu1 %v531_v49  ;;  %v583_v49 = vrot.slane %v9885_v35, 1  ;;  %v899_v47 = vrot.slane %v9942_v27, 1  ;;  %v586_v25 = vrot.slane %v9886_v29, 1  ;;  %v909_v35 = vrot.slane %v13393_v16, 1 }
  0xea   : > { %v890_v60 = vrot.slane %v9939_v58, 1  ;;  %v579_v14 = vsel %vm576_vm1, %v577_v63, %v578_v33  ;;  %v13504_v20 = vld [vmem:[%s13211_s16 + $0x20] ss:$0 sps:$4 sm:$0x11]  }
  0xeb   : > { %v585_v44 = vsel %vm576_vm1, %v583_v49, %v584_v17  ;;  %v901_v63 = vsel %vm576_vm1, %v899_v47, %v900_v39  ;;  %v588_v3 = vsel %vm576_vm1, %v586_v25, %v587_v23  ;;  %v596_v49 = vrot.slane %v13404_v28, 1  ;;  %v12399_v39 = vld [vmem:[#allocation6 + $0x1a8] sm:$0xff]   ;;  %v12404_v47 = vld [vmem:[#allocation6 + $0x1f0] sm:$0xff]  }
  0xec   : > { %v892_v36 = vsel %vm576_vm1, %v890_v60, %v891_v8  ;;  %v12387_v60 = vld [vmem:[#allocation6 + $0x1d8] sm:$0xff]   ;;  %v590_v8 = vrot.slane %v13346_v22, 1  ;;  %v9888_v22 = vcombine.low %v372_v57, %v13366_v48  ;;  %v1760_v28 = vshll.u32 %v13504_v20, 16 }
  0xed   : > { %v10000_v57 = vld [vmem:[%s13211_s16 + $0x34] sm:$0xf] }
  0xee   : > { %v592_v16 = vrot.slane %v9888_v22, 1  ;;  %v12408_v22 = vld [vmem:[#allocation6 + $0x238] sm:$0xff]  }
  0xef   : > { %1196 = vmatmul.mubr.bf16.gmra.mrb[24].mxu0 %v13389_v13  ;;  %v9940_v13 = vcombine.low %v9916_v51, %v13244_v45  ;;  %v581_v45 = vrot.slane %v13263_v0, 1  ;;  %v371_v0 = vld [vmem:[%s13211_s16 + $0x30] sm:$0xe]  ;;  %v12386_v51 = vld [vmem:[#allocation6 + $0x190] sm:$0xff]  }
  0xf0   : > { %1203 = vmatprep.mubr.bf16.mxu0 %v857_v40  ;;  %1534 = vmatmul.mubr.bf16.gmra.mrb[24].mxu1 %v13400_v26  ;;  %v894_v26 = vrot.slane %v13251_v52, 1  ;;  %v12376_v52 = vld [vmem:[#allocation6 + $0x180] sm:$0xff]   ;;  %v12384_v40 = vld [vmem:[#allocation6 + $0x1d0] sm:$0xff]   ;;  %v9887_v58 = vcombine.low %v371_v0, %v13337_v15 }
  0xf1   : > { %1541 = vmatprep.mubr.bf16.mxu1 %v543_v53  ;;  %v893_v43 = vrot.slane %v9940_v13, 1  ;;  %v582_v12 = vsel %vm576_vm1, %v580_v19, %v581_v45  ;;  %v9921_v53 = vld [vmem:[%s13211_s16 + $0x54] sm:$0xe]  ;;  %v13515_v0 = vld [vmem:[%s13211_s16 + $0x28] sm:$0xf] }
  0xf2   : > { %v589_v15 = vrot.slane %v9887_v58, 1  ;;  %v9945_v9 = vcombine.low %v9921_v53, %v13385_v6  ;;  %v374_v45 = vld [vmem:[%s13211_s16 + $0x54] sm:$0xe]  ;;  %v13529_v58 = vld [vmem:[%s13211_s16 + $0x2c] ss:$0 sps:$4 sm:$0x11]  }
  0xf3   : > { %v895_v31 = vsel %vm576_vm1, %v893_v43, %v894_v26  ;;  %v12394_v26 = vld [vmem:[#allocation6 + $0x1e0] sm:$0xff]   ;;  %v9890_v29 = vcombine.low %v374_v45, %v13424_v1  ;;  %v912_v1 = vrot.slane %v13420_v62, 1  ;;  %v12405_v62 = vld [vmem:[#allocation6 + $0x230] sm:$0xff]  }
  0xf4   : > { %v591_v6 = vsel %vm576_vm1, %v589_v15, %v590_v8  ;;  %v908_v19 = vrot.slane %v9945_v9, 1  ;;  %v9999_v53 = vld [vmem:[%s13211_s16 + $0x30] sm:$0xf]  ;;  %v12406_v15 = vld [vmem:[#allocation6 + $0x1b0] sm:$0xff]   ;;  %v1772_v8 = vshll.u32 %v13529_v58, 16 }
  0xf5   : > { %v12407_v9 = vld [vmem:[#allocation6 + $0x1f8] sm:$0xff]   ;;  %v10002_v45 = vld [vmem:[%s13211_s16 + $0x40] sm:$0xf] }
  0xf6   : > { %v910_v27 = vsel %vm576_vm1, %v908_v19, %v909_v35  ;;  %v10001_v35 = vld [vmem:[%s13211_s16 + $0x3c] sm:$0xf]  ;;  %v1884_v19 = vrot.slane %v13529_v58, 1 }
  0xf7   : > { %1204 = vmatmul.mubr.bf16.gmra.mrb[28].mxu0 %v9930_v61  ;;  %v9919_v61 = vld [vmem:[%s13211_s16 + $0x3c] sm:$0xe] }
  0xf8   : > { %11507 = vmatprep.mubr.bf16.mxu0 %v892_v36  ;;  %1542 = vmatmul.mubr.bf16.gmra.mrb[28].mxu1 %v9874_v21  ;;  %v898_v21 = vsel %vm576_vm1, %v896_v24, %v897_v4  ;;  %v9943_v34 = vcombine.low %v9919_v61, %v13326_v5  ;;  %v9920_v5 = vld [vmem:[%s13211_s16 + $0x48] sm:$0xe]  ;;  %v9995_v36 = vld [vmem:[%s13211_s16 + $0x18] sm:$0xf] }
  0xf9   : > { %11539 = vmatprep.mubr.bf16.mxu1 %v579_v14  ;;  %v9944_v33 = vcombine.low %v9920_v5, %v13356_v11  ;;  %v12389_v11 = vld [vmem:[#allocation6 + $0x198] sm:$0xff]   ;;  %v9922_v14 = vld [vmem:[%s13211_s16 + $0x60] sm:$0xe]  ;;  %v13500_v43 = vcombine.low %v9995_v36, %v13493_v10  ;;  %v12395_v24 = vld [vmem:[#allocation6 + $0x220] sm:$0xff]  }
  0xfa   : > { %v902_v42 = vrot.slane %v9943_v34, 1  ;;  %v12396_v4 = vld [vmem:[#allocation6 + $0x1a0] sm:$0xff]   ;;  %v9946_v17 = vcombine.low %v9922_v14, %v13415_v54 }
  0xfb   : > { %v905_v48 = vrot.slane %v9944_v33, 1  ;;  %v1755_v56 = vshll.u32 %v13500_v43, 16  ;;  %v13539_v33 = vcombine.low %v9999_v53, %v10000_v57  ;;  %v12450_v53 = vld [vmem:[#allocation6 + $0x108] sm:$0xff]  }
  0xfc   : > { %v904_v13 = vsel %vm576_vm1, %v902_v42, %v903_v55  ;;  %v10020_v42 = vld [vmem:[%s13211_s16 + $0x24] sm:$0xe] }
  0xfd   : > { %v907_v61 = vsel %vm576_vm1, %v905_v48, %v906_v2  ;;  %v1757_v34 = vrot.slane %v1755_v56, 1 }
  0xff   : > { %11508 = vmatmul.mubr.bf16.vlgmr.msra.gmra.mrb[32].mxu0 %v895_v31  ;;  %v10019_v31 = vld [vmem:[%s13211_s16 + $0x18] sm:$0xe] }
 0x100   : > { %10692 = vmatpush3.bf16.msra.mxu0 %v12376_v52  ;;  %11511 = vmatprep.mubr.bf16.mxu0 %v898_v21  ;;  %v595_v52 = vrot.slane %v9889_v41, 1  ;;  %v1753_v21 = vshrl.u32 %v13500_v43, 16  ;;  %v10043_v25 = vcombine.low %v10019_v31, %v13493_v10  ;;  %v12419_v10 = vld [vmem:[%s13211_s16 + $0x38] ss:$0 sps:$4 sm:$0x11]   ;;  %v1779_v41 = vshll.u32 %v13539_v33, 16 }
 0x101   : > { %11540 = vmatmul.mubr.bf16.vlgmr.msra.gmra.mrb[32].mxu1 %v582_v12  ;;  %10693 = vmatprep.subr.bf16.mxu0 %v12377_v32  ;;  %v9997_v32 = vld [vmem:[%s13211_s16 + $0x24] sm:$0xf]  ;;  %v594_v12 = vsel %vm576_vm1, %v592_v16, %v593_v18  ;;  %v1887_v16 = vrot.slane %v12419_v10, 1  ;;  %v10022_v18 = vld [vmem:[%s13211_s16 + $0x3c] sm:$0xe]  ;;  %v1784_v31 = vshll.u32 %v12419_v10, 16 }
 0x102   : > { %11556 = vmatpush3.bf16.msra.mxu1 %v13437_v46  ;;  %11543 = vmatprep.mubr.bf16.mxu1 %v585_v44  ;;  %v12388_v46 = vld [vmem:[#allocation6 + $0x218] sm:$0xff]   ;;  %v13521_v54 = vcombine.low %v9997_v32, %v13515_v0  ;;  %v597_v23 = vsel %vm576_vm1, %v595_v52, %v596_v49  ;;  %v599_v44 = vrot.slane %v13427_v7, 1  ;;  %v1758_v5 = vor.u32 %v1757_v34, %v1753_v21  ;;  %v13555_v52 = vld [vmem:[%s13211_s16 + $0x44] ss:$0 sps:$4 sm:$0x11]  }
 0x103   : > { %11557 = vmatprep.subr.bf16.mxu1 %v12378_v37  ;;  %v1880_v7 = vrot.slane %v10043_v25, 1  ;;  %v10004_v49 = vld [vmem:[%s13211_s16 + $0x4c] sm:$0xf]  ;;  %v10046_v21 = vcombine.low %v10022_v18, %v10002_v45  ;;  %v13563_v34 = vld [vmem:[%s13211_s16 + $0x50] ss:$0 sps:$4 sm:$0x11]  }
 0x104   : > { %10694 = vmatpush3.bf16.msra.mxu0 %v12379_v30  ;;  %v911_v30 = vrot.slane %v9946_v17, 1  ;;  %v1767_v55 = vshll.u32 %v13521_v54, 16  ;;  %v10023_v17 = vld [vmem:[%s13211_s16 + $0x48] sm:$0xe]  ;;  %v12451_v10 = vld [vmem:[#allocation6 + $0xc8] sm:$0xff]  }
 0x105   : > { %10695 = vmatprep.subr.bf16.mxu0 %v12384_v40  ;;  %v598_v40 = vrot.slane %v9890_v29, 1  ;;  %v1781_v29 = vrot.slane %v1779_v41, 1 }
 0x106   : > { %11558 = vmatpush3.bf16.msra.mxu1 %v12378_v37  ;;  %v12398_v37 = vld [vmem:[#allocation6 + $0x228] sm:$0xff]  }
 0x107   : > { %11512 = vmatmul.mubr.bf16.gmra.mrb[36].mxu0 %v901_v63  ;;  %11559 = vmatprep.subr.bf16.mxu1 %v12385_v50  ;;  %v10021_v63 = vld [vmem:[%s13211_s16 + $0x30] sm:$0xe]  ;;  %v600_v2 = vsel %vm576_vm1, %v598_v40, %v599_v44  ;;  %v1890_v40 = vrot.slane %v13555_v52, 1 }
 0x108   : > { %10696 = vmatpush3.bf16.msra.mxu0 %v12386_v51  ;;  %11515 = vmatprep.mubr.bf16.mxu0 %v904_v13  ;;  %v1881_v51 = vrot.slane %v13504_v20, 1  ;;  %v1769_v13 = vrot.slane %v1767_v55, 1  ;;  %v12415_v20 = vld [vmem:[#allocation6 + $0x140] sm:$0xff]   ;;  %v10025_v55 = vld [vmem:[%s13211_s16 + $0x60] sm:$0xe] }
 0x109   : > { %11544 = vmatmul.mubr.bf16.gmra.mrb[36].mxu1 %v588_v3  ;;  %10697 = vmatprep.subr.bf16.mxu0 %v12387_v60  ;;  %v913_v60 = vsel %vm576_vm1, %v911_v30, %v912_v1  ;;  %v10044_v3 = vcombine.low %v10020_v42, %v13515_v0  ;;  %v12442_v0 = vld [vmem:[#allocation6 + $0xc0] sm:$0xff]   ;;  %v10047_v1 = vcombine.low %v10023_v17, %v10004_v49  ;;  %v12424_v30 = vld [vmem:[#allocation6 + $0x150] sm:$0xff]  }
 0x10a   : > { %11560 = vmatpush3.bf16.msra.mxu1 %v12385_v50  ;;  %11547 = vmatprep.mubr.bf16.mxu1 %v591_v6  ;;  %v1762_v50 = vrot.slane %v1760_v28, 1  ;;  %v1882_v36 = vsel %vm576_vm1, %v1880_v7, %v1881_v51  ;;  %v12409_v6 = vld [vmem:[#allocation6 + $0x1b8] sm:$0xff]  }
 0x10b   : > { %11561 = vmatprep.subr.bf16.mxu1 %v12388_v46  ;;  %v1883_v48 = vrot.slane %v10044_v3, 1  ;;  %v1892_v58 = vrot.slane %v10047_v1, 1  ;;  %v12425_v7 = vld [vmem:[#allocation6 + $0x158] sm:$0xff]  }
 0x10c   : > { %10698 = vmatpush3.bf16.msra.mxu0 %v12389_v11  ;;  %v1763_v38 = vsel %vm447_vm0, %v1758_v5, %v1762_v50  ;;  %v10045_v11 = vcombine.low %v10021_v63, %v10000_v57  ;;  %v13577_v5 = vld [vmem:[%s13211_s16 + $0x64] sm:$0xf]  ;;  %v10026_v3 = vld [vmem:[%s13211_s16 + $0x6c] sm:$0xe] }
 0x10d   : > { %10699 = vmatprep.subr.bf16.mxu0 %v12394_v26  ;;  %v1774_v26 = vrot.slane %v1772_v8, 1  ;;  %v1885_v32 = vsel %vm576_vm1, %v1883_v48, %v1884_v19  ;;  %v1808_v48 = vshll.u32 %v13563_v34, 16 }
 0x10e   : > { %11562 = vmatpush3.bf16.msra.mxu1 %v12388_v46  ;;  %v1765_v46 = vshrl.u32 %v13521_v54, 16  ;;  %v1886_v56 = vrot.slane %v10045_v11, 1 }
 0x10f   : > { %11516 = vmatmul.mubr.bf16.gmra.mrb[40].mxu0 %v907_v61  ;;  %11563 = vmatprep.subr.bf16.mxu1 %v12395_v24 }
 0x110   : > { %10700 = vmatpush3.bf16.msra.mxu0 %v12396_v4  ;;  %11519 = vmatprep.mubr.bf16.mxu0 %v910_v27  ;;  %v1770_v14 = vor.u32 %v1769_v13, %v1765_v46  ;;  %v13552_v4 = vcombine.low %v10001_v35, %v10002_v45  ;;  %v1777_v27 = vshrl.u32 %v13539_v33, 16  ;;  %v1888_v28 = vsel %vm576_vm1, %v1886_v56, %v1887_v16  ;;  %v10005_v46 = vld [vmem:[%s13211_s16 + $0x54] sm:$0xf]  ;;  %v13608_v45 = vld [vmem:[%s13211_s16 + $0x70] sm:$0xf]  ;;  %v12433_v56 = vld [vmem:[#allocation6 + $0x168] sm:$0xff]  }
 0x111   : > { %11548 = vmatmul.mubr.bf16.gmra.mrb[40].mxu1 %v594_v12  ;;  %10701 = vmatprep.subr.bf16.mxu0 %v12397_v59  ;;  %v12416_v59 = vld [vmem:[#allocation6 + $0x148] sm:$0xff]   ;;  %v10003_v12 = vld [vmem:[%s13211_s16 + $0x48] sm:$0xf]  ;;  %v10049_v13 = vcombine.low %v10025_v55, %v13577_v5  ;;  %v12432_v35 = vld [vmem:[#allocation6 + $0x160] sm:$0xff]  }
 0x112   : > { %11564 = vmatpush3.bf16.msra.mxu1 %v12395_v24  ;;  %11551 = vmatprep.mubr.bf16.mxu1 %v597_v23  ;;  %v12441_v24 = vld [vmem:[#allocation6 + $0x100] sm:$0xff]   ;;  %v1775_v61 = vsel %vm447_vm0, %v1770_v14, %v1774_v26  ;;  %v1782_v44 = vor.u32 %v1781_v29, %v1777_v27  ;;  %v1791_v25 = vshll.u32 %v13552_v4, 16  ;;  %v13579_v50 = vcombine.low %v10003_v12, %v10004_v49  ;;  %v12456_v49 = vld [vmem:[#allocation6 + $0x110] sm:$0xff]  }
 0x113   : > { %11565 = vmatprep.subr.bf16.mxu1 %v12398_v37  ;;  %v13571_v23 = vld [vmem:[%s13211_s16 + $0x5c] ss:$0 sps:$4 sm:$0x11]   ;;  %v1789_v57 = vshrl.u32 %v13552_v4, 16  ;;  %v1898_v41 = vrot.slane %v10049_v13, 1 }
 0x114   : > { %10702 = vmatpush3.bf16.msra.mxu0 %v12399_v39  ;;  %v10024_v39 = vld [vmem:[%s13211_s16 + $0x54] sm:$0xe]  ;;  %v1896_v63 = vrot.slane %v13571_v23, 1  ;;  %v1801_v18 = vshrl.u32 %v13579_v50, 16  ;;  %v10158_v12 = vld [vmem:[%s13211_s16 + $0x84] sm:$0xe] }
 0x115   : > { %10703 = vmatprep.subr.bf16.mxu0 %v12404_v47  ;;  %v1786_v47 = vrot.slane %v1784_v31, 1 }
 0x116   : > { %11566 = vmatpush3.bf16.msra.mxu1 %v12398_v37  ;;  %v10006_v37 = vld [vmem:[%s13211_s16 + $0x58] sm:$0xf] }
 0x117   : > { %11520 = vmatmul.mubr.bf16.gmra.mrb[44].mxu0 %v913_v60  ;;  %11567 = vmatprep.subr.bf16.mxu1 %v12405_v62  ;;  %v10048_v42 = vcombine.low %v10024_v39, %v10006_v37  ;;  %v1787_v51 = vsel %vm447_vm0, %v1782_v44, %v1786_v47  ;;  %v1793_v60 = vrot.slane %v1791_v25, 1  ;;  %v13605_v19 = vcombine.low %v10005_v46, %v10006_v37  ;;  %v13633_v39 = vld [vmem:[%s13211_s16 + $0x80] ss:$0 sps:$4 sm:$0x11]  }
 0x118   : > { %10704 = vmatpush3.bf16.msra.mxu0 %v12406_v15  ;;  %2137 = vmatprep.mubr.bf16.mxu0 %v1763_v38  ;;  %v1796_v15 = vshll.u32 %v13555_v52, 16  ;;  %v13614_v52 = vld [vmem:[%s13211_s16 + $0x74] ss:$0 sps:$4 sm:$0x11]   ;;  %v12461_v44 = vld [vmem:[#allocation6 + $0xd0] sm:$0xff]  }
 0x119   : > { %11552 = vmatmul.mubr.bf16.gmra.mrb[44].mxu1 %v600_v2  ;;  %10705 = vmatprep.subr.bf16.mxu0 %v12407_v9  ;;  %v13588_v9 = vld [vmem:[%s13211_s16 + $0x68] ss:$0 sps:$4 sm:$0x11]   ;;  %v13595_v2 = vld [vmem:[%s13211_s16 + $0x70] sm:$0xf]  ;;  %v1794_v11 = vor.u32 %v1793_v60, %v1789_v57  ;;  %v2917_v37 = vrot.slane %v13614_v52, 1 }
 0x11a   : > { %11568 = vmatpush3.bf16.msra.mxu1 %v12405_v62  ;;  %11571 = vmatprep.mubr.bf16.mxu1 %v1882_v36  ;;  %v1893_v62 = vrot.slane %v13563_v34, 1  ;;  %v13599_v36 = vld [vmem:[%s13211_s16 + $0x74] ss:$0 sps:$4 sm:$0x11]   ;;  %v10050_v26 = vcombine.low %v10026_v3, %v13595_v2  ;;  %v1899_v14 = vrot.slane %v13588_v9, 1  ;;  %v1815_v34 = vshll.u32 %v13605_v19, 16 }
 0x11b   : > { %11569 = vmatprep.subr.bf16.mxu1 %v12408_v22  ;;  %v1902_v29 = vrot.slane %v13599_v36, 1  ;;  %v1813_v55 = vshrl.u32 %v13605_v19, 16 }
 0x11c   : > { %10706 = vmatpush3.bf16.msra.mxu0 %v12409_v6  ;;  %v1894_v38 = vsel %vm576_vm1, %v1892_v58, %v1893_v62  ;;  %v1798_v6 = vrot.slane %v1796_v15, 1  ;;  %v1901_v27 = vrot.slane %v10050_v26, 1  ;;  %v1900_v31 = vsel %vm576_vm1, %v1898_v41, %v1899_v14  ;;  %v13663_v26 = vld [vmem:[%s13211_s16 + $0xa0] sm:$0xf]  ;;  %v10160_v41 = vld [vmem:[%s13211_s16 + $0x9c] sm:$0xe] }
 0x11d   : > { %10771 = vmatprep.subr.bf16.mxu0 %v12441_v24  ;;  %v1820_v58 = vshll.u32 %v13571_v23, 16  ;;  %v12443_v23 = vld [vmem:[#allocation6 + $0x178] sm:$0xff]   ;;  %v12473_v14 = vld [vmem:[#allocation6 + $0xe0] sm:$0xff]  }
 0x11e   : > { %11570 = vmatpush3.bf16.msra.mxu1 %v12408_v22  ;;  %v1895_v22 = vrot.slane %v10048_v42, 1  ;;  %v1799_v16 = vsel %vm447_vm0, %v1794_v11, %v1798_v6  ;;  %v13658_v11 = vld [vmem:[%s13211_s16 + $0x98] ss:$0 sps:$4 sm:$0x11]  }
 0x11f   : > { %2138 = vmatmul.mubr.bf16.vlgmr.msra.gmra.mrb[48].mxu0 %v13500_v43  ;;  %11587 = vmatprep.subr.bf16.mxu1 %v12415_v20  ;;  %v1889_v43 = vrot.slane %v10046_v21, 1  ;;  %v1810_v21 = vrot.slane %v1808_v48, 1 }
 0x120   : > { %2145 = vmatprep.mubr.bf16.mxu0 %v1775_v61  ;;  %10772 = vmatpush3.bf16.msra.mxu0 %v12442_v0  ;;  %v1897_v17 = vsel %vm576_vm1, %v1895_v22, %v1896_v63  ;;  %v10007_v61 = vld [vmem:[%s13211_s16 + $0x60] sm:$0xf]  ;;  %v2920_v63 = vrot.slane %v13633_v39, 1  ;;  %v13654_v22 = vld [vmem:[%s13211_s16 + $0x94] sm:$0xf] }
 0x121   : > { %11572 = vmatmul.mubr.bf16.vlgmr.msra.gmra.mrb[32].mxu1 %v1885_v32  ;;  %v1891_v8 = vsel %vm576_vm1, %v1889_v43, %v1890_v40  ;;  %10773 = vmatprep.subr.bf16.mxu0 %v12450_v53  ;;  %v13623_v32 = vld [vmem:[%s13211_s16 + $0x7c] sm:$0xf]  ;;  %v13639_v47 = vcombine.low %v10007_v61, %v13577_v5  ;;  %v12462_v40 = vld [vmem:[#allocation6 + $0x118] sm:$0xff]   ;;  %v1817_v53 = vrot.slane %v1815_v34, 1  ;;  %v1903_v5 = vsel %vm576_vm1, %v1901_v27, %v1902_v29  ;;  %v12460_v29 = vld [vmem:[#allocation6 + $0x90] sm:$0xff]  }
 0x122   : > { %11588 = vmatpush3.bf16.msra.mxu1 %v12415_v20  ;;  %11575 = vmatprep.mubr.bf16.mxu1 %v1888_v28  ;;  %v10156_v20 = vld [vmem:[%s13211_s16 + $0x6c] sm:$0xe]  ;;  %v13628_v28 = vld [vmem:[%s13211_s16 + $0x88] sm:$0xf]  ;;  %v2926_v27 = vrot.slane %v13658_v11, 1 }
 0x123   : > { %11589 = vmatprep.subr.bf16.mxu1 %v12416_v59  ;;  %v10180_v0 = vcombine.low %v10156_v20, %v13608_v45  ;;  %v10182_v62 = vcombine.low %v10158_v12, %v13628_v28  ;;  %v1827_v15 = vshll.u32 %v13639_v47, 16  ;;  %v1818_v3 = vor.u32 %v1817_v53, %v1813_v55  ;;  %v10132_v61 = vld [vmem:[%s13211_s16 + $0x6c] sm:$0xf]  ;;  %v13700_v55 = vld [vmem:[%s13211_s16 + $0xbc] ss:$0 sps:$4 sm:$0x11]  }
 0x124   : > { %10774 = vmatpush3.bf16.msra.mxu0 %v12451_v10  ;;  %v10159_v10 = vld [vmem:[%s13211_s16 + $0x90] sm:$0xe]  ;;  %v1825_v6 = vshrl.u32 %v13639_v47, 16 }
 0x125   : > { %10775 = vmatprep.subr.bf16.mxu0 %v12456_v49  ;;  %v2916_v25 = vrot.slane %v10180_v0, 1  ;;  %v2922_v46 = vrot.slane %v10182_v62, 1  ;;  %v12452_v49 = vld [vmem:[#allocation6 + $0x88] sm:$0xff]  }
 0x126   : > { %11590 = vmatpush3.bf16.msra.mxu1 %v12416_v59  ;;  %v10157_v59 = vld [vmem:[%s13211_s16 + $0x78] sm:$0xe] }
 0x127   : > { %2146 = vmatmul.mubr.bf16.gmra.mrb[52].mxu0 %v13521_v54  ;;  %11591 = vmatprep.subr.bf16.mxu1 %v12424_v30  ;;  %v1803_v54 = vshll.u32 %v13579_v50, 16  ;;  %v10181_v43 = vcombine.low %v10157_v59, %v13623_v32  ;;  %v2918_v57 = vsel %vm576_vm1, %v2916_v25, %v2917_v37  ;;  %v13681_v59 = vld [vmem:[%s13211_s16 + $0xac] sm:$0xf]  ;;  %v13689_v25 = vcombine.low %v10132_v61, %v13608_v45 }
 0x128   : > { %2153 = vmatprep.mubr.bf16.mxu0 %v1787_v51  ;;  %10776 = vmatpush3.bf16.msra.mxu0 %v12461_v44  ;;  %v12468_v51 = vld [vmem:[#allocation6 + $0x120] sm:$0xff]   ;;  %v1844_v44 = vshll.u32 %v13599_v36, 16  ;;  %v12485_v36 = vld [vmem:[#allocation6 + $0xf0] sm:$0xff]   ;;  %v12463_v45 = vld [vmem:[#allocation6 + $0x98] sm:$0xff]  }
 0x129   : > { %11576 = vmatmul.mubr.bf16.gmra.mrb[36].mxu1 %v1891_v8  ;;  %v1805_v24 = vrot.slane %v1803_v54, 1  ;;  %10777 = vmatprep.subr.bf16.mxu0 %v12462_v40  ;;  %v2919_v60 = vrot.slane %v10181_v43, 1  ;;  %v10009_v8 = vld [vmem:[%s13211_s16 + $0x6c] sm:$0xf]  ;;  %v1832_v54 = vshll.u32 %v13588_v9, 16  ;;  %v10183_v9 = vcombine.low %v10159_v10, %v13654_v22 }
 0x12a   : > { %11592 = vmatpush3.bf16.msra.mxu1 %v12424_v30  ;;  %11579 = vmatprep.mubr.bf16.mxu1 %v1894_v38  ;;  %v13636_v30 = vld [vmem:[%s13211_s16 + $0x8c] ss:$0 sps:$4 sm:$0x11]   ;;  %v1822_v38 = vrot.slane %v1820_v58, 1  ;;  %v13667_v48 = vcombine.low %v10009_v8, %v13595_v2  ;;  %v13695_v40 = vld [vmem:[%s13211_s16 + $0xb8] sm:$0xf] }
 0x12b   : > { %11593 = vmatprep.subr.bf16.mxu1 %v12425_v7  ;;  %v1806_v1 = vor.u32 %v1805_v24, %v1801_v18  ;;  %v2923_v13 = vrot.slane %v13636_v30, 1  ;;  %v2921_v18 = vsel %vm576_vm1, %v2919_v60, %v2920_v63  ;;  %v10184_v24 = vcombine.low %v10160_v41, %v13663_v26  ;;  %v13692_v43 = vld [vmem:[%s13211_s16 + $0xb0] ss:$0 sps:$4 sm:$0x11]   ;;  %v10162_v58 = vld [vmem:[%s13211_s16 + $0xb4] sm:$0xe] }
 0x12c   : > { %v1823_v20 = vsel %vm447_vm0, %v1818_v3, %v1822_v38  ;;  %v1834_v0 = vrot.slane %v1832_v54, 1  ;;  %v1837_v37 = vshrl.u32 %v13667_v48, 16  ;;  %v12472_v60 = vld [vmem:[#allocation6 + $0xa0] sm:$0xff]   ;;  %v1846_v8 = vrot.slane %v1844_v44, 1  ;;  %v13710_v38 = vld [vmem:[%s13211_s16 + $0xc4] sm:$0xf] }
 0x12d   : > { %v1811_v42 = vsel %vm447_vm0, %v1806_v1, %v1810_v21  ;;  %v2924_v2 = vsel %vm576_vm1, %v2922_v46, %v2923_v13  ;;  %v2925_v21 = vrot.slane %v10183_v9, 1  ;;  %v2928_v34 = vrot.slane %v10184_v24, 1  ;;  %v10161_v1 = vld [vmem:[%s13211_s16 + $0xa8] sm:$0xe]  ;;  %v10163_v10 = vld [vmem:[%s13211_s16 + $0xc0] sm:$0xe] }
 0x12e   : > { %11594 = vmatpush3.bf16.msra.mxu1 %v12425_v7  ;;  %v12464_v7 = vld [vmem:[#allocation6 + $0xd8] sm:$0xff]   ;;  %v2932_v63 = vrot.slane %v13692_v43, 1  ;;  %v2796_v13 = vshll.u32 %v13614_v52, 16  ;;  %v2935_v3 = vrot.slane %v13700_v55, 1  ;;  %v2789_v54 = vshrl.u32 %v13689_v25, 16  ;;  %v12475_v52 = vld [vmem:[#allocation6 + $0xa8] sm:$0xff]  }
 0x12f   : > { %2154 = vmatmul.mubr.bf16.gmra.mrb[56].mxu0 %v13539_v33  ;;  %11595 = vmatprep.subr.bf16.mxu1 %v12432_v35  ;;  %v12440_v33 = vld [vmem:[#allocation6 + $0x170] sm:$0xff]   ;;  %v2927_v53 = vsel %vm576_vm1, %v2925_v21, %v2926_v27  ;;  %v12488_v46 = vld [vmem:[#allocation6 + $0xf8] sm:$0xff]   ;;  %v13740_v21 = vld [vmem:[%s13211_s16 + $0x7c] sm:$0xf] }
 0x130   : > { %2161 = vmatprep.mubr.bf16.mxu0 %v1799_v16  ;;  %10778 = vmatpush3.bf16.msra.mxu0 %v12464_v7  ;;  %v12474_v16 = vld [vmem:[#allocation6 + $0x128] sm:$0xff]   ;;  %v10185_v7 = vcombine.low %v10161_v1, %v13681_v59  ;;  %v2798_v9 = vrot.slane %v2796_v13, 1  ;;  %v13727_v24 = vld [vmem:[%s13211_s16 + $0x68] ss:$0 sps:$4 sm:$0x11]  }
 0x131   : > { %11580 = vmatmul.mubr.bf16.gmra.mrb[40].mxu1 %v1897_v17  ;;  %10779 = vmatprep.subr.bf16.mxu0 %v12468_v51  ;;  %v12476_v17 = vld [vmem:[#allocation6 + $0xe8] sm:$0xff]   ;;  %v10101_v27 = vld [vmem:[%s13211_s16 + $0x6c] sm:$0xe] }
 0x132   : > { %11596 = vmatpush3.bf16.msra.mxu1 %v12432_v35  ;;  %11583 = vmatprep.mubr.bf16.mxu1 %v1900_v31  ;;  %v1829_v35 = vrot.slane %v1827_v15, 1  ;;  %v13720_v41 = vld [vmem:[%s13211_s16 + $0x64] sm:$0xf] }
 0x133   : > { %11597 = vmatprep.subr.bf16.mxu1 %v12433_v56 }
 0x134   : > { %10780 = vmatpush3.bf16.msra.mxu0 %v12473_v14  ;;  %v1830_v31 = vor.u32 %v1829_v35, %v1825_v6  ;;  %v13716_v6 = vld [vmem:[%s13211_s16 + $0xc8] ss:$0 sps:$4 sm:$0x11]   ;;  %v10100_v14 = vld [vmem:[%s13211_s16 + $0x60] sm:$0xe] }
 0x135   : > { %10781 = vmatprep.subr.bf16.mxu0 %v12474_v16 }
 0x136   : > { %11598 = vmatpush3.bf16.msra.mxu1 %v12433_v56  ;;  %v13671_v56 = vld [vmem:[%s13211_s16 + $0xa4] ss:$0 sps:$4 sm:$0x11]   ;;  %v1835_v62 = vsel %vm447_vm0, %v1830_v31, %v1834_v0 }
 0x137   : > { %2162 = vmatmul.mubr.bf16.gmra.mrb[60].mxu0 %v13552_v4  ;;  %11599 = vmatprep.subr.bf16.mxu1 %v12440_v33  ;;  %v12449_v4 = vld [vmem:[#allocation6 + $0x80] sm:$0xff]   ;;  %v2929_v12 = vrot.slane %v13671_v56, 1  ;;  %v12484_v31 = vld [vmem:[#allocation6 + $0xb0] sm:$0xff]  }
 0x138   : > { %2169 = vmatprep.mubr.bf16.mxu0 %v1811_v42  ;;  %10782 = vmatpush3.bf16.msra.mxu0 %v12476_v17  ;;  %v10124_v17 = vcombine.low %v10100_v14, %v13720_v41 }
 0x139   : > { %11584 = vmatmul.mubr.bf16.gmra.mrb[44].mxu1 %v1903_v5  ;;  %v2930_v51 = vsel %vm576_vm1, %v2928_v34, %v2929_v12  ;;  %v10186_v5 = vcombine.low %v10162_v58, %v13695_v40  ;;  %v2604_v12 = vrot.slane %v13727_v24, 1  ;;  %v13750_v58 = vld [vmem:[%s13211_s16 + $0x74] ss:$0 sps:$4 sm:$0x11]  }
 0x13a   : > { %11600 = vmatpush3.bf16.msra.mxu1 %v12440_v33  ;;  %11603 = vmatprep.mubr.bf16.mxu1 %v2918_v57  ;;  %v12480_v33 = vld [vmem:[#allocation6 + $0x130] sm:$0xff]   ;;  %v2791_v57 = vshll.u32 %v13689_v25, 16  ;;  %v2603_v34 = vrot.slane %v10124_v17, 1 }
 0x13b   : > { %11601 = vmatprep.subr.bf16.mxu1 %v12443_v23  ;;  %10783 = vmatprep.subr.bf16.mxu0 %v12480_v33 }
 0x13c   : > { %10784 = vmatpush3.bf16.msra.mxu0 %v12485_v36  ;;  %v2793_v35 = vrot.slane %v2791_v57, 1 }
 0x13e   : > { %11602 = vmatpush3.bf16.msra.mxu1 %v12443_v23  ;;  %v12486_v23 = vld [vmem:[#allocation6 + $0x138] sm:$0xff]   ;;  %v2794_v61 = vor.u32 %v2793_v35, %v2789_v54 }
 0x13f   : > { %2170 = vmatmul.mubr.bf16.gmra.mrb[64].mxu0 %v13579_v50  ;;  %11619 = vmatprep.subr.bf16.mxu1 %v12449_v4  ;;  %v1839_v50 = vshll.u32 %v13667_v48, 16  ;;  %v10138_v54 = vld [vmem:[%s13211_s16 + $0x90] sm:$0xf] }
 0x140   : > { %2177 = vmatprep.mubr.bf16.mxu0 %v1823_v20  ;;  %10785 = vmatprep.subr.bf16.mxu0 %v12486_v23  ;;  %v2799_v44 = vsel %vm447_vm0, %v2794_v61, %v2798_v9  ;;  %v2605_v23 = vsel %vm576_vm1, %v2603_v34, %v2604_v12  ;;  %v10104_v35 = vld [vmem:[%s13211_s16 + $0x90] sm:$0xe]  ;;  %v13790_v61 = vcombine.low %v10138_v54, %v13654_v22  ;;  %v12505_v22 = vld [vmem:[#allocation6 + $0x1d0] sm:$0xff]  }
 0x141   : > { %11604 = vmatmul.mubr.bf16.vlgmr.msra.gmra.mrb[48].mxu1 %v2921_v18  ;;  %v1841_v42 = vrot.slane %v1839_v50, 1  ;;  %10786 = vmatpush3.bf16.msra.mxu0 %v12488_v46  ;;  %v10187_v18 = vcombine.low %v10163_v10, %v13710_v38  ;;  %v2938_v50 = vrot.slane %v13716_v6, 1  ;;  %v13778_v10 = vld [vmem:[%s13211_s16 + $0x94] sm:$0xf] }
 0x142   : > { %11620 = vmatpush3.bf16.msra.mxu1 %v12449_v4  ;;  %11607 = vmatprep.mubr.bf16.mxu1 %v2924_v2  ;;  %v2934_v4 = vrot.slane %v10186_v5, 1  ;;  %v13764_v5 = vld [vmem:[%s13211_s16 + $0x88] sm:$0xf] }
 0x143   : > { %11621 = vmatprep.subr.bf16.mxu1 %v12452_v49  ;;  %v1842_v15 = vor.u32 %v1841_v42, %v1837_v37  ;;  %v2937_v0 = vrot.slane %v10187_v18, 1  ;;  %v10102_v37 = vld [vmem:[%s13211_s16 + $0x78] sm:$0xe]  ;;  %v10128_v18 = vcombine.low %v10104_v35, %v13778_v10  ;;  %v10142_v35 = vld [vmem:[%s13211_s16 + $0xa8] sm:$0xf] }
 0x144   : > { %v2936_v2 = vsel %vm576_vm1, %v2934_v4, %v2935_v3  ;;  %v10126_v36 = vcombine.low %v10102_v37, %v13740_v21  ;;  %v13774_v4 = vld [vmem:[%s13211_s16 + $0x8c] ss:$0 sps:$4 sm:$0x11]   ;;  %v2820_v3 = vshll.u32 %v13636_v30, 16  ;;  %v12496_v30 = vld [vmem:[#allocation6 + $0x1c8] sm:$0xff]   ;;  %v2825_v37 = vshrl.u32 %v13790_v61, 16 }
 0x145   : > { %v1847_v20 = vsel %vm447_vm0, %v1842_v15, %v1846_v8  ;;  %v12494_v15 = vld [vmem:[#allocation6 + $0x1c0] sm:$0xff]  }
 0x146   : > { %11622 = vmatpush3.bf16.msra.mxu1 %v12452_v49  ;;  %v13730_v49 = vld [vmem:[%s13211_s16 + $0x70] sm:$0xf] }
 0x147   : > { %2178 = vmatmul.mubr.bf16.gmra.mrb[68].mxu0 %v13605_v19  ;;  %11623 = vmatprep.subr.bf16.mxu1 %v12460_v29  ;;  %v2931_v19 = vrot.slane %v10185_v7, 1  ;;  %v10125_v33 = vcombine.low %v10101_v27, %v13730_v49  ;;  %v2808_v7 = vshll.u32 %v13633_v39, 16  ;;  %v10103_v39 = vld [vmem:[%s13211_s16 + $0x84] sm:$0xe] }
 0x148   : > { %2185 = vmatprep.mubr.bf16.mxu0 %v1835_v62  ;;  %v13753_v62 = vld [vmem:[%s13211_s16 + $0x80] ss:$0 sps:$4 sm:$0x11]   ;;  %v10127_v46 = vcombine.low %v10103_v39, %v13764_v5 }
 0x149   : > { %11608 = vmatmul.mubr.bf16.gmra.mrb[52].mxu1 %v2927_v53  ;;  %v2933_v16 = vsel %vm576_vm1, %v2931_v19, %v2932_v63  ;;  %v2606_v57 = vrot.slane %v10125_v33, 1  ;;  %v2810_v19 = vrot.slane %v2808_v7, 1  ;;  %v2609_v63 = vrot.slane %v10126_v36, 1  ;;  %v13801_v33 = vld [vmem:[%s13211_s16 + $0xa4] ss:$0 sps:$4 sm:$0x11]  }
 0x14a   : > { %11624 = vmatpush3.bf16.msra.mxu1 %v12460_v29  ;;  %11611 = vmatprep.mubr.bf16.mxu1 %v2930_v51  ;;  %v10136_v29 = vld [vmem:[%s13211_s16 + $0x84] sm:$0xf]  ;;  %v12487_v51 = vld [vmem:[#allocation6 + $0xb8] sm:$0xff]   ;;  %v2612_v17 = vrot.slane %v10127_v46, 1  ;;  %v2619_v46 = vrot.slane %v13801_v33, 1 }
 0x14b   : > { %11625 = vmatprep.subr.bf16.mxu1 %v12463_v45  ;;  %v13808_v7 = vld [vmem:[%s13211_s16 + $0xac] sm:$0xf]  ;;  %v10106_v36 = vld [vmem:[%s13211_s16 + $0xa8] sm:$0xe] }
 0x14c   : > { %v12506_v39 = vld [vmem:[#allocation6 + $0x190] sm:$0xff]  }
 0x14e   : > { %11626 = vmatpush3.bf16.msra.mxu1 %v12463_v45  ;;  %v13760_v45 = vcombine.low %v10136_v29, %v13628_v28  ;;  %v2607_v28 = vrot.slane %v13750_v58, 1  ;;  %v2613_v29 = vrot.slane %v13774_v4, 1 }
 0x14f   : > { %2186 = vmatmul.mubr.bf16.gmra.mrb[72].mxu0 %v13639_v47  ;;  %11627 = vmatprep.subr.bf16.mxu1 %v12472_v60  ;;  %v10134_v47 = vld [vmem:[%s13211_s16 + $0x78] sm:$0xf] }
 0x150   : > { %2193 = vmatprep.mubr.bf16.mxu0 %v1847_v20  ;;  %v13745_v1 = vcombine.low %v10134_v47, %v13623_v32  ;;  %v2939_v32 = vsel %vm576_vm1, %v2937_v0, %v2938_v50  ;;  %v2815_v13 = vshll.u32 %v13760_v45, 16  ;;  %v2608_v9 = vsel %vm576_vm1, %v2606_v57, %v2607_v28  ;;  %v13796_v0 = vld [vmem:[%s13211_s16 + $0xa0] sm:$0xf]  ;;  %v10105_v50 = vld [vmem:[%s13211_s16 + $0x9c] sm:$0xe] }
 0x151   : > { %11612 = vmatmul.mubr.bf16.gmra.mrb[56].mxu1 %v2933_v16  ;;  %v13785_v16 = vld [vmem:[%s13211_s16 + $0x98] ss:$0 sps:$4 sm:$0x11]   ;;  %v13814_v57 = vld [vmem:[%s13211_s16 + $0xb0] ss:$0 sps:$4 sm:$0x11]   ;;  %v10130_v28 = vcombine.low %v10106_v36, %v13808_v7 }
 0x152   : > { %11628 = vmatpush3.bf16.msra.mxu1 %v12472_v60  ;;  %11615 = vmatprep.mubr.bf16.mxu1 %v2936_v2  ;;  %v2801_v42 = vshrl.u32 %v13745_v1, 16  ;;  %v2803_v53 = vshll.u32 %v13745_v1, 16  ;;  %v2817_v20 = vrot.slane %v2815_v13, 1  ;;  %v12495_v2 = vld [vmem:[#allocation6 + $0x180] sm:$0xff]   ;;  %v12497_v47 = vld [vmem:[#allocation6 + $0x188] sm:$0xff]   ;;  %v2616_v12 = vrot.slane %v13785_v16, 1 }
 0x153   : > { %11629 = vmatprep.subr.bf16.mxu1 %v12475_v52  ;;  %v10144_v36 = vld [vmem:[%s13211_s16 + $0xb4] sm:$0xf] }
 0x154   : > { %v2805_v60 = vrot.slane %v2803_v53, 1  ;;  %v10129_v53 = vcombine.low %v10105_v50, %v13796_v0  ;;  %v2844_v50 = vshll.u32 %v13671_v56, 16  ;;  %v13852_v56 = vld [vmem:[%s13211_s16 + $0x80] ss:$0 sps:$4 sm:$0x11]  }
 0x156   : > { %11630 = vmatpush3.bf16.msra.mxu1 %v12475_v52  ;;  %v2806_v8 = vor.u32 %v2805_v60, %v2801_v42  ;;  %v2813_v52 = vshrl.u32 %v13760_v45, 16  ;;  %v2832_v42 = vshll.u32 %v13658_v11, 16  ;;  %v2614_v60 = vsel %vm576_vm1, %v2612_v17, %v2613_v29  ;;  %v13819_v11 = vld [vmem:[%s13211_s16 + $0xb8] sm:$0xf] }
 0x157   : > { %2194 = vmatmul.mubr.bf16.gmra.mrb[76].mxu0 %v13667_v48  ;;  %11631 = vmatprep.subr.bf16.mxu1 %v12484_v31  ;;  %v2610_v48 = vrot.slane %v13753_v62, 1  ;;  %v12517_v17 = vld [vmem:[#allocation6 + $0x1e8] sm:$0xff]  }
 0x158   : > { %3172 = vmatprep.mubr.bf16.mxu0 %v2799_v44  ;;  %v2811_v14 = vsel %vm447_vm0, %v2806_v8, %v2810_v19  ;;  %v2818_v34 = vor.u32 %v2817_v20, %v2813_v52  ;;  %v2827_v44 = vshll.u32 %v13790_v61, 16  ;;  %v10107_v19 = vld [vmem:[%s13211_s16 + $0xb4] sm:$0xe]  ;;  %v2621_v52 = vrot.slane %v10130_v28, 1 }
 0x159   : > { %11616 = vmatmul.mubr.bf16.gmra.mrb[60].mxu1 %v2939_v32  ;;  %v2611_v27 = vsel %vm576_vm1, %v2609_v63, %v2610_v48  ;;  %v10140_v32 = vld [vmem:[%s13211_s16 + $0x9c] sm:$0xf]  ;;  %v12508_v63 = vld [vmem:[#allocation6 + $0x198] sm:$0xff]   ;;  %v2618_v48 = vrot.slane %v10129_v53, 1  ;;  %v2622_v20 = vrot.slane %v13814_v57, 1 }
 0x15a   : > { %11632 = vmatpush3.bf16.msra.mxu1 %v12484_v31  ;;  %11635 = vmatprep.mubr.bf16.mxu1 %v2605_v23  ;;  %v2822_v31 = vrot.slane %v2820_v3, 1  ;;  %v2829_v23 = vrot.slane %v2827_v44, 1  ;;  %v2834_v3 = vrot.slane %v2832_v42, 1  ;;  %v13826_v54 = vcombine.low %v10140_v32, %v13663_v26  ;;  %v13833_v26 = vld [vmem:[%s13211_s16 + $0xbc] ss:$0 sps:$4 sm:$0x11]  }
 0x15b   : > { %11633 = vmatprep.subr.bf16.mxu1 %v12487_v51  ;;  %v2846_v44 = vrot.slane %v2844_v50, 1  ;;  %v12518_v53 = vld [vmem:[#allocation6 + $0x1a8] sm:$0xff]   ;;  %v12540_v50 = vld [vmem:[#allocation6 + $0x10] sm:$0xff]  }
 0x15c   : > { %v2830_v13 = vor.u32 %v2829_v23, %v2825_v37  ;;  %v2837_v29 = vshrl.u32 %v13826_v54, 16  ;;  %v3785_v23 = vshll.u32 %v13852_v56, 16 }
 0x15e   : > { %11634 = vmatpush3.bf16.msra.mxu1 %v12487_v51  ;;  %v2823_v51 = vsel %vm447_vm0, %v2818_v34, %v2822_v31  ;;  %v2839_v31 = vshll.u32 %v13826_v54, 16  ;;  %v10236_v34 = vld [vmem:[%s13211_s16 + $0x78] sm:$0xf] }
 0x15f   : > { %3173 = vmatmul.mubr.bf16.vlgmr.msra.gmra.mrb[80].mxu0 %v13689_v25  ;;  %10931 = vmatprep.subr.bf16.mxu1 %v12494_v15  ;;  %v2615_v25 = vrot.slane %v10128_v18, 1  ;;  %v12507_v15 = vld [vmem:[#allocation6 + $0x1d8] sm:$0xff]   ;;  %v12527_v18 = vld [vmem:[#allocation6 + $0x40] sm:$0xff]  }
 0x160   : > { %3180 = vmatprep.mubr.bf16.mxu0 %v2811_v14  ;;  %v12515_v14 = vld [vmem:[#allocation6 + $0x1e0] sm:$0xff]   ;;  %10851 = vmatprep.subr.bf16.mxu0 %v12527_v18  ;;  %v2841_v37 = vrot.slane %v2839_v31, 1 }
 0x161   : > { %11636 = vmatmul.mubr.bf16.vlgmr.msra.gmra.mrb[48].mxu1 %v2608_v9  ;;  %v2617_v8 = vsel %vm576_vm1, %v2615_v25, %v2616_v12  ;;  %v12528_v9 = vld [vmem:[#allocation6] sm:$0xff]   ;;  %v2623_v12 = vsel %vm576_vm1, %v2621_v52, %v2622_v20 }
 0x162   : > { %10932 = vmatpush3.bf16.msra.mxu1 %v12495_v2  ;;  %11639 = vmatprep.mubr.bf16.mxu1 %v2611_v27  ;;  %v12516_v2 = vld [vmem:[#allocation6 + $0x1a0] sm:$0xff]   ;;  %v2842_v32 = vor.u32 %v2841_v37, %v2837_v29  ;;  %v12542_v37 = vld [vmem:[#allocation6 + $0x18] sm:$0xff]  }
 0x163   : > { %10933 = vmatprep.subr.bf16.mxu1 %v12496_v30  ;;  %v2835_v30 = vsel %vm447_vm0, %v2830_v13, %v2834_v3  ;;  %10852 = vmatpush3.bf16.msra.mxu0 %v12528_v9  ;;  %v13844_v25 = vld [vmem:[%s13211_s16 + $0x7c] sm:$0xf]  ;;  %v2856_v3 = vshll.u32 %v13692_v43, 16  ;;  %v13871_v9 = vld [vmem:[%s13211_s16 + $0x8c] ss:$0 sps:$4 sm:$0x11]  }
 0x164   : > { %v13849_v42 = vcombine.low %v10236_v34, %v13844_v25  ;;  %v3797_v31 = vshll.u32 %v13871_v9, 16  ;;  %v12530_v34 = vld [vmem:[#allocation6 + $0x1b8] sm:$0xff]  }
 0x166   : > { %10934 = vmatpush3.bf16.msra.mxu1 %v12497_v47  ;;  %v13839_v47 = vcombine.low %v10142_v35, %v13681_v59  ;;  %v12534_v59 = vld [vmem:[#allocation6 + $0x48] sm:$0xff]   ;;  %v13864_v35 = vld [vmem:[%s13211_s16 + $0x88] sm:$0xf] }
 0x167   : > { %3181 = vmatmul.mubr.bf16.gmra.mrb[84].mxu0 %v13745_v1  ;;  %10935 = vmatprep.subr.bf16.mxu1 %v12505_v22  ;;  %v10131_v1 = vcombine.low %v10107_v19, %v13819_v11  ;;  %v2620_v22 = vsel %vm576_vm1, %v2618_v48, %v2619_v46  ;;  %v3787_v19 = vrot.slane %v3785_v23, 1  ;;  %v12538_v48 = vld [vmem:[#allocation6 + $0x50] sm:$0xff]  }
 0x168   : > { %3188 = vmatprep.mubr.bf16.mxu0 %v2823_v51  ;;  %v3778_v51 = vshrl.u32 %v13849_v42, 16  ;;  %10853 = vmatprep.subr.bf16.mxu0 %v12534_v59  ;;  %v2851_v28 = vshll.u32 %v13839_v47, 16  ;;  %v12526_v46 = vld [vmem:[#allocation6 + $0x1b0] sm:$0xff]   ;;  %v2849_v13 = vshrl.u32 %v13839_v47, 16  ;;  %v3799_v59 = vrot.slane %v3797_v31, 1 }
 0x169   : > { %11640 = vmatmul.mubr.bf16.gmra.mrb[52].mxu1 %v2614_v60  ;;  %v2624_v27 = vrot.slane %v10131_v1, 1  ;;  %v12535_v60 = vld [vmem:[#allocation6 + $0x8] sm:$0xff]   ;;  %v2847_v1 = vsel %vm447_vm0, %v2842_v32, %v2846_v44  ;;  %v12533_v44 = vld [vmem:[#allocation6 + $0x200] sm:$0xff]  }
 0x16a   : > { %10936 = vmatpush3.bf16.msra.mxu1 %v12506_v39  ;;  %11643 = vmatprep.mubr.bf16.mxu1 %v2617_v8  ;;  %v2625_v39 = vrot.slane %v13833_v26, 1  ;;  %v2853_v20 = vrot.slane %v2851_v28, 1  ;;  %v13910_v31 = vld [vmem:[%s13211_s16 + $0xa0] sm:$0xf] }
 0x16b   : > { %10937 = vmatprep.subr.bf16.mxu1 %v12507_v15  ;;  %v12525_v15 = vld [vmem:[#allocation6 + $0x1f0] sm:$0xff]   ;;  %10854 = vmatpush3.bf16.msra.mxu0 %v12535_v60 }
 0x16c   : > { %10855 = vmatprep.subr.bf16.mxu0 %v12538_v48  ;;  %v2626_v43 = vsel %vm576_vm1, %v2624_v27, %v2625_v39  ;;  %v2858_v27 = vrot.slane %v2856_v3, 1  ;;  %v2868_v39 = vshll.u32 %v13700_v55, 16  ;;  %v10076_v3 = vld [vmem:[%s13211_s16 + $0x60] sm:$0xf] }
 0x16e   : > { %10938 = vmatpush3.bf16.msra.mxu1 %v12508_v63  ;;  %v10238_v63 = vld [vmem:[%s13211_s16 + $0x84] sm:$0xf] }
 0x16f   : > { %3189 = vmatmul.mubr.bf16.gmra.mrb[88].mxu0 %v13760_v45  ;;  %10939 = vmatprep.subr.bf16.mxu1 %v12515_v14  ;;  %v3780_v45 = vshll.u32 %v13849_v42, 16  ;;  %v12529_v14 = vld [vmem:[#allocation6 + $0x1f8] sm:$0xff]   ;;  %v13868_v18 = vcombine.low %v10238_v63, %v13864_v35  ;;  %v12539_v63 = vld [vmem:[#allocation6 + $0x208] sm:$0xff]  }
 0x170   : > { %3196 = vmatprep.mubr.bf16.mxu0 %v2835_v30  ;;  %10856 = vmatpush3.bf16.msra.mxu0 %v12540_v50  ;;  %v12552_v50 = vld [vmem:[#allocation6 + $0x70] sm:$0xff]  }
 0x171   : > { %11644 = vmatmul.mubr.bf16.gmra.mrb[56].mxu1 %v2620_v22  ;;  %v3782_v8 = vrot.slane %v3780_v45, 1  ;;  %v3792_v29 = vshll.u32 %v13868_v18, 16  ;;  %v10146_v22 = vld [vmem:[%s13211_s16 + $0xc0] sm:$0xf]  ;;  %v13886_v45 = vld [vmem:[%s13211_s16 + $0x94] sm:$0xf] }
 0x172   : > { %10940 = vmatpush3.bf16.msra.mxu1 %v12516_v2  ;;  %11647 = vmatprep.mubr.bf16.mxu1 %v2623_v12  ;;  %v13874_v2 = vcombine.low %v10144_v36, %v13695_v40  ;;  %v2854_v40 = vor.u32 %v2853_v20, %v2849_v13  ;;  %v12545_v36 = vld [vmem:[#allocation6 + $0x60] sm:$0xff]  }
 0x173   : > { %10941 = vmatprep.subr.bf16.mxu1 %v12517_v17  ;;  %v3783_v52 = vor.u32 %v3782_v8, %v3778_v51  ;;  %v3790_v17 = vshrl.u32 %v13868_v18, 16  ;;  %v3794_v12 = vrot.slane %v3792_v29, 1  ;;  %v10240_v51 = vld [vmem:[%s13211_s16 + $0x90] sm:$0xf]  ;;  %v13897_v8 = vcombine.low %v10146_v22, %v13710_v38  ;;  %v10242_v29 = vld [vmem:[%s13211_s16 + $0x9c] sm:$0xf] }
 0x174   : > { %v2861_v23 = vshrl.u32 %v13874_v2, 16  ;;  %v13891_v28 = vcombine.low %v10240_v51, %v13886_v45  ;;  %v12547_v13 = vld [vmem:[#allocation6 + $0x20] sm:$0xff]  }
 0x175   : > { %v3788_v30 = vsel %vm447_vm0, %v3783_v52, %v3787_v19  ;;  %v3795_v32 = vor.u32 %v3794_v12, %v3790_v17  ;;  %v2859_v19 = vsel %vm447_vm0, %v2854_v40, %v2858_v27  ;;  %v12548_v52 = vld [vmem:[#allocation6 + $0x68] sm:$0xff]   ;;  %v2875_v17 = vshll.u32 %v13897_v8, 16 }
 0x176   : > { %10942 = vmatpush3.bf16.msra.mxu1 %v12518_v53  ;;  %v2863_v53 = vshll.u32 %v13874_v2, 16  ;;  %v3802_v48 = vshrl.u32 %v13891_v28, 16  ;;  %v13917_v40 = vld [vmem:[%s13211_s16 + $0xa4] ss:$0 sps:$4 sm:$0x11]   ;;  %v2880_v12 = vshll.u32 %v13716_v6, 16 }
 0x177   : > { %3197 = vmatmul.mubr.bf16.gmra.mrb[92].mxu0 %v13790_v61  ;;  %10943 = vmatprep.subr.bf16.mxu1 %v12525_v15  ;;  %v12541_v61 = vld [vmem:[#allocation6 + $0x58] sm:$0xff]   ;;  %v13894_v15 = vld [vmem:[%s13211_s16 + $0x98] ss:$0 sps:$4 sm:$0x11]   ;;  %v3800_v38 = vsel %vm447_vm0, %v3795_v32, %v3799_v59  ;;  %v2877_v27 = vrot.slane %v2875_v17, 1  ;;  %v12554_v32 = vld [vmem:[#allocation6 + $0x30] sm:$0xff]  }
 0x178   : > { %3204 = vmatprep.mubr.bf16.mxu0 %v2847_v1  ;;  %10857 = vmatprep.subr.bf16.mxu0 %v12541_v61  ;;  %v2865_v60 = vrot.slane %v2863_v53, 1  ;;  %v3809_v55 = vshll.u32 %v13894_v15, 16  ;;  %v13921_v61 = vcombine.low %v10076_v3, %v13720_v41  ;;  %v3821_v51 = vshll.u32 %v13917_v40, 16  ;;  %v13944_v3 = vld [vmem:[%s13211_s16 + $0xb0] ss:$0 sps:$4 sm:$0x11]  }
 0x179   : > { %11648 = vmatmul.mubr.bf16.gmra.mrb[60].mxu1 %v2626_v43  ;;  %10858 = vmatpush3.bf16.msra.mxu0 %v12542_v37  ;;  %v12546_v43 = vld [vmem:[#allocation6 + $0x210] sm:$0xff]   ;;  %v10080_v37 = vld [vmem:[%s13211_s16 + $0x78] sm:$0xf]  ;;  %v10246_v17 = vld [vmem:[%s13211_s16 + $0xb4] sm:$0xf] }
 0x17a   : > { %10944 = vmatpush3.bf16.msra.mxu1 %v12526_v46  ;;  %4161 = vmatprep.mubr.bf16.mxu1 %v3788_v30  ;;  %v3804_v46 = vshll.u32 %v13891_v28, 16  ;;  %v2866_v20 = vor.u32 %v2865_v60, %v2861_v23  ;;  %v12549_v30 = vld [vmem:[#allocation6 + $0x28] sm:$0xff]   ;;  %v12555_v23 = vld [vmem:[#allocation6 + $0x78] sm:$0xff]  }
 0x17b   : > { %10945 = vmatprep.subr.bf16.mxu1 %v12529_v14  ;;  %10859 = vmatprep.subr.bf16.mxu0 %v12545_v36  ;;  %v2870_v14 = vrot.slane %v2868_v39, 1  ;;  %v12553_v36 = vld [vmem:[#allocation6 + $0x218] sm:$0xff]   ;;  %v2882_v39 = vrot.slane %v2880_v12, 1 }
 0x17c   : > { %v3806_v1 = vrot.slane %v3804_v46, 1  ;;  %v13935_v46 = vcombine.low %v10080_v37, %v13740_v21  ;;  %v2476_v21 = vshrl.u32 %v13921_v61, 16  ;;  %v2495_v37 = vshll.u32 %v13750_v58, 16 }
 0x17d   : > { %10860 = vmatpush3.bf16.msra.mxu0 %v12547_v13  ;;  %v3823_v13 = vrot.slane %v3821_v51, 1 }
 0x17e   : > { %10946 = vmatpush3.bf16.msra.mxu1 %v12530_v34  ;;  %v3807_v22 = vor.u32 %v3806_v1, %v3802_v48  ;;  %10861 = vmatprep.subr.bf16.mxu0 %v12548_v52  ;;  %v13914_v34 = vcombine.low %v10242_v29, %v13910_v31  ;;  %v10244_v48 = vld [vmem:[%s13211_s16 + $0xa8] sm:$0xf]  ;;  %v10078_v1 = vld [vmem:[%s13211_s16 + $0x6c] sm:$0xf] }
 0x17f   : > { %3205 = vmatmul.mubr.bf16.gmra.mrb[96].mxu0 %v13826_v54  ;;  %11651 = vmatprep.subr.bf16.mxu1 %v12533_v44  ;;  %v3811_v54 = vrot.slane %v3809_v55, 1  ;;  %v13938_v55 = vld [vmem:[%s13211_s16 + $0xac] sm:$0xf]  ;;  %v13954_v29 = vcombine.low %v10078_v1, %v13730_v49  ;;  %v12563_v49 = vld [vmem:[#allocation6 + $0x228] sm:$0xff]  }
 0x180   : > { %3212 = vmatprep.mubr.bf16.mxu0 %v2859_v19  ;;  %v3814_v59 = vshrl.u32 %v13914_v34, 16  ;;  %v3816_v53 = vshll.u32 %v13914_v34, 16  ;;  %v12556_v19 = vld [vmem:[#allocation6 + $0x38] sm:$0xff]  }
 0x181   : > { %4162 = vmatmul.mubr.bf16.vlgmr.msra.gmra.mrb[64].mxu1 %v13849_v42  ;;  %v2873_v42 = vshrl.u32 %v13897_v8, 16  ;;  %10862 = vmatpush3.bf16.msra.mxu0 %v12549_v30  ;;  %v3812_v6 = vsel %vm447_vm0, %v3807_v22, %v3811_v54  ;;  %v3833_v30 = vshll.u32 %v13944_v3, 16  ;;  %v2502_v22 = vshll.u32 %v13935_v46, 16 }
 0x182   : > { %11652 = vmatpush3.bf16.msra.mxu1 %v12533_v44  ;;  %4169 = vmatprep.mubr.bf16.mxu1 %v3800_v38  ;;  %v2871_v44 = vsel %vm447_vm0, %v2866_v20, %v2870_v14  ;;  %v3818_v41 = vrot.slane %v3816_v53, 1  ;;  %v13941_v38 = vcombine.low %v10244_v48, %v13938_v55  ;;  %v10084_v53 = vld [vmem:[%s13211_s16 + $0x90] sm:$0xf]  ;;  %v2488_v58 = vshrl.u32 %v13954_v29, 16  ;;  %v13980_v48 = vld [vmem:[%s13211_s16 + $0xc4] sm:$0xf] }
 0x183   : > { %11653 = vmatprep.subr.bf16.mxu1 %v12539_v63  ;;  %10863 = vmatprep.subr.bf16.mxu0 %v12552_v50  ;;  %v2878_v60 = vor.u32 %v2877_v27, %v2873_v42  ;;  %v13957_v50 = vld [vmem:[%s13211_s16 + $0xb8] sm:$0xf]  ;;  %v10082_v42 = vld [vmem:[%s13211_s16 + $0x84] sm:$0xf] }
 0x184   : > { %v3826_v20 = vshrl.u32 %v13941_v38, 16  ;;  %v13987_v1 = vcombine.low %v10082_v42, %v13764_v5 }
 0x185   : > { %10864 = vmatpush3.bf16.msra.mxu0 %v12554_v32  ;;  %v2883_v52 = vsel %vm447_vm0, %v2878_v60, %v2882_v39  ;;  %v2490_v32 = vshll.u32 %v13954_v29, 16  ;;  %v12566_v60 = vld [vmem:[#allocation6 + $0x230] sm:$0xff]  }
 0x186   : > { %11654 = vmatpush3.bf16.msra.mxu1 %v12539_v63  ;;  %v2478_v63 = vshll.u32 %v13921_v61, 16  ;;  %10865 = vmatprep.subr.bf16.mxu0 %v12555_v23  ;;  %v10248_v23 = vld [vmem:[%s13211_s16 + $0xc0] sm:$0xf] }
 0x187   : > { %3213 = vmatmul.mubr.bf16.gmra.mrb[100].mxu0 %v13839_v47  ;;  %11655 = vmatprep.subr.bf16.mxu1 %v12546_v43  ;;  %v2483_v47 = vshll.u32 %v13727_v24, 16  ;;  %v12559_v24 = vld [vmem:[#allocation6 + $0x220] sm:$0xff]  }
 0x188   : > { %3220 = vmatprep.mubr.bf16.mxu0 %v2871_v44  ;;  %v2480_v14 = vrot.slane %v2478_v63, 1  ;;  %v13965_v44 = vcombine.low %v10246_v17, %v13957_v50  ;;  %v2504_v63 = vrot.slane %v2502_v22, 1 }
 0x189   : > { %4170 = vmatmul.mubr.bf16.gmra.mrb[68].mxu1 %v13868_v18  ;;  %v3819_v18 = vor.u32 %v3818_v41, %v3814_v59  ;;  %10866 = vmatpush3.bf16.msra.mxu0 %v12556_v19  ;;  %v2485_v54 = vrot.slane %v2483_v47, 1  ;;  %v13968_v59 = vld [vmem:[%s13211_s16 + $0xbc] ss:$0 sps:$4 sm:$0x11]   ;;  %v3835_v41 = vrot.slane %v3833_v30, 1  ;;  %v2507_v47 = vshll.u32 %v13753_v62, 16 }
 0x18a   : > { %4177 = vmatprep.mubr.bf16.mxu1 %v3812_v6  ;;  %11656 = vmatpush3.bf16.msra.mxu1 %v12546_v43  ;;  %v3828_v43 = vshll.u32 %v13941_v38, 16  ;;  %v3840_v51 = vshll.u32 %v13965_v44, 16  ;;  %v3845_v39 = vshll.u32 %v13968_v59, 16  ;;  %v13992_v30 = vcombine.low %v10084_v53, %v13778_v10  ;;  %v12569_v10 = vld [vmem:[#allocation6 + $0x238] sm:$0xff]  }
 0x18b   : > { %11657 = vmatprep.subr.bf16.mxu1 %v12553_v36  ;;  %v3824_v27 = vsel %vm447_vm0, %v3819_v18, %v3823_v13  ;;  %v2492_v18 = vrot.slane %v2490_v32, 1  ;;  %v2509_v62 = vrot.slane %v2507_v47, 1 }
 0x18c   : > { %v3830_v12 = vrot.slane %v3828_v43, 1  ;;  %v3842_v13 = vrot.slane %v3840_v51, 1  ;;  %v3847_v42 = vrot.slane %v3845_v39, 1  ;;  %v2514_v39 = vshll.u32 %v13987_v1, 16 }
 0x18e   : > { %11658 = vmatpush3.bf16.msra.mxu1 %v12553_v36  ;;  %v2481_v36 = vor.u32 %v2480_v14, %v2476_v21  ;;  %v3831_v6 = vor.u32 %v3830_v12, %v3826_v20  ;;  %v13984_v14 = vcombine.low %v10248_v23, %v13980_v48  ;;  %v2497_v12 = vrot.slane %v2495_v37, 1 }
 0x18f   : > { %3221 = vmatmul.mubr.bf16.gmra.mrb[104].mxu0 %v13874_v2  ;;  %11659 = vmatprep.subr.bf16.mxu1 %v12559_v24  ;;  %v2500_v2 = vshrl.u32 %v13935_v46, 16  ;;  %v2516_v47 = vrot.slane %v2514_v39, 1  ;;  %v3906_v39 = vrot.slane %v13852_v56, 1 }
 0x190   : > { %3228 = vmatprep.mubr.bf16.mxu0 %v2883_v52  ;;  %v2486_v22 = vsel %vm447_vm0, %v2481_v36, %v2485_v54  ;;  %v2493_v54 = vor.u32 %v2492_v18, %v2488_v58  ;;  %v3852_v37 = vshll.u32 %v13984_v14, 16  ;;  %v3850_v58 = vshrl.u32 %v13984_v14, 16 }
 0x191   : > { %4178 = vmatmul.mubr.bf16.gmra.mrb[72].mxu1 %v13891_v28  ;;  %v3838_v28 = vshrl.u32 %v13965_v44, 16  ;;  %v2505_v43 = vor.u32 %v2504_v63, %v2500_v2 }
 0x192   : > { %4185 = vmatprep.mubr.bf16.mxu1 %v3824_v27  ;;  %11660 = vmatpush3.bf16.msra.mxu1 %v12559_v24  ;;  %v10547_v19 = vpop.f32.mrb[0].mxu0  ;;  %v3836_v27 = vsel %vm447_vm0, %v3831_v6, %v3835_v41  ;;  %v14005_v6 = vld [vmem:[%s13211_s16 + $0xc8] ss:$0 sps:$4 sm:$0x11]  }
 0x193   : > { %11661 = vmatprep.subr.bf16.mxu1 %v12563_v49  ;;  %v10548_v21 = vpop.f32.mrb[1].mxu0  ;;  %v10627_v24 = vpop.f32.mrb[0].mxu1  ;;  %v14001_v2 = vsel %vm447_vm0, %v2505_v43, %v2509_v62  ;;  %v3843_v36 = vor.u32 %v3842_v13, %v3838_v28  ;;  %v14017_v28 = vld [vmem:[%s13211_s16 + $0xd0] sm:$0xf]  ;;  %v2498_v13 = vsel %vm447_vm0, %v2493_v54, %v2497_v12  ;;  %v3854_v62 = vrot.slane %v3852_v37, 1 }
 0x194   : > { %v13989_v52 = vadd.f32 %v10548_v21, %v10547_v19  ;;  %v10550_v20 = vpop.f32.mrb[2].mxu0  ;;  %v10628_v17 = vpop.f32.mrb[1].mxu1  ;;  %v2519_v19 = vshll.u32 %v13774_v4, 16  ;;  %v2524_v4 = vshrl.u32 %v13992_v30, 16  ;;  %v12578_v43 = vld [vmem:[#allocation8 + $0x40] sm:$0xff]  }
 0x195   : > { %v10551_v32 = vpop.f32.mrb[3].mxu0  ;;  %v13996_v51 = vadd.f32 %v10628_v17, %v10627_v24  ;;  %v10630_v5 = vpop.f32.mrb[2].mxu1  ;;  %v3848_v21 = vsel %vm447_vm0, %v3843_v36, %v3847_v42  ;;  %v10261_v12 = vld [vmem:[%s13211_s16 + $0x84] sm:$0xe]  ;;  %v3857_v42 = vshll.u32 %v14005_v6, 16 }
 0x196   : > { %11662 = vmatpush3.bf16.msra.mxu1 %v12563_v49  ;;  %v13998_v23 = vadd.f32 %v10551_v32, %v10550_v20  ;;  %v10631_v53 = vpop.f32.mrb[3].mxu1  ;;  %v2512_v49 = vshrl.u32 %v13987_v1, 16  ;;  %v2521_v18 = vrot.slane %v2519_v19, 1  ;;  %v10260_v20 = vld [vmem:[%s13211_s16 + $0x78] sm:$0xe]  ;;  %v2531_v32 = vshll.u32 %v13785_v16, 16 }
 0x197   : > { %3229 = vmatmul.mubr.bf16.gmra.mrb[108].mxu0 %v13897_v8  ;;  %11663 = vmatprep.subr.bf16.mxu1 %v12566_v60  ;;  %v14009_v41 = vadd.f32 %v10631_v53, %v10630_v5  ;;  %v10250_v8 = vld [vmem:[%s13211_s16 + $0xcc] sm:$0xf]  ;;  %v10284_v36 = vcombine.low %v10260_v20, %v13844_v25  ;;  %v12582_v19 = vld [vmem:[#allocation8 + $0x100] sm:$0xff]  }
 0x198   : > { %16634 = vst [vmem:[#allocation17_spill] sm:$0xff] %v13998_v23  ;;  %3510 = vmatprep.mubr.bf16.mxu0 %v2486_v22  ;;  %v14040_v16 = vcombine.low %v10250_v8, %v14017_v28  ;;  %v2533_v56 = vrot.slane %v2531_v32, 1  ;;  %v12584_v20 = vld [vmem:[#allocation8 + $0xc0] sm:$0xff]   ;;  %11011 = vmatprep.subr.bf16.mxu0 %v12582_v19 }
 0x199   : > { %16635 = vst [vmem:[#allocation18_spill] sm:$0xff] %v14009_v41  ;;  %4186 = vmatmul.mubr.bf16.gmra.mrb[76].mxu1 %v13914_v34  ;;  %v2526_v34 = vshll.u32 %v13992_v30, 16  ;;  %v10088_v41 = vld [vmem:[%s13211_s16 + $0xa8] sm:$0xf]  ;;  %v10090_v8 = vld [vmem:[%s13211_s16 + $0xb4] sm:$0xf] }
 0x19a   : > { %4193 = vmatprep.mubr.bf16.mxu1 %v3836_v27  ;;  %11664 = vmatpush3.bf16.msra.mxu1 %v12566_v60  ;;  %v10553_v63 = vpop.f32.mrb[4].mxu0  ;;  %v2517_v27 = vor.u32 %v2516_v47, %v2512_v49 }
 0x19b   : > { %v10554_v24 = vpop.f32.mrb[5].mxu0  ;;  %11665 = vmatprep.subr.bf16.mxu1 %v12569_v10  ;;  %v10633_v60 = vpop.f32.mrb[4].mxu1  ;;  %v2528_v54 = vrot.slane %v2526_v34, 1  ;;  %v10285_v34 = vcombine.low %v10261_v12, %v13864_v35 }
 0x19c   : > { %v14024_v17 = vadd.f32 %v10554_v24, %v10553_v63  ;;  %v10556_v22 = vpop.f32.mrb[6].mxu0  ;;  %v10634_v5 = vpop.f32.mrb[5].mxu1  ;;  %v14037_v49 = vsel %vm447_vm0, %v2517_v27, %v2521_v18  ;;  %v3905_v24 = vrot.slane %v10284_v36, 1  ;;  %v3909_v18 = vrot.slane %v13871_v9, 1 }
 0x19d   : > { %v10557_v53 = vpop.f32.mrb[7].mxu0  ;;  %v14032_v23 = vadd.f32 %v10634_v5, %v10633_v60  ;;  %v10636_v37 = vpop.f32.mrb[6].mxu1  ;;  %v2529_v25 = vor.u32 %v2528_v54, %v2524_v4  ;;  %v3908_v4 = vrot.slane %v10285_v34, 1  ;;  %v12586_v54 = vld [vmem:[#allocation8 + $0x108] sm:$0xff]  }
 0x19e   : > { %v14034_v63 = vadd.f32 %v10557_v53, %v10556_v22  ;;  %11666 = vmatpush3.bf16.msra.mxu1 %v12569_v10  ;;  %v10637_v47 = vpop.f32.mrb[7].mxu1  ;;  %v14048_v10 = vcombine.low %v10088_v41, %v13808_v7  ;;  %v14056_v35 = vsel %vm576_vm1, %v3905_v24, %v3906_v39  ;;  %v3859_v22 = vrot.slane %v3857_v42, 1 }
 0x19f   : > { %3511 = vmatmul.mubr.bf16.vlgmr.msra.gmra.mrb[112].mxu0 %v13921_v61  ;;  %11091 = vmatprep.subr.bf16.mxu1 %v12578_v43  ;;  %v14044_v60 = vadd.f32 %v10637_v47, %v10636_v37  ;;  %v14053_v61 = vsel %vm447_vm0, %v2529_v25, %v2533_v56  ;;  %v3855_v43 = vor.u32 %v3854_v62, %v3850_v58  ;;  %v3864_v7 = vshll.u32 %v14040_v16, 16 }
 0x1a0   : > { %3518 = vmatprep.mubr.bf16.mxu0 %v2498_v13  ;;  %11012 = vmatpush3.bf16.msra.mxu0 %v12584_v20  ;;  %v14059_v13 = vld [vmem:[%s13211_s16 + $0xd4] ss:$0 sps:$4 sm:$0x11]   ;;  %v14063_v27 = vsel %vm576_vm1, %v3908_v4, %v3909_v18  ;;  %v2548_v53 = vshrl.u32 %v14048_v10, 16  ;;  %v2550_v62 = vshll.u32 %v14048_v10, 16  ;;  %v2555_v42 = vshll.u32 %v13814_v57, 16 }
 0x1a1   : > { %4194 = vmatmul.mubr.bf16.gmra.mrb[80].mxu1 %v13941_v38  ;;  %v10086_v38 = vld [vmem:[%s13211_s16 + $0x9c] sm:$0xf]  ;;  %v3862_v37 = vshrl.u32 %v14040_v16, 16  ;;  %v3869_v47 = vshll.u32 %v14059_v13, 16  ;;  %11013 = vmatprep.subr.bf16.mxu0 %v12586_v54  ;;  %v3866_v24 = vrot.slane %v3864_v7, 1 }
 0x1a2   : > { %4201 = vmatprep.mubr.bf16.mxu1 %v3848_v21  ;;  %v10559_v9 = vpop.f32.mrb[8].mxu0  ;;  %v14070_v21 = vcombine.low %v10090_v8, %v13819_v11  ;;  %v3860_v11 = vsel %vm447_vm0, %v3855_v43, %v3859_v22  ;;  %v2552_v34 = vrot.slane %v2550_v62, 1  ;;  %v2557_v20 = vrot.slane %v2555_v42, 1  ;;  %v12588_v43 = vld [vmem:[#allocation8 + $0xc8] sm:$0xff]  }
 0x1a3   : > { %v10560_v41 = vpop.f32.mrb[9].mxu0  ;;  %v10639_v32 = vpop.f32.mrb[8].mxu1  ;;  %v14083_v57 = vcombine.low %v10086_v38, %v13796_v0  ;;  %v3871_v22 = vrot.slane %v3869_v47, 1  ;;  %v2543_v42 = vshll.u32 %v13801_v33, 16 }
 0x1a4   : > { %v14066_v12 = vadd.f32 %v10560_v41, %v10559_v9  ;;  %v10562_v5 = vpop.f32.mrb[10].mxu0  ;;  %v10640_v36 = vpop.f32.mrb[9].mxu1  ;;  %v2553_v8 = vor.u32 %v2552_v34, %v2548_v53  ;;  %v2560_v4 = vshrl.u32 %v14070_v21, 16  ;;  %v2562_v9 = vshll.u32 %v14070_v21, 16  ;;  %11014 = vmatpush3.bf16.msra.mxu0 %v12588_v43 }
 0x1a5   : > { %v10563_v58 = vpop.f32.mrb[11].mxu0  ;;  %v14074_v39 = vadd.f32 %v10640_v36, %v10639_v32  ;;  %v10642_v19 = vpop.f32.mrb[10].mxu1  ;;  %v3867_v41 = vor.u32 %v3866_v24, %v3862_v37  ;;  %v2536_v36 = vshrl.u32 %v14083_v57, 16  ;;  %v2538_v62 = vshll.u32 %v14083_v57, 16 }
 0x1a6   : > { %v14078_v25 = vadd.f32 %v10563_v58, %v10562_v5  ;;  %v10643_v56 = vpop.f32.mrb[11].mxu1  ;;  %v14093_v38 = vsel %vm447_vm0, %v2553_v8, %v2557_v20  ;;  %v2564_v32 = vrot.slane %v2562_v9, 1  ;;  %v3912_v20 = vrot.slane %v13894_v15, 1  ;;  %v10262_v9 = vld [vmem:[%s13211_s16 + $0x90] sm:$0xe] }
 0x1a7   : > { %3519 = vmatmul.mubr.bf16.gmra.mrb[116].mxu0 %v13954_v29  ;;  %v14085_v18 = vadd.f32 %v10643_v56, %v10642_v19  ;;  %v2567_v29 = vshll.u32 %v13833_v26, 16  ;;  %v3872_v34 = vsel %vm447_vm0, %v3867_v41, %v3871_v22 }
 0x1a8   : > { %3526 = vmatprep.mubr.bf16.mxu0 %v14001_v2  ;;  %v2565_v19 = vor.u32 %v2564_v32, %v2560_v4 }
 0x1a9   : > { %4202 = vmatmul.mubr.bf16.gmra.mrb[84].mxu1 %v13965_v44  ;;  %v2569_v2 = vrot.slane %v2567_v29, 1  ;;  %v12590_v44 = vld [vmem:[#allocation8 + $0x110] sm:$0xff]   ;;  %v12594_v29 = vld [vmem:[#allocation8 + $0x118] sm:$0xff]  }
 0x1aa   : > { %4209 = vmatprep.mubr.bf16.mxu1 %v3860_v11  ;;  %v10565_v7 = vpop.f32.mrb[12].mxu0  ;;  %11015 = vmatprep.subr.bf16.mxu0 %v12590_v44  ;;  %v12592_v11 = vld [vmem:[#allocation8 + $0xd0] sm:$0xff]  }
 0x1ab   : > { %v10566_v0 = vpop.f32.mrb[13].mxu0  ;;  %v10645_v5 = vpop.f32.mrb[12].mxu1  ;;  %v14108_v8 = vsel %vm447_vm0, %v2565_v19, %v2569_v2  ;;  %11016 = vmatpush3.bf16.msra.mxu0 %v12592_v11  ;;  %v14131_v19 = vld [vmem:[%s13211_s16 + $0xa8] sm:$0xe]  ;;  %v12598_v11 = vld [vmem:[#allocation8 + $0x120] sm:$0xff]  }
 0x1ac   : > { %v14095_v53 = vadd.f32 %v10566_v0, %v10565_v7  ;;  %v10568_v54 = vpop.f32.mrb[14].mxu0  ;;  %v10646_v26 = vpop.f32.mrb[13].mxu1  ;;  %11017 = vmatprep.subr.bf16.mxu0 %v12594_v29 }
 0x1ad   : > { %v10569_v58 = vpop.f32.mrb[15].mxu0  ;;  %v14100_v37 = vadd.f32 %v10646_v26, %v10645_v5  ;;  %v10648_v47 = vpop.f32.mrb[14].mxu1  ;;  %v2545_v5 = vrot.slane %v2543_v42, 1 }
 0x1ae   : > { %v14102_v56 = vadd.f32 %v10569_v58, %v10568_v54  ;;  %v10649_v24 = vpop.f32.mrb[15].mxu1  ;;  %v10286_v54 = vcombine.low %v10262_v9, %v13886_v45 }
 0x1af   : > { %3527 = vmatmul.mubr.bf16.gmra.mrb[120].mxu0 %v13935_v46  ;;  %v14110_v33 = vadd.f32 %v10649_v24, %v10648_v47  ;;  %v2540_v46 = vrot.slane %v2538_v62, 1  ;;  %v14128_v62 = vld [vmem:[%s13211_s16 + $0x9c] sm:$0xe] }
 0x1b0   : > { %3534 = vmatprep.mubr.bf16.mxu0 %v14037_v49 }
 0x1b1   : > { %4210 = vmatmul.mubr.bf16.gmra.mrb[88].mxu1 %v13984_v14  ;;  %v12596_v14 = vld [vmem:[#allocation8 + $0xd8] sm:$0xff]   ;;  %v2541_v58 = vor.u32 %v2540_v46, %v2536_v36 }
 0x1b2   : > { %4217 = vmatprep.mubr.bf16.mxu1 %v3872_v34  ;;  %v10571_v4 = vpop.f32.mrb[16].mxu0  ;;  %11018 = vmatpush3.bf16.msra.mxu0 %v12596_v14 }
 0x1b3   : > { %v10572_v43 = vpop.f32.mrb[17].mxu0  ;;  %v10651_v7 = vpop.f32.mrb[16].mxu1  ;;  %11019 = vmatprep.subr.bf16.mxu0 %v12598_v11  ;;  %v2546_v36 = vsel %vm447_vm0, %v2541_v58, %v2545_v5  ;;  %v3915_v5 = vrot.slane %v13917_v40, 1  ;;  %v12952_v58 = vmov 0   ;;  %v12587_v40 = vld [vmem:[#allocation8 + $0x58] sm:$0xff]  }
 0x1b4   : > { %v14115_v22 = vadd.f32 %v10572_v43, %v10571_v4  ;;  %v10574_v15 = vpop.f32.mrb[18].mxu0  ;;  %v10652_v41 = vpop.f32.mrb[17].mxu1  ;;  %v14136_v4 = vld [vmem:[#allocation8] sm:$0xff]   ;;  %301 = vst [vmem:[#allocation2 + $0x8] sm:$0xff] %v12952_v58  ;;  %308 = vst [vmem:[#allocation2 + $0x18] sm:$0xff] %v12952_v58  ;;  %v14201_v11 = vrot.slane %v12952_v58, 1 }
 0x1b5   : > { %v10575_v0 = vpop.f32.mrb[19].mxu0  ;;  %v14117_v32 = vadd.f32 %v10652_v41, %v10651_v7  ;;  %v10654_v49 = vpop.f32.mrb[18].mxu1  ;;  %v10288_v7 = vcombine.low %v14131_v19, %v13938_v55  ;;  %v14156_v55 = vld [vmem:[%s13211_s16 + $0xb4] sm:$0xe]  ;;  %309 = vst [vmem:[#allocation2 + $0x30] sm:$0xff] %v12952_v58  ;;  %310 = vst [vmem:[#allocation2 + $0x48] sm:$0xff] %v12952_v58 }
 0x1b6   : > { %v14119_v2 = vadd.f32 %v10575_v0, %v10574_v15  ;;  %v10655_v44 = vpop.f32.mrb[19].mxu1  ;;  %v12602_v15 = vld [vmem:[#allocation8 + $0x128] sm:$0xff]   ;;  %311 = vst [vmem:[#allocation2 + $0x60] sm:$0xff] %v12952_v58  ;;  %312 = vst [vmem:[#allocation2 + $0x78] sm:$0xff] %v12952_v58 }
 0x1b7   : > { %3535 = vmatmul.mubr.bf16.gmra.mrb[124].mxu0 %v13987_v1  ;;  %v14123_v26 = vadd.f32 %v10655_v44, %v10654_v49  ;;  %v3911_v1 = vrot.slane %v10286_v54, 1  ;;  %v12580_v49 = vld [vmem:[#allocation8 + $0x48] sm:$0xff]   ;;  %v14158_v54 = vld [vmem:[#allocation8 + $0x50] sm:$0xff]   ;;  %313 = vst [vmem:[#allocation2 + $0x90] sm:$0xff] %v12952_v58  ;;  %314 = vst [vmem:[#allocation2 + $0xa8] sm:$0xff] %v12952_v58 }
 0x1b8   : > { %3542 = vmatprep.mubr.bf16.mxu0 %v14053_v61  ;;  %v12600_v61 = vld [vmem:[#allocation8 + $0xe0] sm:$0xff]   ;;  %v14151_v44 = vld [vmem:[#allocation8 + $0x8] sm:$0xff]   ;;  %315 = vst [vmem:[#allocation2 + $0xc0] sm:$0xff] %v12952_v58  ;;  %316 = vst [vmem:[#allocation2 + $0xd8] sm:$0xff] %v12952_v58 }
 0x1b9   : > { %4218 = vmatmul.mubr.bf16.gmra.mrb[92].mxu1 %v14040_v16  ;;  %11020 = vmatpush3.bf16.msra.mxu0 %v12600_v61  ;;  %v3913_v0 = vsel %vm576_vm1, %v3911_v1, %v3912_v20  ;;  %317 = vst [vmem:[#allocation2 + $0xf0] sm:$0xff] %v12952_v58  ;;  %318 = vst [vmem:[#allocation2 + $0x108] sm:$0xff] %v12952_v58  ;;  %v3917_v20 = vrot.slane %v10288_v7, 1  ;;  %v10266_v19 = vld [vmem:[%s13211_s16 + $0xc0] sm:$0xe]  ;;  %v10289_v7 = vcombine.low %v14156_v55, %v13957_v50  ;;  %v12609_v50 = vld [vmem:[#allocation8 + $0xf8] sm:$0xff]  }
 0x1ba   : > { %11667 = vmatprep.mubr.bf16.mxu1 %v14056_v35  ;;  %v10577_v47 = vpop.f32.mrb[20].mxu0  ;;  %v10287_v35 = vcombine.low %v14128_v62, %v13910_v31  ;;  %11021 = vmatprep.subr.bf16.mxu0 %v12602_v15  ;;  %v12604_v31 = vld [vmem:[#allocation8 + $0xe8] sm:$0xff]   ;;  %319 = vst [vmem:[#allocation2 + $0x120] sm:$0xff] %v12952_v58  ;;  %320 = vst [vmem:[#allocation2 + $0x138] sm:$0xff] %v12952_v58  ;;  %v3918_v62 = vrot.slane %v13944_v3, 1  ;;  %v12606_v1 = vld [vmem:[#allocation8 + $0x130] sm:$0xff]  }
 0x1bb   : > { %v10578_v42 = vpop.f32.mrb[21].mxu0  ;;  %v10657_v24 = vpop.f32.mrb[20].mxu1  ;;  %321 = vst [vmem:[#allocation2 + $0x150] sm:$0xff] %v12952_v58  ;;  %322 = vst [vmem:[#allocation2 + $0x168] sm:$0xff] %v12952_v58  ;;  %v12607_v61 = vld [vmem:[#allocation8 + $0xf0] sm:$0xff]   ;;  %v3921_v55 = vrot.slane %v13968_v59, 1 }
 0x1bc   : > { %v14134_v45 = vadd.f32 %v10578_v42, %v10577_v47  ;;  %v10580_v34 = vpop.f32.mrb[22].mxu0  ;;  %v10658_v16 = vpop.f32.mrb[21].mxu1  ;;  %323 = vst [vmem:[#allocation2 + $0x180] sm:$0xff] %v12952_v58  ;;  %326 = vst [vmem:[#allocation2 + $0x28] sm:$0xff] %v12952_v58  ;;  %v12585_v15 = vld [vmem:[#allocation8 + $0x10] sm:$0xff]  }
 0x1bd   : > { %v10581_v9 = vpop.f32.mrb[23].mxu0  ;;  %v14139_v29 = vadd.f32 %v10658_v16, %v10657_v24  ;;  %v10660_v43 = vpop.f32.mrb[22].mxu1  ;;  %327 = vst [vmem:[#allocation2 + $0x40] sm:$0xff] %v12952_v58  ;;  %328 = vst [vmem:[#allocation2 + $0x58] sm:$0xff] %v12952_v58  ;;  %11022 = vmatpush3.bf16.msra.mxu0 %v12604_v31 }
 0x1be   : > { %v14143_v46 = vadd.f32 %v10581_v9, %v10580_v34  ;;  %v10661_v41 = vpop.f32.mrb[23].mxu1  ;;  %329 = vst [vmem:[#allocation2 + $0x70] sm:$0xff] %v12952_v58  ;;  %330 = vst [vmem:[#allocation2 + $0x88] sm:$0xff] %v12952_v58  ;;  %11023 = vmatprep.subr.bf16.mxu0 %v12606_v1  ;;  %v12608_v9 = vld [vmem:[#allocation8 + $0x138] sm:$0xff]  }
 0x1bf   : > { %3543 = vmatmul.mubr.bf16.gmra.mrb[128].mxu0 %v13992_v30  ;;  %v14149_v14 = vadd.f32 %v10661_v41, %v10660_v43  ;;  %331 = vst [vmem:[#allocation2 + $0xa0] sm:$0xff] %v12952_v58  ;;  %332 = vst [vmem:[#allocation2 + $0xb8] sm:$0xff] %v12952_v58  ;;  %v3914_v30 = vrot.slane %v10287_v35, 1 }
 0x1c0   : > { %3550 = vmatprep.mubr.bf16.mxu0 %v2546_v36  ;;  %333 = vst [vmem:[#allocation2 + $0xd0] sm:$0xff] %v12952_v58  ;;  %334 = vst [vmem:[#allocation2 + $0xe8] sm:$0xff] %v12952_v58 }
 0x1c1   : > { %11668 = vmatmul.mubr.bf16.vlgmr.msra.gmra.mrb[48].mxu1 %v14063_v27  ;;  %335 = vst [vmem:[#allocation2 + $0x100] sm:$0xff] %v12952_v58  ;;  %336 = vst [vmem:[#allocation2 + $0x118] sm:$0xff] %v12952_v58  ;;  %11024 = vmatpush3.bf16.msra.mxu0 %v12607_v61 }
 0x1c2   : > { %337 = vst [vmem:[#allocation2 + $0x130] sm:$0xff] %v12952_v58  ;;  %338 = vst [vmem:[#allocation2 + $0x148] sm:$0xff] %v12952_v58  ;;  %11671 = vmatprep.mubr.bf16.mxu1 %v3913_v0  ;;  %v10583_v27 = vpop.f32.mrb[24].mxu0  ;;  %11092 = vmatpush3.bf16.msra.mxu1 %v14136_v4  ;;  %v3916_v4 = vsel %vm576_vm1, %v3914_v30, %v3915_v5  ;;  %v3919_v0 = vsel %vm576_vm1, %v3917_v20, %v3918_v62  ;;  %v10267_v30 = vld [vmem:[%s13211_s16 + $0xcc] sm:$0xe]  ;;  %v3924_v20 = vrot.slane %v14005_v6, 1 }
 0x1c3   : > { %339 = vst [vmem:[#allocation2 + $0x160] sm:$0xff] %v12952_v58  ;;  %340 = vst [vmem:[#allocation2 + $0x178] sm:$0xff] %v12952_v58  ;;  %v10584_v47 = vpop.f32.mrb[25].mxu0  ;;  %11093 = vmatprep.subr.bf16.mxu1 %v12580_v49  ;;  %v10663_v42 = vpop.f32.mrb[24].mxu1  ;;  %v10290_v49 = vcombine.low %v10266_v19, %v13980_v48  ;;  %11025 = vmatprep.subr.bf16.mxu0 %v12608_v9  ;;  %v12589_v48 = vld [vmem:[#allocation8 + $0x18] sm:$0xff]   ;;  %v4521_v62 = vshrl.u32 %v14201_v11, 16  ;;  %v10291_v59 = vcombine.low %v10267_v30, %v14017_v28 }
 0x1c4   : > { %341 = vst [vmem:[#allocation2 + $0x190] sm:$0xff] %v12952_v58  ;;  %307 = vst [vmem:[#allocation2] sm:$0xff] %v12952_v58  ;;  %v14203_v24 = vadd.f32 %v10584_v47, %v10583_v27  ;;  %v10586_v34 = vpop.f32.mrb[26].mxu0  ;;  %v10664_v16 = vpop.f32.mrb[25].mxu1  ;;  %v12593_v9 = vld [vmem:[#allocation8 + $0x20] sm:$0xff]   ;;  %v4524_v28 = vshll.u32 %v14201_v11, 16 }
 0x1c5   : > { %324 = vst [vmem:[#allocation2 + $0x198] sm:$0xff] %v12952_v58  ;;  %325 = vst [vmem:[#allocation2 + $0x10] sm:$0xff] %v12952_v58  ;;  %v10587_v36 = vpop.f32.mrb[27].mxu0  ;;  %v14205_v3 = vadd.f32 %v10664_v16, %v10663_v42  ;;  %v10666_v43 = vpop.f32.mrb[26].mxu1  ;;  %v3923_v27 = vrot.slane %v10290_v49, 1  ;;  %11026 = vmatpush3.bf16.msra.mxu0 %v12609_v50  ;;  %v3927_v49 = vrot.slane %v14059_v13, 1 }
 0x1c6   : > { %342 = vst [vmem:[#allocation2 + $0x1a8] sm:$0xff] %v12952_v58  ;;  %v14210_v35 = vadd.f32 %v10587_v36, %v10586_v34  ;;  %11094 = vmatpush3.bf16.msra.mxu1 %v14151_v44  ;;  %v10667_v41 = vpop.f32.mrb[27].mxu1  ;;  %v14222_v44 = vld [vmem:[#allocation8 + $0x140] sm:$0xff]   ;;  %v12597_v50 = vld [vmem:[#allocation8 + $0x28] sm:$0xff]  }
 0x1c7   : > { %3551 = vmatmul.mubr.bf16.gmra.mrb[132].mxu0 %v14083_v57  ;;  %11095 = vmatprep.subr.bf16.mxu1 %v14158_v54  ;;  %v14219_v31 = vadd.f32 %v10667_v41, %v10666_v43  ;;  %v3920_v57 = vrot.slane %v10289_v7, 1  ;;  %v12595_v7 = vld [vmem:[#allocation8 + $0x68] sm:$0xff]  }
 0x1c8   : > { %3558 = vmatprep.mubr.bf16.mxu0 %v14093_v38  ;;  %v12591_v38 = vld [vmem:[#allocation8 + $0x60] sm:$0xff]   ;;  %11683 = vmatprep.subr.bf16.mxu0 %v14222_v44 }
 0x1c9   : > { %11672 = vmatmul.mubr.bf16.gmra.mrb[52].mxu1 %v3916_v4  ;;  %v3922_v6 = vsel %vm576_vm1, %v3920_v57, %v3921_v55  ;;  %v3925_v4 = vsel %vm576_vm1, %v3923_v27, %v3924_v20  ;;  %v12601_v20 = vld [vmem:[#allocation8 + $0x30] sm:$0xff]  }
 0x1ca   : > { %v10589_v5 = vpop.f32.mrb[28].mxu0  ;;  %11675 = vmatprep.mubr.bf16.mxu1 %v3919_v0  ;;  %11096 = vmatpush3.bf16.msra.mxu1 %v12585_v15  ;;  %v4523_v15 = vrot.slane %v4521_v62, 7  ;;  %v3926_v0 = vrot.slane %v10291_v59, 1  ;;  %v12605_v59 = vld [vmem:[#allocation8 + $0x38] sm:$0xff]  }
 0x1cb   : > { %v10590_v54 = vpop.f32.mrb[29].mxu0  ;;  %11097 = vmatprep.subr.bf16.mxu1 %v12587_v40  ;;  %v10669_v19 = vpop.f32.mrb[28].mxu1  ;;  %v4388_v30 = vld [vmem:[#allocation2] sm:$0x80] }
 0x1cc   : > { %v14228_v47 = vadd.f32 %v10590_v54, %v10589_v5  ;;  %v10592_v1 = vpop.f32.mrb[30].mxu0  ;;  %v10670_v42 = vpop.f32.mrb[29].mxu1  ;;  %v4526_v55 = vor.u32 %v4524_v28, %v4523_v15  ;;  %v3928_v27 = vsel %vm576_vm1, %v3926_v0, %v3927_v49 }
 0x1cd   : > { %v10593_v34 = vpop.f32.mrb[31].mxu0  ;;  %v14232_v61 = vadd.f32 %v10670_v42, %v10669_v19  ;;  %v10672_v16 = vpop.f32.mrb[30].mxu1  ;;  %v4510_v19 = vshrl.u32 %v4388_v30, 16  ;;  %v16637_v42 = vld [vmem:[#allocation18_spill] sm:$0xff] }
 0x1ce   : > { %v14235_v36 = vadd.f32 %v10593_v34, %v10592_v1  ;;  %11098 = vmatpush3.bf16.msra.mxu1 %v12589_v48  ;;  %v10673_v43 = vpop.f32.mrb[31].mxu1 }
 0x1cf   : > { %3559 = vmatmul.mubr.bf16.gmra.mrb[136].mxu0 %v14048_v10  ;;  %11099 = vmatprep.subr.bf16.mxu1 %v12591_v38  ;;  %v14240_v41 = vadd.f32 %v10673_v43, %v10672_v16  ;;  %v12599_v10 = vld [vmem:[#allocation8 + $0x70] sm:$0xff]   ;;  %v4512_v16 = vrot.slane %v4510_v19, 7 }
 0x1d0   : > { %3566 = vmatprep.mubr.bf16.mxu0 %v14108_v8 }
 0x1d1   : > { %11676 = vmatmul.mubr.bf16.gmra.mrb[56].mxu1 %v3922_v6 }
 0x1d2   : > { %v11509_v40 = vpop.f32.mrb[32].mxu0  ;;  %11679 = vmatprep.mubr.bf16.mxu1 %v3925_v4  ;;  %11100 = vmatpush3.bf16.msra.mxu1 %v12593_v9 }
 0x1d3   : > { %v1255_v5 = vadd.f32 %v11509_v40, %v14024_v17  ;;  %v1246_v57 = vpop.f32.mrb[33].mxu0  ;;  %11101 = vmatprep.subr.bf16.mxu1 %v12595_v7  ;;  %v16636_v17 = vld [vmem:[#allocation17_spill] sm:$0xff] }
 0x1d4   : > { %v1247_v11 = vadd.f32 %v13989_v52, %v1246_v57  ;;  %v11510_v48 = vpop.f32.mrb[34].mxu0  ;;  %v4513_v52 = vrot.slane %v12952_v58, 7 }
 0x1d5   : > { %v14247_v8 = vadd.f32 %v14032_v23, %v1255_v5  ;;  %v1258_v13 = vadd.f32 %v11510_v48, %v14034_v63  ;;  %v1249_v54 = vpop.f32.mrb[35].mxu0  ;;  %v12603_v23 = vld [vmem:[#allocation8 + $0x78] sm:$0xff]   ;;  %v4527_v63 = vsel %vm4508_vm2, %v4523_v15, %v4526_v55 }
 0x1d6   : > { %v14252_v38 = vadd.f32 %v13996_v51, %v1247_v11  ;;  %v1250_v62 = vadd.f32 %v16636_v17, %v1249_v54  ;;  %11102 = vmatpush3.bf16.msra.mxu1 %v12597_v50  ;;  %v4515_v28 = vsel %vm4508_vm2, %v4512_v16, %v4513_v52  ;;  %v4829_v11 = vld [vmem:[#allocation2 + $0x18] sm:$0x80]  ;;  %v4392_v54 = vld [vmem:[#allocation2 + $0x30] sm:$0x80]  ;;  %v14313_v17 = vld [vmem:[#allocation9] ss:$0 sm:$0xff] }
 0x1d7   : > { %v14257_v1 = vadd.f32 %v14044_v60, %v1258_v13  ;;  %3567 = vmatmul.mubr.bf16.gmra.mrb[140].mxu0 %v14070_v21  ;;  %11103 = vmatprep.subr.bf16.mxu1 %v12599_v10  ;;  %v4390_v48 = vld [vmem:[#allocation2 + $0x18] sm:$0x80]  ;;  %v4950_v52 = vshrl.u32 %v4829_v11, 16  ;;  %v4572_v16 = vshrl.u32 %v4392_v54, 16 }
 0x1d8   : > { %v14262_v34 = vadd.f32 %v16637_v42, %v1250_v62 }
 0x1d9   : > { %11680 = vmatmul.mubr.bf16.gmra.mrb[60].mxu1 %v3928_v27 }
 0x1da   : > { %v11513_v51 = vpop.f32.mrb[36].mxu0  ;;  %11104 = vmatpush3.bf16.msra.mxu1 %v12601_v20  ;;  %5784 = vmatprep.mubr.bf16.mxu1 %v4527_v63 }
 0x1db   : > { %v1271_v58 = vadd.f32 %v11513_v51, %v14095_v53  ;;  %v1262_v6 = vpop.f32.mrb[37].mxu0  ;;  %11105 = vmatprep.subr.bf16.mxu1 %v12603_v23  ;;  %v12626_v23 = vld [vmem:[#allocation8 + $0x100] sm:$0xff]  }
 0x1dc   : > { %v1263_v60 = vadd.f32 %v14066_v12, %v1262_v6  ;;  %v11514_v21 = vpop.f32.mrb[38].mxu0  ;;  %v12627_v6 = vld [vmem:[#allocation8 + $0xc0] sm:$0xff]  }
 0x1dd   : > { %v14267_v9 = vadd.f32 %v14100_v37, %v1271_v58  ;;  %v1274_v43 = vadd.f32 %v11514_v21, %v14102_v56  ;;  %v1265_v4 = vpop.f32.mrb[39].mxu0  ;;  %v4833_v58 = vld [vmem:[#allocation2 + $0x48] sm:$0x80] }
 0x1de   : > { %v14271_v7 = vadd.f32 %v14074_v39, %v1263_v60  ;;  %v1266_v15 = vadd.f32 %v14078_v25, %v1265_v4  ;;  %11106 = vmatpush3.bf16.msra.mxu1 %v12605_v59  ;;  %v14318_v4 = vrot.slane %v4950_v52, 7  ;;  %v4837_v52 = vld [vmem:[#allocation2 + $0x78] sm:$0x80] }
 0x1df   : > { %v14276_v53 = vadd.f32 %v14110_v33, %v1274_v43  ;;  %11251 = vmatprep.subr.bf16.mxu1 %v12626_v23 }
 0x1e0   : > { %v14279_v12 = vadd.f32 %v14085_v18, %v1266_v15 }
 0x1e1   : > { %5785 = vmatmul.mubr.bf16.vlgmr.msra.gmra.mrb[96].mxu1 %v4515_v28  ;;  %v5012_v28 = vshrl.u32 %v4833_v58, 16 }
 0x1e2   : > { %v11517_v37 = vpop.f32.mrb[40].mxu0  ;;  %11252 = vmatpush3.bf16.msra.mxu1 %v12627_v6 }
 0x1e3   : > { %v1287_v0 = vadd.f32 %v11517_v37, %v14134_v45  ;;  %v1278_v56 = vpop.f32.mrb[41].mxu0  ;;  %v4394_v37 = vld [vmem:[#allocation2 + $0x48] sm:$0x80] }
 0x1e4   : > { %v1279_v49 = vadd.f32 %v14115_v22, %v1278_v56  ;;  %v11518_v39 = vpop.f32.mrb[42].mxu0  ;;  %v4603_v54 = vshrl.u32 %v4394_v37, 16 }
 0x1e5   : > { %v14284_v40 = vadd.f32 %v14139_v29, %v1287_v0  ;;  %v1290_v25 = vadd.f32 %v11518_v39, %v14143_v46  ;;  %v1281_v50 = vpop.f32.mrb[43].mxu0 }
 0x1e6   : > { %v14288_v33 = vadd.f32 %v14117_v32, %v1279_v49  ;;  %v1282_v18 = vadd.f32 %v14119_v2, %v1281_v50 }
 0x1e7   : > { %v14292_v10 = vadd.f32 %v14149_v14, %v1290_v25  ;;  %v14327_v25 = vrot.slane %v4572_v16, 7  ;;  %v4398_v16 = vld [vmem:[#allocation2 + $0x78] sm:$0x80] }
 0x1e8   : > { %v14295_v45 = vadd.f32 %v14123_v26, %v1282_v18 }
 0x1ea   : > { %v11521_v5 = vpop.f32.mrb[44].mxu0 }
 0x1eb   : > { %v1303_v22 = vadd.f32 %v11521_v5, %v14228_v47  ;;  %v1294_v57 = vpop.f32.mrb[45].mxu0  ;;  %v4835_v5 = vld [vmem:[#allocation2 + $0x60] sm:$0x80] }
 0x1ec   : > { %v1295_v29 = vadd.f32 %v14203_v24, %v1294_v57  ;;  %v11522_v55 = vpop.f32.mrb[46].mxu0 }
 0x1ed   : > { %v14300_v46 = vadd.f32 %v14232_v61, %v1303_v22  ;;  %v1306_v32 = vadd.f32 %v11522_v55, %v14235_v36  ;;  %v1297_v30 = vpop.f32.mrb[47].mxu0  ;;  %v4831_v61 = vld [vmem:[#allocation2 + $0x30] sm:$0x80]  ;;  %v4396_v22 = vld [vmem:[#allocation2 + $0x60] sm:$0x80] }
 0x1ee   : > { %v14304_v2 = vadd.f32 %v14205_v3, %v1295_v29  ;;  %v1298_v14 = vadd.f32 %v14210_v35, %v1297_v30  ;;  %v4981_v59 = vshrl.u32 %v4831_v61, 16 }
 0x1ef   : > { %v14308_v26 = vadd.f32 %v14240_v41, %v1306_v32 }
 0x1f0   : > { %v14311_v47 = vadd.f32 %v14219_v31, %v1298_v14  ;;  %v4541_v31 = vshrl.u32 %v4390_v48, 16  ;;  %v14325_v39 = vrot.slane %v4981_v59, 7  ;;  %v12631_v14 = vld [vmem:[#allocation8 + $0x108] sm:$0xff]   ;;  %v14343_v59 = vrot.slane %v4603_v54, 7 }
 0x1f1   : > { %11253 = vmatprep.subr.bf16.mxu1 %v12631_v14 }
 0x1f2   : > { %v10707_v24 = vpop.f32.mrb[48].mxu0 }
 0x1f3   : > { %v10708_v13 = vpop.f32.mrb[49].mxu0 }
 0x1f4   : > { %v11573_v27 = vpop.f32.mrb[32].mxu1  ;;  %v10709_v36 = vadd.f32 %v10708_v13, %v10707_v24  ;;  %v10710_v20 = vpop.f32.mrb[50].mxu0  ;;  %v14332_v24 = vrot.slane %v5012_v28, 7 }
 0x1f5   : > { %v2236_v3 = vpop.f32.mrb[33].mxu1  ;;  %v10711_v62 = vpop.f32.mrb[51].mxu0 }
 0x1f6   : > { %v11881_v35 = vadd.f32 %v10709_v36, %v14252_v38  ;;  %v11574_v41 = vpop.f32.mrb[34].mxu1  ;;  %v10712_v19 = vadd.f32 %v10711_v62, %v10710_v20  ;;  %v14320_v38 = vrot.slane %v4541_v31, 7  ;;  %v12633_v36 = vld [vmem:[#allocation8 + $0xc8] sm:$0xff]   ;;  %v5043_v20 = vshrl.u32 %v4835_v5, 16 }
 0x1f7   : > { %v2239_v63 = vpop.f32.mrb[35].mxu1  ;;  %11254 = vmatpush3.bf16.msra.mxu1 %v12633_v36  ;;  %v4665_v5 = vshrl.u32 %v4398_v16, 16 }
 0x1f8   : > { %v11882_v42 = vadd.f32 %v11881_v35, %v2236_v3  ;;  %v11889_v51 = vadd.f32 %v10712_v19, %v14262_v34  ;;  %v4634_v3 = vshrl.u32 %v4396_v22, 16 }
 0x1fa   : > { %v2321_v60 = vadd.f32 %v11882_v42, %v14313_v17  ;;  %v11890_v21 = vadd.f32 %v11889_v51, %v2239_v63  ;;  %v10713_v43 = vpop.f32.mrb[52].mxu0 }
 0x1fb   : > { %v10714_v15 = vpop.f32.mrb[53].mxu0 }
 0x1fc   : > { %v2322_v0 = vadd.f32 %v11890_v21, %v14313_v17  ;;  %v14323_v34 = vpop.f32.mrb[36].mxu1  ;;  %v10715_v56 = vadd.f32 %v10714_v15, %v10713_v43  ;;  %v10716_v49 = vpop.f32.mrb[54].mxu0  ;;  %v2337_v57 = vmax.f32 %v2321_v60, 0.0  ;;  %v5074_v60 = vshrl.u32 %v4837_v52, 16 }
 0x1fd   : > { %v2252_v50 = vpop.f32.mrb[37].mxu1  ;;  %v10717_v18 = vpop.f32.mrb[55].mxu0 }
 0x1fe   : > { %v2338_v29 = vmax.f32 %v2322_v0, 0.0  ;;  %v11877_v55 = vadd.f32 %v10715_v56, %v14247_v8  ;;  %v14330_v32 = vpop.f32.mrb[38].mxu1  ;;  %v10718_v30 = vadd.f32 %v10717_v18, %v10716_v49  ;;  %v12637_v0 = vld [vmem:[#allocation8 + $0x110] sm:$0xff]  }
 0x1ff   : > { %v2255_v11 = vpop.f32.mrb[39].mxu1  ;;  %11255 = vmatprep.subr.bf16.mxu1 %v12637_v0 }
 0x200   : > { %v14334_v48 = vpack.c.bf16 %v2338_v29, %v2337_v57  ;;  %v11878_v13 = vadd.f32 %v11877_v55, %v11573_v27  ;;  %v11885_v61 = vadd.f32 %v10718_v30, %v14257_v1  ;;  %v12639_v30 = vld [vmem:[#allocation8 + $0xd0] sm:$0xff]  }
 0x201   : > { %11256 = vmatpush3.bf16.msra.mxu1 %v12639_v30 }
 0x202   : > { %v2323_v62 = vadd.f32 %v11878_v13, %v14313_v17  ;;  %v11886_v8 = vadd.f32 %v11885_v61, %v11574_v41  ;;  %v10719_v35 = vpop.f32.mrb[56].mxu0  ;;  %v4854_v19 = vshll.u32 %v14334_v48, 16  ;;  %v4857_v23 = vshrl.u32 %v14334_v48, 16 }
 0x203   : > { %v10720_v31 = vpop.f32.mrb[57].mxu0  ;;  %v14357_v13 = vrot.slane %v4634_v3, 7  ;;  %v14359_v61 = vrot.slane %v5074_v60, 7 }
 0x204   : > { %v2324_v27 = vadd.f32 %v11886_v8, %v14313_v17  ;;  %v14341_v63 = vpop.f32.mrb[40].mxu1  ;;  %v10721_v1 = vadd.f32 %v10720_v31, %v10719_v35  ;;  %v10722_v42 = vpop.f32.mrb[58].mxu0  ;;  %v4856_v51 = vrot.slane %v4854_v19, 1  ;;  %v2339_v58 = vmax.f32 %v2323_v62, 0.0 }
 0x205   : > { %v14345_v41 = vpop.f32.mrb[41].mxu1  ;;  %v10723_v6 = vpop.f32.mrb[59].mxu0  ;;  %v4953_v18 = vrot.slane %v4857_v23, 7  ;;  %v14367_v31 = vrot.slane %v4665_v5, 7  ;;  %v12643_v5 = vld [vmem:[#allocation8 + $0x118] sm:$0xff]  }
 0x206   : > { %v2340_v21 = vmax.f32 %v2324_v27, 0.0  ;;  %v11897_v43 = vadd.f32 %v10721_v1, %v14271_v7  ;;  %v14348_v15 = vpop.f32.mrb[42].mxu1  ;;  %v10724_v28 = vadd.f32 %v10723_v6, %v10722_v42  ;;  %v4859_v37 = vor.u32 %v4857_v23, %v4856_v51  ;;  %v14369_v23 = vld [vmem:[#allocation2 + $0x90] sm:$0x80]  ;;  %11257 = vmatprep.subr.bf16.mxu1 %v12643_v5 }
 0x207   : > { %v14350_v56 = vpop.f32.mrb[43].mxu1  ;;  %v4957_v49 = vshrl.u32 %v4856_v51, 16  ;;  %v14355_v7 = vrot.slane %v5043_v20, 7  ;;  %v4954_v20 = vor.u32 %v4953_v18, %v4854_v19  ;;  %v12611_v18 = vld [vmem:[#allocation8 + $0x148] sm:$0xff]  }
 0x208   : > { %v14352_v22 = vpack.c.bf16 %v2340_v21, %v2339_v58  ;;  %v11898_v57 = vadd.f32 %v11897_v43, %v2252_v50  ;;  %v11905_v29 = vadd.f32 %v10724_v28, %v14279_v12  ;;  %v4961_v55 = vshrl.u32 %v4859_v37, 16  ;;  %v14364_v12 = vld [vmem:[#allocation2 + $0x90] sm:$0x80]  ;;  %v14374_v58 = vld [vmem:[#allocation2 + $0xa8] sm:$0x80] }
 0x209   : > { %v4964_v14 = vshll.u32 %v4859_v37, 16  ;;  %v4959_v52 = vrot.slane %v4957_v49, 7 }
 0x20a   : > { %2363 = vst [vmem:[#allocation2 + $0x38] sm:$0xff] %v14352_v22  ;;  %v2325_v54 = vadd.f32 %v11898_v57, %v14313_v17  ;;  %v11906_v36 = vadd.f32 %v11905_v29, %v2255_v11  ;;  %v10725_v62 = vpop.f32.mrb[60].mxu0  ;;  %v4963_v8 = vrot.slane %v4961_v55, 7  ;;  %v4861_v50 = vshll.u32 %v14352_v22, 16 }
 0x20b   : > { %v10726_v35 = vpop.f32.mrb[61].mxu0  ;;  %v4864_v3 = vshrl.u32 %v14352_v22, 16  ;;  %v4955_v29 = vsel %vm4508_vm2, %v14318_v4, %v4954_v20  ;;  %v4546_v55 = vsel %vm4508_vm2, %v14320_v38, %v4954_v20  ;;  %v12612_v38 = vld [vmem:[#allocation8 + $0x150] sm:$0xff]   ;;  %v4843_v20 = vld [vmem:[#allocation2 + $0xc0] sm:$0x80] }
 0x20c   : > { %v2341_v27 = vmax.f32 %v2325_v54, 0.0  ;;  %v2326_v1 = vadd.f32 %v11906_v36, %v14313_v17  ;;  %v14372_v11 = vpop.f32.mrb[44].mxu1  ;;  %v10727_v42 = vadd.f32 %v10726_v35, %v10725_v62  ;;  %v10728_v51 = vpop.f32.mrb[62].mxu0  ;;  %v4966_v16 = vor.u32 %v4964_v14, %v4963_v8  ;;  %v14394_v8 = vld [vmem:[#allocation2 + $0xa8] sm:$0x80]  ;;  %v12645_v35 = vld [vmem:[#allocation8 + $0xd8] sm:$0xff]  }
 0x20d   : > { %v14376_v6 = vpop.f32.mrb[45].mxu1  ;;  %v10729_v60 = vpop.f32.mrb[63].mxu0  ;;  %v4863_v19 = vrot.slane %v4861_v50, 1  ;;  %v4984_v21 = vrot.slane %v4864_v3, 7  ;;  %v4696_v62 = vshrl.u32 %v14369_v23, 16  ;;  %11258 = vmatpush3.bf16.msra.mxu1 %v12645_v35 }
 0x20e   : > { %v2342_v43 = vmax.f32 %v2326_v1, 0.0  ;;  %v11893_v28 = vadd.f32 %v10727_v42, %v14267_v9  ;;  %v14379_v37 = vpop.f32.mrb[46].mxu1  ;;  %v10730_v0 = vadd.f32 %v10729_v60, %v10728_v51  ;;  %v4967_v49 = vsel %vm4508_vm2, %v4959_v52, %v4966_v16 }
 0x20f   : > { %v14382_v57 = vpop.f32.mrb[47].mxu1  ;;  %5446 = vmatprep.mubr.bf16.mxu0 %v4967_v49  ;;  %5792 = vmatprep.mubr.bf16.mxu1 %v4967_v49  ;;  %v4866_v30 = vor.u32 %v4864_v3, %v4863_v19  ;;  %v5105_v9 = vshrl.u32 %v14364_v12, 16  ;;  %v4988_v4 = vshrl.u32 %v4863_v19, 16  ;;  %v4985_v1 = vor.u32 %v4984_v21, %v4861_v50 }
 0x210   : > { %v14389_v14 = vpack.c.bf16 %v2342_v43, %v2341_v27  ;;  %v11894_v54 = vadd.f32 %v11893_v28, %v14323_v34  ;;  %v11901_v36 = vadd.f32 %v10730_v0, %v14276_v53  ;;  %5447 = vmatmul.mubr.bf16.vlgmr.msra.gmra.mrb[144].mxu0 %v4955_v29  ;;  %5793 = vmatmul.mubr.bf16.gmra.mrb[100].mxu1 %v4546_v55  ;;  %v5136_v12 = vshrl.u32 %v14374_v58, 16 }
 0x211   : > { %v4992_v52 = vshrl.u32 %v4866_v30, 16  ;;  %11684 = vmatpush3.bf16.msra.mxu0 %v14222_v44  ;;  %v4995_v42 = vshll.u32 %v4866_v30, 16  ;;  %v4727_v51 = vshrl.u32 %v14394_v8, 16  ;;  %v5167_v21 = vshrl.u32 %v4843_v20, 16 }
 0x212   : > { %2364 = vst [vmem:[#allocation2 + $0x50] sm:$0xff] %v14389_v14  ;;  %v2327_v53 = vadd.f32 %v11894_v54, %v14313_v17  ;;  %v11902_v34 = vadd.f32 %v11901_v36, %v14330_v32  ;;  %v10731_v3 = vpop.f32.mrb[64].mxu0  ;;  %v4868_v23 = vshll.u32 %v14389_v14, 16  ;;  %11685 = vmatprep.subr.bf16.mxu0 %v12611_v18  ;;  %v4871_v44 = vshrl.u32 %v14389_v14, 16 }
 0x213   : > { %v10732_v27 = vpop.f32.mrb[65].mxu0  ;;  %v4994_v50 = vrot.slane %v4992_v52, 7  ;;  %v4990_v28 = vrot.slane %v4988_v4, 7  ;;  %v4986_v49 = vsel %vm4508_vm2, %v14325_v39, %v4985_v1  ;;  %v4577_v36 = vsel %vm4508_vm2, %v14327_v25, %v4985_v1  ;;  %v12613_v52 = vld [vmem:[#allocation8 + $0x158] sm:$0xff]  }
 0x214   : > { %v2328_v16 = vadd.f32 %v11902_v34, %v14313_v17  ;;  %v10733_v58 = vadd.f32 %v10732_v27, %v10731_v3  ;;  %v10734_v60 = vpop.f32.mrb[66].mxu0  ;;  %v4870_v19 = vrot.slane %v4868_v23, 1  ;;  %v2343_v43 = vmax.f32 %v2327_v53, 0.0 }
 0x215   : > { %v10735_v32 = vpop.f32.mrb[67].mxu0  ;;  %v4997_v0 = vor.u32 %v4995_v42, %v4994_v50  ;;  %11686 = vmatpush3.bf16.msra.mxu0 %v12611_v18  ;;  %v5015_v35 = vrot.slane %v4871_v44, 7  ;;  %v14415_v53 = vrot.slane %v5105_v9, 7  ;;  %v14417_v34 = vrot.slane %v4696_v62, 7  ;;  %v12614_v50 = vld [vmem:[#allocation8 + $0x160] sm:$0xff]  }
 0x216   : > { %v2344_v5 = vmax.f32 %v2328_v16, 0.0  ;;  %v11913_v29 = vadd.f32 %v10733_v58, %v14288_v33  ;;  %v10736_v55 = vadd.f32 %v10735_v32, %v10734_v60  ;;  %v4873_v30 = vor.u32 %v4871_v44, %v4870_v19  ;;  %11687 = vmatprep.subr.bf16.mxu0 %v12612_v38  ;;  %v14430_v16 = vld [vmem:[#allocation2 + $0x28] sm:$0x1]  ;;  %v14433_v32 = vld [vmem:[#allocation2 + $0x40] sm:$0x1] }
 0x217   : > { %v4998_v54 = vsel %vm4508_vm2, %v4990_v28, %v4997_v0  ;;  %v5019_v8 = vshrl.u32 %v4870_v19, 16  ;;  %v14419_v25 = vrot.slane %v5136_v12, 7  ;;  %v5016_v44 = vor.u32 %v5015_v35, %v4868_v23 }
 0x218   : > { %v14411_v4 = vpack.c.bf16 %v2344_v5, %v2343_v43  ;;  %v11914_v20 = vadd.f32 %v11913_v29, %v14345_v41  ;;  %v11921_v39 = vadd.f32 %v10736_v55, %v14295_v45  ;;  %5454 = vmatprep.mubr.bf16.mxu0 %v4998_v54  ;;  %5800 = vmatprep.mubr.bf16.mxu1 %v4998_v54  ;;  %v5023_v33 = vshrl.u32 %v4873_v30, 16  ;;  %v14439_v55 = vld [vmem:[#allocation2 + $0x70] sm:$0x1] }
 0x219   : > { %5455 = vmatmul.mubr.bf16.gmra.mrb[148].mxu0 %v4986_v49  ;;  %5801 = vmatmul.mubr.bf16.gmra.mrb[104].mxu1 %v4577_v36  ;;  %v5026_v18 = vshll.u32 %v4873_v30, 16  ;;  %v14426_v62 = vrot.slane %v4727_v51, 7  ;;  %v14428_v12 = vrot.slane %v5167_v21, 7  ;;  %v5021_v19 = vrot.slane %v5019_v8, 7  ;;  %v12615_v8 = vld [vmem:[#allocation8 + $0x168] sm:$0xff]  }
 0x21a   : > { %2365 = vst [vmem:[#allocation2 + $0x68] sm:$0xff] %v14411_v4  ;;  %v2329_v1 = vadd.f32 %v11914_v20, %v14313_v17  ;;  %v11922_v41 = vadd.f32 %v11921_v39, %v14350_v56  ;;  %v10737_v3 = vpop.f32.mrb[68].mxu0  ;;  %v5025_v45 = vrot.slane %v5023_v33, 7  ;;  %v4875_v27 = vshll.u32 %v14411_v4, 16  ;;  %11688 = vmatpush3.bf16.msra.mxu0 %v12612_v38  ;;  %v14435_v38 = vld [vmem:[#allocation2 + $0x58] sm:$0x1] }
 0x21b   : > { %v10738_v42 = vpop.f32.mrb[69].mxu0  ;;  %v4878_v9 = vshrl.u32 %v14411_v4, 16  ;;  %11689 = vmatprep.subr.bf16.mxu0 %v12613_v52  ;;  %v5017_v30 = vsel %vm4508_vm2, %v14332_v24, %v5016_v44  ;;  %v4926_v35 = vrot.slane %v14430_v16, 1  ;;  %v12649_v20 = vld [vmem:[#allocation8 + $0x120] sm:$0xff]   ;;  %v14539_v16 = vrot.slane %v14352_v22, 1 }
 0x21c   : > { %v2330_v58 = vadd.f32 %v11922_v41, %v14313_v17  ;;  %v10739_v56 = vadd.f32 %v10738_v42, %v10737_v3  ;;  %v10740_v60 = vpop.f32.mrb[70].mxu0  ;;  %v5028_v43 = vor.u32 %v5026_v18, %v5025_v45  ;;  %v2345_v23 = vmax.f32 %v2329_v1, 0.0  ;;  %v12651_v18 = vld [vmem:[#allocation8 + $0xe0] sm:$0xff]   ;;  %11259 = vmatprep.subr.bf16.mxu1 %v12649_v20  ;;  %v14464_v20 = vld [vmem:[#allocation2 + $0xb8] sm:$0x1] }
 0x21d   : > { %v10741_v28 = vpop.f32.mrb[71].mxu0  ;;  %v4877_v0 = vrot.slane %v4875_v27, 1  ;;  %v5046_v49 = vrot.slane %v4878_v9, 7  ;;  %v4929_v1 = vrot.slane %v14433_v32, 1  ;;  %v4932_v41 = vrot.slane %v14435_v38, 1  ;;  %11260 = vmatpush3.bf16.msra.mxu1 %v12651_v18 }
 0x21e   : > { %v2346_v51 = vmax.f32 %v2330_v58, 0.0  ;;  %v11909_v21 = vadd.f32 %v10739_v56, %v14284_v40  ;;  %v10742_v5 = vadd.f32 %v10741_v28, %v10740_v60  ;;  %v5029_v29 = vsel %vm4508_vm2, %v5021_v19, %v5028_v43  ;;  %11690 = vmatpush3.bf16.msra.mxu0 %v12613_v52  ;;  %v12616_v19 = vld [vmem:[#allocation8 + $0x170] sm:$0xff]  }
 0x21f   : > { %5462 = vmatprep.mubr.bf16.mxu0 %v5029_v29  ;;  %5808 = vmatprep.mubr.bf16.mxu1 %v5029_v29  ;;  %v4880_v54 = vor.u32 %v4878_v9, %v4877_v0  ;;  %v5050_v36 = vshrl.u32 %v4877_v0, 16  ;;  %v4608_v52 = vsel %vm4508_vm2, %v14343_v59, %v5016_v44  ;;  %v4935_v3 = vrot.slane %v14439_v55, 1 }
 0x220   : > { %v14444_v39 = vpack.c.bf16 %v2346_v51, %v2345_v23  ;;  %v11910_v40 = vadd.f32 %v11909_v21, %v14341_v63  ;;  %v11917_v33 = vadd.f32 %v10742_v5, %v14292_v10  ;;  %11691 = vmatprep.subr.bf16.mxu0 %v12614_v50  ;;  %v5047_v42 = vor.u32 %v5046_v49, %v4875_v27  ;;  %v14459_v27 = vld [vmem:[#allocation2 + $0x88] sm:$0x1] }
 0x221   : > { %5463 = vmatmul.mubr.bf16.gmra.mrb[152].mxu0 %v5017_v30  ;;  %5809 = vmatmul.mubr.bf16.gmra.mrb[108].mxu1 %v4608_v52  ;;  %v5054_v24 = vshrl.u32 %v4880_v54, 16  ;;  %v5052_v9 = vrot.slane %v5050_v36, 7  ;;  %v5057_v56 = vshll.u32 %v4880_v54, 16  ;;  %v12617_v54 = vld [vmem:[#allocation8 + $0x178] sm:$0xff]   ;;  %v14462_v36 = vld [vmem:[#allocation2 + $0xa0] sm:$0x1] }
 0x222   : > { %2366 = vst [vmem:[#allocation2 + $0x80] sm:$0xff] %v14444_v39  ;;  %v2331_v63 = vadd.f32 %v11910_v40, %v14313_v17  ;;  %v11918_v10 = vadd.f32 %v11917_v33, %v14348_v15  ;;  %v10743_v45 = vpop.f32.mrb[72].mxu0  ;;  %v4882_v59 = vshll.u32 %v14444_v39, 16  ;;  %11692 = vmatpush3.bf16.msra.mxu0 %v12614_v50  ;;  %v4885_v60 = vshrl.u32 %v14444_v39, 16 }
 0x223   : > { %v10744_v44 = vpop.f32.mrb[73].mxu0  ;;  %v5056_v58 = vrot.slane %v5054_v24, 7  ;;  %11693 = vmatprep.subr.bf16.mxu0 %v12615_v8  ;;  %v5048_v33 = vsel %vm4508_vm2, %v14355_v7, %v5047_v42  ;;  %v4639_v52 = vsel %vm4508_vm2, %v14357_v13, %v5047_v42  ;;  %v12652_v24 = vld [vmem:[#allocation8 + $0x128] sm:$0xff]   ;;  %v4938_v13 = vrot.slane %v14459_v27, 1 }
 0x224   : > { %v2347_v43 = vmax.f32 %v2331_v63, 0.0  ;;  %v2332_v23 = vadd.f32 %v11918_v10, %v14313_v17  ;;  %v10745_v28 = vadd.f32 %v10744_v44, %v10743_v45  ;;  %v10746_v15 = vpop.f32.mrb[74].mxu0  ;;  %v4884_v0 = vrot.slane %v4882_v59, 1  ;;  %v14475_v45 = vld [vmem:[#allocation2 + $0xd0] sm:$0x1]  ;;  %v12653_v44 = vld [vmem:[#allocation8 + $0xe8] sm:$0xff]   ;;  %11261 = vmatprep.subr.bf16.mxu1 %v12652_v24 }
 0x225   : > { %v10747_v49 = vpop.f32.mrb[75].mxu0  ;;  %v5059_v50 = vor.u32 %v5057_v56, %v5056_v58  ;;  %v5077_v51 = vrot.slane %v4885_v60, 7  ;;  %v14478_v42 = vld [vmem:[#allocation2 + $0x28] sm:$0x1]  ;;  %11262 = vmatpush3.bf16.msra.mxu1 %v12653_v44 }
 0x226   : > { %v2348_v21 = vmax.f32 %v2332_v23, 0.0  ;;  %v11929_v5 = vadd.f32 %v10745_v28, %v14304_v2  ;;  %v10748_v29 = vadd.f32 %v10747_v49, %v10746_v15  ;;  %v4887_v30 = vor.u32 %v4885_v60, %v4884_v0  ;;  %11694 = vmatpush3.bf16.msra.mxu0 %v12615_v8  ;;  %v14484_v28 = vld [vmem:[#allocation8 + $0x80] sm:$0xff]  }
 0x227   : > { %v5060_v40 = vsel %vm4508_vm2, %v5052_v9, %v5059_v50  ;;  %v5081_v18 = vshrl.u32 %v4884_v0, 16  ;;  %11695 = vmatprep.subr.bf16.mxu0 %v12616_v19  ;;  %v5078_v23 = vor.u32 %v5077_v51, %v4882_v59  ;;  %v4941_v15 = vrot.slane %v14462_v36, 1 }
 0x228   : > { %v14471_v2 = vpack.c.bf16 %v2348_v21, %v2347_v43  ;;  %v11930_v8 = vadd.f32 %v11929_v5, %v14376_v6  ;;  %v11937_v63 = vadd.f32 %v10748_v29, %v14311_v47  ;;  %5470 = vmatprep.mubr.bf16.mxu0 %v5060_v40  ;;  %5816 = vmatprep.mubr.bf16.mxu1 %v5060_v40  ;;  %v5085_v10 = vshrl.u32 %v4887_v30, 16 }
 0x229   : > { %5471 = vmatmul.mubr.bf16.gmra.mrb[156].mxu0 %v5048_v33  ;;  %5817 = vmatmul.mubr.bf16.gmra.mrb[112].mxu1 %v4639_v52  ;;  %v5088_v7 = vshll.u32 %v4887_v30, 16  ;;  %v5083_v43 = vrot.slane %v5081_v18, 7  ;;  %v4944_v0 = vrot.slane %v14464_v20, 1  ;;  %v4947_v51 = vrot.slane %v14475_v45, 1 }
 0x22a   : > { %2367 = vst [vmem:[#allocation2 + $0x98] sm:$0xff] %v14471_v2  ;;  %v2333_v9 = vadd.f32 %v11930_v8, %v14313_v17  ;;  %v11938_v6 = vadd.f32 %v11937_v63, %v14382_v57  ;;  %v10749_v47 = vpop.f32.mrb[76].mxu0  ;;  %v5087_v58 = vrot.slane %v5085_v10, 7  ;;  %v4889_v56 = vshll.u32 %v14471_v2, 16  ;;  %11696 = vmatpush3.bf16.msra.mxu0 %v12616_v19  ;;  %v14490_v19 = vld [vmem:[#allocation2 + $0x40] sm:$0x1] }
 0x22b   : > { %v10750_v60 = vpop.f32.mrb[77].mxu0  ;;  %11697 = vmatprep.subr.bf16.mxu0 %v12617_v54  ;;  %v4892_v5 = vshrl.u32 %v14471_v2, 16  ;;  %v4488_v40 = vrot.slane %v14478_v42, 1  ;;  %v5079_v8 = vsel %vm4508_vm2, %v14359_v61, %v5078_v23  ;;  %v4670_v63 = vsel %vm4508_vm2, %v14367_v31, %v5078_v23 }
 0x22c   : > { %v2334_v49 = vadd.f32 %v11938_v6, %v14313_v17  ;;  %v10751_v57 = vadd.f32 %v10750_v60, %v10749_v47  ;;  %v10752_v50 = vpop.f32.mrb[78].mxu0  ;;  %v5090_v21 = vor.u32 %v5088_v7, %v5087_v58  ;;  %v2349_v29 = vmax.f32 %v2333_v9, 0.0  ;;  %v12654_v7 = vld [vmem:[#allocation8 + $0x130] sm:$0xff]  }
 0x22d   : > { %v10753_v30 = vpop.f32.mrb[79].mxu0  ;;  %v4891_v59 = vrot.slane %v4889_v56, 1  ;;  %v4491_v44 = vrot.slane %v14490_v19, 1  ;;  %v5108_v47 = vrot.slane %v4892_v5, 7  ;;  %v4404_v60 = vld [vmem:[#allocation2 + $0x10] sm:$0x1]  ;;  %11263 = vmatprep.subr.bf16.mxu1 %v12654_v7 }
 0x22e   : > { %v2350_v33 = vmax.f32 %v2334_v49, 0.0  ;;  %v11925_v52 = vadd.f32 %v10751_v57, %v14300_v46  ;;  %v10754_v18 = vadd.f32 %v10753_v30, %v10752_v50  ;;  %v5091_v24 = vsel %vm4508_vm2, %v5083_v43, %v5090_v21  ;;  %11698 = vmatpush3.bf16.msra.mxu0 %v12617_v54  ;;  %v12655_v54 = vld [vmem:[#allocation8 + $0xf0] sm:$0xff]  }
 0x22f   : > { %5478 = vmatprep.mubr.bf16.mxu0 %v5091_v24  ;;  %5824 = vmatprep.mubr.bf16.mxu1 %v5091_v24  ;;  %v4894_v10 = vor.u32 %v4892_v5, %v4891_v59  ;;  %v5112_v61 = vshrl.u32 %v4891_v59, 16  ;;  %v12722_v24 = vld [vmem:[#allocation2 + $0x8] sm:$0xff] }
 0x230   : > { %v14501_v9 = vpack.c.bf16 %v2350_v33, %v2349_v29  ;;  %v11926_v46 = vadd.f32 %v11925_v52, %v14372_v11  ;;  %v11933_v6 = vadd.f32 %v10754_v18, %v14308_v26  ;;  %11715 = vmatprep.subr.bf16.mxu0 %v14484_v28  ;;  %v14511_v26 = vrot.slane %v14334_v48, 1  ;;  %11264 = vmatpush3.bf16.msra.mxu1 %v12655_v54  ;;  %v14517_v33 = vld [vmem:[#allocation2 + $0x58] sm:$0x1]  ;;  %v14521_v54 = vld [vmem:[#allocation2 + $0x70] sm:$0x1] }
 0x231   : > { %5479 = vmatmul.mubr.bf16.gmra.mrb[160].mxu0 %v5079_v8  ;;  %5825 = vmatmul.mubr.bf16.gmra.mrb[116].mxu1 %v4670_v63  ;;  %v5116_v58 = vshrl.u32 %v4894_v10, 16  ;;  %v5119_v57 = vshll.u32 %v4894_v10, 16  ;;  %v5109_v29 = vor.u32 %v5108_v47, %v4889_v56  ;;  %v5114_v52 = vrot.slane %v5112_v61, 7 }
 0x232   : > { %2368 = vst [vmem:[#allocation2 + $0xb0] sm:$0xff] %v14501_v9  ;;  %v2335_v31 = vadd.f32 %v11926_v46, %v14313_v17  ;;  %v11934_v43 = vadd.f32 %v11933_v6, %v14379_v37  ;;  %v4896_v23 = vshll.u32 %v14501_v9, 16  ;;  %v10787_v11 = vpop.f32.mrb[80].mxu0  ;;  %v4899_v50 = vshrl.u32 %v14501_v9, 16 }
 0x233   : > { %v5118_v49 = vrot.slane %v5116_v58, 7  ;;  %v10788_v21 = vpop.f32.mrb[81].mxu0  ;;  %v4484_v8 = vrot.slane %v12722_v24, 1  ;;  %v4485_v63 = vrot.slane %v4404_v60, 1  ;;  %v14528_v61 = vsel %vm576_vm1, %v14511_v26, %v4926_v35 }
 0x234   : > { %v2336_v5 = vadd.f32 %v11934_v43, %v14313_v17  ;;  %v4898_v30 = vrot.slane %v4896_v23, 1  ;;  %v14515_v59 = vadd.f32 %v10788_v21, %v10787_v11  ;;  %v10790_v37 = vpop.f32.mrb[82].mxu0  ;;  %v2351_v10 = vmax.f32 %v2335_v31, 0.0  ;;  %v12656_v17 = vld [vmem:[#allocation8 + $0x138] sm:$0xff]  }
 0x235   : > { %v5121_v18 = vor.u32 %v5119_v57, %v5118_v49  ;;  %v10791_v48 = vpop.f32.mrb[83].mxu0  ;;  %v5139_v58 = vrot.slane %v4899_v50, 7  ;;  %v5110_v60 = vsel %vm4508_vm2, %v14415_v53, %v5109_v29  ;;  %v4701_v31 = vsel %vm4508_vm2, %v14417_v34, %v5109_v29  ;;  %v14536_v49 = vld [vmem:[#allocation2 + $0x88] sm:$0x1]  ;;  %11265 = vmatprep.subr.bf16.mxu1 %v12656_v17 }
 0x236   : > { %v2352_v7 = vmax.f32 %v2336_v5, 0.0  ;;  %v4901_v46 = vor.u32 %v4899_v50, %v4898_v30  ;;  %v14519_v6 = vadd.f32 %v10791_v48, %v10790_v37  ;;  %v5143_v47 = vshrl.u32 %v4898_v30, 16 }
 0x237   : > { %v5122_v56 = vsel %vm4508_vm2, %v5114_v52, %v5121_v18  ;;  %v14541_v35 = vshrl.u32 %v4484_v8, 16  ;;  %v4494_v57 = vrot.slane %v14517_v33, 1  ;;  %v4497_v50 = vrot.slane %v14521_v54, 1  ;;  %v12621_v54 = vld [vmem:[#allocation8 + $0x98] sm:$0xff]  }
 0x238   : > { %v14530_v43 = vpack.c.bf16 %v2352_v7, %v2351_v10  ;;  %5486 = vmatprep.mubr.bf16.mxu0 %v5122_v56  ;;  %5832 = vmatprep.mubr.bf16.mxu1 %v5122_v56  ;;  %v5147_v11 = vshrl.u32 %v4901_v46, 16  ;;  %v5150_v21 = vshll.u32 %v4901_v46, 16  ;;  %v14548_v29 = vsel %vm576_vm1, %v4484_v8, %v4485_v63  ;;  %v12657_v56 = vld [vmem:[#allocation8 + $0xf8] sm:$0xff]  }
 0x239   : > { %5487 = vmatmul.mubr.bf16.gmra.mrb[164].mxu0 %v5110_v60  ;;  %5833 = vmatmul.mubr.bf16.gmra.mrb[120].mxu1 %v4701_v31  ;;  %v5145_v30 = vrot.slane %v5143_v47, 7  ;;  %v5140_v22 = vor.u32 %v5139_v58, %v4896_v23  ;;  %v4973_v37 = vshrl.u32 %v14528_v61, 16  ;;  %v4500_v18 = vrot.slane %v14536_v49, 1  ;;  %v12658_v47 = vld [vmem:[#allocation8 + $0x140] sm:$0xff]  }
 0x23a   : > { %2369 = vst [vmem:[#allocation2 + $0xc8] sm:$0xff] %v14530_v43  ;;  %v5149_v53 = vrot.slane %v5147_v11, 7  ;;  %v4903_v34 = vshll.u32 %v14530_v43, 16  ;;  %v10793_v5 = vpop.f32.mrb[84].mxu0  ;;  %v4906_v10 = vshrl.u32 %v14530_v43, 16  ;;  %v14559_v8 = vsel %vm576_vm1, %v14539_v16, %v4929_v1  ;;  %11266 = vmatpush3.bf16.msra.mxu1 %v12657_v56 }
 0x23b   : > { %v10794_v52 = vpop.f32.mrb[85].mxu0  ;;  %v4531_v23 = vrot.slane %v14541_v35, 7  ;;  %v4533_v63 = vshrl.u32 %v14548_v29, 16  ;;  %v4536_v17 = vshll.u32 %v14548_v29, 16  ;;  %v14566_v11 = vrot.slane %v14389_v14, 1  ;;  %11779 = vmatprep.subr.bf16.mxu1 %v12658_v47  ;;  %v14675_v35 = vld [vmem:[#allocation2 + $0x38] sm:$0xff] }
 0x23c   : > { %v5152_v48 = vor.u32 %v5150_v21, %v5149_v53  ;;  %v4905_v24 = vrot.slane %v4903_v34, 1  ;;  %v14553_v7 = vadd.f32 %v10794_v52, %v10793_v5  ;;  %v10796_v46 = vpop.f32.mrb[86].mxu0  ;;  %v14569_v53 = vrot.slane %v14411_v4, 1 }
 0x23d   : > { %v10797_v60 = vpop.f32.mrb[87].mxu0  ;;  %v5141_v32 = vsel %vm4508_vm2, %v14419_v25, %v5140_v22  ;;  %v4975_v1 = vrot.slane %v4973_v37, 7  ;;  %v14576_v5 = vrot.slane %v14444_v39, 1  ;;  %v4732_v29 = vsel %vm4508_vm2, %v14426_v62, %v5140_v22 }
 0x23e   : > { %v5153_v58 = vsel %vm4508_vm2, %v5145_v30, %v5152_v48  ;;  %v4908_v31 = vor.u32 %v4906_v10, %v4905_v24  ;;  %v14573_v21 = vadd.f32 %v10797_v60, %v10796_v46  ;;  %v5174_v14 = vshrl.u32 %v4905_v24, 16 }
 0x23f   : > { %5494 = vmatprep.mubr.bf16.mxu0 %v5153_v58  ;;  %5840 = vmatprep.mubr.bf16.mxu1 %v5153_v58  ;;  %v5170_v52 = vrot.slane %v4906_v10, 7  ;;  %v4976_v4 = vshll.u32 %v14528_v61, 16  ;;  %v5004_v48 = vshrl.u32 %v14559_v8, 16  ;;  %v14583_v25 = vrot.slane %v14471_v2, 1  ;;  %v14601_v58 = vld [vmem:[#allocation2 + $0xa0] sm:$0x1] }
 0x240   : > { %v5178_v30 = vshrl.u32 %v4908_v31, 16  ;;  %v4535_v37 = vrot.slane %v4533_v63, 7  ;;  %v5181_v39 = vshll.u32 %v4908_v31, 16  ;;  %v4933_v62 = vsel %vm576_vm1, %v14566_v11, %v4932_v41 }
 0x241   : > { %5495 = vmatmul.mubr.bf16.gmra.mrb[168].mxu0 %v5141_v32  ;;  %5841 = vmatmul.mubr.bf16.gmra.mrb[124].mxu1 %v4732_v29  ;;  %v4936_v24 = vsel %vm576_vm1, %v14569_v53, %v4935_v3  ;;  %v4969_v61 = vshrl.u32 %v14511_v26, 16  ;;  %v4978_v10 = vor.u32 %v4976_v4, %v4975_v1  ;;  %v5000_v2 = vshrl.u32 %v14539_v16, 16 }
 0x242   : > { %v5180_v46 = vrot.slane %v5178_v30, 7  ;;  %v10799_v22 = vpop.f32.mrb[88].mxu0  ;;  %v4939_v38 = vsel %vm576_vm1, %v14576_v5, %v4938_v13  ;;  %v5176_v60 = vrot.slane %v5174_v14, 7  ;;  %v5171_v41 = vor.u32 %v5170_v52, %v4903_v34 }
 0x243   : > { %v10800_v56 = vpop.f32.mrb[89].mxu0  ;;  %v5006_v3 = vrot.slane %v5004_v48, 7  ;;  %v5035_v31 = vshrl.u32 %v4933_v62, 16  ;;  %v5066_v1 = vshrl.u32 %v4936_v24, 16  ;;  %v4942_v27 = vsel %vm576_vm1, %v14583_v25, %v4941_v15 }
 0x244   : > { %v5183_v63 = vor.u32 %v5181_v39, %v5180_v46  ;;  %v14599_v47 = vadd.f32 %v10800_v56, %v10799_v22  ;;  %v10802_v55 = vpop.f32.mrb[90].mxu0  ;;  %v5097_v14 = vshrl.u32 %v4939_v38, 16  ;;  %v14611_v34 = vrot.slane %v14501_v9, 1 }
 0x245   : > { %v10803_v32 = vpop.f32.mrb[91].mxu0  ;;  %v14613_v30 = vrot.slane %v4969_v61, 7  ;;  %v4946_v52 = vrot.slane %v14530_v43, 1  ;;  %v4538_v4 = vor.u32 %v4536_v17, %v4535_v37  ;;  %v4503_v48 = vrot.slane %v14601_v58, 1 }
 0x246   : > { %v5184_v29 = vsel %vm4508_vm2, %v5176_v60, %v5183_v63  ;;  %v14608_v13 = vadd.f32 %v10803_v32, %v10802_v55  ;;  %v5172_v36 = vsel %vm4508_vm2, %v14428_v12, %v5171_v41  ;;  %v5007_v15 = vshll.u32 %v14559_v8, 16 }
 0x247   : > { %5502 = vmatprep.mubr.bf16.mxu0 %v5184_v29  ;;  %v5128_v46 = vshrl.u32 %v4942_v27, 16  ;;  %v14624_v9 = vsel %vm576_vm1, %v14511_v26, %v4488_v40  ;;  %v4979_v39 = vsel %vm4508_vm2, %v14613_v30, %v4978_v10  ;;  %v14628_v43 = vrot.slane %v5000_v2, 7 }
 0x248   : > { %v5037_v17 = vrot.slane %v5035_v31, 7  ;;  %v5068_v37 = vrot.slane %v5066_v1, 7  ;;  %v5009_v22 = vor.u32 %v5007_v15, %v5006_v3  ;;  %v5031_v12 = vshrl.u32 %v14566_v11, 16  ;;  %v12619_v31 = vld [vmem:[#allocation8 + $0x88] sm:$0xff]  }
 0x249   : > { %5503 = vmatmul.mubr.bf16.gmra.mrb[172].mxu0 %v5172_v36  ;;  %v5099_v61 = vrot.slane %v5097_v14, 7  ;;  %v4945_v42 = vsel %vm576_vm1, %v14611_v34, %v4944_v0  ;;  %v5038_v40 = vshll.u32 %v4933_v62, 16  ;;  %v5062_v56 = vshrl.u32 %v14569_v53, 16 }
 0x24a   : > { %11699 = vmatprep.mubr.bf16.mxu0 %v4979_v39  ;;  %v10805_v8 = vpop.f32.mrb[92].mxu0  ;;  %v5069_v10 = vshll.u32 %v4936_v24, 16  ;;  %v4948_v2 = vsel %vm576_vm1, %v4946_v52, %v4947_v51  ;;  %v5093_v41 = vshrl.u32 %v14576_v5, 16  ;;  %v5100_v55 = vshll.u32 %v4939_v38, 16 }
 0x24b   : > { %v10806_v26 = vpop.f32.mrb[93].mxu0  ;;  %v5130_v3 = vrot.slane %v5128_v46, 7  ;;  %v5040_v20 = vor.u32 %v5038_v40, %v5037_v17  ;;  %v5124_v62 = vshrl.u32 %v14583_v25, 16  ;;  %v5159_v1 = vshrl.u32 %v4945_v42, 16 }
 0x24c   : > { %v14639_v60 = vadd.f32 %v10806_v26, %v10805_v8  ;;  %v10808_v63 = vpop.f32.mrb[94].mxu0  ;;  %v5071_v32 = vor.u32 %v5069_v10, %v5068_v37  ;;  %v5102_v24 = vor.u32 %v5100_v55, %v5099_v61  ;;  %v5131_v45 = vshll.u32 %v4942_v27, 16  ;;  %v4411_v10 = vld [vmem:[#allocation2 + $0xb8] sm:$0x1] }
 0x24d   : > { %v10809_v0 = vpop.f32.mrb[95].mxu0  ;;  %v5190_v14 = vshrl.u32 %v4948_v2, 16  ;;  %v5010_v51 = vsel %vm4508_vm2, %v14628_v43, %v5009_v22  ;;  %v14647_v36 = vrot.slane %v5031_v12, 7  ;;  %v14649_v15 = vrot.slane %v5062_v56, 7 }
 0x24e   : > { %v14643_v29 = vadd.f32 %v10809_v0, %v10808_v63  ;;  %v14651_v38 = vrot.slane %v5093_v41, 7  ;;  %v5133_v46 = vor.u32 %v5131_v45, %v5130_v3  ;;  %v5155_v39 = vshrl.u32 %v14611_v34, 16 }
 0x24f   : > { %v14658_v17 = vsel %vm576_vm1, %v14539_v16, %v4491_v44  ;;  %v5041_v27 = vsel %vm4508_vm2, %v14647_v36, %v5040_v20  ;;  %v5161_v37 = vrot.slane %v5159_v1, 7  ;;  %v14665_v22 = vsel %vm4508_vm2, %v4531_v23, %v4538_v4  ;;  %v12620_v44 = vld [vmem:[#allocation8 + $0x90] sm:$0xff]  }
 0x250   : > { %v4564_v12 = vshrl.u32 %v14624_v9, 16  ;;  %v5072_v19 = vsel %vm4508_vm2, %v14649_v15, %v5071_v32  ;;  %v5103_v16 = vsel %vm4508_vm2, %v14651_v38, %v5102_v24  ;;  %v14673_v61 = vrot.slane %v5124_v62, 7  ;;  %v14699_v62 = vld [vmem:[#allocation2 + $0x50] sm:$0xff] }
 0x251   : > { %11700 = vmatmul.mubr.bf16.vlgmr.msra.gmra.mrb[176].mxu0 %v5010_v51  ;;  %v5192_v40 = vrot.slane %v5190_v14, 7  ;;  %v5162_v4 = vshll.u32 %v4945_v42, 16  ;;  %v5186_v26 = vshrl.u32 %v4946_v52, 16  ;;  %v4595_v56 = vshrl.u32 %v14658_v17, 16 }
 0x252   : > { %11703 = vmatprep.mubr.bf16.mxu0 %v5041_v27  ;;  %11716 = vmatpush3.bf16.msra.mxu0 %v14484_v28  ;;  %v10811_v8 = vpop.f32.mrb[96].mxu0  ;;  %v14682_v28 = vsel %vm576_vm1, %v14566_v11, %v4494_v57  ;;  %v14688_v3 = vsel %vm4508_vm2, %v14673_v61, %v5133_v46  ;;  %v14690_v20 = vrot.slane %v5155_v39, 7  ;;  %v5193_v52 = vshll.u32 %v4948_v2, 16 }
 0x253   : > { %11717 = vmatprep.subr.bf16.mxu0 %v12619_v31  ;;  %v10812_v23 = vpop.f32.mrb[97].mxu0  ;;  %v5164_v0 = vor.u32 %v5162_v4, %v5161_v37  ;;  %v4566_v33 = vrot.slane %v4564_v12, 7  ;;  %v14696_v57 = vsel %vm576_vm1, %v14569_v53, %v4497_v50  ;;  %v5972_v11 = vshll.u32 %v14675_v35, 16 }
 0x254   : > { %v10947_v63 = vpop.f32.mrb[64].mxu1  ;;  %v14684_v41 = vadd.f32 %v10812_v23, %v10811_v8  ;;  %v10814_v55 = vpop.f32.mrb[98].mxu0  ;;  %v5195_v2 = vor.u32 %v5193_v52, %v5192_v40  ;;  %v4626_v14 = vshrl.u32 %v14682_v28, 16  ;;  %v5188_v46 = vrot.slane %v5186_v26, 7 }
 0x255   : > { %v10948_v42 = vpop.f32.mrb[65].mxu1  ;;  %v10815_v32 = vpop.f32.mrb[99].mxu0  ;;  %v4567_v50 = vshll.u32 %v14624_v9, 16  ;;  %v4597_v53 = vrot.slane %v4595_v56, 7  ;;  %v4598_v39 = vshll.u32 %v14658_v17, 16  ;;  %v4657_v37 = vshrl.u32 %v14696_v57, 16 }
 0x256   : > { %16638 = vst [vmem:[#allocation17_spill] sm:$0xff] %v14684_v41  ;;  %v14701_v1 = vadd.f32 %v10948_v42, %v10947_v63  ;;  %v10950_v24 = vpop.f32.mrb[66].mxu1  ;;  %11718 = vmatpush3.bf16.msra.mxu0 %v12619_v31  ;;  %v14703_v45 = vadd.f32 %v10815_v32, %v10814_v55  ;;  %v14715_v31 = vsel %vm576_vm1, %v14576_v5, %v4500_v18  ;;  %v4506_v12 = vrot.slane %v4411_v10, 1  ;;  %v12622_v18 = vld [vmem:[#allocation8 + $0xa0] sm:$0xff]   ;;  %v5947_v56 = vld [vmem:[#allocation2 + $0x30] sm:$0x80] }
 0x257   : > { %v10951_v51 = vpop.f32.mrb[67].mxu1  ;;  %11719 = vmatprep.subr.bf16.mxu0 %v12620_v44  ;;  %v4569_v8 = vor.u32 %v4567_v50, %v4566_v33  ;;  %v14721_v9 = vsel %vm576_vm1, %v14583_v25, %v4503_v48  ;;  %v14725_v17 = vrot.slane %v5972_v11, 1  ;;  %v16602_v40 = vshll.u32 %v14699_v62, 16  ;;  %v14734_v48 = vld [vmem:[#allocation2 + $0x68] sm:$0xff]  ;;  %v14739_v10 = vld [vmem:[#allocation2 + $0x80] sm:$0xff] }
 0x258   : > { %16639 = vst [vmem:[#allocation18_spill] sm:$0xff] %v14703_v45  ;;  %v14708_v27 = vadd.f32 %v10951_v51, %v10950_v24  ;;  %v5165_v5 = vsel %vm4508_vm2, %v14690_v20, %v5164_v0  ;;  %v4628_v58 = vrot.slane %v4626_v14, 7  ;;  %v4629_v25 = vshll.u32 %v14682_v28, 16 }
 0x259   : > { %11704 = vmatmul.mubr.bf16.gmra.mrb[180].mxu0 %v5072_v19  ;;  %v14731_v19 = vsel %vm4508_vm2, %v5188_v46, %v5195_v2  ;;  %v4600_v4 = vor.u32 %v4598_v39, %v4597_v53  ;;  %v4660_v26 = vshll.u32 %v14696_v57, 16  ;;  %v4659_v42 = vrot.slane %v4657_v37, 7  ;;  %v12623_v39 = vld [vmem:[#allocation8 + $0xa8] sm:$0xff]  }
 0x25a   : > { %11707 = vmatprep.mubr.bf16.mxu0 %v5103_v16  ;;  %11720 = vmatpush3.bf16.msra.mxu0 %v12620_v44  ;;  %v10817_v49 = vpop.f32.mrb[100].mxu0  ;;  %v4688_v44 = vshrl.u32 %v14715_v31, 16  ;;  %v5975_v16 = vshrl.u32 %v14675_v35, 16  ;;  %v4719_v28 = vshrl.u32 %v14721_v9, 16  ;;  %v14746_v32 = vsel %vm576_vm1, %v14611_v34, %v4506_v12 }
 0x25b   : > { %11721 = vmatprep.subr.bf16.mxu0 %v12621_v54  ;;  %v10818_v23 = vpop.f32.mrb[101].mxu0  ;;  %v14750_v57 = vsel %vm4508_vm2, %v14613_v30, %v4569_v8  ;;  %v14757_v2 = vrot.slane %v16602_v40, 1  ;;  %v16601_v14 = vshll.u32 %v14734_v48, 16  ;;  %v4631_v50 = vor.u32 %v4629_v25, %v4628_v58 }
 0x25c   : > { %v10953_v63 = vpop.f32.mrb[68].mxu1  ;;  %v14741_v55 = vadd.f32 %v10818_v23, %v10817_v49  ;;  %v10820_v52 = vpop.f32.mrb[102].mxu0  ;;  %v14753_v24 = vor.u32 %v5975_v16, %v14725_v17  ;;  %v4691_v53 = vshll.u32 %v14715_v31, 16  ;;  %v14767_v37 = vsel %vm4508_vm2, %v14628_v43, %v4600_v4 }
 0x25d   : > { %v10954_v0 = vpop.f32.mrb[69].mxu1  ;;  %v10821_v33 = vpop.f32.mrb[103].mxu0  ;;  %v4690_v12 = vrot.slane %v4688_v44, 7  ;;  %v4750_v8 = vshrl.u32 %v14746_v32, 16  ;;  %v5982_v49 = vshrl.u32 %v14699_v62, 16  ;;  %v16603_v58 = vshll.u32 %v14739_v10, 16 }
 0x25e   : > { %16640 = vst [vmem:[#allocation19_spill] sm:$0xff] %v14741_v55  ;;  %v14760_v51 = vadd.f32 %v10954_v0, %v10953_v63  ;;  %v10956_v46 = vpop.f32.mrb[70].mxu1  ;;  %11722 = vmatpush3.bf16.msra.mxu0 %v12621_v54  ;;  %v14762_v34 = vadd.f32 %v10821_v33, %v10820_v52  ;;  %v4662_v54 = vor.u32 %v4660_v26, %v4659_v42  ;;  %v6068_v63 = vshrl.u32 %v5947_v56, 16  ;;  %v12624_v44 = vld [vmem:[#allocation8 + $0xb0] sm:$0xff]  }
 0x25f   : > { %v10957_v30 = vpop.f32.mrb[71].mxu1  ;;  %11723 = vmatprep.subr.bf16.mxu0 %v12622_v18  ;;  %v4721_v31 = vrot.slane %v4719_v28, 7  ;;  %v6079_v25 = vshrl.u32 %v14753_v24, 16  ;;  %v14777_v52 = vor.u32 %v5982_v49, %v14757_v2  ;;  %v14781_v43 = vrot.slane %v16601_v14, 1  ;;  %v14860_v55 = vld [vmem:[#allocation2 + $0xb0] sm:$0xff] }
 0x260   : > { %16641 = vst [vmem:[#allocation20_spill] sm:$0xff] %v14762_v34  ;;  %v14771_v23 = vadd.f32 %v10957_v30, %v10956_v46  ;;  %v14785_v26 = vsel %vm4508_vm2, %v14647_v36, %v4631_v50  ;;  %v4753_v56 = vshll.u32 %v14746_v32, 16  ;;  %v6071_v42 = vrot.slane %v5975_v16, 7  ;;  %v5949_v30 = vld [vmem:[#allocation2 + $0x48] sm:$0x80]  ;;  %v14801_v32 = vld [vmem:[#allocation2 + $0x98] sm:$0xff] }
 0x261   : > { %11708 = vmatmul.mubr.bf16.gmra.mrb[184].mxu0 %v14688_v3  ;;  %v4722_v3 = vshll.u32 %v14721_v9, 16  ;;  %v4693_v0 = vor.u32 %v4691_v53, %v4690_v12  ;;  %v4752_v33 = vrot.slane %v4750_v8, 7  ;;  %v6075_v46 = vshrl.u32 %v14725_v17, 16 }
 0x262   : > { %11711 = vmatprep.mubr.bf16.mxu0 %v5165_v5  ;;  %11724 = vmatpush3.bf16.msra.mxu0 %v12622_v18  ;;  %v10823_v4 = vpop.f32.mrb[104].mxu0  ;;  %v5989_v18 = vshrl.u32 %v14734_v48, 16  ;;  %v14795_v36 = vsel %vm4508_vm2, %v14649_v15, %v4662_v54  ;;  %v6070_v9 = vrot.slane %v6068_v63, 7  ;;  %v14799_v16 = vrot.slane %v16603_v58, 1 }
 0x263   : > { %v10824_v28 = vpop.f32.mrb[105].mxu0  ;;  %11725 = vmatprep.subr.bf16.mxu0 %v12623_v39  ;;  %v4724_v53 = vor.u32 %v4722_v3, %v4721_v31  ;;  %v6081_v12 = vrot.slane %v6079_v25, 7  ;;  %v6110_v8 = vshrl.u32 %v14777_v52, 16  ;;  %v6072_v63 = vor.u32 %v6071_v42, %v5972_v11  ;;  %v12625_v31 = vld [vmem:[#allocation8 + $0xb8] sm:$0xff]  }
 0x264   : > { %v10959_v5 = vpop.f32.mrb[72].mxu1  ;;  %v14791_v14 = vadd.f32 %v10824_v28, %v10823_v4  ;;  %v10826_v40 = vpop.f32.mrb[106].mxu0  ;;  %v14805_v4 = vor.u32 %v5989_v18, %v14781_v43  ;;  %v16604_v58 = vshrl.u32 %v14739_v10, 16  ;;  %v14816_v25 = vsel %vm4508_vm2, %v14651_v38, %v4693_v0 }
 0x265   : > { %v10960_v50 = vpop.f32.mrb[73].mxu1  ;;  %v10827_v17 = vpop.f32.mrb[107].mxu0  ;;  %v4755_v3 = vor.u32 %v4753_v56, %v4752_v33  ;;  %v6112_v38 = vrot.slane %v6110_v8, 7  ;;  %v14836_v33 = vsel %vm4508_vm2, %v6070_v9, %v6072_v63  ;;  %v16645_v9 = vshll.u32 %v14699_v62, 16 }
 0x266   : > { %16642 = vst [vmem:[#allocation21_spill] sm:$0xff] %v14791_v14  ;;  %v14807_v28 = vadd.f32 %v10960_v50, %v10959_v5  ;;  %v10962_v15 = vpop.f32.mrb[74].mxu1  ;;  %v14809_v54 = vadd.f32 %v10827_v17, %v10826_v40  ;;  %11726 = vmatpush3.bf16.msra.mxu0 %v12623_v39  ;;  %v6082_v5 = vshll.u32 %v14753_v24, 16  ;;  %v6106_v50 = vshrl.u32 %v14757_v2, 16  ;;  %v5951_v40 = vld [vmem:[#allocation2 + $0x60] sm:$0x80] }
 0x267   : > { %v10963_v14 = vpop.f32.mrb[75].mxu1  ;;  %11727 = vmatprep.subr.bf16.mxu0 %v12624_v44  ;;  %v6099_v39 = vshrl.u32 %v5949_v30, 16  ;;  %v14825_v11 = vor.u32 %v16604_v58, %v14799_v16  ;;  %v6141_v56 = vshrl.u32 %v14805_v4, 16  ;;  %v12628_v2 = vld [vmem:[#allocation8 + $0x1c0] sm:$0xff]   ;;  %v5953_v58 = vld [vmem:[#allocation2 + $0x78] sm:$0x80] }
 0x268   : > { %16643 = vst [vmem:[#allocation22_spill] sm:$0xff] %v14809_v54  ;;  %v14820_v17 = vadd.f32 %v10963_v14, %v10962_v15  ;;  %v6102_v54 = vrot.slane %v5982_v49, 7  ;;  %v6084_v42 = vor.u32 %v6082_v5, %v6081_v12  ;;  %v14833_v14 = vsel %vm4508_vm2, %v14673_v61, %v4724_v53  ;;  %v12629_v53 = vld [vmem:[#allocation8 + $0x180] sm:$0xff]  }
 0x269   : > { %11712 = vmatmul.mubr.bf16.gmra.mrb[188].mxu0 %v14731_v19  ;;  %v6077_v49 = vrot.slane %v6075_v46, 7  ;;  %v6130_v19 = vshrl.u32 %v5951_v40, 16  ;;  %v14840_v12 = vsel %vm4508_vm2, %v14690_v20, %v4755_v3  ;;  %v6108_v8 = vrot.slane %v6106_v50, 7  ;;  %v12630_v20 = vld [vmem:[#allocation8 + $0x1c8] sm:$0xff]  }
 0x26a   : > { %v10829_v0 = vpop.f32.mrb[108].mxu0  ;;  %11728 = vmatpush3.bf16.msra.mxu0 %v12624_v44  ;;  %11731 = vmatprep.mubr.bf16.mxu0 %v14665_v22  ;;  %v6113_v44 = vshll.u32 %v14777_v52, 16  ;;  %v6133_v22 = vrot.slane %v5989_v18, 7  ;;  %v6101_v46 = vrot.slane %v6099_v39, 7  ;;  %v6103_v63 = vor.u32 %v6102_v54, %v16645_v9 }
 0x26b   : > { %v10830_v30 = vpop.f32.mrb[109].mxu0  ;;  %11729 = vmatprep.subr.bf16.mxu0 %v12625_v31  ;;  %v6172_v40 = vshrl.u32 %v14825_v11, 16  ;;  %v14849_v3 = vsel %vm4508_vm2, %v6077_v49, %v6084_v42  ;;  %v6143_v18 = vrot.slane %v6141_v56, 7  ;;  %v16646_v50 = vshll.u32 %v14801_v32, 16 }
 0x26c   : > { %v10965_v15 = vpop.f32.mrb[76].mxu1  ;;  %v14843_v5 = vadd.f32 %v10830_v30, %v10829_v0  ;;  %v10832_v61 = vpop.f32.mrb[110].mxu0  ;;  %v6115_v52 = vor.u32 %v6113_v44, %v6112_v38  ;;  %v6137_v54 = vshrl.u32 %v14781_v43, 16  ;;  %v6132_v9 = vrot.slane %v6130_v19, 7  ;;  %v5955_v44 = vld [vmem:[#allocation2 + $0x90] sm:$0x80] }
 0x26d   : > { %v10966_v24 = vpop.f32.mrb[77].mxu1  ;;  %v10833_v34 = vpop.f32.mrb[111].mxu0  ;;  %v14853_v0 = vrot.slane %v16646_v50, 1  ;;  %v6144_v42 = vshll.u32 %v14805_v4, 16  ;;  %v16648_v38 = vshll.u32 %v14734_v48, 16  ;;  %v6168_v49 = vshrl.u32 %v14799_v16, 16 }
 0x26e   : > { %16644 = vst [vmem:[#allocation23_spill] sm:$0xff] %v14843_v5  ;;  %v14855_v30 = vadd.f32 %v10966_v24, %v10965_v15  ;;  %v10968_v39 = vpop.f32.mrb[78].mxu1  ;;  %v14857_v5 = vadd.f32 %v10833_v34, %v10832_v61  ;;  %11730 = vmatpush3.bf16.msra.mxu0 %v12625_v31  ;;  %v6003_v24 = vshrl.u32 %v14801_v32, 16  ;;  %v14870_v31 = vsel %vm4508_vm2, %v6101_v46, %v6103_v63  ;;  %v14872_v15 = vld [vmem:[#allocation2 + $0xc8] sm:$0xff] }
 0x26f   : > { %v10969_v45 = vpop.f32.mrb[79].mxu1  ;;  %11171 = vmatprep.subr.bf16.mxu0 %v12628_v2  ;;  %v6134_v56 = vor.u32 %v6133_v22, %v16648_v38  ;;  %16650 = vst [vmem:[#allocation26_spill] sm:$0xff] %v14870_v31  ;;  %v6174_v43 = vrot.slane %v6172_v40, 7  ;;  %v6161_v19 = vshrl.u32 %v5953_v58, 16  ;;  %v12632_v4 = vld [vmem:[#allocation8 + $0x188] sm:$0xff]   ;;  %v12634_v2 = vld [vmem:[#allocation8 + $0x1d0] sm:$0xff]   ;;  %v6146_v61 = vor.u32 %v6144_v42, %v6143_v18 }
 0x270   : > { %16647 = vst [vmem:[#allocation24_spill] sm:$0xff] %v14857_v5  ;;  %v14867_v34 = vadd.f32 %v10969_v45, %v10968_v39  ;;  %v16651_v22 = vshrl.u32 %v14739_v10, 16  ;;  %v14878_v50 = vor.u32 %v6003_v24, %v14853_v0  ;;  %v7504_v45 = vld [vmem:[#allocation2 + $0xd8] sm:$0x80]  ;;  %v14883_v58 = vsel %vm4508_vm2, %v6108_v8, %v6115_v52 }
 0x271   : > { %11732 = vmatmul.mubr.bf16.vlgmr.msra.gmra.mrb[176].mxu0 %v14750_v57  ;;  %v6139_v57 = vrot.slane %v6137_v54, 7  ;;  %v6175_v63 = vshll.u32 %v14825_v11, 16  ;;  %v6192_v40 = vshrl.u32 %v5955_v44, 16  ;;  %v14887_v42 = vsel %vm4508_vm2, %v6132_v9, %v6134_v56  ;;  %v7506_v44 = vld [vmem:[#allocation2 + $0xf0] sm:$0x80] }
 0x272   : > { %16649 = vst [vmem:[#allocation25_spill] sm:$0xff] %v14867_v34  ;;  %v6164_v16 = vrot.slane %v16651_v22, 7  ;;  %v10867_v46 = vpop.f32.mrb[112].mxu0  ;;  %11735 = vmatprep.mubr.bf16.mxu0 %v14767_v37  ;;  %11172 = vmatpush3.bf16.msra.mxu0 %v12629_v53  ;;  %16652 = vst [vmem:[#allocation27_spill] sm:$0xff] %v14887_v42  ;;  %v6170_v38 = vrot.slane %v6168_v49, 7  ;;  %v6195_v22 = vrot.slane %v6003_v24, 7 }
 0x273   : > { %v10868_v18 = vpop.f32.mrb[113].mxu0  ;;  %11173 = vmatprep.subr.bf16.mxu0 %v12630_v20  ;;  %v16605_v39 = vshll.u32 %v14872_v15, 16  ;;  %v12635_v53 = vld [vmem:[#allocation8 + $0x190] sm:$0xff]   ;;  %v6177_v41 = vor.u32 %v6175_v63, %v6174_v43  ;;  %v6163_v8 = vrot.slane %v6161_v19, 7  ;;  %v7625_v52 = vshrl.u32 %v7504_v45, 16 }
 0x274   : > { %v10971_v5 = vpop.f32.mrb[80].mxu1  ;;  %v10869_v31 = vadd.f32 %v10868_v18, %v10867_v46  ;;  %v10870_v37 = vpop.f32.mrb[114].mxu0  ;;  %v14891_v11 = vsel %vm4508_vm2, %v6139_v57, %v6146_v61  ;;  %v16653_v20 = vshll.u32 %v14739_v10, 16  ;;  %v6203_v56 = vshrl.u32 %v14878_v50, 16  ;;  %v12636_v57 = vld [vmem:[#allocation8 + $0x1d8] sm:$0xff]  }
 0x275   : > { %v10972_v54 = vpop.f32.mrb[81].mxu1  ;;  %v10871_v34 = vpop.f32.mrb[115].mxu0  ;;  %v16654_v49 = vshll.u32 %v14860_v55, 16  ;;  %v6194_v63 = vrot.slane %v6192_v40, 7  ;;  %v16655_v18 = vshll.u32 %v14801_v32, 16  ;;  %v14909_v42 = vrot.slane %v16605_v39, 1 }
 0x276   : > { %v6165_v9 = vor.u32 %v6164_v16, %v16653_v20  ;;  %v11942_v46 = vadd.f32 %v10869_v31, %v14515_v59  ;;  %v14901_v43 = vadd.f32 %v10972_v54, %v10971_v5  ;;  %v10974_v19 = vpop.f32.mrb[82].mxu1  ;;  %v10872_v45 = vadd.f32 %v10871_v34, %v10870_v37  ;;  %11174 = vmatpush3.bf16.msra.mxu0 %v12632_v4  ;;  %v12638_v34 = vld [vmem:[#allocation8 + $0x198] sm:$0xff]  }
 0x277   : > { %v14898_v24 = vrot.slane %v16654_v49, 1  ;;  %v10975_v61 = vpop.f32.mrb[83].mxu1  ;;  %11175 = vmatprep.subr.bf16.mxu0 %v12634_v2  ;;  %v6199_v16 = vshrl.u32 %v14853_v0, 16  ;;  %v6196_v20 = vor.u32 %v6195_v22, %v16655_v18  ;;  %v6010_v49 = vshrl.u32 %v14860_v55, 16  ;;  %v5957_v2 = vld [vmem:[#allocation2 + $0xa8] sm:$0x80] }
 0x278   : > { %v11948_v59 = vadd.f32 %v10872_v45, %v14519_v6  ;;  %v14912_v5 = vadd.f32 %v10975_v61, %v10974_v19  ;;  %v14915_v31 = vadd.f32 %v11942_v46, %v14701_v1  ;;  %v7656_v4 = vshrl.u32 %v7506_v44, 16  ;;  %v12640_v0 = vld [vmem:[#allocation8 + $0x1e0] sm:$0xff]  }
 0x279   : > { %11736 = vmatmul.mubr.bf16.gmra.mrb[180].mxu0 %v14785_v26  ;;  %v6205_v40 = vrot.slane %v6203_v56, 7  ;;  %v14918_v22 = vrot.slane %v7625_v52, 7  ;;  %v14921_v37 = vor.u32 %v6010_v49, %v14898_v24  ;;  %v16606_v54 = vshrl.u32 %v14872_v15, 16  ;;  %v5963_v56 = vld [vmem:[#allocation2 + $0x40] sm:$0x1] }
 0x27a   : > { %v10873_v6 = vpop.f32.mrb[116].mxu0  ;;  %11739 = vmatprep.mubr.bf16.mxu0 %v14795_v36  ;;  %11176 = vmatpush3.bf16.msra.mxu0 %v12635_v53  ;;  %v14926_v1 = vadd.f32 %v11948_v59, %v14708_v27  ;;  %v14929_v44 = vsel %vm4508_vm2, %v6170_v38, %v6177_v41  ;;  %v14932_v26 = vsel %vm4508_vm2, %v6163_v8, %v6165_v9  ;;  %v6206_v52 = vshll.u32 %v14878_v50, 16  ;;  %v12641_v53 = vld [vmem:[#allocation8 + $0x1a0] sm:$0xff]  }
 0x27b   : > { %16656 = vst [vmem:[#allocation28_spill] sm:$0xff] %v14918_v22  ;;  %v10874_v46 = vpop.f32.mrb[117].mxu0  ;;  %11177 = vmatprep.subr.bf16.mxu0 %v12636_v57  ;;  %v6230_v19 = vshrl.u32 %v14898_v24, 16  ;;  %v6223_v45 = vshrl.u32 %v5957_v2, 16  ;;  %v6226_v61 = vrot.slane %v6010_v49, 7  ;;  %v14939_v27 = vor.u32 %v16606_v54, %v14909_v42  ;;  %v12642_v24 = vld [vmem:[#allocation8 + $0x1e8] sm:$0xff]  }
 0x27c   : > { %v10977_v36 = vpop.f32.mrb[84].mxu1  ;;  %v10875_v41 = vadd.f32 %v10874_v46, %v10873_v6  ;;  %v10876_v38 = vpop.f32.mrb[118].mxu0  ;;  %v6201_v8 = vrot.slane %v6199_v16, 7  ;;  %v14942_v9 = vsel %vm4508_vm2, %v6194_v63, %v6196_v20  ;;  %v14944_v50 = vrot.slane %v7656_v4, 7  ;;  %v14952_v63 = vld [vmem:[#allocation2 + $0x108] sm:$0x80] }
 0x27d   : > { %16657 = vst [vmem:[#allocation29_spill] sm:$0xff] %v14942_v9  ;;  %v10978_v57 = vpop.f32.mrb[85].mxu1  ;;  %v10877_v18 = vpop.f32.mrb[119].mxu0  ;;  %v6208_v59 = vor.u32 %v6206_v52, %v6205_v40  ;;  %v6234_v49 = vshrl.u32 %v14921_v37, 16  ;;  %v6261_v2 = vshrl.u32 %v14909_v42, 16  ;;  %v6044_v4 = vrot.slane %v5963_v56, 1 }
 0x27e   : > { %16658 = vst [vmem:[#allocation30_spill] sm:$0xff] %v14944_v50  ;;  %v11939_v6 = vadd.f32 %v10875_v41, %v14553_v7  ;;  %v14950_v46 = vadd.f32 %v10978_v57, %v10977_v36  ;;  %v10980_v16 = vpop.f32.mrb[86].mxu1  ;;  %v10878_v54 = vadd.f32 %v10877_v18, %v10876_v38  ;;  %11178 = vmatpush3.bf16.msra.mxu0 %v12638_v34  ;;  %v5959_v20 = vld [vmem:[#allocation2 + $0xc0] sm:$0x80]  ;;  %v5964_v50 = vld [vmem:[#allocation2 + $0x58] sm:$0x1] }
 0x27f   : > { %v10981_v9 = vpop.f32.mrb[87].mxu1  ;;  %11179 = vmatprep.subr.bf16.mxu0 %v12640_v0  ;;  %v14954_v40 = vrot.slane %v6230_v19, 7  ;;  %v6225_v52 = vrot.slane %v6223_v45, 7  ;;  %v16659_v42 = vshll.u32 %v14860_v55, 16  ;;  %v6265_v7 = vshrl.u32 %v14939_v27, 16 }
 0x280   : > { %v14959_v36 = vld [vmem:[#allocation2 + $0x120] sm:$0x80]  ;;  %v5965_v41 = vld [vmem:[#allocation2 + $0x70] sm:$0x1]  ;;  %v11945_v34 = vadd.f32 %v10878_v54, %v14573_v21  ;;  %v14962_v38 = vadd.f32 %v10981_v9, %v10980_v16  ;;  %v14965_v56 = vadd.f32 %v11939_v6, %v14760_v51  ;;  %v6237_v0 = vshll.u32 %v14921_v37, 16  ;;  %v12644_v21 = vld [vmem:[#allocation8 + $0x1a8] sm:$0xff]  }
 0x281   : > { %v6227_v39 = vor.u32 %v6226_v61, %v16659_v42  ;;  %11740 = vmatmul.mubr.bf16.gmra.mrb[184].mxu0 %v14816_v25  ;;  %v14970_v19 = vsel %vm4508_vm2, %v6201_v8, %v6208_v59  ;;  %v6236_v45 = vrot.slane %v6234_v49, 7  ;;  %v14972_v61 = vrot.slane %v6261_v2, 7  ;;  %v5961_v54 = vld [vmem:[#allocation2 + $0xd8] sm:$0x80]  ;;  %v12646_v49 = vld [vmem:[#allocation8 + $0x1f0] sm:$0xff]  }
 0x282   : > { %16660 = vst [vmem:[#allocation31_spill] sm:$0xff] %v14970_v19  ;;  %v7687_v57 = vshrl.u32 %v14952_v63, 16  ;;  %v10879_v18 = vpop.f32.mrb[120].mxu0  ;;  %11743 = vmatprep.mubr.bf16.mxu0 %v14833_v14  ;;  %11180 = vmatpush3.bf16.msra.mxu0 %v12641_v53  ;;  %v14977_v51 = vadd.f32 %v11945_v34, %v14771_v23  ;;  %v16661_v37 = vrot.slane %v14675_v35, 1  ;;  %v6047_v9 = vrot.slane %v5964_v50, 1 }
 0x283   : > { %v10880_v59 = vpop.f32.mrb[121].mxu0  ;;  %11181 = vmatprep.subr.bf16.mxu0 %v12642_v24  ;;  %v6267_v2 = vrot.slane %v6265_v7, 7  ;;  %v6268_v14 = vshll.u32 %v14939_v27, 16  ;;  %v6254_v53 = vshrl.u32 %v5959_v20, 16  ;;  %v16662_v6 = vshrl.u32 %v14872_v15, 16 }
 0x284   : > { %v14982_v25 = vsel %vm576_vm1, %v16661_v37, %v6044_v4  ;;  %v10983_v16 = vpop.f32.mrb[88].mxu1  ;;  %v10881_v63 = vadd.f32 %v10880_v59, %v10879_v18  ;;  %v10882_v42 = vpop.f32.mrb[122].mxu0  ;;  %v7718_v34 = vshrl.u32 %v14959_v36, 16  ;;  %v6049_v4 = vrot.slane %v14734_v48, 1  ;;  %v14994_v20 = vld [vmem:[#allocation2 + $0x138] sm:$0x80] }
 0x285   : > { %v6257_v23 = vrot.slane %v16662_v6, 7  ;;  %v6050_v37 = vrot.slane %v5965_v41, 1  ;;  %v10984_v8 = vpop.f32.mrb[89].mxu1  ;;  %v10883_v50 = vpop.f32.mrb[123].mxu0  ;;  %v6239_v22 = vor.u32 %v6237_v0, %v6236_v45  ;;  %v14991_v24 = vsel %vm4508_vm2, %v6225_v52, %v6227_v39  ;;  %v12647_v48 = vld [vmem:[#allocation8 + $0x1b0] sm:$0xff]   ;;  %v12648_v52 = vld [vmem:[#allocation8 + $0x1f8] sm:$0xff]  }
 0x286   : > { %16663 = vst [vmem:[#allocation32_spill] sm:$0xff] %v14991_v24  ;;  %v6285_v7 = vshrl.u32 %v5961_v54, 16  ;;  %v6091_v27 = vshrl.u32 %v14982_v25, 16  ;;  %v11954_v6 = vadd.f32 %v10881_v63, %v14599_v47  ;;  %v14997_v18 = vadd.f32 %v10984_v8, %v10983_v16  ;;  %v10986_v59 = vpop.f32.mrb[90].mxu1  ;;  %11182 = vmatpush3.bf16.msra.mxu0 %v12644_v21 }
 0x287   : > { %v10884_v36 = vadd.f32 %v10883_v50, %v10882_v42  ;;  %v16664_v41 = vrot.slane %v14699_v62, 1  ;;  %v10987_v39 = vpop.f32.mrb[91].mxu1  ;;  %11183 = vmatprep.subr.bf16.mxu0 %v12646_v49  ;;  %v6270_v45 = vor.u32 %v6268_v14, %v6267_v2  ;;  %v6256_v54 = vrot.slane %v6254_v53, 7  ;;  %v5966_v49 = vld [vmem:[#allocation2 + $0x88] sm:$0x1]  ;;  %v12659_v42 = vld [vmem:[#allocation8 + $0x200] sm:$0xff]  }
 0x288   : > { %v16665_v24 = vshll.u32 %v14872_v15, 16  ;;  %v16666_v47 = vrot.slane %v14675_v35, 1  ;;  %v15011_v16 = vadd.f32 %v10987_v39, %v10986_v59  ;;  %v15014_v63 = vadd.f32 %v11954_v6, %v14807_v28  ;;  %v12650_v28 = vld [vmem:[#allocation8 + $0x1b8] sm:$0xff]   ;;  %v7514_v6 = vld [vmem:[#allocation2 + $0x150] sm:$0x80] }
 0x289   : > { %v15002_v0 = vsel %vm576_vm1, %v16664_v41, %v6047_v9  ;;  %v11960_v21 = vadd.f32 %v10884_v36, %v14608_v13  ;;  %v15017_v9 = vsel %vm576_vm1, %v6049_v4, %v6050_v37  ;;  %11744 = vmatmul.mubr.bf16.gmra.mrb[188].mxu0 %v14840_v12  ;;  %v15022_v2 = vsel %vm4508_vm2, %v14954_v40, %v6239_v22 }
 0x28a   : > { %v15006_v19 = vor.u32 %v6257_v23, %v16665_v24  ;;  %v6087_v8 = vshrl.u32 %v16666_v47, 16  ;;  %v15024_v14 = vrot.slane %v7687_v57, 7  ;;  %v6093_v35 = vrot.slane %v6091_v27, 7  ;;  %v10885_v53 = vpop.f32.mrb[124].mxu0  ;;  %11184 = vmatpush3.bf16.msra.mxu0 %v12647_v48  ;;  %6564 = vmatprep.mubr.bf16.mxu0 %v14849_v3 }
 0x28b   : > { %v6122_v13 = vshrl.u32 %v15002_v0, 16  ;;  %v15029_v23 = vadd.f32 %v11960_v21, %v14820_v17  ;;  %v15031_v37 = vrot.slane %v7718_v34, 7  ;;  %v15033_v12 = vrot.slane %v6285_v7, 7  ;;  %v10886_v40 = vpop.f32.mrb[125].mxu0  ;;  %11185 = vmatprep.subr.bf16.mxu0 %v12648_v52 }
 0x28c   : > { %v7749_v22 = vshrl.u32 %v14994_v20, 16  ;;  %v15038_v57 = vsel %vm4508_vm2, %v6256_v54, %v15006_v19  ;;  %v6094_v50 = vshll.u32 %v14982_v25, 16  ;;  %v6153_v3 = vshrl.u32 %v15017_v9, 16  ;;  %v10989_v24 = vpop.f32.mrb[92].mxu1  ;;  %v10888_v34 = vpop.f32.mrb[126].mxu0 }
 0x28d   : > { %v6052_v17 = vrot.slane %v14739_v10, 1  ;;  %v10887_v27 = vadd.f32 %v10886_v40, %v10885_v53  ;;  %v15045_v7 = vsel %vm4508_vm2, %v14972_v61, %v6270_v45  ;;  %v6089_v20 = vrot.slane %v6087_v8, 7  ;;  %v10990_v36 = vpop.f32.mrb[93].mxu1  ;;  %v10889_v48 = vpop.f32.mrb[127].mxu0  ;;  %v5967_v45 = vld [vmem:[#allocation2 + $0xa0] sm:$0x1] }
 0x28e   : > { %v6053_v59 = vrot.slane %v5966_v49, 1  ;;  %v6096_v41 = vor.u32 %v6094_v50, %v6093_v35  ;;  %v16667_v39 = vrot.slane %v14699_v62, 1  ;;  %v6124_v52 = vrot.slane %v6122_v13, 7  ;;  %v10992_v21 = vpop.f32.mrb[94].mxu1  ;;  %11186 = vmatpush3.bf16.msra.mxu0 %v12650_v28  ;;  %v12660_v49 = vld [vmem:[#allocation8 + $0x208] sm:$0xff]  }
 0x28f   : > { %v15049_v54 = vshrl.u32 %v6049_v4, 16  ;;  %v11951_v10 = vadd.f32 %v10887_v27, %v14639_v60  ;;  %v15052_v47 = vadd.f32 %v10990_v36, %v10989_v24  ;;  %v10890_v53 = vadd.f32 %v10889_v48, %v10888_v34  ;;  %v10993_v8 = vpop.f32.mrb[95].mxu1  ;;  %11747 = vmatprep.subr.bf16.mxu0 %v12659_v42  ;;  %v7516_v27 = vld [vmem:[#allocation2 + $0x168] sm:$0x80] }
 0x290   : > { %v6118_v25 = vshrl.u32 %v16667_v39, 16  ;;  %v6125_v61 = vshll.u32 %v15002_v0, 16  ;;  %v6155_v35 = vrot.slane %v6153_v3, 7  ;;  %v7780_v40 = vshrl.u32 %v7514_v6, 16  ;;  %v15067_v0 = vld [vmem:[#allocation2 + $0xb8] sm:$0x1] }
 0x291   : > { %v15055_v62 = vshrl.u32 %v6052_v17, 16  ;;  %v6055_v4 = vrot.slane %v14801_v32, 1  ;;  %v11957_v13 = vadd.f32 %v10890_v53, %v14643_v29  ;;  %v15059_v60 = vadd.f32 %v10993_v8, %v10992_v21  ;;  %6565 = vmatmul.mubr.bf16.vlgmr.msra.gmra.mrb[192].mxu0 %v14836_v33 }
 0x292   : > { %v15062_v50 = vadd.f32 %v11951_v10, %v14855_v30  ;;  %v15065_v28 = vsel %vm576_vm1, %v6052_v17, %v6053_v59  ;;  %v15071_v3 = vsel %vm4508_vm2, %v6089_v20, %v6096_v41  ;;  %v15073_v24 = vrot.slane %v7749_v22, 7  ;;  %v10891_v34 = vpop.f32.mrb[128].mxu0  ;;  %6572 = vmatprep.mubr.bf16.mxu0 %v14883_v58  ;;  %v16668_v30 = vld [vmem:[#allocation25_spill] sm:$0xff]  ;;  %11748 = vmatpush3.bf16.msra.mxu0 %v12659_v42  ;;  %v12662_v20 = vld [vmem:[#allocation8 + $0x210] sm:$0xff]  }
 0x293   : > { %v6127_v32 = vor.u32 %v6125_v61, %v6124_v52  ;;  %v6156_v29 = vshll.u32 %v15017_v9, 16  ;;  %v15078_v6 = vadd.f32 %v11957_v13, %v16668_v30  ;;  %v6120_v17 = vrot.slane %v6118_v25, 7  ;;  %v10892_v36 = vpop.f32.mrb[129].mxu0  ;;  %11749 = vmatprep.subr.bf16.mxu0 %v12660_v49 }
 0x294   : > { %v6151_v59 = vrot.slane %v15049_v54, 7  ;;  %v6056_v33 = vrot.slane %v5967_v45, 1  ;;  %v15081_v48 = vrot.slane %v7780_v40, 7  ;;  %v6182_v9 = vrot.slane %v15055_v62, 7  ;;  %v11669_v39 = vpop.f32.mrb[48].mxu1  ;;  %v10894_v52 = vpop.f32.mrb[130].mxu0 }
 0x295   : > { %v6158_v22 = vor.u32 %v6156_v29, %v6155_v35  ;;  %v6184_v41 = vshrl.u32 %v15065_v28, 16  ;;  %v10893_v58 = vadd.f32 %v10892_v36, %v10891_v34  ;;  %v6187_v10 = vshll.u32 %v15065_v28, 16  ;;  %v4260_v21 = vpop.f32.mrb[49].mxu1  ;;  %v10895_v53 = vpop.f32.mrb[131].mxu0  ;;  %v16669_v35 = vld [vmem:[#allocation17_spill] sm:$0xff]  ;;  %v16670_v36 = vld [vmem:[#allocation18_spill] sm:$0xff] }
 0x296   : > { %v15086_v42 = vshrl.u32 %v6055_v4, 16  ;;  %v7811_v25 = vshrl.u32 %v7516_v27, 16  ;;  %v11941_v54 = vadd.f32 %v14965_v56, %v11669_v39  ;;  %v15090_v61 = vsel %vm4508_vm2, %v6120_v17, %v6127_v32  ;;  %v11670_v29 = vpop.f32.mrb[50].mxu1  ;;  %11750 = vmatpush3.bf16.msra.mxu0 %v12660_v49  ;;  %v15099_v56 = vld [vmem:[#allocation9] ss:$0 sm:$0xff] }
 0x297   : > { %v6058_v45 = vrot.slane %v14860_v55, 1  ;;  %v6059_v8 = vrot.slane %v15067_v0, 1  ;;  %v11966_v40 = vadd.f32 %v10893_v58, %v16669_v35  ;;  %v11944_v13 = vadd.f32 %v14915_v31, %v4260_v21  ;;  %v4263_v30 = vpop.f32.mrb[51].mxu1  ;;  %11751 = vmatprep.subr.bf16.mxu0 %v12662_v20  ;;  %v12663_v55 = vld [vmem:[#allocation8 + $0x218] sm:$0xff]   ;;  %v16671_v58 = vld [vmem:[#allocation26_spill] sm:$0xff] }
 0x298   : > { %v10896_v28 = vadd.f32 %v10895_v53, %v10894_v52  ;;  %v15097_v27 = vsel %vm576_vm1, %v6055_v4, %v6056_v33  ;;  %v4341_v34 = vadd.f32 %v15099_v56, %v11941_v54  ;;  %v11947_v32 = vadd.f32 %v14977_v51, %v11670_v29 }
 0x299   : > { %v6186_v0 = vrot.slane %v6184_v41, 7  ;;  %v15104_v17 = vrot.slane %v14872_v15, 1  ;;  %v4339_v31 = vadd.f32 %v15099_v56, %v11944_v13  ;;  %v11950_v4 = vadd.f32 %v14926_v1, %v4263_v30  ;;  %6573 = vmatmul.mubr.bf16.gmra.mrb[196].mxu0 %v16671_v58 }
 0x29a   : > { %v11972_v49 = vadd.f32 %v10896_v28, %v16670_v36  ;;  %v15110_v33 = vadd.f32 %v11966_v40, %v14901_v43  ;;  %v4342_v39 = vadd.f32 %v15099_v56, %v11947_v32  ;;  %v6215_v41 = vshrl.u32 %v15097_v27, 16  ;;  %v10897_v54 = vpop.f32.mrb[132].mxu0  ;;  %6580 = vmatprep.mubr.bf16.mxu0 %v14891_v11  ;;  %11752 = vmatpush3.bf16.msra.mxu0 %v12662_v20  ;;  %v12665_v43 = vld [vmem:[#allocation8 + $0x220] sm:$0xff]  }
 0x29b   : > { %v15116_v52 = vrot.slane %v7811_v25, 7  ;;  %v4340_v15 = vadd.f32 %v15099_v56, %v11950_v4  ;;  %v15125_v53 = vsel %vm576_vm1, %v6058_v45, %v6059_v8  ;;  %v4357_v35 = vmax.f32 %v4341_v34, 0.0  ;;  %v10898_v13 = vpop.f32.mrb[133].mxu0  ;;  %11753 = vmatprep.subr.bf16.mxu0 %v12663_v55 }
 0x29c   : > { %v15121_v1 = vadd.f32 %v11972_v49, %v14912_v5  ;;  %v4358_v40 = vmax.f32 %v4342_v39, 0.0  ;;  %v15128_v25 = vsel %vm4508_vm2, %v6151_v59, %v6158_v22  ;;  %v15130_v29 = vshrl.u32 %v6058_v45, 16  ;;  %v11673_v5 = vpop.f32.mrb[52].mxu1  ;;  %v10900_v20 = vpop.f32.mrb[134].mxu0  ;;  %v16672_v22 = vld [vmem:[#allocation19_spill] sm:$0xff] }
 0x29d   : > { %v4355_v11 = vmax.f32 %v4339_v31, 0.0  ;;  %v4356_v28 = vmax.f32 %v4340_v15, 0.0  ;;  %v10899_v32 = vadd.f32 %v10898_v13, %v10897_v54  ;;  %v6189_v30 = vor.u32 %v6187_v10, %v6186_v0  ;;  %v4276_v49 = vpop.f32.mrb[53].mxu1  ;;  %v10901_v34 = vpop.f32.mrb[135].mxu0 }
 0x29e   : > { %v15132_v36 = vpack.c.bf16 %v4358_v40, %v4357_v35  ;;  %v11953_v8 = vadd.f32 %v15062_v50, %v11673_v5  ;;  %v15135_v4 = vrot.slane %v6215_v41, 7  ;;  %v11956_v31 = vadd.f32 %v15014_v63, %v4276_v49  ;;  %v11674_v58 = vpop.f32.mrb[54].mxu1  ;;  %11754 = vmatpush3.bf16.msra.mxu0 %v12663_v55  ;;  %v12666_v35 = vld [vmem:[#allocation8 + $0x228] sm:$0xff]   ;;  %v16673_v40 = vld [vmem:[#allocation20_spill] sm:$0xff] }
 0x29f   : > { %v15138_v59 = vpack.c.bf16 %v4356_v28, %v4355_v11  ;;  %v11963_v45 = vadd.f32 %v10899_v32, %v16672_v22  ;;  %v10902_v15 = vadd.f32 %v10901_v34, %v10900_v20  ;;  %v11959_v50 = vadd.f32 %v15078_v6, %v11674_v58  ;;  %v4279_v0 = vpop.f32.mrb[55].mxu1  ;;  %11755 = vmatprep.subr.bf16.mxu0 %v12665_v43  ;;  %v16674_v6 = vld [vmem:[#allocation27_spill] sm:$0xff] }
 0x2a0   : > { %4381 = vst [vmem:[#allocation2 + $0xf8] sm:$0xff] %v15132_v36  ;;  %v4345_v10 = vadd.f32 %v15099_v56, %v11953_v8  ;;  %v7536_v41 = vshll.u32 %v15132_v36, 16  ;;  %v7539_v54 = vshrl.u32 %v15132_v36, 16  ;;  %v4343_v63 = vadd.f32 %v15099_v56, %v11956_v31 }
 0x2a1   : > { %4380 = vst [vmem:[#allocation2 + $0xe0] sm:$0xff] %v15138_v59  ;;  %v11969_v13 = vadd.f32 %v10902_v15, %v16673_v40  ;;  %v11962_v55 = vadd.f32 %v15029_v23, %v4279_v0  ;;  %v11964_v11 = vadd.f32 %v11963_v45, %v14950_v46  ;;  %v4346_v28 = vadd.f32 %v15099_v56, %v11959_v50  ;;  %v12668_v50 = vld [vmem:[#allocation8 + $0x230] sm:$0xff]  }
 0x2a2   : > { %6581 = vmatmul.mubr.bf16.gmra.mrb[200].mxu0 %v16674_v6  ;;  %v7529_v5 = vshll.u32 %v15138_v59, 16  ;;  %v7532_v32 = vshrl.u32 %v15138_v59, 16  ;;  %v4361_v8 = vmax.f32 %v4345_v10, 0.0  ;;  %v4359_v49 = vmax.f32 %v4343_v63, 0.0  ;;  %v10903_v22 = vpop.f32.mrb[136].mxu0 }
 0x2a3   : > { %v4344_v34 = vadd.f32 %v15099_v56, %v11962_v55  ;;  %v11970_v31 = vadd.f32 %v11969_v13, %v14962_v38  ;;  %6588 = vmatprep.mubr.bf16.mxu0 %v14929_v44  ;;  %11756 = vmatpush3.bf16.msra.mxu0 %v12665_v43  ;;  %v4362_v46 = vmax.f32 %v4346_v28, 0.0  ;;  %v10904_v23 = vpop.f32.mrb[137].mxu0  ;;  %v15162_v15 = vrot.slane %v7536_v41, 1 }
 0x2a4   : > { %v7531_v45 = vrot.slane %v7529_v5, 1  ;;  %v7628_v58 = vrot.slane %v7532_v32, 7  ;;  %11757 = vmatprep.subr.bf16.mxu0 %v12666_v35  ;;  %v11677_v0 = vpop.f32.mrb[56].mxu1  ;;  %v10905_v63 = vadd.f32 %v10904_v23, %v10903_v22  ;;  %v10906_v40 = vpop.f32.mrb[138].mxu0  ;;  %v15164_v55 = vrot.slane %v7539_v54, 7 }
 0x2a5   : > { %v4360_v10 = vmax.f32 %v4344_v34, 0.0  ;;  %v15169_v44 = vsel %vm4508_vm2, %v6182_v9, %v6189_v30  ;;  %v15171_v38 = vpack.c.bf16 %v4362_v46, %v4361_v8  ;;  %v11965_v43 = vadd.f32 %v11964_v11, %v11677_v0  ;;  %v4292_v13 = vpop.f32.mrb[57].mxu1  ;;  %v10907_v28 = vpop.f32.mrb[139].mxu0  ;;  %v16675_v34 = vld [vmem:[#allocation21_spill] sm:$0xff]  ;;  %v16676_v46 = vld [vmem:[#allocation22_spill] sm:$0xff] }
 0x2a6   : > { %v7534_v6 = vor.u32 %v7532_v32, %v7531_v45  ;;  %v7632_v51 = vshrl.u32 %v7531_v45, 16  ;;  %v11978_v21 = vadd.f32 %v10905_v63, %v16675_v34  ;;  %v11968_v22 = vadd.f32 %v15110_v33, %v4292_v13  ;;  %v11678_v23 = vpop.f32.mrb[58].mxu1  ;;  %v12669_v32 = vld [vmem:[#allocation8 + $0x238] sm:$0xff]  }
 0x2a7   : > { %v15173_v20 = vpack.c.bf16 %v4360_v10, %v4359_v49  ;;  %v10908_v39 = vadd.f32 %v10907_v28, %v10906_v40  ;;  %11758 = vmatpush3.bf16.msra.mxu0 %v12666_v35  ;;  %4383 = vst [vmem:[#allocation2 + $0x128] sm:$0xff] %v15171_v38  ;;  %v4349_v62 = vadd.f32 %v15099_v56, %v11965_v43  ;;  %v4295_v30 = vpop.f32.mrb[59].mxu1  ;;  %v16677_v13 = vld [vmem:[#allocation31_spill] sm:$0xff] }
 0x2a8   : > { %v11971_v9 = vadd.f32 %v11970_v31, %v11678_v23  ;;  %v7636_v11 = vshrl.u32 %v7534_v6, 16  ;;  %v7541_v8 = vor.u32 %v7539_v54, %v15162_v15  ;;  %11759 = vmatprep.subr.bf16.mxu0 %v12668_v50  ;;  %v4347_v49 = vadd.f32 %v15099_v56, %v11968_v22 }
 0x2a9   : > { %4382 = vst [vmem:[#allocation2 + $0x110] sm:$0xff] %v15173_v20  ;;  %v11984_v33 = vadd.f32 %v10908_v39, %v16676_v46  ;;  %v11974_v45 = vadd.f32 %v15121_v1, %v4295_v30  ;;  %v11979_v35 = vadd.f32 %v11978_v21, %v14997_v18  ;;  %v7639_v0 = vshll.u32 %v7534_v6, 16  ;;  %v16678_v30 = vld [vmem:[#allocation28_spill] sm:$0xff] }
 0x2aa   : > { %v4350_v10 = vadd.f32 %v15099_v56, %v11971_v9  ;;  %6589 = vmatmul.mubr.bf16.gmra.mrb[204].mxu0 %v14932_v26  ;;  %v7638_v31 = vrot.slane %v7636_v11, 7  ;;  %v7663_v54 = vshrl.u32 %v15162_v15, 16  ;;  %v10909_v40 = vpop.f32.mrb[140].mxu0  ;;  %v7634_v39 = vrot.slane %v7632_v51, 7  ;;  %v12661_v11 = vld [vmem:[#allocation8 + $0x148] sm:$0xff]  }
 0x2ab   : > { %v4348_v63 = vadd.f32 %v15099_v56, %v11974_v45  ;;  %v11985_v43 = vadd.f32 %v11984_v33, %v15011_v16  ;;  %6596 = vmatprep.mubr.bf16.mxu0 %v16677_v13  ;;  %v15191_v28 = vor.u32 %v7628_v58, %v7529_v5  ;;  %11760 = vmatpush3.bf16.msra.mxu0 %v12668_v50  ;;  %v4365_v18 = vmax.f32 %v4349_v62, 0.0  ;;  %v10910_v21 = vpop.f32.mrb[141].mxu0  ;;  %v15201_v33 = vld [vmem:[#allocation2 + $0xd0] sm:$0x1]  ;;  %v16679_v45 = vld [vmem:[#allocation23_spill] sm:$0xff] }
 0x2ac   : > { %v4366_v1 = vmax.f32 %v4350_v10, 0.0  ;;  %v7641_v34 = vor.u32 %v7639_v0, %v7638_v31  ;;  %v7667_v26 = vshrl.u32 %v7541_v8, 16  ;;  %11761 = vmatprep.subr.bf16.mxu0 %v12669_v32  ;;  %v4363_v6 = vmax.f32 %v4347_v49, 0.0  ;;  %v11681_v15 = vpop.f32.mrb[60].mxu1  ;;  %v10912_v9 = vpop.f32.mrb[142].mxu0 }
 0x2ad   : > { %v4364_v22 = vmax.f32 %v4348_v63, 0.0  ;;  %v10911_v23 = vadd.f32 %v10910_v21, %v10909_v40  ;;  %v7630_v16 = vsel %vm4508_vm2, %v16678_v30, %v15191_v28  ;;  %v4308_v5 = vpop.f32.mrb[61].mxu1  ;;  %v10913_v58 = vpop.f32.mrb[143].mxu0  ;;  %v7670_v46 = vshll.u32 %v7541_v8, 16 }
 0x2ae   : > { %v15196_v51 = vpack.c.bf16 %v4366_v1, %v4365_v18  ;;  %v15199_v50 = vsel %vm4508_vm2, %v7634_v39, %v7641_v34  ;;  %v7669_v62 = vrot.slane %v7667_v26, 7  ;;  %v11980_v31 = vadd.f32 %v11979_v35, %v4308_v5  ;;  %v11682_v0 = vpop.f32.mrb[62].mxu1  ;;  %v12671_v1 = vld [vmem:[#allocation8 + $0x40] sm:$0xff]  }
 0x2af   : > { %v15203_v49 = vpack.c.bf16 %v4364_v22, %v4363_v6  ;;  %v11975_v10 = vadd.f32 %v10911_v23, %v16679_v45  ;;  %v10914_v63 = vadd.f32 %v10913_v58, %v10912_v9  ;;  %8120 = vmatprep.mubr.bf16.mxu1 %v15199_v50  ;;  %v4311_v40 = vpop.f32.mrb[63].mxu1  ;;  %v7665_v13 = vrot.slane %v7663_v54, 7  ;;  %11762 = vmatpush3.bf16.msra.mxu0 %v12669_v32  ;;  %v16680_v34 = vld [vmem:[#allocation24_spill] sm:$0xff]  ;;  %v16681_v23 = vld [vmem:[#allocation29_spill] sm:$0xff]  ;;  %v12664_v32 = vld [vmem:[#allocation8 + $0x150] sm:$0xff]  }
 0x2b0   : > { %4385 = vst [vmem:[#allocation2 + $0x158] sm:$0xff] %v15196_v51  ;;  %8121 = vmatmul.mubr.bf16.vlgmr.msra.gmra.mrb[128].mxu1 %v7630_v16  ;;  %v7672_v39 = vor.u32 %v7670_v46, %v7669_v62  ;;  %v7660_v8 = vor.u32 %v15164_v55, %v7536_v41  ;;  %v7543_v18 = vshll.u32 %v15173_v20, 16  ;;  %v4351_v21 = vadd.f32 %v15099_v56, %v11980_v31  ;;  %v12724_v22 = vld [vmem:[#allocation8 + $0x140] sm:$0xff]  }
 0x2b1   : > { %4384 = vst [vmem:[#allocation2 + $0x140] sm:$0xff] %v15203_v49  ;;  %v11976_v35 = vadd.f32 %v11975_v10, %v15052_v47  ;;  %v11981_v26 = vadd.f32 %v10914_v63, %v16680_v34  ;;  %v11986_v6 = vadd.f32 %v11985_v43, %v4311_v40  ;;  %11780 = vmatpush3.bf16.msra.mxu1 %v12724_v22  ;;  %v7546_v55 = vshrl.u32 %v15173_v20, 16  ;;  %v16682_v63 = vld [vmem:[#allocation30_spill] sm:$0xff]  ;;  %v12667_v40 = vld [vmem:[#allocation8 + $0x158] sm:$0xff]  }
 0x2b2   : > { %v7673_v54 = vsel %vm4508_vm2, %v7665_v13, %v7672_v39  ;;  %6597 = vmatmul.mubr.bf16.gmra.mrb[208].mxu0 %v16681_v23  ;;  %11781 = vmatprep.subr.bf16.mxu1 %v12661_v11  ;;  %v7545_v41 = vrot.slane %v7543_v18, 1  ;;  %v7550_v47 = vshll.u32 %v15171_v38, 16  ;;  %v6062_v16 = vrot.slane %v15201_v33, 1 }
 0x2b3   : > { %v11977_v9 = vadd.f32 %v11976_v35, %v11681_v15  ;;  %v11982_v30 = vadd.f32 %v11981_v26, %v15059_v60  ;;  %v4352_v43 = vadd.f32 %v15099_v56, %v11986_v6  ;;  %8128 = vmatprep.mubr.bf16.mxu1 %v7673_v54  ;;  %6604 = vmatprep.mubr.bf16.mxu0 %v15022_v2  ;;  %v4367_v5 = vmax.f32 %v4351_v21, 0.0 }
 0x2b4   : > { %v7548_v58 = vor.u32 %v7546_v55, %v7545_v41  ;;  %v7694_v62 = vshrl.u32 %v7545_v41, 16  ;;  %v7552_v46 = vrot.slane %v7550_v47, 1  ;;  %11331 = vmatprep.subr.bf16.mxu0 %v12671_v1  ;;  %v7553_v60 = vshrl.u32 %v15171_v38, 16  ;;  %v15230_v31 = vpop.f32.mrb[96].mxu1  ;;  %v15251_v41 = vld [vmem:[#allocation2 + $0x180] sm:$0x80] }
 0x2b5   : > { %v4353_v45 = vadd.f32 %v15099_v56, %v11977_v9  ;;  %v11983_v10 = vadd.f32 %v11982_v30, %v11682_v0  ;;  %v4368_v15 = vmax.f32 %v4352_v43, 0.0  ;;  %11782 = vmatpush3.bf16.msra.mxu1 %v12661_v11  ;;  %v7661_v2 = vsel %vm4508_vm2, %v16682_v63, %v7660_v8  ;;  %v15234_v13 = vpop.f32.mrb[97].mxu1  ;;  %v15254_v43 = vld [vmem:[#allocation2 + $0xe8] sm:$0x1] }
 0x2b6   : > { %v7698_v33 = vshrl.u32 %v7548_v58, 16  ;;  %11783 = vmatprep.subr.bf16.mxu1 %v12664_v32  ;;  %v6244_v39 = vrot.slane %v15130_v29, 7  ;;  %v16683_v1 = vshrl.u32 %v15125_v53, 16  ;;  %v7690_v21 = vrot.slane %v7546_v55, 7  ;;  %v15242_v26 = vpop.f32.mrb[98].mxu1 }
 0x2b7   : > { %v4354_v0 = vadd.f32 %v15099_v56, %v11983_v10  ;;  %v15240_v11 = vpack.c.bf16 %v4368_v15, %v4367_v5  ;;  %v7555_v34 = vor.u32 %v7553_v60, %v7552_v46  ;;  %v7701_v6 = vshll.u32 %v7548_v58, 16  ;;  %v15249_v23 = vpop.f32.mrb[99].mxu1  ;;  %v16684_v58 = vld [vmem:[#allocation32_spill] sm:$0xff] }
 0x2b8   : > { %v6248_v35 = vrot.slane %v16683_v1, 7  ;;  %8129 = vmatmul.mubr.bf16.gmra.mrb[132].mxu1 %v7661_v2  ;;  %v7700_v8 = vrot.slane %v7698_v33, 7  ;;  %v16607_v22 = vshll.u32 %v15203_v49, 16  ;;  %v15247_v54 = vsel %vm576_vm1, %v15104_v17, %v6062_v16  ;;  %v15267_v33 = vld [vmem:[#allocation2 + $0xe8] sm:$0x1] }
 0x2b9   : > { %v4369_v56 = vmax.f32 %v4353_v45, 0.0  ;;  %v4370_v9 = vmax.f32 %v4354_v0, 0.0  ;;  %4386 = vst [vmem:[#allocation2 + $0x170] sm:$0xff] %v15240_v11  ;;  %v7696_v55 = vrot.slane %v7694_v62, 7  ;;  %v7729_v30 = vshrl.u32 %v7555_v34, 16  ;;  %11784 = vmatpush3.bf16.msra.mxu1 %v12664_v32  ;;  %v12670_v45 = vld [vmem:[#allocation8 + $0x160] sm:$0xff]  }
 0x2ba   : > { %v7703_v5 = vor.u32 %v7701_v6, %v7700_v8  ;;  %6605 = vmatmul.mubr.bf16.gmra.mrb[212].mxu0 %v16684_v58  ;;  %v7725_v10 = vshrl.u32 %v7552_v46, 16  ;;  %11785 = vmatprep.subr.bf16.mxu1 %v12667_v40  ;;  %v15259_v16 = vrot.slane %v16607_v22, 1  ;;  %v16608_v15 = vshrl.u32 %v15203_v49, 16 }
 0x2bb   : > { %v15262_v63 = vpack.c.bf16 %v4370_v9, %v4369_v56  ;;  %6612 = vmatprep.mubr.bf16.mxu0 %v15045_v7  ;;  %v7691_v32 = vor.u32 %v7690_v21, %v7543_v18  ;;  %v7731_v62 = vrot.slane %v7729_v30, 7  ;;  %v7732_v2 = vshll.u32 %v7555_v34, 16  ;;  %v7064_v56 = vld [vmem:[#allocation2 + $0xc0] sm:$0x80]  ;;  %v12673_v34 = vld [vmem:[#allocation8 + $0x168] sm:$0xff]  }
 0x2bc   : > { %v7704_v46 = vsel %vm4508_vm2, %v7696_v55, %v7703_v5  ;;  %v7562_v1 = vor.u32 %v16608_v15, %v15259_v16  ;;  %v16685_v0 = vshll.u32 %v15097_v27, 16  ;;  %v6273_v6 = vshrl.u32 %v15104_v17, 16  ;;  %v12678_v55 = vld [vmem:[#allocation8 + $0x170] sm:$0xff]   ;;  %v15296_v15 = vld [vmem:[#allocation2 + $0x118] sm:$0x1] }
 0x2bd   : > { %4387 = vst [vmem:[#allocation2 + $0x188] sm:$0xff] %v15262_v63  ;;  %8136 = vmatprep.mubr.bf16.mxu1 %v7704_v46  ;;  %v7734_v18 = vor.u32 %v7732_v2, %v7731_v62  ;;  %11786 = vmatpush3.bf16.msra.mxu1 %v12667_v40  ;;  %v16610_v21 = vshll.u32 %v15196_v51, 16  ;;  %v7842_v9 = vshrl.u32 %v15251_v41, 16  ;;  %v7727_v30 = vrot.slane %v7725_v10, 7 }
 0x2be   : > { %v6220_v8 = vor.u32 %v16685_v0, %v15135_v4  ;;  %v7721_v5 = vrot.slane %v7553_v60, 7  ;;  %v7760_v58 = vshrl.u32 %v7562_v1, 16  ;;  %11787 = vmatprep.subr.bf16.mxu1 %v12670_v45  ;;  %v6277_v27 = vshrl.u32 %v15247_v54, 16  ;;  %v15282_v4 = vld [vmem:[#allocation2 + $0x100] sm:$0x1] }
 0x2bf   : > { %v7692_v46 = vsel %vm4508_vm2, %v15024_v14, %v7691_v32  ;;  %v15288_v40 = vrot.slane %v16610_v21, 1  ;;  %v7567_v62 = vshrl.u32 %v15196_v51, 16  ;;  %v16686_v41 = vshll.u32 %v15125_v53, 16 }
 0x2c0   : > { %8137 = vmatmul.mubr.bf16.gmra.mrb[136].mxu1 %v7692_v46  ;;  %v7735_v60 = vsel %vm4508_vm2, %v7727_v30, %v7734_v18  ;;  %v7762_v10 = vrot.slane %v7760_v58, 7  ;;  %v16609_v0 = vshll.u32 %v15240_v11, 16  ;;  %v6065_v22 = vrot.slane %v15267_v33, 1  ;;  %v15310_v30 = vld [vmem:[#allocation2 + $0x130] sm:$0x1] }
 0x2c1   : > { %v6251_v2 = vor.u32 %v16686_v41, %v6248_v35  ;;  %8144 = vmatprep.mubr.bf16.mxu1 %v7735_v60  ;;  %v15301_v14 = vor.u32 %v7567_v62, %v15288_v40  ;;  %11788 = vmatpush3.bf16.msra.mxu1 %v12670_v45  ;;  %v16687_v53 = vrot.slane %v15086_v42, 7  ;;  %v15308_v32 = vrot.slane %v6273_v6, 7  ;;  %v7066_v45 = vld [vmem:[#allocation2 + $0xd8] sm:$0x80] }
 0x2c2   : > { %v7185_v18 = vshrl.u32 %v7064_v56, 16  ;;  %6613 = vmatmul.mubr.bf16.gmra.mrb[216].mxu0 %v15038_v57  ;;  %v7756_v58 = vshrl.u32 %v15259_v16, 16  ;;  %v7763_v46 = vshll.u32 %v7562_v1, 16  ;;  %11789 = vmatprep.subr.bf16.mxu1 %v12673_v34  ;;  %v6280_v41 = vshll.u32 %v15247_v54, 16  ;;  %v7080_v1 = vld [vmem:[#allocation2 + $0xd0] sm:$0x1] }
 0x2c3   : > { %v15306_v35 = vsel %vm4508_vm2, %v16687_v53, %v6220_v8  ;;  %v15315_v60 = vrot.slane %v7842_v9, 7  ;;  %6620 = vmatprep.mubr.bf16.mxu0 %v15199_v50  ;;  %v7722_v42 = vor.u32 %v7721_v5, %v7550_v47  ;;  %v15323_v8 = vsel %vm4508_vm2, %v6244_v39, %v6251_v2  ;;  %v15332_v9 = vld [vmem:[#allocation2 + $0x148] sm:$0x1]  ;;  %v7070_v50 = vld [vmem:[#allocation2 + $0x108] sm:$0x80] }
 0x2c4   : > { %v6279_v57 = vrot.slane %v6277_v27, 7  ;;  %v7765_v6 = vor.u32 %v7763_v46, %v7762_v10  ;;  %v7791_v54 = vshrl.u32 %v15301_v14, 16  ;;  %v15329_v56 = vrot.slane %v16609_v0, 1  ;;  %v7068_v27 = vld [vmem:[#allocation2 + $0xf0] sm:$0x80]  ;;  %v12683_v46 = vld [vmem:[#allocation8 + $0x178] sm:$0xff]  }
 0x2c5   : > { %11790 = vmatpush3.bf16.msra.mxu1 %v12673_v34  ;;  %v15336_v29 = vadd.f32 %v15234_v13, %v15230_v31  ;;  %v15338_v47 = vrot.slane %v7185_v18, 7  ;;  %v7216_v5 = vshrl.u32 %v7066_v45, 16  ;;  %v7758_v2 = vrot.slane %v7756_v58, 7  ;;  %v15351_v58 = vld [vmem:[#allocation2 + $0x160] sm:$0x1] }
 0x2c6   : > { %v7574_v10 = vshrl.u32 %v15240_v11, 16  ;;  %11791 = vmatprep.subr.bf16.mxu1 %v12678_v55  ;;  %v15344_v53 = vadd.f32 %v15249_v23, %v15242_v26  ;;  %v7161_v34 = vrot.slane %v7080_v1, 1  ;;  %v7723_v31 = vsel %vm4508_vm2, %v15031_v37, %v7722_v42  ;;  %v15353_v16 = vld [vmem:[#allocation2 + $0x178] sm:$0x1]  ;;  %v15360_v37 = vld [vmem:[#allocation2 + $0x190] sm:$0x1] }
 0x2c7   : > { %v16688_v13 = vshrl.u32 %v15203_v49, 16  ;;  %v6282_v39 = vor.u32 %v6280_v41, %v6279_v57  ;;  %v7766_v26 = vsel %vm4508_vm2, %v7758_v2, %v7765_v6  ;;  %v7793_v23 = vrot.slane %v7791_v54, 7  ;;  %v15362_v42 = vld [vmem:[#allocation2 + $0xe8] sm:$0x1]  ;;  %v7072_v54 = vld [vmem:[#allocation2 + $0x120] sm:$0x80] }
 0x2c8   : > { %8145 = vmatmul.mubr.bf16.gmra.mrb[140].mxu1 %v7723_v31  ;;  %v15357_v1 = vor.u32 %v7574_v10, %v15329_v56  ;;  %v16611_v0 = vshll.u32 %v15262_v63, 16  ;;  %v6290_v41 = vsel %vm4508_vm2, %v15033_v12, %v15191_v28  ;;  %v15367_v57 = vrot.slane %v7216_v5, 7  ;;  %v15371_v45 = vld [vmem:[#allocation8 + $0x80] sm:$0xff]  }
 0x2c9   : > { %v7752_v18 = vrot.slane %v16688_v13, 7  ;;  %8152 = vmatprep.mubr.bf16.mxu1 %v7766_v26  ;;  %11792 = vmatpush3.bf16.msra.mxu1 %v12678_v55  ;;  %v7247_v31 = vshrl.u32 %v7068_v27, 16  ;;  %v7278_v6 = vshrl.u32 %v7070_v50, 16  ;;  %v7787_v2 = vshrl.u32 %v15288_v40, 16  ;;  %v15378_v12 = vld [vmem:[#allocation2 + $0x100] sm:$0x1] }
 0x2ca   : > { %6621 = vmatmul.mubr.bf16.gmra.mrb[220].mxu0 %v6290_v41  ;;  %v7794_v13 = vshll.u32 %v15301_v14, 16  ;;  %11793 = vmatprep.subr.bf16.mxu1 %v12683_v46  ;;  %v15376_v21 = vsel %vm576_vm1, %v15104_v17, %v7161_v34  ;;  %v16689_v28 = vshll.u32 %v15203_v49, 16  ;;  %v7822_v27 = vshrl.u32 %v15357_v1, 16  ;;  %v12674_v40 = vld [vmem:[#allocation8 + $0x48] sm:$0xff]  }
 0x2cb   : > { %11763 = vmatprep.mubr.bf16.mxu0 %v15071_v3  ;;  %v15389_v17 = vrot.slane %v16611_v0, 1  ;;  %v7309_v34 = vshrl.u32 %v7072_v54, 16  ;;  %v15391_v41 = vrot.slane %v7247_v31, 7  ;;  %v7208_v3 = vshrl.u32 %v15376_v21, 16  ;;  %v12672_v31 = vld [vmem:[#allocation8] sm:$0xff]  }
 0x2cc   : > { %v7753_v55 = vor.u32 %v7752_v18, %v16689_v28  ;;  %v7796_v5 = vor.u32 %v7794_v13, %v7793_v23  ;;  %v15394_v18 = vrot.slane %v7278_v6, 7  ;;  %v7789_v14 = vrot.slane %v7787_v2, 7  ;;  %v15408_v2 = vld [vmem:[#allocation2 + $0xe0] sm:$0xff] }
 0x2cd   : > { %11794 = vmatpush3.bf16.msra.mxu1 %v12683_v46  ;;  %v7581_v50 = vshrl.u32 %v15262_v63, 16  ;;  %v15399_v23 = vrot.slane %v15138_v59, 1  ;;  %v7211_v13 = vshll.u32 %v15376_v21, 16  ;;  %v7783_v6 = vrot.slane %v7567_v62, 7 }
 0x2ce   : > { %11811 = vmatprep.subr.bf16.mxu1 %v15371_v45  ;;  %v7754_v46 = vsel %vm4508_vm2, %v15073_v24, %v7753_v55  ;;  %v7814_v54 = vrot.slane %v7574_v10, 7  ;;  %v16612_v28 = vrot.slane %v15132_v36, 1  ;;  %v7797_v59 = vsel %vm4508_vm2, %v7789_v14, %v7796_v5  ;;  %v15426_v14 = vld [vmem:[#allocation2 + $0x118] sm:$0x1]  ;;  %v15428_v5 = vld [vmem:[#allocation2 + $0x130] sm:$0x1] }
 0x2cf   : > { %v7824_v26 = vrot.slane %v7822_v27, 7  ;;  %v15412_v0 = vor.u32 %v7581_v50, %v15389_v17  ;;  %v15414_v21 = vrot.slane %v7309_v34, 7  ;;  %v7818_v24 = vshrl.u32 %v15329_v56, 16  ;;  %v12675_v34 = vld [vmem:[#allocation8 + $0x8] sm:$0xff]  }
 0x2d0   : > { %8153 = vmatmul.mubr.bf16.gmra.mrb[144].mxu1 %v7754_v46  ;;  %v15419_v62 = vsel %vm4508_vm2, %v15308_v32, %v6282_v39  ;;  %v15424_v10 = vsel %vm4508_vm2, %v15338_v47, %v15006_v19  ;;  %v7210_v55 = vrot.slane %v7208_v3, 7  ;;  %v7825_v27 = vshll.u32 %v15357_v1, 16 }
 0x2d1   : > { %8160 = vmatprep.mubr.bf16.mxu1 %v7797_v59  ;;  %v16690_v56 = vrot.slane %v15254_v43, 1  ;;  %v15442_v19 = vsel %vm576_vm1, %v15399_v23, %v6065_v22  ;;  %v16692_v43 = vshll.u32 %v15240_v11, 16  ;;  %v16693_v46 = vrot.slane %v15282_v4, 1  ;;  %v15456_v59 = vld [vmem:[#allocation2 + $0x138] sm:$0x80] }
 0x2d2   : > { %11764 = vmatmul.mubr.bf16.vlgmr.msra.gmra.mrb[176].mxu0 %v15090_v61  ;;  %v16691_v61 = vshll.u32 %v15196_v51, 16  ;;  %v7606_v22 = vrot.slane %v15173_v20, 1  ;;  %16694 = vst [vmem:[#allocation25_spill] sm:$0xff] %v15456_v59  ;;  %v15463_v47 = vor.u32 %v7211_v13, %v7210_v55  ;;  %v16696_v13 = vrot.slane %v15296_v15, 1  ;;  %v12679_v55 = vld [vmem:[#allocation8 + $0x58] sm:$0xff]  }
 0x2d3   : > { %v15436_v39 = vsel %vm576_vm1, %v15399_v23, %v16690_v56  ;;  %11767 = vmatprep.mubr.bf16.mxu0 %v15128_v25  ;;  %11332 = vmatpush3.bf16.msra.mxu0 %v12672_v31  ;;  %v7815_v3 = vor.u32 %v7814_v54, %v16692_v43  ;;  %v7605_v33 = vsel %vm576_vm1, %v16612_v28, %v16693_v46  ;;  %v12676_v31 = vld [vmem:[#allocation8 + $0x50] sm:$0xff]   ;;  %v7853_v56 = vshrl.u32 %v15412_v0, 16 }
 0x2d4   : > { %v7784_v1 = vor.u32 %v7783_v6, %v16691_v61  ;;  %11333 = vmatprep.subr.bf16.mxu0 %v12674_v40  ;;  %v7827_v25 = vor.u32 %v7825_v27, %v7824_v26  ;;  %v7845_v54 = vrot.slane %v7581_v50, 7  ;;  %v7648_v4 = vshrl.u32 %v15436_v39, 16  ;;  %v12677_v61 = vld [vmem:[#allocation8 + $0x10] sm:$0xff]  }
 0x2d5   : > { %v6308_v43 = vshrl.u32 %v15442_v19, 16  ;;  %v7820_v46 = vrot.slane %v7818_v24, 7  ;;  %v7679_v20 = vshrl.u32 %v7605_v33, 16  ;;  %v16695_v28 = vshll.u32 %v15408_v2, 16 }
 0x2d6   : > { %v7785_v27 = vsel %vm4508_vm2, %v15081_v48, %v7784_v1  ;;  %v7816_v50 = vsel %vm4508_vm2, %v15116_v52, %v7815_v3  ;;  %v7849_v6 = vshrl.u32 %v15389_v17, 16  ;;  %v7608_v24 = vsel %vm576_vm1, %v7606_v22, %v16696_v13 }
 0x2d7   : > { %v15467_v40 = vrot.slane %v16695_v28, 1  ;;  %11334 = vmatpush3.bf16.msra.mxu0 %v12675_v34  ;;  %v7828_v28 = vsel %vm4508_vm2, %v7820_v46, %v7827_v25  ;;  %v7855_v26 = vrot.slane %v7853_v56, 7  ;;  %v7099_v59 = vshrl.u32 %v15408_v2, 16  ;;  %v12680_v56 = vld [vmem:[#allocation8 + $0x18] sm:$0xff]  }
 0x2d8   : > { %8161 = vmatmul.mubr.bf16.gmra.mrb[148].mxu1 %v7785_v27  ;;  %11335 = vmatprep.subr.bf16.mxu0 %v12676_v31  ;;  %v7609_v48 = vrot.slane %v15171_v38, 1  ;;  %v7856_v1 = vshll.u32 %v15412_v0, 16  ;;  %v16697_v52 = vshll.u32 %v15262_v63, 16  ;;  %v7650_v34 = vrot.slane %v7648_v4, 7 }
 0x2d9   : > { %8168 = vmatprep.mubr.bf16.mxu1 %v7828_v28  ;;  %v6310_v15 = vrot.slane %v6308_v43, 7  ;;  %v7681_v3 = vrot.slane %v7679_v20, 7  ;;  %v7710_v27 = vshrl.u32 %v7608_v24, 16  ;;  %v15486_v25 = vor.u32 %v7099_v59, %v15467_v40  ;;  %v12681_v43 = vld [vmem:[#allocation8 + $0x60] sm:$0xff]  }
 0x2da   : > { %v7846_v17 = vor.u32 %v7845_v54, %v16697_v52  ;;  %11768 = vmatmul.mubr.bf16.gmra.mrb[180].mxu0 %v15169_v44  ;;  %v7612_v31 = vrot.slane %v15203_v49, 1  ;;  %v7851_v38 = vrot.slane %v7849_v6, 7  ;;  %v7644_v0 = vshrl.u32 %v15399_v23, 16  ;;  %v15500_v6 = vld [vmem:[#allocation2 + $0xf8] sm:$0xff] }
 0x2db   : > { %11771 = vmatprep.mubr.bf16.mxu0 %v15306_v35  ;;  %11336 = vmatpush3.bf16.msra.mxu0 %v12677_v61  ;;  %v7651_v54 = vshll.u32 %v15436_v39, 16  ;;  %v6311_v4 = vshll.u32 %v15442_v19, 16  ;;  %v7858_v44 = vor.u32 %v7856_v1, %v7855_v26  ;;  %v16698_v46 = vrot.slane %v15132_v36, 1  ;;  %v12682_v1 = vld [vmem:[#allocation8 + $0x20] sm:$0xff]  }
 0x2dc   : > { %11337 = vmatprep.subr.bf16.mxu0 %v12679_v55  ;;  %v7682_v13 = vshll.u32 %v7605_v33, 16  ;;  %v16699_v28 = vrot.slane %v15310_v30, 1  ;;  %v15504_v23 = vsel %vm4508_vm2, %v15315_v60, %v7846_v17  ;;  %v15506_v61 = vshrl.u32 %v7606_v22, 16 }
 0x2dd   : > { %v7675_v20 = vshrl.u32 %v16698_v46, 16  ;;  %v7653_v39 = vor.u32 %v7651_v54, %v7650_v34  ;;  %v6313_v19 = vor.u32 %v6311_v4, %v6310_v15  ;;  %v7712_v55 = vrot.slane %v7710_v27, 7  ;;  %v12684_v15 = vld [vmem:[#allocation8 + $0x68] sm:$0xff]   ;;  %v15525_v4 = vld [vmem:[#allocation2 + $0x110] sm:$0xff] }
 0x2de   : > { %v15498_v35 = vsel %vm576_vm1, %v7609_v48, %v16699_v28  ;;  %v7684_v26 = vor.u32 %v7682_v13, %v7681_v3  ;;  %v7227_v36 = vshrl.u32 %v15486_v25, 16  ;;  %v16700_v33 = vrot.slane %v15332_v9, 1 }
 0x2df   : > { %11338 = vmatpush3.bf16.msra.mxu0 %v12680_v56  ;;  %v7646_v52 = vrot.slane %v7644_v0, 7  ;;  %v7223_v60 = vshrl.u32 %v15467_v40, 16  ;;  %v7741_v17 = vshrl.u32 %v15498_v35, 16  ;;  %v16614_v22 = vshll.u32 %v15500_v6, 16 }
 0x2e0   : > { %v15514_v30 = vsel %vm576_vm1, %v7612_v31, %v16700_v33  ;;  %8169 = vmatmul.mubr.bf16.gmra.mrb[152].mxu1 %v7816_v50  ;;  %v7859_v34 = vsel %vm4508_vm2, %v7851_v38, %v7858_v44  ;;  %11339 = vmatprep.subr.bf16.mxu0 %v12681_v43  ;;  %v7677_v9 = vrot.slane %v7675_v20, 7  ;;  %v7713_v3 = vshll.u32 %v7608_v24, 16  ;;  %v12685_v43 = vld [vmem:[#allocation8 + $0x28] sm:$0xff]  }
 0x2e1   : > { %v7615_v27 = vrot.slane %v15196_v51, 1  ;;  %8176 = vmatprep.mubr.bf16.mxu1 %v7859_v34  ;;  %v7654_v56 = vsel %vm4508_vm2, %v7646_v52, %v7653_v39  ;;  %v6314_v0 = vsel %vm4508_vm2, %v7646_v52, %v6313_v19  ;;  %v7708_v40 = vrot.slane %v15506_v61, 7 }
 0x2e2   : > { %v7772_v54 = vshrl.u32 %v15514_v30, 16  ;;  %11772 = vmatmul.mubr.bf16.gmra.mrb[184].mxu0 %v15323_v8  ;;  %v15529_v50 = vsel %vm4508_vm2, %v7677_v9, %v7684_v26  ;;  %v7715_v38 = vor.u32 %v7713_v3, %v7712_v55  ;;  %v7229_v24 = vrot.slane %v7227_v36, 7  ;;  %v12686_v8 = vld [vmem:[#allocation8 + $0x70] sm:$0xff]  }
 0x2e3   : > { %v7219_v44 = vrot.slane %v7099_v59, 7  ;;  %11775 = vmatprep.mubr.bf16.mxu0 %v15419_v62  ;;  %11340 = vmatpush3.bf16.msra.mxu0 %v12682_v1  ;;  %v7225_v46 = vrot.slane %v7223_v60, 7  ;;  %v7737_v20 = vshrl.u32 %v7609_v48, 16  ;;  %v7743_v13 = vrot.slane %v7741_v17, 7  ;;  %v11027_v39 = vpop.f32.mrb[144].mxu0  ;;  %v11113_v19 = vpop.f32.mrb[100].mxu1 }
 0x2e4   : > { %v15534_v28 = vrot.slane %v16614_v22, 1  ;;  %11341 = vmatprep.subr.bf16.mxu0 %v12684_v15  ;;  %v7230_v61 = vshll.u32 %v15486_v25, 16  ;;  %v7744_v26 = vshll.u32 %v15498_v35, 16  ;;  %v16701_v59 = vrot.slane %v15351_v58, 1  ;;  %v11028_v55 = vpop.f32.mrb[145].mxu0  ;;  %v11114_v36 = vpop.f32.mrb[101].mxu1 }
 0x2e5   : > { %v7110_v48 = vshll.u32 %v15525_v4, 16  ;;  %v7768_v33 = vshrl.u32 %v7612_v31, 16  ;;  %v7774_v1 = vrot.slane %v7772_v54, 7  ;;  %v7775_v52 = vshll.u32 %v15514_v30, 16  ;;  %v11030_v58 = vpop.f32.mrb[146].mxu0  ;;  %v11116_v17 = vpop.f32.mrb[102].mxu1 }
 0x2e6   : > { %v15543_v62 = vsel %vm576_vm1, %v7615_v27, %v16701_v59  ;;  %v7106_v25 = vshrl.u32 %v15500_v6, 16  ;;  %v11029_v35 = vadd.f32 %v11028_v55, %v11027_v39  ;;  %v15550_v60 = vadd.f32 %v11114_v36, %v11113_v19  ;;  %v11031_v3 = vpop.f32.mrb[147].mxu0  ;;  %v11117_v59 = vpop.f32.mrb[103].mxu1  ;;  %v12687_v22 = vld [vmem:[#allocation8 + $0x30] sm:$0xff]  }
 0x2e7   : > { %v7232_v34 = vor.u32 %v7230_v61, %v7229_v24  ;;  %v16702_v15 = vshll.u32 %v15408_v2, 16  ;;  %11342 = vmatpush3.bf16.msra.mxu0 %v12685_v43  ;;  %v7746_v49 = vor.u32 %v7744_v26, %v7743_v13  ;;  %v7803_v30 = vshrl.u32 %v15543_v62, 16 }
 0x2e8   : > { %v15555_v31 = vor.u32 %v7106_v25, %v15534_v28  ;;  %v7618_v54 = vrot.slane %v15240_v11, 1  ;;  %v15560_v39 = vadd.f32 %v15336_v29, %v11029_v35  ;;  %8177 = vmatmul.mubr.bf16.gmra.mrb[156].mxu1 %v15504_v23  ;;  %v11032_v24 = vadd.f32 %v11031_v3, %v11030_v58  ;;  %11343 = vmatprep.subr.bf16.mxu0 %v12686_v8  ;;  %v15571_v29 = vld [vmem:[#allocation2 + $0x128] sm:$0xff] }
 0x2e9   : > { %v7220_v9 = vor.u32 %v7219_v44, %v16702_v15  ;;  %v15563_v19 = vadd.f32 %v11117_v59, %v11116_v17  ;;  %v12688_v44 = vld [vmem:[#allocation8 + $0x78] sm:$0xff]   ;;  %v15567_v43 = vrot.slane %v7110_v48, 1  ;;  %11795 = vmatprep.mubr.bf16.mxu1 %v7654_v56  ;;  %v7716_v13 = vsel %vm4508_vm2, %v7708_v40, %v7715_v38 }
 0x2ea   : > { %v7739_v61 = vrot.slane %v7737_v20, 7  ;;  %v7777_v26 = vor.u32 %v7775_v52, %v7774_v1  ;;  %v7254_v11 = vshrl.u32 %v15534_v28, 16  ;;  %v15574_v23 = vadd.f32 %v15344_v53, %v11032_v24  ;;  %11776 = vmatmul.mubr.bf16.gmra.mrb[188].mxu0 %v6314_v0  ;;  %v12690_v56 = vld [vmem:[#allocation8 + $0x38] sm:$0xff]   ;;  %v12691_v1 = vld [vmem:[#allocation8 + $0x88] sm:$0xff]  }
 0x2eb   : > { %v7770_v55 = vrot.slane %v7768_v33, 7  ;;  %v15578_v8 = vsel %vm4508_vm2, %v15367_v57, %v7220_v9  ;;  %v7113_v36 = vshrl.u32 %v15525_v4, 16  ;;  %11344 = vmatpush3.bf16.msra.mxu0 %v12687_v22  ;;  %8458 = vmatprep.mubr.bf16.mxu0 %v15045_v7  ;;  %v7233_v40 = vsel %vm4508_vm2, %v7225_v46, %v7232_v34 }
 0x2ec   : > { %v7258_v38 = vshrl.u32 %v15555_v31, 16  ;;  %v16703_v20 = vrot.slane %v15353_v16, 1  ;;  %v7250_v0 = vrot.slane %v7106_v25, 7  ;;  %11345 = vmatprep.subr.bf16.mxu0 %v12688_v44  ;;  %v15590_v57 = vsel %vm4508_vm2, %v7739_v61, %v7746_v49  ;;  %v11033_v46 = vpop.f32.mrb[148].mxu0  ;;  %v11119_v33 = vpop.f32.mrb[104].mxu1 }
 0x2ed   : > { %v7805_v28 = vrot.slane %v7803_v30, 7  ;;  %v15595_v7 = vor.u32 %v7113_v36, %v15567_v43  ;;  %v7117_v22 = vshll.u32 %v15571_v29, 16  ;;  %v15599_v16 = vsel %vm4508_vm2, %v7770_v55, %v7777_v26  ;;  %v11034_v58 = vpop.f32.mrb[149].mxu0  ;;  %v11120_v17 = vpop.f32.mrb[105].mxu1 }
 0x2ee   : > { %v15587_v53 = vsel %vm576_vm1, %v7618_v54, %v16703_v20  ;;  %v15601_v52 = vrot.slane %v7254_v11, 7  ;;  %v7799_v25 = vshrl.u32 %v7615_v27, 16  ;;  %v7806_v35 = vshll.u32 %v15543_v62, 16  ;;  %v11036_v30 = vpop.f32.mrb[150].mxu0  ;;  %v11122_v24 = vpop.f32.mrb[106].mxu1 }
 0x2ef   : > { %v7261_v34 = vshll.u32 %v15555_v31, 16  ;;  %v15607_v15 = vshrl.u32 %v7618_v54, 16  ;;  %v7834_v9 = vshrl.u32 %v15587_v53, 16  ;;  %v7621_v3 = vrot.slane %v15262_v63, 1  ;;  %11346 = vmatpush3.bf16.msra.mxu0 %v12690_v56  ;;  %v11037_v31 = vpop.f32.mrb[151].mxu0  ;;  %v11123_v54 = vpop.f32.mrb[107].mxu1 }
 0x2f0   : > { %v11035_v59 = vadd.f32 %v11034_v58, %v11033_v46  ;;  %v15611_v49 = vadd.f32 %v11120_v17, %v11119_v33  ;;  %v7260_v51 = vrot.slane %v7258_v38, 7  ;;  %v16704_v27 = vshll.u32 %v15500_v6, 16  ;;  %11796 = vmatmul.mubr.bf16.vlgmr.msra.gmra.mrb[160].mxu1 %v15529_v50  ;;  %v12692_v38 = vld [vmem:[#allocation8 + $0x90] sm:$0xff]   ;;  %v15643_v33 = vld [vmem:[#allocation2 + $0x140] sm:$0xff] }
 0x2f1   : > { %v7808_v44 = vor.u32 %v7806_v35, %v7805_v28  ;;  %v7289_v61 = vshrl.u32 %v15595_v7, 16  ;;  %v15621_v63 = vrot.slane %v7117_v22, 1  ;;  %v7163_v26 = vrot.slane %v15408_v2, 1  ;;  %11799 = vmatprep.mubr.bf16.mxu1 %v7716_v13  ;;  %11812 = vmatpush3.bf16.msra.mxu1 %v15371_v45 }
 0x2f2   : > { %v15615_v62 = vor.u32 %v7250_v0, %v16704_v27  ;;  %v15625_v11 = vadd.f32 %v15550_v60, %v11035_v59  ;;  %v11038_v55 = vadd.f32 %v11037_v31, %v11036_v30  ;;  %v11124_v56 = vadd.f32 %v11123_v54, %v11122_v24  ;;  %8459 = vmatmul.mubr.bf16.vlgmr.msra.gmra.mrb[224].mxu0 %v15424_v10 }
 0x2f3   : > { %v15629_v50 = vrot.slane %v15500_v6, 1  ;;  %11813 = vmatprep.subr.bf16.mxu1 %v12691_v1  ;;  %v7801_v20 = vrot.slane %v7799_v25, 7  ;;  %v7836_v0 = vrot.slane %v7834_v9, 7  ;;  %v16705_v28 = vrot.slane %v15360_v37, 1  ;;  %8466 = vmatprep.mubr.bf16.mxu0 %v7233_v40 }
 0x2f4   : > { %v7120_v60 = vshrl.u32 %v15571_v29, 16  ;;  %v15639_v45 = vadd.f32 %v15563_v19, %v11038_v55  ;;  %v7263_v13 = vor.u32 %v7261_v34, %v7260_v51  ;;  %v7832_v6 = vrot.slane %v15607_v15, 7  ;;  %v11125_v58 = vpop.f32.mrb[108].mxu1 }
 0x2f5   : > { %v15635_v46 = vsel %vm576_vm1, %v7621_v3, %v16705_v28  ;;  %v7837_v10 = vshll.u32 %v15587_v53, 16  ;;  %v15648_v37 = vsel %vm4508_vm2, %v15391_v41, %v15615_v62  ;;  %v7291_v25 = vrot.slane %v7289_v61, 7  ;;  %11814 = vmatpush3.bf16.msra.mxu1 %v12691_v1  ;;  %v11039_v53 = vpop.f32.mrb[152].mxu0  ;;  %v11126_v59 = vpop.f32.mrb[109].mxu1  ;;  %v12693_v1 = vld [vmem:[#allocation8 + $0x98] sm:$0xff]  }
 0x2f6   : > { %v15653_v35 = vor.u32 %v7120_v60, %v15621_v63  ;;  %v16706_v19 = vrot.slane %v15362_v42, 1  ;;  %v15663_v17 = vsel %vm4508_vm2, %v7801_v20, %v7808_v44  ;;  %v7865_v41 = vshrl.u32 %v15635_v46, 16  ;;  %v11040_v9 = vpop.f32.mrb[153].mxu0  ;;  %11815 = vmatprep.subr.bf16.mxu1 %v12692_v38 }
 0x2f7   : > { %v7281_v34 = vrot.slane %v7113_v36, 7  ;;  %v16707_v15 = vrot.slane %v15378_v12, 1  ;;  %v7839_v30 = vor.u32 %v7837_v10, %v7836_v0  ;;  %v7292_v24 = vshll.u32 %v15595_v7, 16  ;;  %v11042_v36 = vpop.f32.mrb[154].mxu0  ;;  %v11128_v12 = vpop.f32.mrb[110].mxu1 }
 0x2f8   : > { %v15660_v40 = vsel %vm576_vm1, %v7163_v26, %v16706_v19  ;;  %v15675_v51 = vshrl.u32 %v7621_v3, 16  ;;  %v7124_v27 = vshll.u32 %v15643_v33, 16  ;;  %v11041_v31 = vadd.f32 %v11040_v9, %v11039_v53  ;;  %11800 = vmatmul.mubr.bf16.gmra.mrb[164].mxu1 %v15590_v57  ;;  %v11043_v55 = vpop.f32.mrb[155].mxu0  ;;  %v11129_v20 = vpop.f32.mrb[111].mxu1  ;;  %v12694_v53 = vld [vmem:[#allocation8 + $0xa0] sm:$0xff]  }
 0x2f9   : > { %v15672_v42 = vsel %vm576_vm1, %v15629_v50, %v16707_v15  ;;  %v15678_v54 = vadd.f32 %v11126_v59, %v11125_v58  ;;  %v7285_v44 = vshrl.u32 %v15567_v43, 16  ;;  %v7239_v61 = vshrl.u32 %v15660_v40, 16  ;;  %11803 = vmatprep.mubr.bf16.mxu1 %v15599_v16  ;;  %11816 = vmatpush3.bf16.msra.mxu1 %v12692_v38 }
 0x2fa   : > { %v15685_v7 = vsel %vm4508_vm2, %v15601_v52, %v7263_v13  ;;  %v7294_v3 = vor.u32 %v7292_v24, %v7291_v25  ;;  %v7320_v0 = vshrl.u32 %v15653_v35, 16  ;;  %v7270_v28 = vshrl.u32 %v15672_v42, 16  ;;  %8467 = vmatmul.mubr.bf16.gmra.mrb[228].mxu0 %v15578_v8  ;;  %11817 = vmatprep.subr.bf16.mxu1 %v12693_v1 }
 0x2fb   : > { %v15690_v10 = vadd.f32 %v15611_v49, %v11041_v31  ;;  %v11044_v43 = vadd.f32 %v11043_v55, %v11042_v36  ;;  %v11130_v19 = vadd.f32 %v11129_v20, %v11128_v12  ;;  %v7867_v57 = vrot.slane %v7865_v41, 7  ;;  %8474 = vmatprep.mubr.bf16.mxu0 %v15685_v7  ;;  %v12695_v31 = vld [vmem:[#allocation8 + $0xa8] sm:$0xff]  }
 0x2fc   : > { %v7840_v52 = vsel %vm4508_vm2, %v7832_v6, %v7839_v30  ;;  %v7863_v13 = vrot.slane %v15675_v51, 7  ;;  %v7868_v25 = vshll.u32 %v15635_v46, 16  ;;  %v15699_v49 = vrot.slane %v7124_v27, 1  ;;  %v11045_v9 = vpop.f32.mrb[156].mxu0  ;;  %v11131_v59 = vpop.f32.mrb[112].mxu1 }
 0x2fd   : > { %v15701_v58 = vadd.f32 %v11124_v56, %v11044_v43  ;;  %v7287_v16 = vrot.slane %v7285_v44, 7  ;;  %v15706_v8 = vor.u32 %v7281_v34, %v7110_v48  ;;  %v7241_v38 = vrot.slane %v7239_v61, 7  ;;  %11818 = vmatpush3.bf16.msra.mxu1 %v12693_v1  ;;  %v11046_v34 = vpop.f32.mrb[157].mxu0  ;;  %v11132_v51 = vpop.f32.mrb[113].mxu1 }
 0x2fe   : > { %v7322_v41 = vrot.slane %v7320_v0, 7  ;;  %v7272_v6 = vrot.slane %v7270_v28, 7  ;;  %v7127_v15 = vshrl.u32 %v15643_v33, 16  ;;  %v15710_v46 = vrot.slane %v15525_v4, 1  ;;  %11819 = vmatprep.subr.bf16.mxu1 %v12694_v53  ;;  %v11048_v2 = vpop.f32.mrb[158].mxu0 }
 0x2ff   : > { %v15713_v56 = vsel %vm4508_vm2, %v7287_v16, %v7294_v3  ;;  %v7870_v30 = vor.u32 %v7868_v25, %v7867_v57  ;;  %v7316_v24 = vshrl.u32 %v15621_v63, 16  ;;  %v7235_v48 = vshrl.u32 %v7163_v26, 16  ;;  %v11134_v26 = vpop.f32.mrb[114].mxu1 }
 0x300   : > { %v7323_v36 = vshll.u32 %v15653_v35, 16  ;;  %v7242_v4 = vshll.u32 %v15660_v40, 16  ;;  %v7273_v1 = vshll.u32 %v15672_v42, 16  ;;  %v15724_v12 = vor.u32 %v7127_v15, %v15699_v49  ;;  %v15732_v35 = vld [vmem:[#allocation2 + $0x158] sm:$0xff]  ;;  %11804 = vmatmul.mubr.bf16.gmra.mrb[168].mxu1 %v15663_v17  ;;  %v11049_v40 = vpop.f32.mrb[159].mxu0  ;;  %v11135_v42 = vpop.f32.mrb[115].mxu1 }
 0x301   : > { %v11047_v44 = vadd.f32 %v11046_v34, %v11045_v9  ;;  %v15726_v63 = vadd.f32 %v11132_v51, %v11131_v59  ;;  %v7266_v61 = vshrl.u32 %v15629_v50, 16  ;;  %v15730_v55 = vrot.slane %v15571_v29, 1  ;;  %11807 = vmatprep.mubr.bf16.mxu1 %v7840_v52  ;;  %11820 = vmatpush3.bf16.msra.mxu1 %v12694_v53  ;;  %v7085_v34 = vld [vmem:[#allocation2 + $0x148] sm:$0x1] }
 0x302   : > { %v7325_v20 = vor.u32 %v7323_v36, %v7322_v41  ;;  %v7244_v3 = vor.u32 %v7242_v4, %v7241_v38  ;;  %v7275_v0 = vor.u32 %v7273_v1, %v7272_v6  ;;  %v16708_v28 = vrot.slane %v15426_v14, 1  ;;  %8475 = vmatmul.mubr.bf16.gmra.mrb[232].mxu0 %v15648_v37  ;;  %11821 = vmatprep.subr.bf16.mxu1 %v12695_v31  ;;  %v12696_v38 = vld [vmem:[#allocation8 + $0xb0] sm:$0xff]   ;;  %v12697_v36 = vld [vmem:[#allocation8 + $0xb8] sm:$0xff]  }
 0x303   : > { %v15742_v57 = vadd.f32 %v15678_v54, %v11047_v44  ;;  %v11050_v25 = vadd.f32 %v11049_v40, %v11048_v2  ;;  %v11136_v16 = vadd.f32 %v11135_v42, %v11134_v26  ;;  %v7312_v17 = vrot.slane %v7120_v60, 7  ;;  %8482 = vmatprep.mubr.bf16.mxu0 %v15713_v56 }
 0x304   : > { %v15739_v43 = vsel %vm576_vm1, %v15710_v46, %v16708_v28  ;;  %v7318_v41 = vrot.slane %v7316_v24, 7  ;;  %v7237_v14 = vrot.slane %v7235_v48, 7  ;;  %v7351_v6 = vshrl.u32 %v15724_v12, 16  ;;  %v11137_v51 = vpop.f32.mrb[116].mxu1 }
 0x305   : > { %v16615_v9 = vshll.u32 %v15732_v35, 16  ;;  %v15749_v59 = vadd.f32 %v11130_v19, %v11050_v25  ;;  %v15752_v54 = vrot.slane %v7266_v61, 7  ;;  %v7301_v53 = vshrl.u32 %v15739_v43, 16  ;;  %11822 = vmatpush3.bf16.msra.mxu1 %v12695_v31  ;;  %v11138_v1 = vpop.f32.mrb[117].mxu1 }
 0x306   : > { %v16710_v60 = vrot.slane %v15428_v5, 1  ;;  %v7871_v52 = vsel %vm4508_vm2, %v7863_v13, %v7870_v30  ;;  %v7214_v24 = vsel %vm4508_vm2, %v15308_v32, %v15463_v47  ;;  %v7283_v19 = vsel %vm4508_vm2, %v15394_v18, %v15706_v8  ;;  %v11051_v5 = vpop.f32.mrb[160].mxu0  ;;  %v7086_v47 = vld [vmem:[#allocation2 + $0x160] sm:$0x1]  ;;  %11823 = vmatprep.subr.bf16.mxu1 %v12696_v38 }
 0x307   : > { %16709 = vst [vmem:[#allocation17_spill] sm:$0xff] %v15749_v59  ;;  %v15769_v48 = vsel %vm4508_vm2, %v7237_v14, %v7244_v3  ;;  %v15772_v4 = vsel %vm4508_vm2, %v7318_v41, %v7325_v20  ;;  %v15776_v13 = vsel %vm4508_vm2, %v15752_v54, %v7275_v0  ;;  %v15780_v32 = vor.u32 %v7312_v17, %v7117_v22  ;;  %v11052_v30 = vpop.f32.mrb[161].mxu0  ;;  %v11140_v22 = vpop.f32.mrb[118].mxu1  ;;  %v15792_v20 = vld [vmem:[#allocation2 + $0x170] sm:$0xff] }
 0x308   : > { %v15759_v37 = vsel %vm576_vm1, %v15730_v55, %v16710_v60  ;;  %v7347_v18 = vshrl.u32 %v15699_v49, 16  ;;  %v7353_v31 = vrot.slane %v7351_v6, 7  ;;  %v7297_v44 = vshrl.u32 %v15710_v46, 16  ;;  %v11054_v29 = vpop.f32.mrb[162].mxu0  ;;  %11808 = vmatmul.mubr.bf16.gmra.mrb[172].mxu1 %v7871_v52  ;;  %v11141_v0 = vpop.f32.mrb[119].mxu1  ;;  %v12698_v52 = vld [vmem:[#allocation8 + $0x1c0] sm:$0xff]  }
 0x309   : > { %v7332_v2 = vshrl.u32 %v15759_v37, 16  ;;  %v15787_v26 = vrot.slane %v16615_v9, 1  ;;  %v11053_v61 = vadd.f32 %v11052_v30, %v11051_v5  ;;  %v15789_v40 = vadd.f32 %v11138_v1, %v11137_v51  ;;  %v11055_v3 = vpop.f32.mrb[163].mxu0  ;;  %11824 = vmatpush3.bf16.msra.mxu1 %v12696_v38  ;;  %11827 = vmatprep.mubr.bf16.mxu1 %v7214_v24 }
 0x30a   : > { %v7303_v42 = vrot.slane %v7301_v53, 7  ;;  %v7328_v49 = vshrl.u32 %v15730_v55, 16  ;;  %v16617_v28 = vshrl.u32 %v15732_v35, 16  ;;  %v15796_v25 = vrot.slane %v15643_v33, 1  ;;  %8483 = vmatmul.mubr.bf16.gmra.mrb[236].mxu0 %v7283_v19  ;;  %11825 = vmatprep.subr.bf16.mxu1 %v12697_v36 }
 0x30b   : > { %v7176_v17 = vrot.slane %v7085_v34, 1  ;;  %v15799_v41 = vrot.slane %v15732_v35, 1  ;;  %v15802_v14 = vadd.f32 %v15726_v63, %v11053_v61  ;;  %v11056_v6 = vadd.f32 %v11055_v3, %v11054_v29  ;;  %8490 = vmatprep.mubr.bf16.mxu0 %v15772_v4  ;;  %v12699_v29 = vld [vmem:[#allocation8 + $0x180] sm:$0xff]  }
 0x30c   : > { %v11142_v53 = vadd.f32 %v11141_v0, %v11140_v22  ;;  %v7179_v60 = vrot.slane %v7086_v47, 1  ;;  %v7354_v5 = vshll.u32 %v15724_v12, 16  ;;  %v7334_v51 = vrot.slane %v7332_v2, 7  ;;  %v11143_v61 = vpop.f32.mrb[120].mxu1 }
 0x30d   : > { %16711 = vst [vmem:[#allocation18_spill] sm:$0xff] %v15802_v14  ;;  %v15808_v34 = vor.u32 %v16617_v28, %v15787_v26  ;;  %v16616_v30 = vshll.u32 %v15792_v20, 16  ;;  %v15811_v63 = vadd.f32 %v11136_v16, %v11056_v6  ;;  %v7314_v38 = vsel %vm4508_vm2, %v15414_v21, %v15780_v32  ;;  %11826 = vmatpush3.bf16.msra.mxu1 %v12697_v36  ;;  %v11057_v16 = vpop.f32.mrb[164].mxu0 }
 0x30e   : > { %v7304_v24 = vshll.u32 %v15739_v43, 16  ;;  %v7343_v12 = vrot.slane %v7127_v15, 7  ;;  %v7349_v19 = vrot.slane %v7347_v18, 7  ;;  %v7356_v47 = vor.u32 %v7354_v5, %v7353_v31  ;;  %v7087_v43 = vld [vmem:[#allocation2 + $0x178] sm:$0x1]  ;;  %v11058_v18 = vpop.f32.mrb[165].mxu0  ;;  %11411 = vmatprep.subr.bf16.mxu1 %v12698_v52 }
 0x30f   : > { %16712 = vst [vmem:[#allocation26_spill] sm:$0xff] %v15811_v63  ;;  %v15820_v1 = vrot.slane %v7297_v44, 7  ;;  %v7335_v2 = vshll.u32 %v15759_v37, 16  ;;  %v15823_v3 = vrot.slane %v7328_v49, 7  ;;  %v15827_v21 = vsel %vm576_vm1, %v15796_v25, %v7176_v17  ;;  %v11144_v31 = vpop.f32.mrb[121].mxu1  ;;  %v12700_v37 = vld [vmem:[#allocation8 + $0x1c8] sm:$0xff]  }
 0x310   : > { %v7306_v22 = vor.u32 %v7304_v24, %v7303_v42  ;;  %v15831_v15 = vsel %vm576_vm1, %v15799_v41, %v7179_v60  ;;  %v16713_v44 = vld [vmem:[#allocation25_spill] sm:$0xff]  ;;  %v7382_v42 = vshrl.u32 %v15808_v34, 16  ;;  %v15838_v49 = vrot.slane %v16616_v30, 1  ;;  %v11060_v60 = vpop.f32.mrb[166].mxu0  ;;  %v11146_v24 = vpop.f32.mrb[122].mxu1  ;;  %11828 = vmatmul.mubr.bf16.vlgmr.msra.gmra.mrb[160].mxu1 %v15769_v48 }
 0x311   : > { %v7337_v36 = vor.u32 %v7335_v2, %v7334_v51  ;;  %v16714_v0 = vshrl.u32 %v16713_v44, 16  ;;  %v11059_v17 = vadd.f32 %v11058_v18, %v11057_v16  ;;  %v15840_v5 = vadd.f32 %v11144_v31, %v11143_v61  ;;  %v7076_v51 = vld [vmem:[#allocation2 + $0x150] sm:$0x80]  ;;  %v11061_v2 = vpop.f32.mrb[167].mxu0  ;;  %v11147_v44 = vpop.f32.mrb[123].mxu1  ;;  %11831 = vmatprep.mubr.bf16.mxu1 %v15776_v13  ;;  %11412 = vmatpush3.bf16.msra.mxu1 %v12699_v29  ;;  %v12701_v48 = vld [vmem:[#allocation8 + $0x188] sm:$0xff]  }
 0x312   : > { %v15844_v9 = vor.u32 %v7343_v12, %v7124_v27  ;;  %v7378_v52 = vshrl.u32 %v15787_v26, 16  ;;  %v7394_v30 = vshrl.u32 %v15831_v15, 16  ;;  %v16618_v16 = vshrl.u32 %v15792_v20, 16  ;;  %8491 = vmatmul.mubr.bf16.gmra.mrb[240].mxu0 %v7314_v38  ;;  %11413 = vmatprep.subr.bf16.mxu1 %v12700_v37  ;;  %v12702_v31 = vld [vmem:[#allocation8 + $0x1d0] sm:$0xff]  }
 0x313   : > { %v7342_v6 = vrot.slane %v16714_v0, 7  ;;  %v7363_v0 = vshrl.u32 %v15827_v21, 16  ;;  %v15852_v61 = vrot.slane %v15792_v20, 1  ;;  %v15855_v33 = vadd.f32 %v15789_v40, %v11059_v17 }
 0x314   : > { %v11062_v27 = vadd.f32 %v11061_v2, %v11060_v60  ;;  %v11148_v26 = vadd.f32 %v11147_v44, %v11146_v24  ;;  %v7182_v12 = vrot.slane %v7087_v43, 1  ;;  %v15859_v18 = vsel %vm4508_vm2, %v7349_v19, %v7356_v47  ;;  %v11063_v17 = vpop.f32.mrb[168].mxu0  ;;  %v12703_v60 = vld [vmem:[#allocation8 + $0x190] sm:$0xff]  }
 0x315   : > { %16715 = vst [vmem:[#allocation19_spill] sm:$0xff] %v15855_v33  ;;  %v7384_v28 = vrot.slane %v7382_v42, 7  ;;  %v15864_v63 = vor.u32 %v16618_v16, %v15838_v49  ;;  %8498 = vmatprep.mubr.bf16.mxu0 %v15859_v18  ;;  %v7307_v13 = vsel %vm4508_vm2, %v15820_v1, %v7306_v22  ;;  %v7338_v38 = vsel %vm4508_vm2, %v15823_v3, %v7337_v36 }
 0x316   : > { %v15866_v40 = vadd.f32 %v11142_v53, %v11062_v27  ;;  %v7371_v29 = vshrl.u32 %v7076_v51, 16  ;;  %v7385_v19 = vshll.u32 %v15808_v34, 16  ;;  %v7365_v47 = vrot.slane %v7363_v0, 7  ;;  %11414 = vmatpush3.bf16.msra.mxu1 %v12701_v48  ;;  %v11149_v53 = vpop.f32.mrb[124].mxu1  ;;  %v11064_v34 = vpop.f32.mrb[169].mxu0 }
 0x317   : > { %v7396_v43 = vrot.slane %v7394_v30, 7  ;;  %v16717_v37 = vshrl.u32 %v15732_v35, 16  ;;  %v7345_v24 = vsel %vm4508_vm2, %v7342_v6, %v15844_v9  ;;  %v7380_v2 = vrot.slane %v7378_v52, 7  ;;  %v11150_v51 = vpop.f32.mrb[125].mxu1  ;;  %11415 = vmatprep.subr.bf16.mxu1 %v12702_v31  ;;  %v12704_v30 = vld [vmem:[#allocation8 + $0x1d8] sm:$0xff]   ;;  %v11066_v52 = vpop.f32.mrb[170].mxu0 }
 0x318   : > { %16716 = vst [vmem:[#allocation20_spill] sm:$0xff] %v15866_v40  ;;  %v7359_v22 = vshrl.u32 %v15796_v25, 16  ;;  %v15881_v36 = vsel %vm576_vm1, %v15852_v61, %v7182_v12  ;;  %v7387_v44 = vor.u32 %v7385_v19, %v7384_v28  ;;  %v7366_v0 = vshll.u32 %v15827_v21, 16  ;;  %v11152_v16 = vpop.f32.mrb[126].mxu1  ;;  %11832 = vmatmul.mubr.bf16.gmra.mrb[164].mxu1 %v7307_v13  ;;  %v11067_v33 = vpop.f32.mrb[171].mxu0 }
 0x319   : > { %v7374_v42 = vrot.slane %v16717_v37, 7  ;;  %v7397_v27 = vshll.u32 %v15831_v15, 16  ;;  %v7413_v48 = vshrl.u32 %v15864_v63, 16  ;;  %v11065_v37 = vadd.f32 %v11064_v34, %v11063_v17  ;;  %v11153_v14 = vpop.f32.mrb[127].mxu1  ;;  %11835 = vmatprep.mubr.bf16.mxu1 %v7338_v38  ;;  %v8637_v34 = vld [vmem:[#allocation2 + $0x100] sm:$0x1] }
 0x31a   : > { %v15886_v6 = vadd.f32 %v11150_v51, %v11149_v53  ;;  %v7390_v40 = vshrl.u32 %v15799_v41, 16  ;;  %v7373_v12 = vrot.slane %v7371_v29, 7  ;;  %v7368_v31 = vor.u32 %v7366_v0, %v7365_v47  ;;  %11416 = vmatpush3.bf16.msra.mxu1 %v12703_v60  ;;  %v12705_v29 = vld [vmem:[#allocation8 + $0x198] sm:$0xff]   ;;  %8499 = vmatmul.mubr.bf16.gmra.mrb[244].mxu0 %v7345_v24 }
 0x31b   : > { %v7399_v59 = vor.u32 %v7397_v27, %v7396_v43  ;;  %v16718_v28 = vshll.u32 %v15732_v35, 16  ;;  %v7425_v15 = vshrl.u32 %v15881_v36, 16  ;;  %v15895_v19 = vadd.f32 %v15840_v5, %v11065_v37  ;;  %11417 = vmatprep.subr.bf16.mxu1 %v12704_v30  ;;  %v12706_v43 = vld [vmem:[#allocation8 + $0x1e0] sm:$0xff]   ;;  %v8638_v5 = vld [vmem:[#allocation2 + $0x118] sm:$0x1] }
 0x31c   : > { %v11068_v17 = vadd.f32 %v11067_v33, %v11066_v52  ;;  %v15897_v53 = vadd.f32 %v11153_v14, %v11152_v16  ;;  %v7421_v13 = vshrl.u32 %v15852_v61, 16  ;;  %v15901_v35 = vsel %vm4508_vm2, %v7380_v2, %v7387_v44  ;;  %v8639_v33 = vld [vmem:[#allocation2 + $0x130] sm:$0x1]  ;;  %v7078_v2 = vld [vmem:[#allocation2 + $0x168] sm:$0x80]  ;;  %v11069_v30 = vpop.f32.mrb[172].mxu0 }
 0x31d   : > { %v15891_v21 = vor.u32 %v7374_v42, %v16718_v28  ;;  %v15903_v47 = vrot.slane %v7359_v22, 7  ;;  %v7415_v42 = vrot.slane %v7413_v48, 7  ;;  %8506 = vmatprep.mubr.bf16.mxu0 %v15901_v35  ;;  %v15908_v14 = vrot.slane %v7390_v40, 7  ;;  %v12707_v44 = vld [vmem:[#allocation8 + $0x1a0] sm:$0xff]   ;;  %v11070_v27 = vpop.f32.mrb[173].mxu0  ;;  %v12708_v48 = vld [vmem:[#allocation8 + $0x1e8] sm:$0xff]  }
 0x31e   : > { %v15905_v51 = vadd.f32 %v11148_v26, %v11068_v17  ;;  %v7409_v16 = vshrl.u32 %v15838_v49, 16  ;;  %v7416_v60 = vshll.u32 %v15864_v63, 16  ;;  %v7427_v24 = vrot.slane %v7425_v15, 7  ;;  %11418 = vmatpush3.bf16.msra.mxu1 %v12705_v29  ;;  %v11072_v15 = vpop.f32.mrb[174].mxu0 }
 0x31f   : > { %v7369_v38 = vsel %vm4508_vm2, %v15903_v47, %v7368_v31  ;;  %v8718_v22 = vrot.slane %v8637_v34, 1  ;;  %v7400_v26 = vsel %vm4508_vm2, %v15908_v14, %v7399_v59  ;;  %v7376_v40 = vsel %vm4508_vm2, %v7373_v12, %v15891_v21  ;;  %11419 = vmatprep.subr.bf16.mxu1 %v12706_v43  ;;  %v11073_v12 = vpop.f32.mrb[175].mxu0 }
 0x320   : > { %v15918_v0 = vrot.slane %v7421_v13, 7  ;;  %v8721_v49 = vrot.slane %v8638_v5, 1  ;;  %v7418_v37 = vor.u32 %v7416_v60, %v7415_v42  ;;  %v7428_v63 = vshll.u32 %v15881_v36, 16  ;;  %11836 = vmatmul.mubr.bf16.gmra.mrb[168].mxu1 %v7369_v38  ;;  %v12709_v13 = vld [vmem:[#allocation8 + $0x1a8] sm:$0xff]  }
 0x321   : > { %v8719_v52 = vsel %vm576_vm1, %v15629_v50, %v8718_v22  ;;  %v8724_v31 = vrot.slane %v8639_v33, 1  ;;  %v11071_v28 = vadd.f32 %v11070_v27, %v11069_v30  ;;  %v7411_v59 = vrot.slane %v7409_v16, 7  ;;  %v8640_v50 = vld [vmem:[#allocation2 + $0x148] sm:$0x1]  ;;  %11839 = vmatprep.mubr.bf16.mxu1 %v7400_v26 }
 0x322   : > { %v7402_v17 = vshrl.u32 %v7078_v2, 16  ;;  %v8765_v29 = vshrl.u32 %v8719_v52, 16  ;;  %v7430_v34 = vor.u32 %v7428_v63, %v7427_v24  ;;  %v16719_v5 = vshrl.u32 %v15792_v20, 16  ;;  %11420 = vmatpush3.bf16.msra.mxu1 %v12707_v44  ;;  %v8641_v2 = vld [vmem:[#allocation2 + $0x160] sm:$0x1]  ;;  %8507 = vmatmul.mubr.bf16.gmra.mrb[248].mxu0 %v7376_v40 }
 0x323   : > { %v8722_v42 = vsel %vm576_vm1, %v15710_v46, %v8721_v49  ;;  %v8725_v36 = vsel %vm576_vm1, %v15730_v55, %v8724_v31  ;;  %v15930_v33 = vadd.f32 %v15886_v6, %v11071_v28  ;;  %v11074_v16 = vadd.f32 %v11073_v12, %v11072_v15  ;;  %v8642_v24 = vld [vmem:[#allocation2 + $0x178] sm:$0x1]  ;;  %11421 = vmatprep.subr.bf16.mxu1 %v12708_v48  ;;  %v12710_v46 = vld [vmem:[#allocation8 + $0x1f0] sm:$0xff]  }
 0x324   : > { %v7405_v43 = vrot.slane %v16719_v5, 7  ;;  %v8767_v38 = vrot.slane %v8765_v29, 7  ;;  %v8768_v60 = vshll.u32 %v8719_v52, 16  ;;  %v15933_v22 = vsel %vm4508_vm2, %v7411_v59, %v7418_v37  ;;  %v8621_v6 = vld [vmem:[#allocation2 + $0xf0] sm:$0x80]  ;;  %v12712_v12 = vld [vmem:[#allocation8 + $0x1f8] sm:$0xff]  }
 0x325   : > { %v8796_v30 = vshrl.u32 %v8722_v42, 16  ;;  %v8799_v49 = vshll.u32 %v8722_v42, 16  ;;  %v8827_v55 = vshrl.u32 %v8725_v36, 16  ;;  %v15936_v27 = vadd.f32 %v15897_v53, %v11074_v16  ;;  %8514 = vmatprep.mubr.bf16.mxu0 %v15933_v22  ;;  %v12711_v37 = vld [vmem:[#allocation8 + $0x1b0] sm:$0xff]  }
 0x326   : > { %v8770_v26 = vor.u32 %v8768_v60, %v8767_v38  ;;  %v8830_v44 = vshll.u32 %v8725_v36, 16  ;;  %v8727_v63 = vrot.slane %v8640_v50, 1  ;;  %v8730_v40 = vrot.slane %v8641_v2, 1  ;;  %11422 = vmatpush3.bf16.msra.mxu1 %v12709_v13 }
 0x327   : > { %v8798_v52 = vrot.slane %v8796_v30, 7  ;;  %v8829_v31 = vrot.slane %v8827_v55, 7  ;;  %v8733_v48 = vrot.slane %v8642_v24, 1  ;;  %v7404_v28 = vrot.slane %v7402_v17, 7  ;;  %11423 = vmatprep.subr.bf16.mxu1 %v12710_v46 }
 0x328   : > { %v16720_v15 = vshll.u32 %v15792_v20, 16  ;;  %v15945_v53 = vsel %vm4508_vm2, %v15752_v54, %v8770_v26  ;;  %v8728_v29 = vsel %vm576_vm1, %v15796_v25, %v8727_v63  ;;  %v8742_v5 = vshrl.u32 %v8621_v6, 16  ;;  %v12715_v26 = vld [vmem:[#allocation8 + $0x208] sm:$0xff]  }
 0x329   : > { %v8801_v42 = vor.u32 %v8799_v49, %v8798_v52  ;;  %v8832_v36 = vor.u32 %v8830_v44, %v8829_v31  ;;  %v8858_v50 = vshrl.u32 %v8728_v29, 16  ;;  %v7431_v17 = vsel %vm4508_vm2, %v15918_v0, %v7430_v34  ;;  %v12713_v34 = vld [vmem:[#allocation8 + $0x1b8] sm:$0xff]   ;;  %v8623_v49 = vld [vmem:[#allocation2 + $0x108] sm:$0x80] }
 0x32a   : > { %v15941_v59 = vor.u32 %v7405_v43, %v16720_v15  ;;  %v8861_v13 = vshll.u32 %v8728_v29, 16  ;;  %v8731_v20 = vsel %vm576_vm1, %v15799_v41, %v8730_v40  ;;  %v8734_v54 = vsel %vm576_vm1, %v15852_v61, %v8733_v48  ;;  %11840 = vmatmul.mubr.bf16.gmra.mrb[172].mxu1 %v7431_v17  ;;  %v12714_v61 = vld [vmem:[#allocation8 + $0x200] sm:$0xff]   ;;  %v15984_v15 = vld [vmem:[#allocation2 + $0x188] sm:$0xff] }
 0x32b   : > { %v15957_v25 = vsel %vm4508_vm2, %v15820_v1, %v8801_v42  ;;  %v15961_v43 = vsel %vm4508_vm2, %v15823_v3, %v8832_v36  ;;  %v8860_v16 = vrot.slane %v8858_v50, 7  ;;  %v8889_v38 = vshrl.u32 %v8731_v20, 16  ;;  %11424 = vmatpush3.bf16.msra.mxu1 %v12711_v37  ;;  %9237 = vmatprep.mubr.bf16.mxu1 %v15685_v7  ;;  %v8625_v48 = vld [vmem:[#allocation2 + $0x120] sm:$0x80]  ;;  %v12719_v29 = vld [vmem:[#allocation8 + $0x228] sm:$0xff]  }
 0x32c   : > { %v7407_v41 = vsel %vm4508_vm2, %v7404_v28, %v15941_v59  ;;  %v8920_v60 = vshrl.u32 %v8734_v54, 16  ;;  %11425 = vmatprep.subr.bf16.mxu1 %v12712_v12  ;;  %v8892_v24 = vshll.u32 %v8731_v20, 16  ;;  %v8744_v46 = vrot.slane %v8742_v5, 7  ;;  %v8629_v36 = vld [vmem:[#allocation2 + $0x150] sm:$0x80]  ;;  %v12721_v20 = vld [vmem:[#allocation8 + $0x238] sm:$0xff]  }
 0x32d   : > { %8515 = vmatmul.mubr.bf16.gmra.mrb[252].mxu0 %v7407_v41  ;;  %v8863_v2 = vor.u32 %v8861_v13, %v8860_v16  ;;  %v8891_v1 = vrot.slane %v8889_v38, 7  ;;  %v8923_v3 = vshll.u32 %v8734_v54, 16  ;;  %v8773_v52 = vshrl.u32 %v8623_v49, 16  ;;  %v15991_v13 = vld [vmem:[#allocation2 + $0x8] sm:$0xff] }
 0x32e   : > { %v8922_v30 = vrot.slane %v8920_v60, 7  ;;  %v8747_v63 = vsel %vm4508_vm2, %v8744_v46, %v15615_v62  ;;  %v8804_v62 = vshrl.u32 %v8625_v48, 16  ;;  %v8691_v17 = vshrl.u32 %v15984_v15, 16  ;;  %v8631_v60 = vld [vmem:[#allocation2 + $0x168] sm:$0x80] }
 0x32f   : > { %v15968_v55 = vsel %vm4508_vm2, %v15903_v47, %v8863_v2  ;;  %v8894_v7 = vor.u32 %v8892_v24, %v8891_v1  ;;  %11426 = vmatpush3.bf16.msra.mxu1 %v12713_v34  ;;  %v12716_v47 = vld [vmem:[#allocation8 + $0x210] sm:$0xff]   ;;  %v8775_v40 = vrot.slane %v8773_v52, 7  ;;  %v8866_v16 = vshrl.u32 %v8629_v36, 16 }
 0x330   : > { %v8925_v6 = vor.u32 %v8923_v3, %v8922_v30  ;;  %11843 = vmatprep.subr.bf16.mxu1 %v12714_v61  ;;  %v8806_v28 = vrot.slane %v8804_v62, 7  ;;  %v8698_v41 = vshrl.u32 %v15991_v13, 16  ;;  %v8897_v24 = vshrl.u32 %v8631_v60, 16 }
 0x331   : > { %v15972_v44 = vsel %vm4508_vm2, %v15908_v14, %v8894_v7  ;;  %v12717_v14 = vld [vmem:[#allocation8 + $0x218] sm:$0xff]   ;;  %v8778_v37 = vsel %vm4508_vm2, %v8775_v40, %v15706_v8  ;;  %v8688_v8 = vshll.u32 %v15984_v15, 16  ;;  %v8868_v34 = vrot.slane %v8866_v16, 7  ;;  %v8633_v7 = vld [vmem:[#allocation2 + $0x180] sm:$0x80] }
 0x332   : > { %v15978_v31 = vsel %vm4508_vm2, %v15918_v0, %v8925_v6  ;;  %9238 = vmatmul.mubr.bf16.vlgmr.msra.gmra.mrb[176].mxu1 %v8747_v63  ;;  %v12718_v0 = vld [vmem:[#allocation8 + $0x220] sm:$0xff]   ;;  %v8809_v12 = vsel %vm4508_vm2, %v8806_v28, %v15780_v32  ;;  %v8695_v32 = vshll.u32 %v15991_v13, 16  ;;  %v8899_v3 = vrot.slane %v8897_v24, 7  ;;  %v8643_v16 = vld [vmem:[#allocation2 + $0x190] sm:$0x1] }
 0x333   : > { %9245 = vmatprep.mubr.bf16.mxu1 %v15713_v56  ;;  %11844 = vmatpush3.bf16.msra.mxu1 %v12714_v61  ;;  %v8627_v56 = vld [vmem:[#allocation2 + $0x138] sm:$0x80]  ;;  %v8690_v50 = vrot.slane %v8688_v8, 1  ;;  %v8871_v1 = vsel %vm4508_vm2, %v8868_v34, %v15891_v21  ;;  %v8928_v40 = vshrl.u32 %v8633_v7, 16  ;;  %v8931_v21 = vrot.slane %v8691_v17, 7 }
 0x334   : > { %11845 = vmatprep.subr.bf16.mxu1 %v12715_v26  ;;  %v8835_v5 = vshrl.u32 %v8627_v56, 16  ;;  %v8697_v38 = vrot.slane %v8695_v32, 1  ;;  %v8962_v56 = vrot.slane %v8698_v41, 7 }
 0x335   : > { %v8935_v46 = vshrl.u32 %v8690_v50, 16  ;;  %v8930_v62 = vrot.slane %v8928_v40, 7 }
 0x336   : > { %v8837_v42 = vrot.slane %v8835_v5, 7  ;;  %v8700_v2 = vor.u32 %v8698_v41, %v8697_v38  ;;  %v8963_v5 = vor.u32 %v8962_v56, %v8695_v32  ;;  %v8735_v32 = vrot.slane %v15984_v15, 1 }
 0x337   : > { %11846 = vmatpush3.bf16.msra.mxu1 %v12715_v26  ;;  %v8937_v6 = vrot.slane %v8935_v46, 7  ;;  %v8966_v26 = vshrl.u32 %v8697_v38, 16  ;;  %v8736_v41 = vrot.slane %v8643_v16, 1 }
 0x338   : > { %11847 = vmatprep.subr.bf16.mxu1 %v12716_v47  ;;  %v8840_v54 = vsel %vm4508_vm2, %v8837_v42, %v15844_v9  ;;  %v8970_v30 = vshrl.u32 %v8700_v2, 16  ;;  %v8973_v52 = vshll.u32 %v8700_v2, 16  ;;  %v8644_v2 = vld [vmem:[#allocation2 + $0x1a8] sm:$0x1] }
 0x33a   : > { %9246 = vmatmul.mubr.bf16.gmra.mrb[180].mxu1 %v8778_v37  ;;  %v8972_v63 = vrot.slane %v8970_v30, 7  ;;  %v8635_v37 = vld [vmem:[#allocation2 + $0x198] sm:$0x80] }
 0x33b   : > { %9253 = vmatprep.mubr.bf16.mxu1 %v15772_v4  ;;  %11848 = vmatpush3.bf16.msra.mxu1 %v12716_v47  ;;  %v12720_v4 = vld [vmem:[#allocation8 + $0x230] sm:$0xff]   ;;  %v8902_v47 = vsel %vm4508_vm2, %v8899_v3, %v15941_v59  ;;  %v8959_v28 = vshrl.u32 %v8635_v37, 16  ;;  %v10392_v37 = vld [vmem:[%s13211_s16 + $0x18] sm:$0xf] }
 0x33c   : > { %11849 = vmatprep.subr.bf16.mxu1 %v12717_v14 }
 0x33d   : > { %v8961_v59 = vrot.slane %v8959_v28, 7 }
 0x33f   : > { %11850 = vmatpush3.bf16.msra.mxu1 %v12717_v14  ;;  %v8975_v14 = vor.u32 %v8973_v52, %v8972_v63  ;;  %v8964_v42 = vsel %vm4508_vm2, %v8961_v59, %v8963_v5  ;;  %v6819_v59 = vshll.u32 %v10392_v37, 16 }
 0x340   : > { %11851 = vmatprep.subr.bf16.mxu1 %v12718_v0 }
 0x342   : > { %9254 = vmatmul.mubr.bf16.gmra.mrb[184].mxu1 %v8809_v12 }
 0x343   : > { %9261 = vmatprep.mubr.bf16.mxu1 %v15859_v18  ;;  %11852 = vmatpush3.bf16.msra.mxu1 %v12718_v0  ;;  %v8693_v18 = vor.u32 %v8691_v17, %v8690_v50  ;;  %v8932_v0 = vor.u32 %v8931_v21, %v8688_v8 }
 0x344   : > { %11853 = vmatprep.subr.bf16.mxu1 %v12719_v29 }
 0x345   : > { %v8939_v61 = vshrl.u32 %v8693_v18, 16  ;;  %v8933_v12 = vsel %vm4508_vm2, %v8930_v62, %v8932_v0  ;;  %v10393_v0 = vld [vmem:[%s13211_s16 + $0x1c] sm:$0xf] }
 0x347   : > { %11854 = vmatpush3.bf16.msra.mxu1 %v12719_v29  ;;  %v8941_v9 = vrot.slane %v8939_v61, 7 }
 0x348   : > { %11855 = vmatprep.subr.bf16.mxu1 %v12720_v4 }
 0x34a   : > { %9262 = vmatmul.mubr.bf16.gmra.mrb[188].mxu1 %v8840_v54 }
 0x34b   : > { %9269 = vmatprep.mubr.bf16.mxu1 %v15901_v35  ;;  %11856 = vmatpush3.bf16.msra.mxu1 %v12720_v4  ;;  %v8942_v35 = vshll.u32 %v8693_v18, 16 }
 0x34c   : > { %11857 = vmatprep.subr.bf16.mxu1 %v12721_v20 }
 0x34d   : > { %v8944_v49 = vor.u32 %v8942_v35, %v8941_v9  ;;  %v8739_v9 = vrot.slane %v8644_v2, 1 }
 0x34f   : > { %11858 = vmatpush3.bf16.msra.mxu1 %v12721_v20  ;;  %v8945_v48 = vsel %vm4508_vm2, %v8937_v6, %v8944_v49 }
 0x352   : > { %9270 = vmatmul.mubr.bf16.gmra.mrb[192].mxu1 %v8871_v1 }
 0x353   : > { %9277 = vmatprep.mubr.bf16.mxu1 %v15933_v22  ;;  %v8968_v22 = vrot.slane %v8966_v26, 7 }
 0x355   : > { %v8976_v29 = vsel %vm4508_vm2, %v8968_v22, %v8975_v14 }
 0x35a   : > { %9278 = vmatmul.mubr.bf16.gmra.mrb[196].mxu1 %v8902_v47 }
 0x35b   : > { %9285 = vmatprep.mubr.bf16.mxu1 %v8945_v48 }
 0x362   : > { %9286 = vmatmul.mubr.bf16.gmra.mrb[200].mxu1 %v8933_v12  ;;  %v6816_v12 = vshrl.u32 %v10392_v37, 16 }
 0x363   : > { %9293 = vmatprep.mubr.bf16.mxu1 %v8976_v29 }
 0x364   : > { %v11187_v4 = vpop.f32.mrb[192].mxu0 }
 0x365   : > { %v11188_v36 = vpop.f32.mrb[193].mxu0 }
 0x366   : > { %v11189_v50 = vadd.f32 %v11188_v36, %v11187_v4  ;;  %v11190_v17 = vpop.f32.mrb[194].mxu0  ;;  %v6825_v4 = vshll.u32 %v10393_v0, 16  ;;  %v10389_v36 = vld [vmem:[%s13211_s16 + $0xc] sm:$0xf] }
 0x367   : > { %v11191_v20 = vpop.f32.mrb[195].mxu0  ;;  %v6795_v2 = vshll.u32 %v10389_v36, 16 }
 0x368   : > { %v11192_v8 = vadd.f32 %v11191_v20, %v11190_v17  ;;  %v16009_v54 = vadd.f32 %v15560_v39, %v11189_v50  ;;  %v8737_v39 = vsel %vm576_vm1, %v8735_v32, %v8736_v41  ;;  %v16721_v50 = vld [vmem:[#allocation17_spill] sm:$0xff] }
 0x369   : > { %v8951_v46 = vshrl.u32 %v8737_v39, 16  ;;  %v8954_v26 = vshll.u32 %v8737_v39, 16 }
 0x36a   : > { %9294 = vmatmul.mubr.bf16.gmra.mrb[204].mxu1 %v8964_v42  ;;  %v16012_v18 = vadd.f32 %v15574_v23, %v11192_v8  ;;  %v8738_v23 = vrot.slane %v15991_v13, 1  ;;  %v6829_v42 = vshrl.u32 %v10393_v0, 16  ;;  %v10395_v0 = vld [vmem:[%s13211_s16 + $0x24] sm:$0xf] }
 0x36b   : > { %11859 = vmatprep.mubr.bf16.mxu1 %v15945_v53  ;;  %v8953_v7 = vrot.slane %v8951_v46, 7 }
 0x36c   : > { %v11193_v38 = vpop.f32.mrb[196].mxu0  ;;  %v8978_v40 = vshrl.u32 %v8738_v23, 16 }
 0x36d   : > { %v11194_v34 = vpop.f32.mrb[197].mxu0  ;;  %v8956_v52 = vor.u32 %v8954_v26, %v8953_v7 }
 0x36e   : > { %v11195_v60 = vadd.f32 %v11194_v34, %v11193_v38  ;;  %v11196_v61 = vpop.f32.mrb[198].mxu0  ;;  %v8980_v28 = vrot.slane %v8978_v40, 7  ;;  %v6818_v34 = vrot.slane %v6816_v12, 4  ;;  %v16723_v40 = vld [vmem:[#allocation26_spill] sm:$0xff] }
 0x36f   : > { %v11197_v1 = vpop.f32.mrb[199].mxu0 }
 0x370   : > { %v11198_v53 = vadd.f32 %v11197_v1, %v11196_v61  ;;  %v16019_v24 = vadd.f32 %v15625_v11, %v11195_v60  ;;  %v6821_v60 = vrot.slane %v6819_v59, 5  ;;  %v6792_v61 = vshrl.u32 %v10389_v36, 16 }
 0x372   : > { %11860 = vmatmul.mubr.bf16.vlgmr.msra.gmra.mrb[160].mxu1 %v15957_v25  ;;  %v16023_v15 = vadd.f32 %v15639_v45, %v11198_v53  ;;  %v8740_v25 = vsel %vm576_vm1, %v8738_v23, %v8739_v9  ;;  %v8947_v45 = vshrl.u32 %v8735_v32, 16  ;;  %v10390_v32 = vld [vmem:[%s13211_s16 + $0x10] sm:$0xf]  ;;  %v16051_v23 = vrot.slane %v6825_v4, 5 }
 0x373   : > { %11863 = vmatprep.mubr.bf16.mxu1 %v15961_v43  ;;  %v8982_v13 = vshrl.u32 %v8740_v25, 16  ;;  %v8985_v21 = vshll.u32 %v8740_v25, 16  ;;  %v6831_v9 = vrot.slane %v6829_v42, 4  ;;  %v6822_v7 = vor.u32 %v6821_v60, %v6818_v34 }
 0x374   : > { %v8949_v22 = vrot.slane %v8947_v45, 7  ;;  %v6840_v34 = vshrl.u32 %v10395_v0, 16 }
 0x375   : > { %v11199_v35 = vpop.f32.mrb[200].mxu0  ;;  %v6832_v26 = vor.u32 %v6831_v9, %v16051_v23  ;;  %v10404_v9 = vld [vmem:[%s13211_s16 + $0x48] sm:$0xf] }
 0x376   : > { %v11200_v30 = vpop.f32.mrb[201].mxu0 }
 0x377   : > { %v11201_v3 = vadd.f32 %v11200_v30, %v11199_v35  ;;  %v11202_v49 = vpop.f32.mrb[202].mxu0  ;;  %v6801_v35 = vshll.u32 %v10390_v32, 16  ;;  %v6805_v30 = vshrl.u32 %v10390_v32, 16 }
 0x378   : > { %v11203_v43 = vpop.f32.mrb[203].mxu0 }
 0x379   : > { %v11204_v11 = vadd.f32 %v11203_v43, %v11202_v49  ;;  %v16029_v6 = vadd.f32 %v15690_v10, %v11201_v3  ;;  %v8957_v10 = vsel %vm4508_vm2, %v8949_v22, %v8956_v52  ;;  %v10394_v3 = vld [vmem:[%s13211_s16 + $0x20] sm:$0x1]  ;;  %v10391_v52 = vld [vmem:[%s13211_s16 + $0x14] sm:$0x1] }
 0x37a   : > { %11864 = vmatmul.mubr.bf16.gmra.mrb[164].mxu1 %v15968_v55  ;;  %v8984_v55 = vrot.slane %v8982_v13, 7  ;;  %v16722_v49 = vld [vmem:[#allocation18_spill] sm:$0xff]  ;;  %v6797_v13 = vrot.slane %v6795_v2, 5  ;;  %v6835_v22 = vshll.u32 %v10394_v3, 16  ;;  %v6811_v59 = vshll.u32 %v10391_v52, 16 }
 0x37b   : > { %11867 = vmatprep.mubr.bf16.mxu1 %v15972_v44  ;;  %v16032_v63 = vadd.f32 %v15701_v58, %v11204_v11  ;;  %v6794_v11 = vrot.slane %v6792_v61, 4  ;;  %v6843_v2 = vshll.u32 %v10395_v0, 16 }
 0x37c   : > { %v8987_v56 = vor.u32 %v8985_v21, %v8984_v55  ;;  %v6837_v32 = vrot.slane %v6835_v22, 5  ;;  %v6915_v22 = vshll.u32 %v10404_v9, 16 }
 0x37d   : > { %v11205_v47 = vpop.f32.mrb[204].mxu0  ;;  %v6798_v12 = vor.u32 %v6797_v13, %v6794_v11  ;;  %v10400_v13 = vld [vmem:[%s13211_s16 + $0x38] sm:$0x1] }
 0x37e   : > { %v11206_v48 = vpop.f32.mrb[205].mxu0  ;;  %v8988_v38 = vsel %vm4508_vm2, %v8980_v28, %v8987_v56  ;;  %v6823_v56 = vrot.slane %v6822_v7, 4 }
 0x37f   : > { %v11207_v44 = vadd.f32 %v11206_v48, %v11205_v47  ;;  %v11208_v14 = vpop.f32.mrb[206].mxu0  ;;  %v10398_v47 = vld [vmem:[%s13211_s16 + $0x30] sm:$0xf]  ;;  %v16063_v48 = vrot.slane %v6801_v35, 5  ;;  %v6799_v35 = vrot.slane %v6798_v12, 4 }
 0x380   : > { %v11209_v62 = vpop.f32.mrb[207].mxu0 }
 0x381   : > { %v11210_v58 = vadd.f32 %v11209_v62, %v11208_v14  ;;  %v16039_v29 = vadd.f32 %v15742_v57, %v11207_v44  ;;  %v16065_v44 = vrot.slane %v6805_v30, 4  ;;  %v10399_v62 = vld [vmem:[%s13211_s16 + $0x34] sm:$0xf]  ;;  %v6804_v12 = vsel %vm16075_vm5, %v6799_v35, %v16063_v48 }
 0x382   : > { %11868 = vmatmul.mubr.bf16.gmra.mrb[168].mxu1 %v15978_v31  ;;  %v6877_v61 = vshrl.u32 %v10399_v62, 16 }
 0x383   : > { %11871 = vmatprep.mubr.bf16.mxu1 %v8957_v10  ;;  %v11267_v5 = vpop.f32.mrb[128].mxu1  ;;  %v16043_v31 = vadd.f32 %v16721_v50, %v11210_v58 }
 0x384   : > { %v11268_v17 = vpop.f32.mrb[129].mxu1  ;;  %v6879_v0 = vrot.slane %v6877_v61, 4 }
 0x385   : > { %v16045_v20 = vadd.f32 %v11268_v17, %v11267_v5  ;;  %v11270_v8 = vpop.f32.mrb[130].mxu1  ;;  %v11211_v16 = vpop.f32.mrb[208].mxu0  ;;  %v6864_v5 = vshrl.u32 %v10398_v47, 16  ;;  %v6833_v17 = vrot.slane %v6832_v26, 4 }
 0x386   : > { %v11271_v41 = vpop.f32.mrb[131].mxu1  ;;  %v11212_v57 = vpop.f32.mrb[209].mxu0 }
 0x387   : > { %v16049_v1 = vadd.f32 %v11271_v41, %v11270_v8  ;;  %v11213_v53 = vadd.f32 %v11212_v57, %v11211_v16  ;;  %v11214_v39 = vpop.f32.mrb[210].mxu0  ;;  %v6867_v8 = vshll.u32 %v10398_v47, 16  ;;  %v10396_v16 = vld [vmem:[%s13211_s16 + $0x28] sm:$0xf]  ;;  %v6808_v41 = vor.u32 %v16065_v44, %v16063_v48 }
 0x388   : > { %v11215_v46 = vpop.f32.mrb[211].mxu0  ;;  %v6873_v57 = vshll.u32 %v10399_v62, 16  ;;  %v6849_v30 = vshll.u32 %v10396_v16, 16  ;;  %v6866_v7 = vrot.slane %v6864_v5, 4  ;;  %v6845_v62 = vrot.slane %v6843_v2, 5 }
 0x389   : > { %v11216_v25 = vadd.f32 %v11215_v46, %v11214_v39  ;;  %v16055_v43 = vadd.f32 %v16722_v49, %v11213_v53  ;;  %v16726_v53 = vld [vmem:[#allocation19_spill] sm:$0xff]  ;;  %v6828_v46 = vsel %vm16075_vm5, %v6823_v56, %v16051_v23  ;;  %v16089_v49 = vrot.slane %v6811_v59, 5 }
 0x38a   : > { %11872 = vmatmul.mubr.bf16.gmra.mrb[172].mxu1 %v8988_v38  ;;  %v6869_v11 = vrot.slane %v6867_v8, 5  ;;  %v16095_v47 = vrot.slane %v6873_v57, 5  ;;  %v6838_v59 = vsel %vm16075_vm5, %v6833_v17, %v6837_v32  ;;  %v16107_v5 = vrot.slane %v6849_v30, 5 }
 0x38b   : > { %v11273_v45 = vpop.f32.mrb[132].mxu1  ;;  %v16061_v55 = vadd.f32 %v16723_v40, %v11216_v25  ;;  %v6853_v25 = vshrl.u32 %v10396_v16, 16  ;;  %v6842_v40 = vrot.slane %v6840_v34, 4  ;;  %v6883_v57 = vshll.u32 %v10400_v13, 16  ;;  %v10397_v34 = vld [vmem:[%s13211_s16 + $0x2c] sm:$0x1] }
 0x38c   : > { %v11274_v21 = vpop.f32.mrb[133].mxu1  ;;  %v6880_v17 = vor.u32 %v6879_v0, %v16095_v47  ;;  %v16118_v13 = vunpack.c.l.bf16 %v6838_v59 }
 0x38d   : > { %v16067_v14 = vadd.f32 %v11274_v21, %v11273_v45  ;;  %v11276_v37 = vpop.f32.mrb[134].mxu1  ;;  %v11217_v10 = vpop.f32.mrb[212].mxu0  ;;  %v16727_v45 = vld [vmem:[#allocation20_spill] sm:$0xff]  ;;  %v6912_v21 = vshrl.u32 %v10404_v9, 16  ;;  %v6846_v35 = vor.u32 %v6845_v62, %v6842_v40 }
 0x38e   : > { %v11277_v58 = vpop.f32.mrb[135].mxu1  ;;  %v11218_v28 = vpop.f32.mrb[213].mxu0 }
 0x38f   : > { %v16071_v4 = vadd.f32 %v11277_v58, %v11276_v37  ;;  %v11219_v42 = vadd.f32 %v11218_v28, %v11217_v10  ;;  %v11220_v36 = vpop.f32.mrb[214].mxu0  ;;  %v16099_v10 = vunpack.c.l.bf16 %v6828_v46  ;;  %v10401_v58 = vld [vmem:[%s13211_s16 + $0x3c] sm:$0xf]  ;;  %v6914_v2 = vrot.slane %v6912_v21, 4 }
 0x390   : > { %v11221_v38 = vpop.f32.mrb[215].mxu0  ;;  %v6888_v9 = vshrl.u32 %v10401_v58, 16  ;;  %v6891_v46 = vshll.u32 %v10401_v58, 16  ;;  %v6847_v59 = vrot.slane %v6846_v35, 4 }
 0x391   : > { %v11222_v60 = vadd.f32 %v11221_v38, %v11220_v36  ;;  %v16083_v39 = vadd.f32 %v16726_v53, %v11219_v42  ;;  %v6855_v42 = vrot.slane %v6853_v25, 4  ;;  %v6870_v38 = vor.u32 %v6869_v11, %v6866_v7 }
 0x392   : > { %v6917_v53 = vrot.slane %v6915_v22, 5  ;;  %v6859_v25 = vshll.u32 %v10397_v34, 16  ;;  %v6885_v22 = vrot.slane %v6883_v57, 5  ;;  %v6893_v62 = vrot.slane %v6891_v46, 5  ;;  %v10403_v46 = vld [vmem:[%s13211_s16 + $0x44] sm:$0x1] }
 0x393   : > { %v11279_v3 = vpop.f32.mrb[136].mxu1  ;;  %v16093_v26 = vadd.f32 %v16727_v45, %v11222_v60  ;;  %v10405_v60 = vld [vmem:[%s13211_s16 + $0x4c] sm:$0xf]  ;;  %v6856_v30 = vor.u32 %v6855_v42, %v16107_v5  ;;  %v6809_v45 = vrot.slane %v6808_v41, 4  ;;  %v6881_v42 = vrot.slane %v6880_v17, 4 }
 0x394   : > { %v11280_v52 = vpop.f32.mrb[137].mxu1  ;;  %v6925_v7 = vshrl.u32 %v10405_v60, 16  ;;  %v10406_v41 = vld [vmem:[%s13211_s16 + $0x50] sm:$0x1] }
 0x395   : > { %v16097_v23 = vadd.f32 %v11280_v52, %v11279_v3  ;;  %v11282_v44 = vpop.f32.mrb[138].mxu1  ;;  %v11223_v37 = vpop.f32.mrb[216].mxu0  ;;  %v6921_v3 = vshll.u32 %v10405_v60, 16  ;;  %v6871_v52 = vrot.slane %v6870_v38, 4  ;;  %v6861_v38 = vrot.slane %v6859_v25, 5 }
 0x396   : > { %v11283_v28 = vpop.f32.mrb[139].mxu1  ;;  %v11224_v56 = vpop.f32.mrb[217].mxu0  ;;  %v6927_v57 = vrot.slane %v6925_v7, 4  ;;  %v6886_v7 = vsel %vm16075_vm5, %v6881_v42, %v6885_v22 }
 0x397   : > { %v16109_v36 = vadd.f32 %v11283_v28, %v11282_v44  ;;  %v11225_v8 = vadd.f32 %v11224_v56, %v11223_v37  ;;  %v11226_v16 = vpop.f32.mrb[218].mxu0  ;;  %v6918_v44 = vor.u32 %v6917_v53, %v6914_v2  ;;  %v10402_v37 = vld [vmem:[%s13211_s16 + $0x40] sm:$0xf]  ;;  %v16126_v56 = vunpack.c.l.bf16 %v6804_v12 }
 0x398   : > { %v11227_v61 = vpop.f32.mrb[219].mxu0  ;;  %v6923_v34 = vrot.slane %v6921_v3, 5  ;;  %v6897_v53 = vshll.u32 %v10402_v37, 16  ;;  %v6814_v12 = vsel %vm16075_vm5, %v6809_v45, %v16089_v49  ;;  %v6876_v35 = vsel %vm16075_vm5, %v6871_v52, %v16095_v47 }
 0x399   : > { %v11228_v48 = vadd.f32 %v11227_v61, %v11226_v16  ;;  %v16115_v32 = vadd.f32 %v15895_v19, %v11225_v8  ;;  %v6890_v19 = vrot.slane %v6888_v9, 4  ;;  %v6901_v9 = vshrl.u32 %v10402_v37, 16 }
 0x39a   : > { %v6919_v17 = vrot.slane %v6918_v44, 4  ;;  %v6852_v3 = vsel %vm16075_vm5, %v6847_v59, %v16107_v5  ;;  %v6928_v45 = vor.u32 %v6927_v57, %v6923_v34  ;;  %v6931_v47 = vshll.u32 %v10406_v41, 16  ;;  %v16170_v57 = vld [vmem:[%s13211_s16 + $0x64] sm:$0xf] }
 0x39b   : > { %v11285_v11 = vpop.f32.mrb[140].mxu1  ;;  %v16121_v21 = vadd.f32 %v15905_v51, %v11228_v48  ;;  %v6857_v51 = vrot.slane %v6856_v30, 4  ;;  %v6894_v30 = vor.u32 %v6893_v62, %v6890_v19  ;;  %v6907_v52 = vshll.u32 %v10403_v46, 16 }
 0x39c   : > { %v11286_v40 = vpop.f32.mrb[141].mxu1  ;;  %v7000_v37 = vunpack.c.l.bf16 %v6814_v12  ;;  %v6899_v19 = vrot.slane %v6897_v53, 5  ;;  %v6903_v62 = vrot.slane %v6901_v9, 4  ;;  %v6929_v53 = vrot.slane %v6928_v45, 4 }
 0x39d   : > { %v16124_v0 = vadd.f32 %v11286_v40, %v11285_v11  ;;  %v11288_v58 = vpop.f32.mrb[142].mxu1  ;;  %v11229_v28 = vpop.f32.mrb[220].mxu0  ;;  %v16147_v40 = vld [vmem:[%s13211_s16 + $0x60] sm:$0xf]  ;;  %v6862_v49 = vsel %vm16075_vm5, %v6857_v51, %v6861_v38  ;;  %v16163_v51 = vunpack.c.l.bf16 %v6852_v3  ;;  %v6933_v9 = vrot.slane %v6931_v47, 5 }
 0x39e   : > { %v11289_v8 = vpop.f32.mrb[143].mxu1  ;;  %v11230_v16 = vpop.f32.mrb[221].mxu0  ;;  %v6960_v59 = vshrl.u32 %v16147_v40, 16  ;;  %v16167_v38 = vunpack.c.l.bf16 %v6862_v49  ;;  %v16173_v46 = vrot.slane %v6907_v52, 5  ;;  %v6963_v47 = vshll.u32 %v16147_v40, 16 }
 0x39f   : > { %v16129_v60 = vadd.f32 %v11289_v8, %v11288_v58  ;;  %v11231_v61 = vadd.f32 %v11230_v16, %v11229_v28  ;;  %v11232_v2 = vpop.f32.mrb[222].mxu0  ;;  %v16154_v58 = vunpack.c.l.bf16 %v6876_v35  ;;  %v6895_v28 = vrot.slane %v6894_v30, 4  ;;  %v16161_v8 = vld [vmem:[#allocation11] ss:$0 sm:$0xff] }
 0x3a0   : > { %v11233_v48 = vpop.f32.mrb[223].mxu0  ;;  %v6904_v30 = vor.u32 %v6903_v62, %v6899_v19  ;;  %v16185_v49 = vrot.slane %v6960_v59, 4  ;;  %v6969_v52 = vshll.u32 %v16170_v57, 16 }
 0x3a1   : > { %v11234_v25 = vadd.f32 %v11233_v48, %v11232_v2  ;;  %v16144_v11 = vadd.f32 %v15930_v33, %v11231_v61  ;;  %v6924_v33 = vsel %vm16075_vm5, %v6919_v17, %v6923_v34 }
 0x3a2   : > { %v16178_v17 = vunpack.c.l.bf16 %v6924_v33  ;;  %v16201_v40 = vrot.slane %v6904_v30, 4 }
 0x3a3   : > { %v11291_v44 = vpop.f32.mrb[144].mxu1  ;;  %v16152_v5 = vadd.f32 %v15936_v27, %v11234_v25  ;;  %v16165_v27 = vunpack.c.l.bf16 %v6886_v7  ;;  %v6900_v7 = vsel %vm16075_vm5, %v6895_v28, %v6899_v19  ;;  %v6973_v19 = vshrl.u32 %v16170_v57, 16 }
 0x3a4   : > { %v11292_v22 = vpop.f32.mrb[145].mxu1  ;;  %v16199_v59 = vunpack.c.l.bf16 %v6900_v7 }
 0x3a5   : > { %v16159_v42 = vadd.f32 %v11292_v22, %v11291_v44  ;;  %v11294_v41 = vpop.f32.mrb[146].mxu1  ;;  %v11765_v16 = vpop.f32.mrb[176].mxu0  ;;  %v10407_v44 = vld [vmem:[%s13211_s16 + $0x54] sm:$0xf]  ;;  %v6934_v22 = vsel %vm16075_vm5, %v6929_v53, %v6933_v9 }
 0x3a6   : > { %v11295_v61 = vpop.f32.mrb[147].mxu1  ;;  %v11989_v34 = vadd.f32 %v16019_v24, %v11765_v16  ;;  %v6663_v2 = vpop.f32.mrb[177].mxu0 }
 0x3a7   : > { %v16175_v48 = vadd.f32 %v11295_v61, %v11294_v41  ;;  %v11992_v12 = vadd.f32 %v16009_v54, %v6663_v2  ;;  %v11766_v35 = vpop.f32.mrb[178].mxu0  ;;  %v10408_v41 = vld [vmem:[%s13211_s16 + $0x58] sm:$0xf]  ;;  %v6939_v2 = vshll.u32 %v10407_v44, 16 }
 0x3a8   : > { %v6750_v25 = vadd.f32 %v11989_v34, %v16161_v8  ;;  %v11995_v3 = vadd.f32 %v16023_v15, %v11766_v35  ;;  %v6666_v24 = vpop.f32.mrb[179].mxu0  ;;  %v6936_v34 = vshrl.u32 %v10407_v44, 16  ;;  %v16207_v35 = vunpack.c.l.bf16 %v6934_v22 }
 0x3a9   : > { %v6748_v45 = vadd.f32 %v11992_v12, %v16161_v8  ;;  %v11998_v54 = vadd.f32 %v16012_v18, %v6666_v24  ;;  %v6949_v24 = vshrl.u32 %v10408_v41, 16 }
 0x3aa   : > { %v7017_v62 = vadd.f32 %v16099_v10, %v6750_v25  ;;  %v6751_v15 = vadd.f32 %v11995_v3, %v16161_v8 }
 0x3ab   : > { %v7015_v33 = vadd.f32 %v16126_v56, %v6748_v45  ;;  %v6749_v28 = vadd.f32 %v11998_v54, %v16161_v8  ;;  %v11297_v18 = vpop.f32.mrb[148].mxu1 }
 0x3ac   : > { %v7033_v16 = vmax.f32 %v7017_v62, 0.0  ;;  %v7018_v10 = vadd.f32 %v16118_v13, %v6751_v15  ;;  %v11298_v61 = vpop.f32.mrb[149].mxu1  ;;  %v6965_v62 = vrot.slane %v6963_v47, 5 }
 0x3ad   : > { %v7031_v53 = vmax.f32 %v7015_v33, 0.0  ;;  %v7016_v9 = vadd.f32 %v7000_v37, %v6749_v28  ;;  %v16205_v57 = vadd.f32 %v11298_v61, %v11297_v18  ;;  %v11300_v56 = vpop.f32.mrb[150].mxu1  ;;  %v11769_v12 = vpop.f32.mrb[180].mxu0  ;;  %v6945_v37 = vshll.u32 %v10408_v41, 16 }
 0x3ae   : > { %7049 = vst [vmem:[%s16211_s26 + $0x10] sm:$0xff] %v7033_v16  ;;  %v7034_v30 = vmax.f32 %v7018_v10, 0.0  ;;  %v11301_v13 = vpop.f32.mrb[151].mxu1  ;;  %v12001_v25 = vadd.f32 %v16039_v29, %v11769_v12  ;;  %v6679_v3 = vpop.f32.mrb[181].mxu0  ;;  %v6938_v29 = vrot.slane %v6936_v34, 4  ;;  %v6941_v28 = vrot.slane %v6939_v2, 5 }
 0x3af   : > { %7047 = vst [vmem:[%s16211_s26] sm:$0xff] %v7031_v53  ;;  %v7032_v7 = vmax.f32 %v7016_v9, 0.0  ;;  %v16216_v45 = vadd.f32 %v11301_v13, %v11300_v56  ;;  %v12004_v54 = vadd.f32 %v16029_v6, %v6679_v3  ;;  %v11770_v44 = vpop.f32.mrb[182].mxu0  ;;  %v16225_v16 = vrot.slane %v6969_v52, 5  ;;  %v10412_v10 = vld [vmem:[%s13211_s16 + $0x68] sm:$0x1] }
 0x3b0   : > { %7050 = vst [vmem:[%s16211_s26 + $0x18] sm:$0xff] %v7034_v30  ;;  %v6754_v15 = vadd.f32 %v12001_v25, %v16161_v8  ;;  %v12007_v22 = vadd.f32 %v16043_v31, %v11770_v44  ;;  %v6682_v33 = vpop.f32.mrb[183].mxu0  ;;  %v6975_v6 = vrot.slane %v6973_v19, 4  ;;  %v16230_v53 = vrot.slane %v6945_v37, 5  ;;  %v10409_v19 = vld [vmem:[%s13211_s16 + $0x5c] sm:$0x1] }
 0x3b1   : > { %7048 = vst [vmem:[%s16211_s26 + $0x8] sm:$0xff] %v7032_v7  ;;  %v6752_v18 = vadd.f32 %v12004_v54, %v16161_v8  ;;  %v12010_v41 = vadd.f32 %v16032_v63, %v6682_v33  ;;  %v6951_v31 = vrot.slane %v6949_v24, 4  ;;  %v6910_v63 = vsel %vm16075_vm5, %v16201_v40, %v16173_v46 }
 0x3b2   : > { %v7021_v47 = vadd.f32 %v16154_v58, %v6754_v15  ;;  %v6755_v61 = vadd.f32 %v12007_v22, %v16161_v8  ;;  %v6966_v52 = vor.u32 %v6965_v62, %v16185_v49  ;;  %v6942_v30 = vor.u32 %v6941_v28, %v6938_v29 }
 0x3b3   : > { %v7019_v34 = vadd.f32 %v16163_v51, %v6752_v18  ;;  %v6753_v2 = vadd.f32 %v12010_v41, %v16161_v8  ;;  %v11303_v9 = vpop.f32.mrb[152].mxu1  ;;  %v6979_v13 = vshll.u32 %v10412_v10, 16  ;;  %v6976_v46 = vor.u32 %v6975_v6, %v16225_v16 }
 0x3b4   : > { %v7037_v58 = vmax.f32 %v7021_v47, 0.0  ;;  %v7022_v56 = vadd.f32 %v16165_v27, %v6755_v61  ;;  %v11304_v12 = vpop.f32.mrb[153].mxu1  ;;  %v6952_v54 = vor.u32 %v6951_v31, %v16230_v53  ;;  %v6955_v44 = vshll.u32 %v10409_v19, 16 }
 0x3b5   : > { %v7035_v51 = vmax.f32 %v7019_v34, 0.0  ;;  %v7020_v25 = vadd.f32 %v16167_v38, %v6753_v2  ;;  %v16242_v3 = vadd.f32 %v11304_v12, %v11303_v9  ;;  %v11306_v37 = vpop.f32.mrb[154].mxu1  ;;  %v11773_v24 = vpop.f32.mrb[184].mxu0  ;;  %v6967_v33 = vrot.slane %v6966_v52, 4 }
 0x3b6   : > { %7053 = vst [vmem:[%s16211_s26 + $0x30] sm:$0xff] %v7037_v58  ;;  %v7038_v49 = vmax.f32 %v7022_v56, 0.0  ;;  %v11307_v40 = vpop.f32.mrb[155].mxu1  ;;  %v12013_v7 = vadd.f32 %v16083_v39, %v11773_v24  ;;  %v6695_v27 = vpop.f32.mrb[185].mxu0  ;;  %v7008_v39 = vunpack.c.l.bf16 %v6910_v63  ;;  %v6943_v41 = vrot.slane %v6942_v30, 4 }
 0x3b7   : > { %7051 = vst [vmem:[%s16211_s26 + $0x20] sm:$0xff] %v7035_v51  ;;  %v7036_v62 = vmax.f32 %v7020_v25, 0.0  ;;  %v16249_v38 = vadd.f32 %v11307_v40, %v11306_v37  ;;  %v12016_v15 = vadd.f32 %v16055_v43, %v6695_v27  ;;  %v11774_v22 = vpop.f32.mrb[186].mxu0  ;;  %v6977_v47 = vrot.slane %v6976_v46, 4 }
 0x3b8   : > { %7054 = vst [vmem:[%s16211_s26 + $0x38] sm:$0xff] %v7038_v49  ;;  %v6758_v29 = vadd.f32 %v12013_v7, %v16161_v8  ;;  %v12019_v28 = vadd.f32 %v16093_v26, %v11774_v22  ;;  %v6698_v18 = vpop.f32.mrb[187].mxu0  ;;  %v6981_v61 = vrot.slane %v6979_v13, 5  ;;  %v6953_v34 = vrot.slane %v6952_v54, 4 }
 0x3b9   : > { %7052 = vst [vmem:[%s16211_s26 + $0x28] sm:$0xff] %v7036_v62  ;;  %v6756_v10 = vadd.f32 %v12016_v15, %v16161_v8  ;;  %v12022_v6 = vadd.f32 %v16061_v55, %v6698_v18  ;;  %v6957_v2 = vrot.slane %v6955_v44, 5  ;;  %v6972_v52 = vsel %vm16075_vm5, %v6967_v33, %v16225_v16 }
 0x3ba   : > { %v7025_v31 = vadd.f32 %v16178_v17, %v6758_v29  ;;  %v6759_v43 = vadd.f32 %v12019_v28, %v16161_v8  ;;  %v6948_v17 = vsel %vm16075_vm5, %v6943_v41, %v16230_v53  ;;  %v6982_v51 = vsel %vm16075_vm5, %v6977_v47, %v6981_v61 }
 0x3bb   : > { %v7023_v9 = vadd.f32 %v16199_v59, %v6756_v10  ;;  %v6757_v26 = vadd.f32 %v12022_v6, %v16161_v8  ;;  %v11309_v63 = vpop.f32.mrb[156].mxu1  ;;  %v7013_v37 = vunpack.c.l.bf16 %v6972_v52  ;;  %v6958_v53 = vsel %vm16075_vm5, %v6953_v34, %v6957_v2 }
 0x3bc   : > { %v7041_v19 = vmax.f32 %v7025_v31, 0.0  ;;  %v7026_v55 = vadd.f32 %v16207_v35, %v6759_v43  ;;  %v11310_v58 = vpop.f32.mrb[157].mxu1  ;;  %v7011_v7 = vunpack.c.l.bf16 %v6948_v17  ;;  %v7012_v33 = vunpack.c.l.bf16 %v6958_v53 }
 0x3bd   : > { %v7039_v56 = vmax.f32 %v7023_v9, 0.0  ;;  %v7024_v12 = vadd.f32 %v7008_v39, %v6757_v26  ;;  %v16269_v30 = vadd.f32 %v11310_v58, %v11309_v63  ;;  %v11312_v59 = vpop.f32.mrb[158].mxu1  ;;  %v11777_v13 = vpop.f32.mrb[188].mxu0 }
 0x3be   : > { %7057 = vst [vmem:[%s16211_s26 + $0x50] sm:$0xff] %v7041_v19  ;;  %v7042_v16 = vmax.f32 %v7026_v55, 0.0  ;;  %v11313_v25 = vpop.f32.mrb[159].mxu1  ;;  %v12025_v35 = vadd.f32 %v16144_v11, %v11777_v13  ;;  %v6711_v24 = vpop.f32.mrb[189].mxu0  ;;  %v7014_v11 = vunpack.c.l.bf16 %v6982_v51 }
 0x3bf   : > { %7055 = vst [vmem:[%s16211_s26 + $0x40] sm:$0xff] %v7039_v56  ;;  %v7040_v46 = vmax.f32 %v7024_v12, 0.0  ;;  %v16278_v49 = vadd.f32 %v11313_v25, %v11312_v59  ;;  %v12028_v40 = vadd.f32 %v16115_v32, %v6711_v24  ;;  %v11778_v27 = vpop.f32.mrb[190].mxu0 }
 0x3c0   : > { %7058 = vst [vmem:[%s16211_s26 + $0x58] sm:$0xff] %v7042_v16  ;;  %v6762_v54 = vadd.f32 %v12025_v35, %v16161_v8  ;;  %v12031_v44 = vadd.f32 %v16152_v5, %v11778_v27  ;;  %v6714_v62 = vpop.f32.mrb[191].mxu0 }
 0x3c1   : > { %7056 = vst [vmem:[%s16211_s26 + $0x48] sm:$0xff] %v7040_v46  ;;  %v6760_v15 = vadd.f32 %v12028_v40, %v16161_v8  ;;  %v12034_v22 = vadd.f32 %v16121_v21, %v6714_v62 }
 0x3c2   : > { %v7029_v29 = vadd.f32 %v7013_v37, %v6762_v54  ;;  %v6763_v32 = vadd.f32 %v12031_v44, %v16161_v8 }
 0x3c3   : > { %v7027_v28 = vadd.f32 %v7011_v7, %v6760_v15  ;;  %v6761_v18 = vadd.f32 %v12034_v22, %v16161_v8 }
 0x3c4   : > { %v7045_v39 = vmax.f32 %v7029_v29, 0.0  ;;  %v7030_v5 = vadd.f32 %v7014_v11, %v6763_v32 }
 0x3c5   : > { %v7043_v41 = vmax.f32 %v7027_v28, 0.0  ;;  %v7028_v10 = vadd.f32 %v7012_v33, %v6761_v18  ;;  %v11347_v6 = vpop.f32.mrb[224].mxu0 }
 0x3c6   : > { %7061 = vst [vmem:[%s16211_s26 + $0x70] sm:$0xff] %v7045_v39  ;;  %v7046_v47 = vmax.f32 %v7030_v5, 0.0  ;;  %v11348_v61 = vpop.f32.mrb[225].mxu0 }
 0x3c7   : > { %7059 = vst [vmem:[%s16211_s26 + $0x60] sm:$0xff] %v7043_v41  ;;  %v7044_v31 = vmax.f32 %v7028_v10, 0.0  ;;  %v11349_v21 = vadd.f32 %v11348_v61, %v11347_v6  ;;  %v11350_v43 = vpop.f32.mrb[226].mxu0 }
 0x3c8   : > { %7062 = vst [vmem:[%s16211_s26 + $0x78] sm:$0xff] %v7046_v47  ;;  %v11351_v34 = vpop.f32.mrb[227].mxu0 }
 0x3c9   : > { %7060 = vst [vmem:[%s16211_s26 + $0x68] sm:$0xff] %v7044_v31  ;;  %v16294_v2 = vadd.f32 %v11349_v21, %v16045_v20  ;;  %v11352_v9 = vadd.f32 %v11351_v34, %v11350_v43 }
 0x3cb   : > { %v16297_v26 = vadd.f32 %v11352_v9, %v16049_v1 }
 0x3cd   : > { %v11353_v63 = vpop.f32.mrb[228].mxu0 }
 0x3ce   : > { %v11354_v52 = vpop.f32.mrb[229].mxu0 }
 0x3cf   : > { %v11355_v19 = vadd.f32 %v11354_v52, %v11353_v63  ;;  %v11356_v55 = vpop.f32.mrb[230].mxu0 }
 0x3d0   : > { %v11357_v58 = vpop.f32.mrb[231].mxu0 }
 0x3d1   : > { %v16300_v17 = vadd.f32 %v11355_v19, %v16067_v14  ;;  %v11358_v56 = vadd.f32 %v11357_v58, %v11356_v55 }
 0x3d3   : > { %v16303_v12 = vadd.f32 %v11358_v56, %v16071_v4 }
 0x3d5   : > { %v11359_v59 = vpop.f32.mrb[232].mxu0 }
 0x3d6   : > { %v11360_v13 = vpop.f32.mrb[233].mxu0 }
 0x3d7   : > { %v11361_v20 = vadd.f32 %v11360_v13, %v11359_v59  ;;  %v11362_v51 = vpop.f32.mrb[234].mxu0 }
 0x3d8   : > { %v11363_v16 = vpop.f32.mrb[235].mxu0 }
 0x3d9   : > { %v16306_v1 = vadd.f32 %v11361_v20, %v16097_v23  ;;  %v11364_v25 = vadd.f32 %v11363_v16, %v11362_v51 }
 0x3db   : > { %v16309_v35 = vadd.f32 %v11364_v25, %v16109_v36 }
 0x3dd   : > { %v11365_v37 = vpop.f32.mrb[236].mxu0 }
 0x3de   : > { %v11366_v24 = vpop.f32.mrb[237].mxu0 }
 0x3df   : > { %v11367_v14 = vadd.f32 %v11366_v24, %v11365_v37  ;;  %v11368_v53 = vpop.f32.mrb[238].mxu0 }
 0x3e0   : > { %v11369_v46 = vpop.f32.mrb[239].mxu0 }
 0x3e1   : > { %v16312_v4 = vadd.f32 %v11367_v14, %v16124_v0  ;;  %v11370_v40 = vadd.f32 %v11369_v46, %v11368_v53 }
 0x3e3   : > { %v16315_v7 = vadd.f32 %v11370_v40, %v16129_v60 }
 0x3e5   : > { %v11371_v27 = vpop.f32.mrb[240].mxu0 }
 0x3e6   : > { %v11372_v54 = vpop.f32.mrb[241].mxu0 }
 0x3e7   : > { %v11373_v23 = vadd.f32 %v11372_v54, %v11371_v27  ;;  %v11374_v44 = vpop.f32.mrb[242].mxu0 }
 0x3e8   : > { %v11375_v11 = vpop.f32.mrb[243].mxu0 }
 0x3e9   : > { %v16318_v36 = vadd.f32 %v11373_v23, %v16159_v42  ;;  %v11376_v62 = vadd.f32 %v11375_v11, %v11374_v44 }
 0x3eb   : > { %v16321_v15 = vadd.f32 %v11376_v62, %v16175_v48  ;;  %v10488_v62 = vld [vmem:[%s13211_s16 + $0x78] sm:$0xf] }
 0x3ed   : > { %v11377_v22 = vpop.f32.mrb[244].mxu0 }
 0x3ee   : > { %v11378_v33 = vpop.f32.mrb[245].mxu0 }
 0x3ef   : > { %v11379_v0 = vadd.f32 %v11378_v33, %v11377_v22  ;;  %v11380_v29 = vpop.f32.mrb[246].mxu0  ;;  %v10489_v33 = vld [vmem:[%s13211_s16 + $0x7c] sm:$0xf] }
 0x3f0   : > { %v11381_v32 = vpop.f32.mrb[247].mxu0 }
 0x3f1   : > { %v16324_v60 = vadd.f32 %v11379_v0, %v16205_v57  ;;  %v11382_v28 = vadd.f32 %v11381_v32, %v11380_v29 }
 0x3f3   : > { %v16327_v18 = vadd.f32 %v11382_v28, %v16216_v45  ;;  %v9483_v28 = vshll.u32 %v10488_v62, 16 }
 0x3f5   : > { %v11383_v39 = vpop.f32.mrb[248].mxu0 }
 0x3f6   : > { %v11384_v5 = vpop.f32.mrb[249].mxu0 }
 0x3f7   : > { %v11385_v42 = vadd.f32 %v11384_v5, %v11383_v39  ;;  %v11386_v41 = vpop.f32.mrb[250].mxu0  ;;  %v9489_v5 = vshll.u32 %v10489_v33, 16 }
 0x3f8   : > { %v11387_v10 = vpop.f32.mrb[251].mxu0 }
 0x3f9   : > { %v16330_v48 = vadd.f32 %v11385_v42, %v16242_v3  ;;  %v11388_v6 = vadd.f32 %v11387_v10, %v11386_v41  ;;  %v9493_v42 = vshrl.u32 %v10489_v33, 16  ;;  %v10485_v41 = vld [vmem:[%s13211_s16 + $0x6c] sm:$0xf] }
 0x3fb   : > { %v16333_v47 = vadd.f32 %v11388_v6, %v16249_v38 }
 0x400   : > { %v11389_v61 = vpop.f32.mrb[252].mxu0 }
 0x401   : > { %v11390_v31 = vpop.f32.mrb[253].mxu0 }
 0x402   : > { %v11391_v57 = vadd.f32 %v11390_v31, %v11389_v61  ;;  %v11392_v21 = vpop.f32.mrb[254].mxu0  ;;  %v9485_v61 = vrot.slane %v9483_v28, 5  ;;  %v9456_v31 = vshrl.u32 %v10485_v41, 16 }
 0x403   : > { %v11393_v43 = vpop.f32.mrb[255].mxu0 }
 0x404   : > { %v16336_v45 = vadd.f32 %v11391_v57, %v16269_v30  ;;  %v11394_v34 = vadd.f32 %v11393_v43, %v11392_v21  ;;  %v9459_v57 = vshll.u32 %v10485_v41, 16  ;;  %v10494_v21 = vld [vmem:[%s13211_s16 + $0x90] sm:$0xf] }
 0x405   : > { %v11427_v63 = vpop.f32.mrb[176].mxu1 }
 0x406   : > { %v16339_v9 = vadd.f32 %v11394_v34, %v16278_v49  ;;  %v11428_v52 = vpop.f32.mrb[177].mxu1  ;;  %v16376_v34 = vrot.slane %v9489_v5, 5 }
 0x407   : > { %v11429_v3 = vadd.f32 %v11428_v52, %v11427_v63  ;;  %v11430_v19 = vpop.f32.mrb[178].mxu1  ;;  %v9495_v52 = vrot.slane %v9493_v42, 4 }
 0x408   : > { %v11431_v55 = vpop.f32.mrb[179].mxu1 }
 0x409   : > { %v11432_v58 = vadd.f32 %v11431_v55, %v11430_v19  ;;  %v16342_v38 = vadd.f32 %v16294_v2, %v11429_v3  ;;  %v10491_v55 = vld [vmem:[%s13211_s16 + $0x84] sm:$0xf] }
 0x40b   : > { %v16345_v56 = vadd.f32 %v16297_v26, %v11432_v58 }
 0x40d   : > { %v11433_v59 = vpop.f32.mrb[180].mxu1 }
 0x40e   : > { %v11434_v13 = vpop.f32.mrb[181].mxu1 }
 0x40f   : > { %v11435_v30 = vadd.f32 %v11434_v13, %v11433_v59  ;;  %v11436_v20 = vpop.f32.mrb[182].mxu1  ;;  %v9528_v59 = vshrl.u32 %v10494_v21, 16  ;;  %v9531_v13 = vshll.u32 %v10494_v21, 16 }
 0x410   : > { %v11437_v51 = vpop.f32.mrb[183].mxu1 }
 0x411   : > { %v11438_v16 = vadd.f32 %v11437_v51, %v11436_v20  ;;  %v16348_v49 = vadd.f32 %v16300_v17, %v11435_v30  ;;  %v9533_v33 = vrot.slane %v9531_v13, 5 }
 0x413   : > { %v16351_v25 = vadd.f32 %v16303_v12, %v11438_v16  ;;  %v9461_v16 = vrot.slane %v9459_v57, 5 }
 0x415   : > { %v11439_v37 = vpop.f32.mrb[184].mxu1 }
 0x416   : > { %v11440_v24 = vpop.f32.mrb[185].mxu1 }
 0x417   : > { %v11441_v2 = vadd.f32 %v11440_v24, %v11439_v37  ;;  %v11442_v14 = vpop.f32.mrb[186].mxu1  ;;  %v10495_v37 = vld [vmem:[%s13211_s16 + $0x94] sm:$0xf] }
 0x418   : > { %v11443_v26 = vpop.f32.mrb[187].mxu1 }
 0x419   : > { %v11444_v53 = vadd.f32 %v11443_v26, %v11442_v14  ;;  %v16354_v46 = vadd.f32 %v16306_v1, %v11441_v2  ;;  %v9496_v14 = vor.u32 %v9495_v52, %v16376_v34  ;;  %v10492_v26 = vld [vmem:[%s13211_s16 + $0x88] sm:$0xf]  ;;  %v10496_v52 = vld [vmem:[%s13211_s16 + $0x98] sm:$0x1] }
 0x41a   : > { %v9517_v28 = vshrl.u32 %v10492_v26, 16 }
 0x41b   : > { %v16357_v40 = vadd.f32 %v16309_v35, %v11444_v53  ;;  %v9480_v35 = vshrl.u32 %v10488_v62, 16  ;;  %v9504_v53 = vshrl.u32 %v10491_v55, 16  ;;  %v10487_v62 = vld [vmem:[%s13211_s16 + $0x74] sm:$0x1]  ;;  %v9497_v57 = vrot.slane %v9496_v14, 4 }
 0x41d   : > { %v11445_v27 = vpop.f32.mrb[188].mxu1  ;;  %v9506_v5 = vrot.slane %v9504_v53, 4 }
 0x41e   : > { %v11446_v17 = vpop.f32.mrb[189].mxu1 }
 0x41f   : > { %v11447_v54 = vadd.f32 %v11446_v17, %v11445_v27  ;;  %v11448_v23 = vpop.f32.mrb[190].mxu1  ;;  %v9507_v27 = vshll.u32 %v10491_v55, 16 }
 0x420   : > { %v11449_v12 = vpop.f32.mrb[191].mxu1 }
 0x421   : > { %v11450_v44 = vadd.f32 %v11449_v12, %v11448_v23  ;;  %v16360_v11 = vadd.f32 %v16312_v4, %v11447_v54  ;;  %v10486_v4 = vld [vmem:[%s13211_s16 + $0x70] sm:$0xf]  ;;  %v9509_v42 = vrot.slane %v9507_v27, 5 }
 0x422   : > { %v9465_v63 = vshll.u32 %v10486_v4, 16  ;;  %v9469_v19 = vshrl.u32 %v10486_v4, 16 }
 0x423   : > { %v16364_v22 = vadd.f32 %v16315_v7, %v11450_v44  ;;  %v9482_v7 = vrot.slane %v9480_v35, 4  ;;  %v10500_v44 = vld [vmem:[%s13211_s16 + $0xa8] sm:$0xf]  ;;  %v9541_v35 = vshrl.u32 %v10495_v37, 16 }
 0x424   : > { %v16381_v2 = vrot.slane %v9465_v63, 5  ;;  %v9471_v23 = vrot.slane %v9469_v19, 4  ;;  %v9576_v41 = vshrl.u32 %v10500_v44, 16 }
 0x425   : > { %v11451_v1 = vpop.f32.mrb[192].mxu1  ;;  %v9486_v51 = vor.u32 %v9485_v61, %v9482_v7  ;;  %v9475_v61 = vshll.u32 %v10487_v62, 16 }
 0x426   : > { %v11452_v0 = vpop.f32.mrb[193].mxu1  ;;  %v9472_v7 = vor.u32 %v9471_v23, %v16381_v2  ;;  %v10497_v23 = vld [vmem:[%s13211_s16 + $0x9c] sm:$0xf] }
 0x427   : > { %v11453_v29 = vadd.f32 %v11452_v0, %v11451_v1  ;;  %v11454_v32 = vpop.f32.mrb[194].mxu1  ;;  %v9530_v1 = vrot.slane %v9528_v59, 4  ;;  %v9537_v0 = vshll.u32 %v10495_v37, 16  ;;  %v16393_v4 = vrot.slane %v9486_v51, 4  ;;  %v10501_v51 = vld [vmem:[%s13211_s16 + $0xac] sm:$0xf] }
 0x428   : > { %v11455_v39 = vpop.f32.mrb[195].mxu1  ;;  %v9519_v59 = vrot.slane %v9517_v28, 4  ;;  %v9477_v14 = vrot.slane %v9475_v61, 5  ;;  %v9585_v62 = vshll.u32 %v10501_v51, 16 }
 0x429   : > { %v11456_v10 = vadd.f32 %v11455_v39, %v11454_v32  ;;  %v16370_v6 = vadd.f32 %v16318_v36, %v11453_v29  ;;  %v10490_v36 = vld [vmem:[%s13211_s16 + $0x80] sm:$0x1]  ;;  %v9513_v32 = vshll.u32 %v10492_v26, 16  ;;  %v9534_v21 = vor.u32 %v9533_v33, %v9530_v1 }
 0x42a   : > { %v9499_v54 = vshll.u32 %v10490_v36, 16  ;;  %v16396_v63 = vrot.slane %v9537_v0, 5  ;;  %v10493_v36 = vld [vmem:[%s13211_s16 + $0x8c] sm:$0x1]  ;;  %v9589_v1 = vshrl.u32 %v10501_v51, 16 }
 0x42b   : > { %v16374_v43 = vadd.f32 %v16321_v15, %v11456_v10  ;;  %v9458_v15 = vrot.slane %v9456_v31, 4  ;;  %v9579_v10 = vshll.u32 %v10500_v44, 16  ;;  %v9535_v53 = vrot.slane %v9534_v21, 4 }
 0x42c   : > { %v9501_v55 = vrot.slane %v9499_v54, 5  ;;  %v9523_v54 = vshll.u32 %v10493_v36, 16  ;;  %v9587_v21 = vrot.slane %v9585_v62, 5  ;;  %v10502_v36 = vld [vmem:[%s13211_s16 + $0xb0] sm:$0x1] }
 0x42d   : > { %v11457_v3 = vpop.f32.mrb[196].mxu1  ;;  %v9462_v29 = vor.u32 %v9461_v16, %v9458_v15  ;;  %v9578_v15 = vrot.slane %v9576_v41, 4  ;;  %v9581_v16 = vrot.slane %v9579_v10, 5  ;;  %v9555_v41 = vshll.u32 %v10497_v23, 16 }
 0x42e   : > { %v11458_v58 = vpop.f32.mrb[197].mxu1  ;;  %v9502_v0 = vsel %vm16075_vm5, %v9497_v57, %v9501_v55 }
 0x42f   : > { %v11459_v30 = vadd.f32 %v11458_v58, %v11457_v3  ;;  %v11460_v20 = vpop.f32.mrb[198].mxu1  ;;  %v16399_v58 = vrot.slane %v9513_v32, 5 }
 0x430   : > { %v11461_v24 = vpop.f32.mrb[199].mxu1 }
 0x431   : > { %v11462_v17 = vadd.f32 %v11461_v24, %v11460_v20  ;;  %v16386_v12 = vadd.f32 %v16324_v60, %v11459_v30  ;;  %v9463_v30 = vrot.slane %v9462_v29, 4  ;;  %v9510_v20 = vor.u32 %v9509_v42, %v9506_v5 }
 0x432   : > { %v9473_v24 = vrot.slane %v9472_v7, 4  ;;  %v9520_v44 = vor.u32 %v9519_v59, %v16399_v58  ;;  %v9582_v29 = vor.u32 %v9581_v16, %v9578_v15  ;;  %v9552_v42 = vshrl.u32 %v10497_v23, 16 }
 0x433   : > { %v16391_v39 = vadd.f32 %v16327_v18, %v11462_v17  ;;  %v9543_v18 = vrot.slane %v9541_v35, 4  ;;  %v9547_v17 = vshll.u32 %v10496_v52, 16  ;;  %v9511_v35 = vrot.slane %v9510_v20, 4 }
 0x434   : > { %v9468_v28 = vsel %vm16075_vm5, %v9463_v30, %v16381_v2  ;;  %v9478_v5 = vsel %vm16075_vm5, %v9473_v24, %v9477_v14  ;;  %v9525_v7 = vrot.slane %v9523_v54, 5  ;;  %v9521_v57 = vrot.slane %v9520_v44, 4  ;;  %v10506_v14 = vld [vmem:[%s13211_s16 + $0xc0] sm:$0xf] }
 0x435   : > { %v11463_v60 = vpop.f32.mrb[200].mxu1  ;;  %v9544_v27 = vor.u32 %v9543_v18, %v16396_v63  ;;  %v9591_v2 = vrot.slane %v9589_v1, 4  ;;  %v9516_v18 = vsel %vm16075_vm5, %v9511_v35, %v16399_v58  ;;  %v9554_v59 = vrot.slane %v9552_v42, 4  ;;  %v10499_v58 = vld [vmem:[%s13211_s16 + $0xa4] sm:$0x1] }
 0x436   : > { %v11464_v31 = vpop.f32.mrb[201].mxu1  ;;  %v9663_v51 = vunpack.c.l.bf16 %v9468_v28  ;;  %v9666_v15 = vunpack.c.l.bf16 %v9502_v0  ;;  %v9595_v24 = vshll.u32 %v10502_v36, 16  ;;  %v16443_v54 = vunpack.c.l.bf16 %v9516_v18  ;;  %v10504_v36 = vld [vmem:[%s13211_s16 + $0xb8] sm:$0xf] }
 0x437   : > { %v11465_v3 = vadd.f32 %v11464_v31, %v11463_v60  ;;  %v11466_v19 = vpop.f32.mrb[202].mxu1  ;;  %v9545_v60 = vrot.slane %v9544_v27, 4  ;;  %v9664_v27 = vunpack.c.l.bf16 %v9478_v5 }
 0x438   : > { %v11467_v13 = vpop.f32.mrb[203].mxu1  ;;  %v9597_v42 = vrot.slane %v9595_v24, 5 }
 0x439   : > { %v11468_v37 = vadd.f32 %v11467_v13, %v11466_v19  ;;  %v16404_v26 = vadd.f32 %v16330_v48, %v11465_v3  ;;  %v9492_v48 = vsel %vm16075_vm5, %v16393_v4, %v16376_v34  ;;  %v9540_v34 = vsel %vm16075_vm5, %v9535_v53, %v16396_v63 }
 0x43a   : > { %v9549_v4 = vrot.slane %v9547_v17, 5  ;;  %v9583_v3 = vrot.slane %v9582_v29, 4  ;;  %v9557_v13 = vrot.slane %v9555_v41, 5  ;;  %v9665_v20 = vunpack.c.l.bf16 %v9492_v48 }
 0x43b   : > { %v16410_v33 = vadd.f32 %v16333_v47, %v11468_v37  ;;  %v10498_v47 = vld [vmem:[%s13211_s16 + $0xa0] sm:$0xf]  ;;  %v9592_v37 = vor.u32 %v9591_v2, %v9587_v21  ;;  %v16441_v17 = vunpack.c.l.bf16 %v9540_v34  ;;  %v9571_v29 = vshll.u32 %v10499_v58, 16 }
 0x43c   : > { %v9561_v19 = vshll.u32 %v10498_v47, 16  ;;  %v9565_v55 = vshrl.u32 %v10498_v47, 16  ;;  %v9550_v16 = vsel %vm16075_vm5, %v9545_v60, %v9549_v4  ;;  %v9588_v44 = vsel %vm16075_vm5, %v9583_v3, %v9587_v21 }
 0x43d   : > { %v11469_v32 = vpop.f32.mrb[204].mxu1  ;;  %v9558_v62 = vor.u32 %v9557_v13, %v9554_v59  ;;  %v16452_v35 = vunpack.c.l.bf16 %v9550_v16  ;;  %v9593_v47 = vrot.slane %v9592_v37, 4  ;;  %v9627_v41 = vshll.u32 %v10506_v14, 16 }
 0x43e   : > { %v11470_v10 = vpop.f32.mrb[205].mxu1  ;;  %v16449_v1 = vrot.slane %v9561_v19, 5  ;;  %v9567_v48 = vrot.slane %v9565_v55, 4 }
 0x43f   : > { %v11471_v61 = vadd.f32 %v11470_v10, %v11469_v32  ;;  %v11472_v31 = vpop.f32.mrb[206].mxu1  ;;  %v9624_v32 = vshrl.u32 %v10506_v14, 16  ;;  %v16476_v55 = vrot.slane %v9627_v41, 5 }
 0x440   : > { %v11473_v52 = vpop.f32.mrb[207].mxu1 }
 0x441   : > { %v11474_v63 = vadd.f32 %v11473_v52, %v11472_v31  ;;  %v16432_v30 = vadd.f32 %v16336_v45, %v11471_v61  ;;  %v9526_v45 = vsel %vm16075_vm5, %v9521_v57, %v9525_v7  ;;  %v9568_v31 = vor.u32 %v9567_v48, %v16449_v1  ;;  %v10503_v57 = vld [vmem:[%s13211_s16 + $0xb4] sm:$0xf] }
 0x442   : > { %v16457_v4 = vunpack.c.l.bf16 %v9526_v45  ;;  %v16468_v52 = vrot.slane %v9571_v29, 5  ;;  %v16471_v18 = vrot.slane %v9624_v32, 4  ;;  %v9600_v13 = vshrl.u32 %v10503_v57, 16 }
 0x443   : > { %v16439_v53 = vadd.f32 %v16339_v9, %v11474_v63 }
 0x445   : > { %v11861_v23 = vpop.f32.mrb[160].mxu1 }
 0x446   : > { %v12037_v0 = vadd.f32 %v16348_v49, %v11861_v23  ;;  %v9336_v9 = vpop.f32.mrb[161].mxu1  ;;  %v16459_v49 = vunpack.c.l.bf16 %v9588_v44  ;;  %v9609_v44 = vshll.u32 %v10504_v36, 16 }
 0x447   : > { %v12040_v28 = vadd.f32 %v16342_v38, %v9336_v9  ;;  %v11862_v5 = vpop.f32.mrb[162].mxu1  ;;  %v16463_v38 = vrot.slane %v9558_v62, 4  ;;  %v9613_v62 = vshrl.u32 %v10504_v36, 16  ;;  %v9569_v9 = vrot.slane %v9568_v31, 4 }
 0x448   : > { %v9417_v10 = vadd.f32 %v12037_v0, %v16161_v8  ;;  %v12043_v34 = vadd.f32 %v16351_v25, %v11862_v5  ;;  %v9339_v60 = vpop.f32.mrb[163].mxu1  ;;  %v10507_v25 = vld [vmem:[%s13211_s16 + $0xc4] sm:$0xf]  ;;  %v9630_v31 = vor.u32 %v16476_v55, %v16471_v18 }
 0x449   : > { %v9415_v7 = vadd.f32 %v12040_v28, %v16161_v8  ;;  %v12046_v61 = vadd.f32 %v16345_v56, %v9339_v60  ;;  %v9598_v56 = vsel %vm16075_vm5, %v9593_v47, %v9597_v42  ;;  %v9633_v58 = vshll.u32 %v10507_v25, 16  ;;  %v10508_v60 = vld [vmem:[%s13211_s16 + $0xc8] sm:$0x1] }
 0x44a   : > { %v9681_v21 = vadd.f32 %v9665_v20, %v9417_v10  ;;  %v9418_v2 = vadd.f32 %v12043_v34, %v16161_v8  ;;  %v9603_v20 = vshll.u32 %v10503_v57, 16  ;;  %v9637_v14 = vshrl.u32 %v10507_v25, 16 }
 0x44b   : > { %v9679_v3 = vadd.f32 %v9663_v51, %v9415_v7  ;;  %v9416_v19 = vadd.f32 %v12046_v61, %v16161_v8  ;;  %v9602_v28 = vrot.slane %v9600_v13, 4  ;;  %v9635_v42 = vrot.slane %v9633_v58, 5 }
 0x44c   : > { %v9697_v63 = vmax.f32 %v9681_v21, 0.0  ;;  %v9682_v59 = vadd.f32 %v9666_v15, %v9418_v2  ;;  %v9605_v5 = vrot.slane %v9603_v20, 5  ;;  %v9639_v41 = vrot.slane %v9637_v14, 4  ;;  %v12726_v14 = vld [vmem:[#allocation11] ss:$0 sm:$0xff] }
 0x44d   : > { %v9695_v16 = vmax.f32 %v9679_v3, 0.0  ;;  %v9680_v37 = vadd.f32 %v9664_v27, %v9416_v19  ;;  %v11865_v24 = vpop.f32.mrb[164].mxu1  ;;  %v9564_v27 = vsel %vm16075_vm5, %v16463_v38, %v16449_v1  ;;  %v16495_v34 = vrot.slane %v9609_v44, 5 }
 0x44e   : > { %10511 = vst [vmem:[%s16211_s26 + $0x90] sm:$0xff] %v9697_v63  ;;  %v9698_v51 = vmax.f32 %v9682_v59, 0.0  ;;  %v12049_v45 = vadd.f32 %v16360_v11, %v11865_v24  ;;  %v9352_v23 = vpop.f32.mrb[165].mxu1  ;;  %v9674_v38 = vunpack.c.l.bf16 %v9598_v56  ;;  %v9574_v21 = vsel %vm16075_vm5, %v9569_v9, %v16468_v52 }
 0x44f   : > { %10509 = vst [vmem:[%s16211_s26 + $0x80] sm:$0xff] %v9695_v16  ;;  %v9696_v48 = vmax.f32 %v9680_v37, 0.0  ;;  %v12052_v15 = vadd.f32 %v16354_v46, %v9352_v23  ;;  %v11866_v0 = vpop.f32.mrb[166].mxu1  ;;  %v9606_v2 = vor.u32 %v9605_v5, %v9602_v28  ;;  %v9640_v19 = vor.u32 %v9639_v41, %v9635_v42 }
 0x450   : > { %10512 = vst [vmem:[%s16211_s26 + $0x98] sm:$0xff] %v9698_v51  ;;  %v9421_v29 = vadd.f32 %v12049_v45, %v16161_v8  ;;  %v12055_v11 = vadd.f32 %v16364_v22, %v11866_v0  ;;  %v9355_v32 = vpop.f32.mrb[167].mxu1  ;;  %v9615_v22 = vrot.slane %v9613_v62, 4  ;;  %v9643_v56 = vshll.u32 %v10508_v60, 16 }
 0x451   : > { %10510 = vst [vmem:[%s16211_s26 + $0x88] sm:$0xff] %v9696_v48  ;;  %v9419_v46 = vadd.f32 %v12052_v15, %v16161_v8  ;;  %v12058_v47 = vadd.f32 %v16357_v40, %v9355_v32  ;;  %v10505_v40 = vld [vmem:[%s13211_s16 + $0xbc] sm:$0x1]  ;;  %v9671_v13 = vunpack.c.l.bf16 %v9564_v27  ;;  %v9672_v58 = vunpack.c.l.bf16 %v9574_v21 }
 0x452   : > { %v9685_v1 = vadd.f32 %v16441_v17, %v9421_v29  ;;  %v9422_v10 = vadd.f32 %v12055_v11, %v16161_v8  ;;  %v9619_v63 = vshll.u32 %v10505_v40, 16  ;;  %v9641_v23 = vrot.slane %v9640_v19, 4 }
 0x453   : > { %v9683_v7 = vadd.f32 %v16443_v54, %v9419_v46  ;;  %v9420_v61 = vadd.f32 %v12058_v47, %v16161_v8  ;;  %v9645_v44 = vrot.slane %v9643_v56, 5 }
 0x454   : > { %v9701_v57 = vmax.f32 %v9685_v1, 0.0  ;;  %v9686_v17 = vadd.f32 %v16452_v35, %v9422_v10  ;;  %v9616_v35 = vor.u32 %v9615_v22, %v16495_v34  ;;  %v9621_v15 = vrot.slane %v9619_v63, 5 }
 0x455   : > { %v9699_v25 = vmax.f32 %v9683_v7, 0.0  ;;  %v9684_v3 = vadd.f32 %v16457_v4, %v9420_v61  ;;  %v11869_v54 = vpop.f32.mrb[168].mxu1  ;;  %v9631_v4 = vrot.slane %v9630_v31, 4 }
 0x456   : > { %10515 = vst [vmem:[%s16211_s26 + $0xb0] sm:$0xff] %v9701_v57  ;;  %v9702_v36 = vmax.f32 %v9686_v17, 0.0  ;;  %v12061_v18 = vadd.f32 %v16386_v12, %v11869_v54  ;;  %v9368_v55 = vpop.f32.mrb[169].mxu1  ;;  %v9607_v12 = vrot.slane %v9606_v2, 4  ;;  %v9617_v48 = vrot.slane %v9616_v35, 4 }
 0x457   : > { %10513 = vst [vmem:[%s16211_s26 + $0xa0] sm:$0xff] %v9699_v25  ;;  %v9700_v59 = vmax.f32 %v9684_v3, 0.0  ;;  %v12064_v52 = vadd.f32 %v16370_v6, %v9368_v55  ;;  %v11870_v20 = vpop.f32.mrb[170].mxu1 }
 0x458   : > { %10516 = vst [vmem:[%s16211_s26 + $0xb8] sm:$0xff] %v9702_v36  ;;  %v9425_v16 = vadd.f32 %v12061_v18, %v16161_v8  ;;  %v12067_v37 = vadd.f32 %v16391_v39, %v11870_v20  ;;  %v9371_v24 = vpop.f32.mrb[171].mxu1  ;;  %v9636_v39 = vsel %vm16075_vm5, %v9631_v4, %v9635_v42  ;;  %v9622_v42 = vsel %vm16075_vm5, %v9617_v48, %v9621_v15 }
 0x459   : > { %10514 = vst [vmem:[%s16211_s26 + $0xa8] sm:$0xff] %v9700_v59  ;;  %v9423_v51 = vadd.f32 %v12726_v14, %v12064_v52  ;;  %v12070_v45 = vadd.f32 %v16374_v43, %v9371_v24  ;;  %v9612_v43 = vsel %vm16075_vm5, %v9607_v12, %v16495_v34  ;;  %v9677_v46 = vunpack.c.l.bf16 %v9636_v39 }
 0x45a   : > { %v9689_v6 = vadd.f32 %v16459_v49, %v9425_v16  ;;  %v9426_v62 = vadd.f32 %v12726_v14, %v12067_v37  ;;  %v9646_v49 = vsel %vm16075_vm5, %v9641_v23, %v9645_v44  ;;  %v9675_v10 = vunpack.c.l.bf16 %v9612_v43 }
 0x45b   : > { %v9687_v0 = vadd.f32 %v9671_v13, %v9423_v51  ;;  %v9424_v8 = vadd.f32 %v12726_v14, %v12070_v45  ;;  %v9678_v7 = vunpack.c.l.bf16 %v9646_v49 }
 0x45c   : > { %v9705_v27 = vmax.f32 %v9689_v6, 0.0  ;;  %v9690_v9 = vadd.f32 %v9674_v38, %v9426_v62  ;;  %v9676_v38 = vunpack.c.l.bf16 %v9622_v42 }
 0x45d   : > { %v9703_v29 = vmax.f32 %v9687_v0, 0.0  ;;  %v9688_v11 = vadd.f32 %v9672_v58, %v9424_v8  ;;  %v11873_v32 = vpop.f32.mrb[172].mxu1 }
 0x45e   : > { %10519 = vst [vmem:[%s16211_s26 + $0xd0] sm:$0xff] %v9705_v27  ;;  %v9706_v28 = vmax.f32 %v9690_v9, 0.0  ;;  %v12073_v5 = vadd.f32 %v16432_v30, %v11873_v32  ;;  %v9384_v47 = vpop.f32.mrb[173].mxu1 }
 0x45f   : > { %10517 = vst [vmem:[%s16211_s26 + $0xc0] sm:$0xff] %v9703_v29  ;;  %v9704_v41 = vmax.f32 %v9688_v11, 0.0  ;;  %v12076_v1 = vadd.f32 %v16404_v26, %v9384_v47  ;;  %v11874_v34 = vpop.f32.mrb[174].mxu1 }
 0x460   : > { %10520 = vst [vmem:[%s16211_s26 + $0xd8] sm:$0xff] %v9706_v28  ;;  %v9429_v60 = vadd.f32 %v12726_v14, %v12073_v5  ;;  %v12079_v22 = vadd.f32 %v16439_v53, %v11874_v34  ;;  %v9387_v30 = vpop.f32.mrb[175].mxu1 }
 0x461   : > { %10518 = vst [vmem:[%s16211_s26 + $0xc8] sm:$0xff] %v9704_v41  ;;  %v9427_v61 = vadd.f32 %v12726_v14, %v12076_v1  ;;  %v12082_v50 = vadd.f32 %v16410_v33, %v9387_v30 }
 0x462   : > { %v9693_v31 = vadd.f32 %v9677_v46, %v9429_v60  ;;  %v9430_v26 = vadd.f32 %v12726_v14, %v12079_v22 }
 0x463   : > { %v9691_v40 = vadd.f32 %v9675_v10, %v9427_v61  ;;  %v9428_v57 = vadd.f32 %v12726_v14, %v12082_v50 }
 0x464   : > { %v9709_v53 = vmax.f32 %v9693_v31, 0.0  ;;  %v9694_v17 = vadd.f32 %v9678_v7, %v9430_v26 }
 0x465   : > { %v9707_v21 = vmax.f32 %v9691_v40, 0.0  ;;  %v9692_v2 = vadd.f32 %v9676_v38, %v9428_v57 }
 0x466   : > { %10523 = vst [vmem:[%s16211_s26 + $0xf0] sm:$0xff] %v9709_v53  ;;  %v9710_v25 = vmax.f32 %v9694_v17, 0.0 }
 0x467   : > { %10521 = vst [vmem:[%s16211_s26 + $0xe0] sm:$0xff] %v9707_v21  ;;  %v9708_v33 = vmax.f32 %v9692_v2, 0.0 }
 0x468   : > { %10524 = vst [vmem:[%s16211_s26 + $0xf8] sm:$0xff] %v9710_v25 }
 0x469   : > { %10522 = vst [vmem:[%s16211_s26 + $0xe8] sm:$0xff] %v9708_v33 }
 0x46a   : > { %12882 = shalt.err (!%p12879_p13)
}
 0x46b   : > { %s12883_s30 = scalar_lea.hbm %s16542_s17, 4096  ;;  %s12887_s16 = scalar_lea.hbm %s16596_s5, 8192 }
 0x46c   : > { %p12884_p9 = scmp.ne.s32.totalorder %s16542_s17, %s12883_s30  ;;  %p12888_p4 = scmp.lt.u32.totalorder %s16542_s17, %s16596_s5 }
 0x46d   : > { %p12889_p8 = scmp.lt.u32.totalorder %s12887_s16, %s12883_s30  ;;  %p12891_p3 = scmp.lt.u32.totalorder %s12883_s30, %s16542_s17 }
 0x46e   : > { %p12885_p0 = pnand %p12884_p9, %p13152_p10 }
 0x46f   : > { %p12890_p6 = por %p12889_p8, %p12888_p4 }
 0x470   : > { %p12886_p11 = pneg %p12885_p0 }
 0x471   : > { %p12892_p5 = por %p12891_p3, %p12890_p6 }
 0x473   : > { %p12893_p7 = pnand %p12892_p5, %p12886_p11 }
 0x475   : > { %12896 = shalt.err (!%p12893_p7)
}
 0x476   : > { %s12954_s27 = smov 128   ;;  %s12955_s8 = smov 8  }
 0x477   : > { %12216 = dma.vmem_to_hbm [thread:$0]  (%p13152_p10), %s16544_s13, 4096, %s16542_s17, %s9729_s22, %s12954_s27, %s12954_s27, %s12955_s8  }
 0x478 PF: > { %s9757_s6 = sand.u32 1, %s12931_s18   ;;  %p16728_p12 = scmp.ne.s32.totalorder %s16620_s25, 0 }
 0x479   : > { %p16729_p1 = scmp.ge.s32.totalorder %s12943_s21, 2  ;;  %s9758_s11 = scalar_lea.sflag [#allocation5], %s9757_s6 }
 0x47b   : > { %p12236_p2 = pnand %p16729_p1, %p16728_p12 }
 0x47d   : > { %12926 = dma.done.wait (!%p12236_p2), %s9758_s11, 4096  }
 0x47e   : > { %12928 = vsyncadd (!%p12236_p2), %s9758_s11, 4294963200  ;;  %p20_p13 = scmp.ge.s32.totalorder %s13142_s14, 4   ;;  %s16730_s18 = smov %s12935_s19 }
 0x47f   : > { %s16731_s19 = smov %s12939_s20  ;;  %s16732_s20 = smov %s13158_s10 }
 0x480   : > { %s16733_s21 = smov %s13142_s14  ;;  %22 = sbr.rel (!%p20_p13) target bundleno = 7 (0x7), region = 117 }
 0x487   :  { %9763 = vsyncpa [#allocation4], 1 }
 0x488   :  { %9765 = vsyncpa [#allocation4 + $0x1], 1 }
 0x489   :  { %9766 = vsyncpa [#allocation7], 1 }
 0x48a   :  { %9767 = vsyncpa [#allocation10], 1 }
 0x48b   :  { %9768 = vsyncpa [#allocation5], 1 }
 0x48c   :  { %9770 = vsyncpa [#allocation5 + $0x1], 1 }

</bundles_post_ra>
